<compile_context>
chip_gen: v6e
topology: v6e:2x2x1
jax: 0.10.0
libtpu: 0.0.40
codegen_flags: <defaults>
</compile_context>

<pallas_src>
import functools

import jax
import jax.numpy as jnp
from jax import lax
from jax.experimental import pallas as pl
from jax.experimental.pallas import tpu as pltpu

IMSIZE = 16
Z_DIM = 32
IM_CHANNELS = 1
INIT_SIZE = IMSIZE // 4                                  # 4
S0, S1, S2 = INIT_SIZE, 2 * INIT_SIZE, 4 * INIT_SIZE     # 4, 8, 16
C = 128                                                  # working channel width
KK = 9 * C                                               # im2col contraction (3*3*128)
PADL = 8                                                 # left pad -> aligned interior

# bf16 MXU operands with f32 accumulation (fast path on v5e/v6e/v7x).
# Set False to keep f32 operand dots (slower multi-pass MXU lowering).
USE_BF16_MXU = True
_MXU_DT = jnp.bfloat16 if USE_BF16_MXU else jnp.float32

_VMEM = pl.BlockSpec(memory_space=pltpu.MemorySpace.VMEM)
_ANY = pl.BlockSpec(memory_space=pl.ANY)


# ---------------------------------------------------------------------------
# In-kernel helpers
# ---------------------------------------------------------------------------
def _mm(a, b):
    return jnp.dot(a.astype(_MXU_DT), b.astype(_MXU_DT),
                   preferred_element_type=jnp.float32)


def _mm_nt(a, b):
    # a @ b.T (contract last dims) -> lane-dense (rows_a, rows_b)
    return lax.dot_general(a.astype(_MXU_DT), b.astype(_MXU_DT),
                           (((1,), (1,)), ((), ())),
                           preferred_element_type=jnp.float32)


def _bn_act(x, gamma, beta, eps, m, lrelu):
    # Training-mode BatchNorm over rows (rows = N*H*W) per channel column, biased
    # variance (matches torch BN forward); variance clamped at 0 to guard the
    # E[x^2]-E[x]^2 cancellation. Optional fused LeakyReLU(0.2).
    inv_m = 1.0 / m
    mean = jnp.sum(x, axis=0, keepdims=True) * inv_m
    var = jnp.maximum(jnp.sum(x * x, axis=0, keepdims=True) * inv_m - mean * mean, 0.0)
    scale = gamma * lax.rsqrt(var + eps)
    bias = beta - mean * scale
    y = x * scale + bias
    if lrelu:
        y = jnp.where(y > 0, y, 0.2 * y)
    return y


def _zero_ring(xpad_ref, S, N):
    # Zero only the padding actually read by the 3x3 conv: rows 0 and S+1 (full
    # width, aligned), the left pad block [0:PADL] (aligned, contains column
    # PADL-1) and the right pad column at PADL+S (aligned start). The interior is
    # fully overwritten; columns outside [PADL-1, PADL+S] are never read.
    Wp = 2 * PADL + S
    row = jnp.zeros((N, 1, Wp, C), jnp.float32)
    xpad_ref[:, 0:1, :, :] = row
    xpad_ref[:, S + 1:S + 2, :, :] = row
    xpad_ref[:, :, 0:PADL, :] = jnp.zeros((N, S + 2, PADL, C), jnp.float32)
    xpad_ref[:, :, PADL + S:PADL + S + 1, :] = jnp.zeros((N, S + 2, 1, C), jnp.float32)


def _im2col(xpad_ref, S, M):
    # Build the (M, 9*C) im2col slab for a 3x3 / pad=1 conv from the padded
    # activation buffer. Column block (dy*3+dx)*C+cin matches the weight layout
    # produced by prepare_params.
    cols = []
    for dy in range(3):
        for dx in range(3):
            patch = xpad_ref[:, dy:dy + S, PADL - 1 + dx:PADL - 1 + dx + S, :]
            cols.append(patch.reshape(M, C).astype(_MXU_DT))
    return jnp.concatenate(cols, axis=-1)


# ---------------------------------------------------------------------------
# The fused decoder kernel
# ---------------------------------------------------------------------------
def decoder_kernel(zaug_ref, w1_ref, b1t_ref, u1_ref, g0_ref, be0_ref,
                   wc1_ref, g1_ref, be1_ref,
                   u2_hbm, wc2_hbm, wc3_hbm,          # pl.ANY (raw HBM) inputs
                   g2_ref, be2_ref, bc3_ref,
                   out_ref,
                   u2_v, wc2_v, wc3_v, dma_sems,      # manual-DMA landing buffers
                   xpad1_ref, xpad2_ref, *, N):
    M0 = N * S0 * S0          # 32
    M1 = N * S1 * S1          # 128
    M2 = N * S2 * S2          # 512

    # ---- Prefetch stage-2/3 weights; DMA overlaps l1/BN0/upsample1/conv1 compute ----
    cp_u2 = pltpu.make_async_copy(u2_hbm, u2_v, dma_sems.at[0])
    cp_w2 = pltpu.make_async_copy(wc2_hbm, wc2_v, dma_sems.at[1])
    cp_w3 = pltpu.make_async_copy(wc3_hbm, wc3_v, dma_sems.at[2])
    cp_u2.start()
    cp_w2.start()
    cp_w3.start()

    # ---- l1: Linear(z_dim -> 128*4*4), emitted directly in (N*H*W, C) NHWC rows ----
    x0 = _mm(zaug_ref[...], w1_ref[...]) + b1t_ref[...]            # (M0, C) f32

    # ---- BatchNorm2d(128), eps=1e-5 ----
    x0 = _bn_act(x0, g0_ref[...], be0_ref[...], 1e-5, M0, lrelu=False)

    # ---- Upsample x2 (4->8) via 0/1 selection matmul into padded scratch ----
    _zero_ring(xpad1_ref, S1, N)
    up1 = _mm(u1_ref[...], x0)                                      # (M1, C)
    xpad1_ref[:, 1:1 + S1, PADL:PADL + S1, :] = up1.reshape(N, S1, S1, C)

    # ---- Conv2d(128,128,3,p=1): single im2col matmul, K=1152 (no bias: BN absorbs) --
    x1 = _mm(_im2col(xpad1_ref, S1, M1), wc1_ref[...])              # (M1, C) f32

    # ---- BatchNorm2d(128, eps=0.8) + LeakyReLU(0.2) ----
    x1 = _bn_act(x1, g1_ref[...], be1_ref[...], 0.8, M1, lrelu=True)

    # ---- Upsample x2 (8->16) into padded scratch (u2 prefetched) ----
    _zero_ring(xpad2_ref, S2, N)
    cp_u2.wait()
    up2 = _mm(u2_v[...], x1)                                        # (M2, C)
    xpad2_ref[:, 1:1 + S2, PADL:PADL + S2, :] = up2.reshape(N, S2, S2, C)

    # ---- Conv2d(128,64,3,p=1): single im2col matmul, Cout zero-padded to 128 ----
    slab2 = _im2col(xpad2_ref, S2, M2)                              # (M2, 1152)
    cp_w2.wait()
    x2 = _mm(slab2, wc2_v[...])                                     # (M2, C) f32

    # ---- BatchNorm2d(64, eps=0.8) + LeakyReLU(0.2) (padded channels stay exactly 0) --
    x2 = _bn_act(x2, g2_ref[...], be2_ref[...], 0.8, M2, lrelu=True)

    # ---- Conv3 input: same spatial size -> reuse xpad2 (pad ring still zero) ----
    xpad2_ref[:, 1:1 + S2, PADL:PADL + S2, :] = x2.reshape(N, S2, S2, C)

    # ---- Conv2d(64->1,3,p=1) + Tanh, LANE-DENSE as (1, N*H*W) ----
    slab3 = _im2col(xpad2_ref, S2, M2)
    cp_w3.wait()
    y3 = _mm_nt(wc3_v[...], slab3)                                  # (8, M2); rows identical
    out_ref[...] = jnp.tanh(y3[0:1, :] + bc3_ref[...])


# ---------------------------------------------------------------------------
# Static parameter preparation (one-time, outside the jitted forward)
# ---------------------------------------------------------------------------
def _upsample_matrix(N, s):
    # 0/1 selection matrix implementing nearest 2x upsample on (N,s,s) tensors
    # stored flat row-major in (n, row, col) order.
    n = jnp.arange(N)[:, None, None]
    r = jnp.arange(2 * s)[None, :, None]
    c = jnp.arange(2 * s)[None, None, :]
    src = n * (s * s) + (r // 2) * s + (c // 2)
    return jax.nn.one_hot(src.reshape(-1), N * s * s, dtype=jnp.float32)


def init_params(key):
    # Parameters in PyTorch-native layouts (Linear: (out,in); Conv2d: (Cout,Cin,kh,kw)).
    ks = jax.random.split(key, 16)
    d_out = 128 * S0 * S0
    f = lambda k, shape, s=0.05: (s * jax.random.normal(k, shape)).astype(jnp.float32)
    return {
        "w1": f(ks[0], (d_out, Z_DIM)), "b1": f(ks[1], (d_out,)),
        "bn0_g": 1.0 + f(ks[2], (128,)), "bn0_b": f(ks[3], (128,)),
        "wc1": f(ks[4], (128, 128, 3, 3)), "bc1": f(ks[5], (128,)),
        "bn1_g": 1.0 + f(ks[6], (128,)), "bn1_b": f(ks[7], (128,)),
        "wc2": f(ks[8], (64, 128, 3, 3)), "bc2": f(ks[9], (64,)),
        "bn2_g": 1.0 + f(ks[10], (64,)), "bn2_b": f(ks[11], (64,)),
        "wc3": f(ks[12], (IM_CHANNELS, 64, 3, 3)), "bc3": f(ks[13], (IM_CHANNELS,)),
    }


def prepare_params(p, N):
    """One-time static re-layout of torch-layout params for the fused kernel."""
    P = S0 * S0  # 16

    # Linear: permute columns so the matmul directly emits NHWC-flat rows.
    w1aug = p["w1"].reshape(128, P, Z_DIM).transpose(1, 2, 0).reshape(P * Z_DIM, 128)
    b1t = jnp.tile(p["b1"].reshape(128, P).T, (N, 1))

    # Conv weights -> (kh, kw, Cin, Cout) -> im2col layout (9*Cin, Cout).
    # bc1/bc2 are intentionally dropped: a per-channel constant shift is exactly
    # absorbed by the batch-statistics BatchNorm that immediately follows.
    wc1cat = p["wc1"].transpose(2, 3, 1, 0).reshape(KK, 128)
    wc2cat = jnp.pad(p["wc2"].transpose(2, 3, 1, 0),
                     ((0, 0), (0, 0), (0, 0), (0, 64))).reshape(KK, 128)
    g2 = jnp.pad(p["bn2_g"], (0, 64))
    be2 = jnp.pad(p["bn2_b"], (0, 64))

    # Conv3 (64->1): Cin zero-padded to 128, single output channel replicated 8x
    # along the sublane axis (keeps the MXU M-dim aligned); flattened to (8, 9*128).
    wc3 = jnp.pad(p["wc3"][0].transpose(1, 2, 0), ((0, 0), (0, 0), (0, 64)))   # (3,3,128)
    wc3cat = jnp.tile(wc3.reshape(1, KK), (8, 1))

    return (
        w1aug.astype(_MXU_DT), b1t,
        _upsample_matrix(N, S0).astype(_MXU_DT),
        p["bn0_g"].reshape(1, 128), p["bn0_b"].reshape(1, 128),
        wc1cat.astype(_MXU_DT),
        p["bn1_g"].reshape(1, 128), p["bn1_b"].reshape(1, 128),
        _upsample_matrix(N, S1).astype(_MXU_DT),     # u2     (prefetched in-kernel)
        wc2cat.astype(_MXU_DT),                      # wc2cat (prefetched in-kernel)
        wc3cat.astype(_MXU_DT),                      # wc3cat (prefetched in-kernel)
        g2.reshape(1, 128), be2.reshape(1, 128),
        p["bc3"].reshape(1, 1),
    )


# ---------------------------------------------------------------------------
# Forward wrapper (single fused pallas_call)
# ---------------------------------------------------------------------------
def vae_decoder_forward(z, prepped):
    N = z.shape[0]
    M1 = N * S1 * S1
    M2 = N * S2 * S2

    # Block-diagonal z expansion: zaug[n*16 + p, p*Z:(p+1)*Z] = z[n]  (tiny).
    eye = jnp.eye(S0 * S0, dtype=jnp.float32)
    zaug = (eye[None, :, :, None] * z.astype(jnp.float32)[:, None, None, :])
    zaug = zaug.reshape(N * S0 * S0, S0 * S0 * Z_DIM).astype(_MXU_DT)

    out_flat = pl.pallas_call(
        functools.partial(decoder_kernel, N=N),
        out_shape=jax.ShapeDtypeStruct((1, M2), jnp.float32),
        in_specs=[_VMEM] * 9 + [_ANY] * 3 + [_VMEM] * 3,
        out_specs=_VMEM,
        scratch_shapes=[
            pltpu.VMEM((M2, M1), _MXU_DT),                           # u2 landing buf
            pltpu.VMEM((KK, C), _MXU_DT),                            # wc2cat landing buf
            pltpu.VMEM((8, KK), _MXU_DT),                            # wc3cat landing buf
            pltpu.SemaphoreType.DMA((3,)),
            pltpu.VMEM((N, S1 + 2, 2 * PADL + S1, C), jnp.float32),  # conv1 padded input
            pltpu.VMEM((N, S2 + 2, 2 * PADL + S2, C), jnp.float32),  # conv2/3 padded input
        ],
        compiler_params=pltpu.CompilerParams(vmem_limit_bytes=32 * 1024 * 1024),
    )(zaug, *prepped)

    # (1, N*H*W) lane-dense row in (n, h, w) order  ->  NCHW (N, 1, H, W)
    return out_flat.reshape(N, IM_CHANNELS, S2, S2)


if __name__ == "__main__":
    key = jax.random.PRNGKey(0)
    k_param, k_z = jax.random.split(key)
    params = init_params(k_param)

    batch = 2
    z = jax.random.normal(k_z, (batch, Z_DIM), dtype=jnp.float32)

    prepped = prepare_params(params, batch)      # one-time static re-layout
    fwd = jax.jit(vae_decoder_forward)
    out = jax.block_until_ready(fwd(z, prepped))

    assert out.shape == (batch, IM_CHANNELS, IMSIZE, IMSIZE), out.shape
    assert bool(jnp.all(jnp.isfinite(out)))
    assert bool(jnp.all(jnp.abs(out) <= 1.0 + 1e-6))  # tanh range
    print("KERNEL_OK")
</pallas_src>

<mosaic_0001>
module attributes {stable_mosaic.version = 11 : i64} {
  func.func @decoder_kernel(%arg0: memref<32x512xbf16, #tpu.memory_space<vmem>>, %arg1: memref<512x128xbf16, #tpu.memory_space<vmem>>, %arg2: memref<32x128xf32, #tpu.memory_space<vmem>>, %arg3: memref<128x32xbf16, #tpu.memory_space<vmem>>, %arg4: memref<1x128xf32, #tpu.memory_space<vmem>>, %arg5: memref<1x128xf32, #tpu.memory_space<vmem>>, %arg6: memref<1152x128xbf16, #tpu.memory_space<vmem>>, %arg7: memref<1x128xf32, #tpu.memory_space<vmem>>, %arg8: memref<1x128xf32, #tpu.memory_space<vmem>>, %arg9: memref<512x128xbf16, #tpu.memory_space<any>>, %arg10: memref<1152x128xbf16, #tpu.memory_space<any>>, %arg11: memref<8x1152xbf16, #tpu.memory_space<any>>, %arg12: memref<1x128xf32, #tpu.memory_space<vmem>>, %arg13: memref<1x128xf32, #tpu.memory_space<vmem>>, %arg14: memref<1x1xf32, #tpu.memory_space<vmem>>, %arg15: memref<1x512xf32, #tpu.memory_space<vmem>>, %arg16: memref<512x128xbf16, #tpu.memory_space<vmem>>, %arg17: memref<1152x128xbf16, #tpu.memory_space<vmem>>, %arg18: memref<8x1152xbf16, #tpu.memory_space<vmem>>, %arg19: memref<3x!tpu.dma_semaphore, #tpu.memory_space<semaphore_mem>>, %arg20: memref<2x10x24x128xf32, #tpu.memory_space<vmem>>, %arg21: memref<2x18x32x128xf32, #tpu.memory_space<vmem>>) attributes {dimension_semantics = [], scalar_prefetch = 0 : i64, scratch_operands = 6 : i64, tpu.core_type = #tpu.core_type<tc>} {
    %c0_i32 = arith.constant 0 : i32
    %0 = tpu.memref_slice %arg19[%c0_i32] : memref<3x!tpu.dma_semaphore, #tpu.memory_space<semaphore_mem>> -> memref<1x!tpu.dma_semaphore, #tpu.memory_space<semaphore_mem>>
    %1 = tpu.memref_squeeze %0 : memref<1x!tpu.dma_semaphore, #tpu.memory_space<semaphore_mem>> -> memref<!tpu.dma_semaphore, #tpu.memory_space<semaphore_mem>>
    tpu.enqueue_dma source(%arg9 : memref<512x128xbf16, #tpu.memory_space<any>>) target(%arg16 : memref<512x128xbf16, #tpu.memory_space<vmem>>) target_semaphore(%1 : memref<!tpu.dma_semaphore, #tpu.memory_space<semaphore_mem>>)
    %c1_i32 = arith.constant 1 : i32
    %2 = tpu.memref_slice %arg19[%c1_i32] : memref<3x!tpu.dma_semaphore, #tpu.memory_space<semaphore_mem>> -> memref<1x!tpu.dma_semaphore, #tpu.memory_space<semaphore_mem>>
    %3 = tpu.memref_squeeze %2 : memref<1x!tpu.dma_semaphore, #tpu.memory_space<semaphore_mem>> -> memref<!tpu.dma_semaphore, #tpu.memory_space<semaphore_mem>>
    tpu.enqueue_dma source(%arg10 : memref<1152x128xbf16, #tpu.memory_space<any>>) target(%arg17 : memref<1152x128xbf16, #tpu.memory_space<vmem>>) target_semaphore(%3 : memref<!tpu.dma_semaphore, #tpu.memory_space<semaphore_mem>>)
    %c2_i32 = arith.constant 2 : i32
    %4 = tpu.memref_slice %arg19[%c2_i32] : memref<3x!tpu.dma_semaphore, #tpu.memory_space<semaphore_mem>> -> memref<1x!tpu.dma_semaphore, #tpu.memory_space<semaphore_mem>>
    %5 = tpu.memref_squeeze %4 : memref<1x!tpu.dma_semaphore, #tpu.memory_space<semaphore_mem>> -> memref<!tpu.dma_semaphore, #tpu.memory_space<semaphore_mem>>
    tpu.enqueue_dma source(%arg11 : memref<8x1152xbf16, #tpu.memory_space<any>>) target(%arg18 : memref<8x1152xbf16, #tpu.memory_space<vmem>>) target_semaphore(%5 : memref<!tpu.dma_semaphore, #tpu.memory_space<semaphore_mem>>)
    %c0 = arith.constant 0 : index
    %c0_0 = arith.constant 0 : index
    %6 = vector.load %arg0[%c0, %c0_0] : memref<32x512xbf16, #tpu.memory_space<vmem>>, vector<32x512xbf16>
    %c0_1 = arith.constant 0 : index
    %c0_2 = arith.constant 0 : index
    %7 = vector.load %arg1[%c0_1, %c0_2] : memref<512x128xbf16, #tpu.memory_space<vmem>>, vector<512x128xbf16>
    %cst = arith.constant dense<0.000000e+00> : vector<32x128xf32>
    %8 = tpu.matmul %6, %7, %cst {dimension_numbers = #tpu.dot_dimension_numbers<[1], [0], [0], [1], [0, 0, 1, 1], [], []>} : vector<32x512xbf16>, vector<512x128xbf16>, vector<32x128xf32> -> vector<32x128xf32>
    %c0_3 = arith.constant 0 : index
    %c0_4 = arith.constant 0 : index
    %9 = vector.load %arg2[%c0_3, %c0_4] : memref<32x128xf32, #tpu.memory_space<vmem>>, vector<32x128xf32>
    %10 = arith.addf %8, %9 : vector<32x128xf32>
    %c0_5 = arith.constant 0 : index
    %c0_6 = arith.constant 0 : index
    %11 = vector.load %arg4[%c0_5, %c0_6] : memref<1x128xf32, #tpu.memory_space<vmem>>, vector<1x128xf32>
    %c0_7 = arith.constant 0 : index
    %c0_8 = arith.constant 0 : index
    %12 = vector.load %arg5[%c0_7, %c0_8] : memref<1x128xf32, #tpu.memory_space<vmem>>, vector<1x128xf32>
    %cst_9 = arith.constant dense<0.000000e+00> : vector<128xf32>
    %13 = vector.multi_reduction <add>, %10, %cst_9 [0] : vector<32x128xf32> to vector<128xf32>
    %14 = vector.shape_cast %13 : vector<128xf32> to vector<1x128xf32>
    %cst_10 = arith.constant 3.125000e-02 : f32
    %15 = vector.broadcast %cst_10 : f32 to vector<1x128xf32>
    %16 = arith.mulf %14, %15 : vector<1x128xf32>
    %17 = arith.mulf %10, %10 : vector<32x128xf32>
    %cst_11 = arith.constant dense<0.000000e+00> : vector<128xf32>
    %18 = vector.multi_reduction <add>, %17, %cst_11 [0] : vector<32x128xf32> to vector<128xf32>
    %19 = vector.shape_cast %18 : vector<128xf32> to vector<1x128xf32>
    %cst_12 = arith.constant 3.125000e-02 : f32
    %20 = vector.broadcast %cst_12 : f32 to vector<1x128xf32>
    %21 = arith.mulf %19, %20 : vector<1x128xf32>
    %22 = arith.mulf %16, %16 : vector<1x128xf32>
    %23 = arith.subf %21, %22 : vector<1x128xf32>
    %cst_13 = arith.constant 0.000000e+00 : f32
    %24 = vector.broadcast %cst_13 : f32 to vector<1x128xf32>
    %25 = arith.maximumf %23, %24 : vector<1x128xf32>
    %cst_14 = arith.constant 9.99999974E-6 : f32
    %26 = vector.broadcast %cst_14 : f32 to vector<1x128xf32>
    %27 = arith.addf %25, %26 : vector<1x128xf32>
    %28 = math.rsqrt %27 : vector<1x128xf32>
    %29 = arith.mulf %11, %28 : vector<1x128xf32>
    %30 = arith.mulf %16, %29 : vector<1x128xf32>
    %31 = arith.subf %12, %30 : vector<1x128xf32>
    %32 = vector.broadcast %29 : vector<1x128xf32> to vector<32x128xf32>
    %33 = arith.mulf %10, %32 : vector<32x128xf32>
    %34 = vector.broadcast %31 : vector<1x128xf32> to vector<32x128xf32>
    %35 = arith.addf %33, %34 : vector<32x128xf32>
    %cst_15 = arith.constant 0.000000e+00 : f32
    %36 = vector.broadcast %cst_15 : f32 to vector<2x1x24x128xf32>
    %c0_16 = arith.constant 0 : index
    %c0_17 = arith.constant 0 : index
    %c0_18 = arith.constant 0 : index
    %c0_19 = arith.constant 0 : index
    %37 = vector.load %arg20[%c0_16, %c0_17, %c0_18, %c0_19] : memref<2x10x24x128xf32, #tpu.memory_space<vmem>>, vector<2x1x24x128xf32>
    tpu.vector_store %arg20[%c0_16, %c0_17, %c0_18, %c0_19], %36 {strides = array<i32>} : memref<2x10x24x128xf32, #tpu.memory_space<vmem>>, vector<2x1x24x128xf32>,
    %c0_20 = arith.constant 0 : index
    %c9 = arith.constant 9 : index
    %c0_21 = arith.constant 0 : index
    %c0_22 = arith.constant 0 : index
    %38 = vector.load %arg20[%c0_20, %c9, %c0_21, %c0_22] : memref<2x10x24x128xf32, #tpu.memory_space<vmem>>, vector<2x1x24x128xf32>
    tpu.vector_store %arg20[%c0_20, %c9, %c0_21, %c0_22], %36 {strides = array<i32>} : memref<2x10x24x128xf32, #tpu.memory_space<vmem>>, vector<2x1x24x128xf32>,
    %cst_23 = arith.constant 0.000000e+00 : f32
    %39 = vector.broadcast %cst_23 : f32 to vector<2x10x8x128xf32>
    %c0_24 = arith.constant 0 : index
    %c0_25 = arith.constant 0 : index
    %c0_26 = arith.constant 0 : index
    %c0_27 = arith.constant 0 : index
    %40 = vector.load %arg20[%c0_24, %c0_25, %c0_26, %c0_27] : memref<2x10x24x128xf32, #tpu.memory_space<vmem>>, vector<2x10x8x128xf32>
    tpu.vector_store %arg20[%c0_24, %c0_25, %c0_26, %c0_27], %39 {strides = array<i32>} : memref<2x10x24x128xf32, #tpu.memory_space<vmem>>, vector<2x10x8x128xf32>,
    %cst_28 = arith.constant 0.000000e+00 : f32
    %41 = vector.broadcast %cst_28 : f32 to vector<2x10x1x128xf32>
    %c0_29 = arith.constant 0 : index
    %c0_30 = arith.constant 0 : index
    %c16 = arith.constant 16 : index
    %c0_31 = arith.constant 0 : index
    %42 = vector.load %arg20[%c0_29, %c0_30, %c16, %c0_31] : memref<2x10x24x128xf32, #tpu.memory_space<vmem>>, vector<2x10x1x128xf32>
    tpu.vector_store %arg20[%c0_29, %c0_30, %c16, %c0_31], %41 {strides = array<i32>} : memref<2x10x24x128xf32, #tpu.memory_space<vmem>>, vector<2x10x1x128xf32>,
    %c0_32 = arith.constant 0 : index
    %c0_33 = arith.constant 0 : index
    %43 = vector.load %arg3[%c0_32, %c0_33] : memref<128x32xbf16, #tpu.memory_space<vmem>>, vector<128x32xbf16>
    %44 = arith.truncf %35 : vector<32x128xf32> to vector<32x128xbf16>
    %cst_34 = arith.constant dense<0.000000e+00> : vector<128x128xf32>
    %45 = tpu.matmul %43, %44, %cst_34 {dimension_numbers = #tpu.dot_dimension_numbers<[1], [0], [0], [1], [0, 0, 1, 1], [], []>} : vector<128x32xbf16>, vector<32x128xbf16>, vector<128x128xf32> -> vector<128x128xf32>
    %46 = vector.shape_cast %45 : vector<128x128xf32> to vector<2x8x8x128xf32>
    %c0_35 = arith.constant 0 : index
    %c1 = arith.constant 1 : index
    %c8 = arith.constant 8 : index
    %c0_36 = arith.constant 0 : index
    %47 = vector.load %arg20[%c0_35, %c1, %c8, %c0_36] : memref<2x10x24x128xf32, #tpu.memory_space<vmem>>, vector<2x8x8x128xf32>
    tpu.vector_store %arg20[%c0_35, %c1, %c8, %c0_36], %46 {strides = array<i32>} : memref<2x10x24x128xf32, #tpu.memory_space<vmem>>, vector<2x8x8x128xf32>,
    %c0_37 = arith.constant 0 : index
    %c0_38 = arith.constant 0 : index
    %c7 = arith.constant 7 : index
    %c0_39 = arith.constant 0 : index
    %48 = vector.load %arg20[%c0_37, %c0_38, %c7, %c0_39] : memref<2x10x24x128xf32, #tpu.memory_space<vmem>>, vector<2x8x8x128xf32>
    %49 = vector.shape_cast %48 : vector<2x8x8x128xf32> to vector<128x128xf32>
    %50 = arith.truncf %49 : vector<128x128xf32> to vector<128x128xbf16>
    %c0_40 = arith.constant 0 : index
    %c0_41 = arith.constant 0 : index
    %c8_42 = arith.constant 8 : index
    %c0_43 = arith.constant 0 : index
    %51 = vector.load %arg20[%c0_40, %c0_41, %c8_42, %c0_43] : memref<2x10x24x128xf32, #tpu.memory_space<vmem>>, vector<2x8x8x128xf32>
    %52 = vector.shape_cast %51 : vector<2x8x8x128xf32> to vector<128x128xf32>
    %53 = arith.truncf %52 : vector<128x128xf32> to vector<128x128xbf16>
    %c0_44 = arith.constant 0 : index
    %c0_45 = arith.constant 0 : index
    %c9_46 = arith.constant 9 : index
    %c0_47 = arith.constant 0 : index
    %54 = vector.load %arg20[%c0_44, %c0_45, %c9_46, %c0_47] : memref<2x10x24x128xf32, #tpu.memory_space<vmem>>, vector<2x8x8x128xf32>
    %55 = vector.shape_cast %54 : vector<2x8x8x128xf32> to vector<128x128xf32>
    %56 = arith.truncf %55 : vector<128x128xf32> to vector<128x128xbf16>
    %c0_48 = arith.constant 0 : index
    %c1_49 = arith.constant 1 : index
    %c7_50 = arith.constant 7 : index
    %c0_51 = arith.constant 0 : index
    %57 = vector.load %arg20[%c0_48, %c1_49, %c7_50, %c0_51] : memref<2x10x24x128xf32, #tpu.memory_space<vmem>>, vector<2x8x8x128xf32>
    %58 = vector.shape_cast %57 : vector<2x8x8x128xf32> to vector<128x128xf32>
    %59 = arith.truncf %58 : vector<128x128xf32> to vector<128x128xbf16>
    %c0_52 = arith.constant 0 : index
    %c1_53 = arith.constant 1 : index
    %c8_54 = arith.constant 8 : index
    %c0_55 = arith.constant 0 : index
    %60 = vector.load %arg20[%c0_52, %c1_53, %c8_54, %c0_55] : memref<2x10x24x128xf32, #tpu.memory_space<vmem>>, vector<2x8x8x128xf32>
    %61 = vector.shape_cast %60 : vector<2x8x8x128xf32> to vector<128x128xf32>
    %62 = arith.truncf %61 : vector<128x128xf32> to vector<128x128xbf16>
    %c0_56 = arith.constant 0 : index
    %c1_57 = arith.constant 1 : index
    %c9_58 = arith.constant 9 : index
    %c0_59 = arith.constant 0 : index
    %63 = vector.load %arg20[%c0_56, %c1_57, %c9_58, %c0_59] : memref<2x10x24x128xf32, #tpu.memory_space<vmem>>, vector<2x8x8x128xf32>
    %64 = vector.shape_cast %63 : vector<2x8x8x128xf32> to vector<128x128xf32>
    %65 = arith.truncf %64 : vector<128x128xf32> to vector<128x128xbf16>
    %c0_60 = arith.constant 0 : index
    %c2 = arith.constant 2 : index
    %c7_61 = arith.constant 7 : index
    %c0_62 = arith.constant 0 : index
    %66 = vector.load %arg20[%c0_60, %c2, %c7_61, %c0_62] : memref<2x10x24x128xf32, #tpu.memory_space<vmem>>, vector<2x8x8x128xf32>
    %67 = vector.shape_cast %66 : vector<2x8x8x128xf32> to vector<128x128xf32>
    %68 = arith.truncf %67 : vector<128x128xf32> to vector<128x128xbf16>
    %c0_63 = arith.constant 0 : index
    %c2_64 = arith.constant 2 : index
    %c8_65 = arith.constant 8 : index
    %c0_66 = arith.constant 0 : index
    %69 = vector.load %arg20[%c0_63, %c2_64, %c8_65, %c0_66] : memref<2x10x24x128xf32, #tpu.memory_space<vmem>>, vector<2x8x8x128xf32>
    %70 = vector.shape_cast %69 : vector<2x8x8x128xf32> to vector<128x128xf32>
    %71 = arith.truncf %70 : vector<128x128xf32> to vector<128x128xbf16>
    %c0_67 = arith.constant 0 : index
    %c2_68 = arith.constant 2 : index
    %c9_69 = arith.constant 9 : index
    %c0_70 = arith.constant 0 : index
    %72 = vector.load %arg20[%c0_67, %c2_68, %c9_69, %c0_70] : memref<2x10x24x128xf32, #tpu.memory_space<vmem>>, vector<2x8x8x128xf32>
    %73 = vector.shape_cast %72 : vector<2x8x8x128xf32> to vector<128x128xf32>
    %74 = arith.truncf %73 : vector<128x128xf32> to vector<128x128xbf16>
    %75 = tpu.concatenate %50, %53, %56, %59, %62, %65, %68, %71, %74 in 1 : vector<128x128xbf16>, vector<128x128xbf16>, vector<128x128xbf16>, vector<128x128xbf16>, vector<128x128xbf16>, vector<128x128xbf16>, vector<128x128xbf16>, vector<128x128xbf16>, vector<128x128xbf16> -> vector<128x1152xbf16>
    %c0_71 = arith.constant 0 : index
    %c0_72 = arith.constant 0 : index
    %76 = vector.load %arg6[%c0_71, %c0_72] : memref<1152x128xbf16, #tpu.memory_space<vmem>>, vector<1152x128xbf16>
    %cst_73 = arith.constant dense<0.000000e+00> : vector<128x128xf32>
    %77 = tpu.matmul %75, %76, %cst_73 {dimension_numbers = #tpu.dot_dimension_numbers<[1], [0], [0], [1], [0, 0, 1, 1], [], []>} : vector<128x1152xbf16>, vector<1152x128xbf16>, vector<128x128xf32> -> vector<128x128xf32>
    %c0_74 = arith.constant 0 : index
    %c0_75 = arith.constant 0 : index
    %78 = vector.load %arg7[%c0_74, %c0_75] : memref<1x128xf32, #tpu.memory_space<vmem>>, vector<1x128xf32>
    %c0_76 = arith.constant 0 : index
    %c0_77 = arith.constant 0 : index
    %79 = vector.load %arg8[%c0_76, %c0_77] : memref<1x128xf32, #tpu.memory_space<vmem>>, vector<1x128xf32>
    %cst_78 = arith.constant dense<0.000000e+00> : vector<128xf32>
    %80 = vector.multi_reduction <add>, %77, %cst_78 [0] : vector<128x128xf32> to vector<128xf32>
    %81 = vector.shape_cast %80 : vector<128xf32> to vector<1x128xf32>
    %cst_79 = arith.constant 7.812500e-03 : f32
    %82 = vector.broadcast %cst_79 : f32 to vector<1x128xf32>
    %83 = arith.mulf %81, %82 : vector<1x128xf32>
    %84 = arith.mulf %77, %77 : vector<128x128xf32>
    %cst_80 = arith.constant dense<0.000000e+00> : vector<128xf32>
    %85 = vector.multi_reduction <add>, %84, %cst_80 [0] : vector<128x128xf32> to vector<128xf32>
    %86 = vector.shape_cast %85 : vector<128xf32> to vector<1x128xf32>
    %cst_81 = arith.constant 7.812500e-03 : f32
    %87 = vector.broadcast %cst_81 : f32 to vector<1x128xf32>
    %88 = arith.mulf %86, %87 : vector<1x128xf32>
    %89 = arith.mulf %83, %83 : vector<1x128xf32>
    %90 = arith.subf %88, %89 : vector<1x128xf32>
    %cst_82 = arith.constant 0.000000e+00 : f32
    %91 = vector.broadcast %cst_82 : f32 to vector<1x128xf32>
    %92 = arith.maximumf %90, %91 : vector<1x128xf32>
    %cst_83 = arith.constant 8.000000e-01 : f32
    %93 = vector.broadcast %cst_83 : f32 to vector<1x128xf32>
    %94 = arith.addf %92, %93 : vector<1x128xf32>
    %95 = math.rsqrt %94 : vector<1x128xf32>
    %96 = arith.mulf %78, %95 : vector<1x128xf32>
    %97 = arith.mulf %83, %96 : vector<1x128xf32>
    %98 = arith.subf %79, %97 : vector<1x128xf32>
    %99 = vector.broadcast %96 : vector<1x128xf32> to vector<128x128xf32>
    %100 = arith.mulf %77, %99 : vector<128x128xf32>
    %101 = vector.broadcast %98 : vector<1x128xf32> to vector<128x128xf32>
    %102 = arith.addf %100, %101 : vector<128x128xf32>
    %cst_84 = arith.constant 0.000000e+00 : f32
    %103 = vector.broadcast %cst_84 : f32 to vector<128x128xf32>
    %104 = arith.cmpf ogt, %102, %103 : vector<128x128xf32>
    %cst_85 = arith.constant 2.000000e-01 : f32
    %105 = vector.broadcast %cst_85 : f32 to vector<128x128xf32>
    %106 = arith.mulf %105, %102 : vector<128x128xf32>
    %107 = arith.select %104, %102, %106 : vector<128x128xi1>, vector<128x128xf32>
    %cst_86 = arith.constant 0.000000e+00 : f32
    %108 = vector.broadcast %cst_86 : f32 to vector<2x1x32x128xf32>
    %c0_87 = arith.constant 0 : index
    %c0_88 = arith.constant 0 : index
    %c0_89 = arith.constant 0 : index
    %c0_90 = arith.constant 0 : index
    %109 = vector.load %arg21[%c0_87, %c0_88, %c0_89, %c0_90] : memref<2x18x32x128xf32, #tpu.memory_space<vmem>>, vector<2x1x32x128xf32>
    tpu.vector_store %arg21[%c0_87, %c0_88, %c0_89, %c0_90], %108 {strides = array<i32>} : memref<2x18x32x128xf32, #tpu.memory_space<vmem>>, vector<2x1x32x128xf32>,
    %c0_91 = arith.constant 0 : index
    %c17 = arith.constant 17 : index
    %c0_92 = arith.constant 0 : index
    %c0_93 = arith.constant 0 : index
    %110 = vector.load %arg21[%c0_91, %c17, %c0_92, %c0_93] : memref<2x18x32x128xf32, #tpu.memory_space<vmem>>, vector<2x1x32x128xf32>
    tpu.vector_store %arg21[%c0_91, %c17, %c0_92, %c0_93], %108 {strides = array<i32>} : memref<2x18x32x128xf32, #tpu.memory_space<vmem>>, vector<2x1x32x128xf32>,
    %cst_94 = arith.constant 0.000000e+00 : f32
    %111 = vector.broadcast %cst_94 : f32 to vector<2x18x8x128xf32>
    %c0_95 = arith.constant 0 : index
    %c0_96 = arith.constant 0 : index
    %c0_97 = arith.constant 0 : index
    %c0_98 = arith.constant 0 : index
    %112 = vector.load %arg21[%c0_95, %c0_96, %c0_97, %c0_98] : memref<2x18x32x128xf32, #tpu.memory_space<vmem>>, vector<2x18x8x128xf32>
    tpu.vector_store %arg21[%c0_95, %c0_96, %c0_97, %c0_98], %111 {strides = array<i32>} : memref<2x18x32x128xf32, #tpu.memory_space<vmem>>, vector<2x18x8x128xf32>,
    %cst_99 = arith.constant 0.000000e+00 : f32
    %113 = vector.broadcast %cst_99 : f32 to vector<2x18x1x128xf32>
    %c0_100 = arith.constant 0 : index
    %c0_101 = arith.constant 0 : index
    %c24 = arith.constant 24 : index
    %c0_102 = arith.constant 0 : index
    %114 = vector.load %arg21[%c0_100, %c0_101, %c24, %c0_102] : memref<2x18x32x128xf32, #tpu.memory_space<vmem>>, vector<2x18x1x128xf32>
    tpu.vector_store %arg21[%c0_100, %c0_101, %c24, %c0_102], %113 {strides = array<i32>} : memref<2x18x32x128xf32, #tpu.memory_space<vmem>>, vector<2x18x1x128xf32>,
    %c0_i32_103 = arith.constant 0 : i32
    %115 = tpu.memref_slice %arg19[%c0_i32_103] : memref<3x!tpu.dma_semaphore, #tpu.memory_space<semaphore_mem>> -> memref<1x!tpu.dma_semaphore, #tpu.memory_space<semaphore_mem>>
    %116 = tpu.memref_squeeze %115 : memref<1x!tpu.dma_semaphore, #tpu.memory_space<semaphore_mem>> -> memref<!tpu.dma_semaphore, #tpu.memory_space<semaphore_mem>>
    tpu.wait_dma2 semaphore(%116 : memref<!tpu.dma_semaphore, #tpu.memory_space<semaphore_mem>>) src(%arg9 : memref<512x128xbf16, #tpu.memory_space<any>>) dst(%arg16 : memref<512x128xbf16, #tpu.memory_space<vmem>>)
    %c0_104 = arith.constant 0 : index
    %c0_105 = arith.constant 0 : index
    %117 = vector.load %arg16[%c0_104, %c0_105] : memref<512x128xbf16, #tpu.memory_space<vmem>>, vector<512x128xbf16>
    %118 = arith.truncf %107 : vector<128x128xf32> to vector<128x128xbf16>
    %cst_106 = arith.constant dense<0.000000e+00> : vector<512x128xf32>
    %119 = tpu.matmul %117, %118, %cst_106 {dimension_numbers = #tpu.dot_dimension_numbers<[1], [0], [0], [1], [0, 0, 1, 1], [], []>} : vector<512x128xbf16>, vector<128x128xbf16>, vector<512x128xf32> -> vector<512x128xf32>
    %120 = vector.shape_cast %119 : vector<512x128xf32> to vector<2x16x16x128xf32>
    %c0_107 = arith.constant 0 : index
    %c1_108 = arith.constant 1 : index
    %c8_109 = arith.constant 8 : index
    %c0_110 = arith.constant 0 : index
    %121 = vector.load %arg21[%c0_107, %c1_108, %c8_109, %c0_110] : memref<2x18x32x128xf32, #tpu.memory_space<vmem>>, vector<2x16x16x128xf32>
    tpu.vector_store %arg21[%c0_107, %c1_108, %c8_109, %c0_110], %120 {strides = array<i32>} : memref<2x18x32x128xf32, #tpu.memory_space<vmem>>, vector<2x16x16x128xf32>,
    %c0_111 = arith.constant 0 : index
    %c0_112 = arith.constant 0 : index
    %c7_113 = arith.constant 7 : index
    %c0_114 = arith.constant 0 : index
    %122 = vector.load %arg21[%c0_111, %c0_112, %c7_113, %c0_114] : memref<2x18x32x128xf32, #tpu.memory_space<vmem>>, vector<2x16x16x128xf32>
    %123 = vector.shape_cast %122 : vector<2x16x16x128xf32> to vector<512x128xf32>
    %124 = arith.truncf %123 : vector<512x128xf32> to vector<512x128xbf16>
    %c0_115 = arith.constant 0 : index
    %c0_116 = arith.constant 0 : index
    %c8_117 = arith.constant 8 : index
    %c0_118 = arith.constant 0 : index
    %125 = vector.load %arg21[%c0_115, %c0_116, %c8_117, %c0_118] : memref<2x18x32x128xf32, #tpu.memory_space<vmem>>, vector<2x16x16x128xf32>
    %126 = vector.shape_cast %125 : vector<2x16x16x128xf32> to vector<512x128xf32>
    %127 = arith.truncf %126 : vector<512x128xf32> to vector<512x128xbf16>
    %c0_119 = arith.constant 0 : index
    %c0_120 = arith.constant 0 : index
    %c9_121 = arith.constant 9 : index
    %c0_122 = arith.constant 0 : index
    %128 = vector.load %arg21[%c0_119, %c0_120, %c9_121, %c0_122] : memref<2x18x32x128xf32, #tpu.memory_space<vmem>>, vector<2x16x16x128xf32>
    %129 = vector.shape_cast %128 : vector<2x16x16x128xf32> to vector<512x128xf32>
    %130 = arith.truncf %129 : vector<512x128xf32> to vector<512x128xbf16>
    %c0_123 = arith.constant 0 : index
    %c1_124 = arith.constant 1 : index
    %c7_125 = arith.constant 7 : index
    %c0_126 = arith.constant 0 : index
    %131 = vector.load %arg21[%c0_123, %c1_124, %c7_125, %c0_126] : memref<2x18x32x128xf32, #tpu.memory_space<vmem>>, vector<2x16x16x128xf32>
    %132 = vector.shape_cast %131 : vector<2x16x16x128xf32> to vector<512x128xf32>
    %133 = arith.truncf %132 : vector<512x128xf32> to vector<512x128xbf16>
    %c0_127 = arith.constant 0 : index
    %c1_128 = arith.constant 1 : index
    %c8_129 = arith.constant 8 : index
    %c0_130 = arith.constant 0 : index
    %134 = vector.load %arg21[%c0_127, %c1_128, %c8_129, %c0_130] : memref<2x18x32x128xf32, #tpu.memory_space<vmem>>, vector<2x16x16x128xf32>
    %135 = vector.shape_cast %134 : vector<2x16x16x128xf32> to vector<512x128xf32>
    %136 = arith.truncf %135 : vector<512x128xf32> to vector<512x128xbf16>
    %c0_131 = arith.constant 0 : index
    %c1_132 = arith.constant 1 : index
    %c9_133 = arith.constant 9 : index
    %c0_134 = arith.constant 0 : index
    %137 = vector.load %arg21[%c0_131, %c1_132, %c9_133, %c0_134] : memref<2x18x32x128xf32, #tpu.memory_space<vmem>>, vector<2x16x16x128xf32>
    %138 = vector.shape_cast %137 : vector<2x16x16x128xf32> to vector<512x128xf32>
    %139 = arith.truncf %138 : vector<512x128xf32> to vector<512x128xbf16>
    %c0_135 = arith.constant 0 : index
    %c2_136 = arith.constant 2 : index
    %c7_137 = arith.constant 7 : index
    %c0_138 = arith.constant 0 : index
    %140 = vector.load %arg21[%c0_135, %c2_136, %c7_137, %c0_138] : memref<2x18x32x128xf32, #tpu.memory_space<vmem>>, vector<2x16x16x128xf32>
    %141 = vector.shape_cast %140 : vector<2x16x16x128xf32> to vector<512x128xf32>
    %142 = arith.truncf %141 : vector<512x128xf32> to vector<512x128xbf16>
    %c0_139 = arith.constant 0 : index
    %c2_140 = arith.constant 2 : index
    %c8_141 = arith.constant 8 : index
    %c0_142 = arith.constant 0 : index
    %143 = vector.load %arg21[%c0_139, %c2_140, %c8_141, %c0_142] : memref<2x18x32x128xf32, #tpu.memory_space<vmem>>, vector<2x16x16x128xf32>
    %144 = vector.shape_cast %143 : vector<2x16x16x128xf32> to vector<512x128xf32>
    %145 = arith.truncf %144 : vector<512x128xf32> to vector<512x128xbf16>
    %c0_143 = arith.constant 0 : index
    %c2_144 = arith.constant 2 : index
    %c9_145 = arith.constant 9 : index
    %c0_146 = arith.constant 0 : index
    %146 = vector.load %arg21[%c0_143, %c2_144, %c9_145, %c0_146] : memref<2x18x32x128xf32, #tpu.memory_space<vmem>>, vector<2x16x16x128xf32>
    %147 = vector.shape_cast %146 : vector<2x16x16x128xf32> to vector<512x128xf32>
    %148 = arith.truncf %147 : vector<512x128xf32> to vector<512x128xbf16>
    %149 = tpu.concatenate %124, %127, %130, %133, %136, %139, %142, %145, %148 in 1 : vector<512x128xbf16>, vector<512x128xbf16>, vector<512x128xbf16>, vector<512x128xbf16>, vector<512x128xbf16>, vector<512x128xbf16>, vector<512x128xbf16>, vector<512x128xbf16>, vector<512x128xbf16> -> vector<512x1152xbf16>
    %c1_i32_147 = arith.constant 1 : i32
    %150 = tpu.memref_slice %arg19[%c1_i32_147] : memref<3x!tpu.dma_semaphore, #tpu.memory_space<semaphore_mem>> -> memref<1x!tpu.dma_semaphore, #tpu.memory_space<semaphore_mem>>
    %151 = tpu.memref_squeeze %150 : memref<1x!tpu.dma_semaphore, #tpu.memory_space<semaphore_mem>> -> memref<!tpu.dma_semaphore, #tpu.memory_space<semaphore_mem>>
    tpu.wait_dma2 semaphore(%151 : memref<!tpu.dma_semaphore, #tpu.memory_space<semaphore_mem>>) src(%arg10 : memref<1152x128xbf16, #tpu.memory_space<any>>) dst(%arg17 : memref<1152x128xbf16, #tpu.memory_space<vmem>>)
    %c0_148 = arith.constant 0 : index
    %c0_149 = arith.constant 0 : index
    %152 = vector.load %arg17[%c0_148, %c0_149] : memref<1152x128xbf16, #tpu.memory_space<vmem>>, vector<1152x128xbf16>
    %cst_150 = arith.constant dense<0.000000e+00> : vector<512x128xf32>
    %153 = tpu.matmul %149, %152, %cst_150 {dimension_numbers = #tpu.dot_dimension_numbers<[1], [0], [0], [1], [0, 0, 1, 1], [], []>} : vector<512x1152xbf16>, vector<1152x128xbf16>, vector<512x128xf32> -> vector<512x128xf32>
    %c0_151 = arith.constant 0 : index
    %c0_152 = arith.constant 0 : index
    %154 = vector.load %arg12[%c0_151, %c0_152] : memref<1x128xf32, #tpu.memory_space<vmem>>, vector<1x128xf32>
    %c0_153 = arith.constant 0 : index
    %c0_154 = arith.constant 0 : index
    %155 = vector.load %arg13[%c0_153, %c0_154] : memref<1x128xf32, #tpu.memory_space<vmem>>, vector<1x128xf32>
    %cst_155 = arith.constant dense<0.000000e+00> : vector<128xf32>
    %156 = vector.multi_reduction <add>, %153, %cst_155 [0] : vector<512x128xf32> to vector<128xf32>
    %157 = vector.shape_cast %156 : vector<128xf32> to vector<1x128xf32>
    %cst_156 = arith.constant 0.001953125 : f32
    %158 = vector.broadcast %cst_156 : f32 to vector<1x128xf32>
    %159 = arith.mulf %157, %158 : vector<1x128xf32>
    %160 = arith.mulf %153, %153 : vector<512x128xf32>
    %cst_157 = arith.constant dense<0.000000e+00> : vector<128xf32>
    %161 = vector.multi_reduction <add>, %160, %cst_157 [0] : vector<512x128xf32> to vector<128xf32>
    %162 = vector.shape_cast %161 : vector<128xf32> to vector<1x128xf32>
    %cst_158 = arith.constant 0.001953125 : f32
    %163 = vector.broadcast %cst_158 : f32 to vector<1x128xf32>
    %164 = arith.mulf %162, %163 : vector<1x128xf32>
    %165 = arith.mulf %159, %159 : vector<1x128xf32>
    %166 = arith.subf %164, %165 : vector<1x128xf32>
    %cst_159 = arith.constant 0.000000e+00 : f32
    %167 = vector.broadcast %cst_159 : f32 to vector<1x128xf32>
    %168 = arith.maximumf %166, %167 : vector<1x128xf32>
    %cst_160 = arith.constant 8.000000e-01 : f32
    %169 = vector.broadcast %cst_160 : f32 to vector<1x128xf32>
    %170 = arith.addf %168, %169 : vector<1x128xf32>
    %171 = math.rsqrt %170 : vector<1x128xf32>
    %172 = arith.mulf %154, %171 : vector<1x128xf32>
    %173 = arith.mulf %159, %172 : vector<1x128xf32>
    %174 = arith.subf %155, %173 : vector<1x128xf32>
    %175 = vector.broadcast %172 : vector<1x128xf32> to vector<512x128xf32>
    %176 = arith.mulf %153, %175 : vector<512x128xf32>
    %177 = vector.broadcast %174 : vector<1x128xf32> to vector<512x128xf32>
    %178 = arith.addf %176, %177 : vector<512x128xf32>
    %cst_161 = arith.constant 0.000000e+00 : f32
    %179 = vector.broadcast %cst_161 : f32 to vector<512x128xf32>
    %180 = arith.cmpf ogt, %178, %179 : vector<512x128xf32>
    %cst_162 = arith.constant 2.000000e-01 : f32
    %181 = vector.broadcast %cst_162 : f32 to vector<512x128xf32>
    %182 = arith.mulf %181, %178 : vector<512x128xf32>
    %183 = arith.select %180, %178, %182 : vector<512x128xi1>, vector<512x128xf32>
    %184 = vector.shape_cast %183 : vector<512x128xf32> to vector<2x16x16x128xf32>
    %c0_163 = arith.constant 0 : index
    %c1_164 = arith.constant 1 : index
    %c8_165 = arith.constant 8 : index
    %c0_166 = arith.constant 0 : index
    %185 = vector.load %arg21[%c0_163, %c1_164, %c8_165, %c0_166] : memref<2x18x32x128xf32, #tpu.memory_space<vmem>>, vector<2x16x16x128xf32>
    tpu.vector_store %arg21[%c0_163, %c1_164, %c8_165, %c0_166], %184 {strides = array<i32>} : memref<2x18x32x128xf32, #tpu.memory_space<vmem>>, vector<2x16x16x128xf32>,
    %c0_167 = arith.constant 0 : index
    %c0_168 = arith.constant 0 : index
    %c7_169 = arith.constant 7 : index
    %c0_170 = arith.constant 0 : index
    %186 = vector.load %arg21[%c0_167, %c0_168, %c7_169, %c0_170] : memref<2x18x32x128xf32, #tpu.memory_space<vmem>>, vector<2x16x16x128xf32>
    %187 = vector.shape_cast %186 : vector<2x16x16x128xf32> to vector<512x128xf32>
    %188 = arith.truncf %187 : vector<512x128xf32> to vector<512x128xbf16>
    %c0_171 = arith.constant 0 : index
    %c0_172 = arith.constant 0 : index
    %c8_173 = arith.constant 8 : index
    %c0_174 = arith.constant 0 : index
    %189 = vector.load %arg21[%c0_171, %c0_172, %c8_173, %c0_174] : memref<2x18x32x128xf32, #tpu.memory_space<vmem>>, vector<2x16x16x128xf32>
    %190 = vector.shape_cast %189 : vector<2x16x16x128xf32> to vector<512x128xf32>
    %191 = arith.truncf %190 : vector<512x128xf32> to vector<512x128xbf16>
    %c0_175 = arith.constant 0 : index
    %c0_176 = arith.constant 0 : index
    %c9_177 = arith.constant 9 : index
    %c0_178 = arith.constant 0 : index
    %192 = vector.load %arg21[%c0_175, %c0_176, %c9_177, %c0_178] : memref<2x18x32x128xf32, #tpu.memory_space<vmem>>, vector<2x16x16x128xf32>
    %193 = vector.shape_cast %192 : vector<2x16x16x128xf32> to vector<512x128xf32>
    %194 = arith.truncf %193 : vector<512x128xf32> to vector<512x128xbf16>
    %c0_179 = arith.constant 0 : index
    %c1_180 = arith.constant 1 : index
    %c7_181 = arith.constant 7 : index
    %c0_182 = arith.constant 0 : index
    %195 = vector.load %arg21[%c0_179, %c1_180, %c7_181, %c0_182] : memref<2x18x32x128xf32, #tpu.memory_space<vmem>>, vector<2x16x16x128xf32>
    %196 = vector.shape_cast %195 : vector<2x16x16x128xf32> to vector<512x128xf32>
    %197 = arith.truncf %196 : vector<512x128xf32> to vector<512x128xbf16>
    %c0_183 = arith.constant 0 : index
    %c1_184 = arith.constant 1 : index
    %c8_185 = arith.constant 8 : index
    %c0_186 = arith.constant 0 : index
    %198 = vector.load %arg21[%c0_183, %c1_184, %c8_185, %c0_186] : memref<2x18x32x128xf32, #tpu.memory_space<vmem>>, vector<2x16x16x128xf32>
    %199 = vector.shape_cast %198 : vector<2x16x16x128xf32> to vector<512x128xf32>
    %200 = arith.truncf %199 : vector<512x128xf32> to vector<512x128xbf16>
    %c0_187 = arith.constant 0 : index
    %c1_188 = arith.constant 1 : index
    %c9_189 = arith.constant 9 : index
    %c0_190 = arith.constant 0 : index
    %201 = vector.load %arg21[%c0_187, %c1_188, %c9_189, %c0_190] : memref<2x18x32x128xf32, #tpu.memory_space<vmem>>, vector<2x16x16x128xf32>
    %202 = vector.shape_cast %201 : vector<2x16x16x128xf32> to vector<512x128xf32>
    %203 = arith.truncf %202 : vector<512x128xf32> to vector<512x128xbf16>
    %c0_191 = arith.constant 0 : index
    %c2_192 = arith.constant 2 : index
    %c7_193 = arith.constant 7 : index
    %c0_194 = arith.constant 0 : index
    %204 = vector.load %arg21[%c0_191, %c2_192, %c7_193, %c0_194] : memref<2x18x32x128xf32, #tpu.memory_space<vmem>>, vector<2x16x16x128xf32>
    %205 = vector.shape_cast %204 : vector<2x16x16x128xf32> to vector<512x128xf32>
    %206 = arith.truncf %205 : vector<512x128xf32> to vector<512x128xbf16>
    %c0_195 = arith.constant 0 : index
    %c2_196 = arith.constant 2 : index
    %c8_197 = arith.constant 8 : index
    %c0_198 = arith.constant 0 : index
    %207 = vector.load %arg21[%c0_195, %c2_196, %c8_197, %c0_198] : memref<2x18x32x128xf32, #tpu.memory_space<vmem>>, vector<2x16x16x128xf32>
    %208 = vector.shape_cast %207 : vector<2x16x16x128xf32> to vector<512x128xf32>
    %209 = arith.truncf %208 : vector<512x128xf32> to vector<512x128xbf16>
    %c0_199 = arith.constant 0 : index
    %c2_200 = arith.constant 2 : index
    %c9_201 = arith.constant 9 : index
    %c0_202 = arith.constant 0 : index
    %210 = vector.load %arg21[%c0_199, %c2_200, %c9_201, %c0_202] : memref<2x18x32x128xf32, #tpu.memory_space<vmem>>, vector<2x16x16x128xf32>
    %211 = vector.shape_cast %210 : vector<2x16x16x128xf32> to vector<512x128xf32>
    %212 = arith.truncf %211 : vector<512x128xf32> to vector<512x128xbf16>
    %213 = tpu.concatenate %188, %191, %194, %197, %200, %203, %206, %209, %212 in 1 : vector<512x128xbf16>, vector<512x128xbf16>, vector<512x128xbf16>, vector<512x128xbf16>, vector<512x128xbf16>, vector<512x128xbf16>, vector<512x128xbf16>, vector<512x128xbf16>, vector<512x128xbf16> -> vector<512x1152xbf16>
    %c2_i32_203 = arith.constant 2 : i32
    %214 = tpu.memref_slice %arg19[%c2_i32_203] : memref<3x!tpu.dma_semaphore, #tpu.memory_space<semaphore_mem>> -> memref<1x!tpu.dma_semaphore, #tpu.memory_space<semaphore_mem>>
    %215 = tpu.memref_squeeze %214 : memref<1x!tpu.dma_semaphore, #tpu.memory_space<semaphore_mem>> -> memref<!tpu.dma_semaphore, #tpu.memory_space<semaphore_mem>>
    tpu.wait_dma2 semaphore(%215 : memref<!tpu.dma_semaphore, #tpu.memory_space<semaphore_mem>>) src(%arg11 : memref<8x1152xbf16, #tpu.memory_space<any>>) dst(%arg18 : memref<8x1152xbf16, #tpu.memory_space<vmem>>)
    %c0_204 = arith.constant 0 : index
    %c0_205 = arith.constant 0 : index
    %216 = vector.load %arg18[%c0_204, %c0_205] : memref<8x1152xbf16, #tpu.memory_space<vmem>>, vector<8x1152xbf16>
    %cst_206 = arith.constant dense<0.000000e+00> : vector<8x512xf32>
    %217 = tpu.matmul %216, %213, %cst_206 {dimension_numbers = #tpu.dot_dimension_numbers<[1], [1], [0], [0], [0, 0, 1, 0], [], []>} : vector<8x1152xbf16>, vector<512x1152xbf16>, vector<8x512xf32> -> vector<8x512xf32>
    %218 = vector.extract_strided_slice %217 {offsets = [0, 0], sizes = [1, 512], strides = [1, 1]} : vector<8x512xf32> to vector<1x512xf32>
    %c0_207 = arith.constant 0 : index
    %c0_208 = arith.constant 0 : index
    %219 = vector.load %arg14[%c0_207, %c0_208] : memref<1x1xf32, #tpu.memory_space<vmem>>, vector<1x1xf32>
    %220 = vector.broadcast %219 : vector<1x1xf32> to vector<1x512xf32>
    %221 = arith.addf %218, %220 : vector<1x512xf32>
    %222 = math.tanh %221 : vector<1x512xf32>
    %c0_209 = arith.constant 0 : index
    %c0_210 = arith.constant 0 : index
    %223 = vector.load %arg15[%c0_209, %c0_210] : memref<1x512xf32, #tpu.memory_space<vmem>>, vector<1x512xf32>
    tpu.vector_store %arg15[%c0_209, %c0_210], %222 {strides = array<i32>} : memref<1x512xf32, #tpu.memory_space<vmem>>, vector<1x512xf32>,
    return
  }
}

</mosaic_0001>

<bundles_post_ra>
// kernel: vae_decoder_forward.1
= control target key start
LH: loop header
LB: loop body
LE: loop exit
PB: predicated region body
PF: predicated region fallthrough
CT: control target
= control target key end

     0   :  { %s14170_s0 = inlined_call_operand.vmem [shape: bf16[32,512], index: 0, kind: input, shape index: {}]   ;;  %s14171_s1 = inlined_call_operand.hbm [shape: bf16[512,128], index: 1, kind: input, shape index: {}]   ;;  %s14172_s2 = inlined_call_operand.vmem [shape: f32[32,128], index: 2, kind: input, shape index: {}]   ;;  %s14173_s3 = inlined_call_operand.vmem [shape: bf16[128,32], index: 3, kind: input, shape index: {}]   ;;  %s14174_s4 = inlined_call_operand.vmem [shape: f32[1,128], index: 4, kind: input, shape index: {}]   ;;  %s14175_s5 = inlined_call_operand.vmem [shape: f32[1,128], index: 5, kind: input, shape index: {}]   ;;  %s14176_s6 = inlined_call_operand.vmem [shape: bf16[1152,128], index: 6, kind: input, shape index: {}]   ;;  %s14177_s7 = inlined_call_operand.vmem [shape: f32[1,128], index: 7, kind: input, shape index: {}]   ;;  %s14178_s8 = inlined_call_operand.vmem [shape: f32[1,128], index: 8, kind: input, shape index: {}]   ;;  %s14179_s9 = inlined_call_operand.hbm [shape: bf16[512,128], index: 9, kind: input, shape index: {}]   ;;  %s14180_s10 = inlined_call_operand.hbm [shape: bf16[1152,128], index: 10, kind: input, shape index: {}]   ;;  %s14181_s11 = inlined_call_operand.vmem [shape: bf16[8,1152], index: 11, kind: input, shape index: {}]   ;;  %s14182_s12 = inlined_call_operand.vmem [shape: f32[1,128], index: 12, kind: input, shape index: {}]   ;;  %s14183_s13 = inlined_call_operand.vmem [shape: f32[1,128], index: 13, kind: input, shape index: {}]   ;;  %s14184_s14 = inlined_call_operand.<no memory space> [shape: f32[1,1], index: 14, kind: input, shape index: {}]   ;;  %s14185_s15 = inlined_call_operand.vmem [shape: f32[1,512], index: 15, kind: output, shape index: {}]  }
   0x1   :  { %v20_v0 = vstv %s14184_s14 }
   0x2   :  { %21 = vst [vmem:[#allocation8] sm:$0x1] %v20_v0 }
   0x3   :  { %22 = vsyncpa [#allocation10], 0  ;;  %s9153_s20 = smov [#allocation9]  }
   0x4   :  { %s30_s21 = sshll.u32 %s9153_s20, 4  ;;  %s31_s21 = int_to_ptr.vmem [resolvable:$true] %s30_s21 }
   0x5   :  { %s9093_s22 = scalar_lea.vmem %s31_s21, 4096  ;;  %p9098_p1 = scmp.lt.s32.totalorder %s31_s21, %s31_s21 }
   0x6   :  { %p9094_p0 = scmp.ne.s32.totalorder %s31_s21, %s9093_s22  ;;  %p9099_p2 = scmp.lt.s32.totalorder %s9093_s22, %s9093_s22 }
   0x8   :  { %p9100_p3 = por %p9099_p2, %p9098_p1 }
   0xa   :  { %p9101_p4 = pnand %p9100_p3, %p9094_p0 }
   0xc   :  { %9104 = shalt.err (!%p9101_p4)
}
   0xd   :  { %s9154_s23 = smov 64   ;;  %s9155_s24 = smov 4  }
   0xe   :  { %36 = dma.hbm_to_vmem [thread:$0]  %s14171_s1, 4096, %s31_s21, [#allocation10], %s9154_s23, %s9154_s23, %s9155_s24  }
   0xf   :  { %9145 = dma.done.wait [#allocation10], 4096  }
  0x10   :  { %9146 = vsyncadd [#allocation10], 4294963200  ;;  %s9156_s14 = smov [#allocation2]   ;;  %s9157_s28 = smov [#allocation3]  }
  0x11   :  { %s68_s27 = sshll.u32 %s9156_s14, 4  ;;  %s80_s29 = sshll.u32 %s9157_s28, 4  ;;  %s69_s27 = int_to_ptr.vmem [resolvable:$true] %s68_s27  ;;  %s81_s29 = int_to_ptr.vmem [resolvable:$true] %s80_s29 }
  0x12   :  { %s9113_s30 = scalar_lea.vmem %s69_s27, 4096  ;;  %p9118_p6 = scmp.lt.s32.totalorder %s69_s27, %s69_s27 }
  0x13   :  { %p9114_p5 = scmp.ne.s32.totalorder %s69_s27, %s9113_s30  ;;  %p9119_p7 = scmp.lt.s32.totalorder %s9113_s30, %s9113_s30 }
  0x15   :  { %p9120_p8 = por %p9119_p7, %p9118_p6 }
  0x17   :  { %p9121_p9 = pnand %p9120_p8, %p9114_p5 }
  0x19   :  { %9124 = shalt.err (!%p9121_p9)  }
  0x1a   :  { %71 = dma.hbm_to_vmem [thread:$0]  %s14179_s9, 4096, %s69_s27, [#allocation5] }
  0x1b   :  { %s9133_s1 = scalar_lea.vmem %s81_s29, 9216  ;;  %p9138_p11 = scmp.lt.s32.totalorder %s81_s29, %s81_s29 }
  0x1c   :  { %p9134_p10 = scmp.ne.s32.totalorder %s81_s29, %s9133_s1  ;;  %p9139_p12 = scmp.lt.s32.totalorder %s9133_s1, %s9133_s1 }
  0x1e   :  { %p9140_p13 = por %p9139_p12, %p9138_p11 }
  0x20   :  { %p9141_p0 = pnand %p9140_p13, %p9134_p10 }
  0x22   :  { %9144 = shalt.err (!%p9141_p0)  }
  0x23   :  { %83 = dma.hbm_to_vmem [thread:$0]  %s14180_s10, 9216, %s81_s29, [#allocation5 + $0x1]  ;;  %v123_v1 = vld [vmem:[%s14181_s11] sm:$0xff]  ;;  %v125_v2 = vld [vmem:[%s14181_s11 + $0x8] sm:$0xff]  ;;  %v127_v3 = vld [vmem:[%s14181_s11 + $0x10] sm:$0xff] }
  0x24   :  { %124 = vst [vmem:[#allocation4] sm:$0xff] %v123_v1  ;;  %126 = vst [vmem:[#allocation4 + $0x8] sm:$0xff] %v125_v2  ;;  %v129_v4 = vld [vmem:[%s14181_s11 + $0x18] sm:$0xff]  ;;  %v7914_v5 = vld [vmem:[%s14181_s11 + $0x20] sm:$0xf] }
  0x25   :  { %128 = vst [vmem:[#allocation4 + $0x10] sm:$0xff] %v127_v3  ;;  %130 = vst [vmem:[#allocation4 + $0x18] sm:$0xff] %v129_v4 }
  0x26   :  { %142 = vst [vmem:[#allocation4 + $0x20] sm:$0xf] %v7914_v5 }
  0x27   :  { %146 = vsyncadd [#allocation5 + $0x2], 576  ;;  %v8833_v6 = vld [vmem:[#allocation9 + $0x78] sm:$0xff]   ;;  %v8835_v8 = vld [vmem:[#allocation9 + $0x70] sm:$0xff]   ;;  %vm718_vm0 = vcmask 261120  }
  0x28   :  { %v8834_v7 = vld [vmem:[#allocation9 + $0x38] sm:$0xff]   ;;  %8159 = vmatprep.subr.bf16.mxu0 %v8833_v6  ;;  %v8836_v9 = vld [vmem:[#allocation9 + $0x30] sm:$0xff]   ;;  %v8837_v10 = vld [vmem:[#allocation9 + $0x68] sm:$0xff]  }
  0x29   :  { %8160 = vmatpush3.bf16.msra.mxu0 %v8834_v7  ;;  %v8838_v11 = vld [vmem:[#allocation9 + $0x28] sm:$0xff]   ;;  %v8839_v12 = vld [vmem:[#allocation9 + $0x60] sm:$0xff]   ;;  %v8841_v14 = vld [vmem:[#allocation9 + $0x58] sm:$0xff]  }
  0x2a   :  { %8161 = vmatprep.subr.bf16.mxu0 %v8835_v8  ;;  %v8840_v13 = vld [vmem:[#allocation9 + $0x20] sm:$0xff]   ;;  %v8842_v15 = vld [vmem:[#allocation9 + $0x18] sm:$0xff]   ;;  %v8843_v16 = vld [vmem:[#allocation9 + $0x50] sm:$0xff]  }
  0x2b   :  { %v8851_v17 = vld [vmem:[%s14170_s0 + $0x4] ss:$16 sps:$4 sm:$0xff]   ;;  %v8849_v24 = vld [vmem:[%s14170_s0] ss:$16 sps:$4 sm:$0xff]   ;;  %v8873_v32 = vld [vmem:[%s14170_s0 + $0xc] ss:$16 sps:$4 sm:$0xff]  }
  0x2c   :  { %487 = vmatprep.mubr.bf16.mxu0 %v8851_v17  ;;  %v8844_v18 = vld [vmem:[#allocation9 + $0x10] sm:$0xff]   ;;  %v8845_v19 = vld [vmem:[#allocation9 + $0x48] sm:$0xff]   ;;  %v8847_v21 = vld [vmem:[#allocation9 + $0x40] sm:$0xff]  }
  0x2d   :  { %8162 = vmatpush3.bf16.msra.mxu0 %v8836_v9  ;;  %v8846_v20 = vld [vmem:[#allocation9 + $0x8] sm:$0xff]   ;;  %v8848_v22 = vld [vmem:[#allocation9] sm:$0xff]   ;;  %v8852_v23 = vld [vmem:[#allocation9 + $0xf8] sm:$0xff]  }
  0x2e   :  { %8163 = vmatprep.subr.bf16.mxu0 %v8837_v10  ;;  %v8853_v25 = vld [vmem:[#allocation9 + $0xb8] sm:$0xff]   ;;  %v8854_v27 = vld [vmem:[#allocation9 + $0xf0] sm:$0xff]   ;;  %v8856_v29 = vld [vmem:[#allocation9 + $0xe8] sm:$0xff]  }
  0x2f   :  { %v8861_v26 = vld [vmem:[%s14170_s0 + $0x24] ss:$16 sps:$4 sm:$0xff]   ;;  %v8864_v30 = vld [vmem:[%s14170_s0 + $0x20] ss:$16 sps:$4 sm:$0xff]   ;;  %v8871_v43 = vld [vmem:[%s14170_s0 + $0x8] ss:$16 sps:$4 sm:$0xff]  }
  0x30   :  { %v8855_v28 = vld [vmem:[#allocation9 + $0xb0] sm:$0xff]   ;;  %v8857_v31 = vld [vmem:[#allocation9 + $0xa8] sm:$0xff]   ;;  %v8858_v33 = vld [vmem:[#allocation9 + $0xe0] sm:$0xff]  }
  0x31   :  { %8164 = vmatpush3.bf16.msra.mxu0 %v8838_v11  ;;  %v8859_v34 = vld [vmem:[#allocation9 + $0xa0] sm:$0xff]   ;;  %v8860_v35 = vld [vmem:[#allocation9 + $0xd8] sm:$0xff]   ;;  %v8865_v37 = vld [vmem:[#allocation9 + $0xd0] sm:$0xff]  }
  0x32   :  { %8165 = vmatprep.subr.bf16.mxu0 %v8839_v12  ;;  %v8863_v36 = vld [vmem:[#allocation9 + $0x98] sm:$0xff]   ;;  %v8866_v38 = vld [vmem:[#allocation9 + $0x90] sm:$0xff]   ;;  %v8867_v39 = vld [vmem:[#allocation9 + $0xc8] sm:$0xff]  }
  0x33   :  { %v8868_v40 = vld [vmem:[#allocation9 + $0x88] sm:$0xff]   ;;  %v8869_v41 = vld [vmem:[#allocation9 + $0xc0] sm:$0xff]   ;;  %v8889_v48 = vld [vmem:[%s14176_s6 + $0xf8] sm:$0xff]  }
  0x34   :  { %v8870_v42 = vld [vmem:[#allocation9 + $0x80] sm:$0xff]   ;;  %v8890_v49 = vld [vmem:[%s14176_s6 + $0xb8] sm:$0xff]   ;;  %v8893_v50 = vld [vmem:[%s14176_s6 + $0xf0] sm:$0xff]  }
  0x35   :  { %8166 = vmatpush3.bf16.msra.mxu0 %v8840_v13  ;;  %v8874_v44 = vld [vmem:[%s14170_s0 + $0x2c] ss:$16 sps:$4 sm:$0xff]   ;;  %v8876_v45 = vld [vmem:[%s14170_s0 + $0x28] ss:$16 sps:$4 sm:$0xff]   ;;  %v8877_v46 = vld [vmem:[%s14173_s3] sm:$0xff]  }
  0x36   :  { %8167 = vmatprep.subr.bf16.mxu0 %v8841_v14  ;;  %8617 = vmatprep.mubr.msk.bf16.mxu1 %vm718_vm0, %v8877_v46  ;;  %v8894_v52 = vld [vmem:[%s14176_s6 + $0xb0] sm:$0xff]   ;;  %v8897_v53 = vld [vmem:[%s14176_s6 + $0xe8] sm:$0xff]   ;;  %v8901_v56 = vld [vmem:[%s14176_s6 + $0xe0] sm:$0xff]  }
  0x37   :  { %v8898_v55 = vld [vmem:[%s14176_s6 + $0xa8] sm:$0xff]   ;;  %v8902_v58 = vld [vmem:[%s14176_s6 + $0xa0] sm:$0xff]   ;;  %v221_v11 = vld [vmem:[%s14172_s2 + $0x10] sm:$0xff] }
  0x38   :  { %v220_v2 = vld [vmem:[%s14172_s2 + $0x8] sm:$0xff]  ;;  %v219_v5 = vld [vmem:[%s14172_s2] sm:$0xff] }
  0x39   :  { %8168 = vmatpush3.bf16.msra.mxu0 %v8842_v15 }
  0x3a   :  { %8169 = vmatprep.subr.bf16.mxu0 %v8843_v16 }
  0x3d   :  { %8170 = vmatpush3.bf16.msra.mxu0 %v8844_v18  ;;  %v222_v18 = vld [vmem:[%s14172_s2 + $0x18] sm:$0xff] }
  0x3e   :  { %8171 = vmatprep.subr.bf16.mxu0 %v8845_v19 }
  0x41   :  { %8172 = vmatpush3.bf16.msra.mxu0 %v8846_v20 }
  0x42   :  { %8173 = vmatprep.subr.bf16.mxu0 %v8847_v21 }
  0x45   :  { %8174 = vmatpush3.bf16.msra.mxu0 %v8848_v22 }
  0x46   :  { %8187 = vmatprep.subr.bf16.mxu0 %v8852_v23 }
  0x48   :  { %488 = vmatmul.mubr.bf16.vlgmr.msra.gmra.mxu0 %v8849_v24 }
  0x49   :  { %8188 = vmatpush3.bf16.msra.mxu0 %v8853_v25  ;;  %495 = vmatprep.mubr.bf16.mxu0 %v8861_v26 }
  0x4a   :  { %8189 = vmatprep.subr.bf16.mxu0 %v8854_v27 }
  0x4d   :  { %8190 = vmatpush3.bf16.msra.mxu0 %v8855_v28 }
  0x4e   :  { %8191 = vmatprep.subr.bf16.mxu0 %v8856_v29 }
  0x50   :  { %496 = vmatmul.mubr.bf16.gmra.mxu0 %v8864_v30 }
  0x51   :  { %8192 = vmatpush3.bf16.msra.mxu0 %v8857_v31  ;;  %536 = vmatprep.mubr.bf16.mxu0 %v8873_v32 }
  0x52   :  { %8193 = vmatprep.subr.bf16.mxu0 %v8858_v33 }
  0x55   :  { %8194 = vmatpush3.bf16.msra.mxu0 %v8859_v34 }
  0x56   :  { %8195 = vmatprep.subr.bf16.mxu0 %v8860_v35 }
  0x59   :  { %8196 = vmatpush3.bf16.msra.mxu0 %v8863_v36 }
  0x5a   :  { %8197 = vmatprep.subr.bf16.mxu0 %v8865_v37 }
  0x5d   :  { %8198 = vmatpush3.bf16.msra.mxu0 %v8866_v38 }
  0x5e   :  { %8199 = vmatprep.subr.bf16.mxu0 %v8867_v39 }
  0x61   :  { %8200 = vmatpush3.bf16.msra.mxu0 %v8868_v40 }
  0x62   :  { %8201 = vmatprep.subr.bf16.mxu0 %v8869_v41 }
  0x65   :  { %8202 = vmatpush3.bf16.msra.mxu0 %v8870_v42 }
  0x66   :  { %8289 = vmatprep.subr.bf16.mxu0 %v8889_v48 }
  0x68   :  { %537 = vmatmul.mubr.bf16.vlgmr.msra.gmra.mxu0 %v8871_v43 }
  0x69   :  { %544 = vmatprep.mubr.bf16.mxu0 %v8874_v44  ;;  %8290 = vmatpush3.bf16.msra.mxu0 %v8890_v49 }
  0x6a   :  { %8291 = vmatprep.subr.bf16.mxu0 %v8893_v50 }
  0x6d   :  { %8292 = vmatpush3.bf16.msra.mxu0 %v8894_v52 }
  0x6e   :  { %8293 = vmatprep.subr.bf16.mxu0 %v8897_v53 }
  0x70   :  { %545 = vmatmul.mubr.bf16.gmra.mxu0 %v8876_v45 }
  0x71   :  { %8294 = vmatpush3.bf16.msra.mxu0 %v8898_v55  ;;  %v14186_v55 = vlaneseq }
  0x72   :  { %8295 = vmatprep.subr.bf16.mxu0 %v8901_v56 }
  0x73   :  { %v9333_v56 = vshrl.u32 %v14186_v55, 7 }
  0x75   :  { %8296 = vmatpush3.bf16.msra.mxu0 %v8902_v58  ;;  %14608 = vst [vmem:[#allocation22_spill] sm:$0xff] %v9333_v56  ;;  %v9339_v58 = vsub.s32 0, %v9333_v56 }
  0x77   :  { %14609 = vst [vmem:[#allocation23_spill] sm:$0xff] %v9339_v58 }
 0x108   :  { %v8175_v47 = vpop.f32.mrf.mxu0 }
 0x10a   :  { %v8176_v51 = vpop.f32.mrf.mxu0 }
 0x10b   :  { %v8177_v4 = vadd.f32 %v8176_v51, %v8175_v47 }
 0x10c   :  { %v8178_v54 = vpop.f32.mrf.mxu0 }
 0x10d   :  { %v490_v13 = vadd.f32 %v8177_v4, %v219_v5 }
 0x10e   :  { %v8179_v57 = vpop.f32.mrf.mxu0 }
 0x10f   :  { %v8180_v1 = vadd.f32 %v8179_v57, %v8178_v54  ;;  %v553_v57 = vld [vmem:[%s14174_s4] sm:$0x1] }
 0x110   :  { %v8181_v59 = vpop.f32.mrf.mxu0 }
 0x111   :  { %v493_v7 = vadd.f32 %v8180_v1, %v220_v2 }
 0x112   :  { %v8182_v60 = vpop.f32.mrf.mxu0 }
 0x113   :  { %v8183_v8 = vadd.f32 %v8182_v60, %v8181_v59 }
 0x114   :  { %v8184_v61 = vpop.f32.mrf.mxu0 }
 0x115   :  { %v498_v17 = vadd.f32 %v8183_v8, %v221_v11 }
 0x116   :  { %v8185_v62 = vpop.f32.mrf.mxu0 }
 0x117   :  { %v8186_v15 = vadd.f32 %v8185_v62, %v8184_v61  ;;  %v554_v61 = vld [vmem:[%s14175_s5] sm:$0x1] }
 0x119   :  { %v501_v24 = vadd.f32 %v8186_v15, %v222_v18  ;;  %v8886_v15 = vld [vmem:[%s14176_s6 + $0x38] sm:$0xff]   ;;  %v8891_v18 = vld [vmem:[%s14176_s6 + $0x68] sm:$0xff]  }
 0x128   :  { %v8203_v63 = vpop.f32.mrf.mxu0 }
 0x12a   :  { %v8204_v0 = vpop.f32.mrf.mxu0 }
 0x12b   :  { %v8205_v9 = vadd.f32 %v8204_v0, %v8203_v63 }
 0x12c   :  { %v8206_v3 = vpop.f32.mrf.mxu0 }
 0x12d   :  { %v539_v19 = vadd.f32 %v8205_v9, %v490_v13  ;;  %v8878_v13 = vld [vmem:[%s14173_s3 + $0x8] sm:$0xff]  }
 0x12e   :  { %v8207_v6 = vpop.f32.mrf.mxu0 }
 0x12f   :  { %v8208_v10 = vadd.f32 %v8207_v6, %v8206_v3  ;;  %v565_v26 = vmul.f32 %v539_v19, %v539_v19 }
 0x130   :  { %v8209_v12 = vpop.f32.mrf.mxu0 }
 0x131   :  { %v542_v14 = vadd.f32 %v8208_v10, %v493_v7 }
 0x132   :  { %v8210_v16 = vpop.f32.mrf.mxu0 }
 0x133   :  { %v8211_v20 = vadd.f32 %v8210_v16, %v8209_v12  ;;  %v566_v22 = vmul.f32 %v542_v14, %v542_v14  ;;  %v555_v27 = vadd.f32 %v542_v14, %v539_v19  ;;  %v8885_v12 = vld [vmem:[%s14176_s6 + $0x78] sm:$0xff]   ;;  %v8887_v16 = vld [vmem:[%s14176_s6 + $0x70] sm:$0xff]  }
 0x134   :  { %v8212_v21 = vpop.f32.mrf.mxu0 }
 0x135   :  { %v547_v23 = vadd.f32 %v8211_v20, %v498_v17  ;;  %v569_v30 = vadd.f32 %v566_v22, %v565_v26  ;;  %v8888_v17 = vld [vmem:[%s14176_s6 + $0x30] sm:$0xff]   ;;  %v8881_v20 = vld [vmem:[%s14173_s3 + $0x20] sm:$0xff]  }
 0x136   :  { %v8213_v25 = vpop.f32.mrf.mxu0  ;;  %v8895_v22 = vld [vmem:[%s14176_s6 + $0x60] sm:$0xff]   ;;  %v8883_v26 = vld [vmem:[%s14173_s3 + $0x30] sm:$0xff]  }
 0x137   :  { %v567_v28 = vmul.f32 %v547_v23, %v547_v23  ;;  %v8214_v29 = vadd.f32 %v8213_v25, %v8212_v21  ;;  %v556_v31 = vadd.f32 %v555_v27, %v547_v23  ;;  %v8892_v21 = vld [vmem:[%s14176_s6 + $0x28] sm:$0xff]   ;;  %v8900_v27 = vld [vmem:[%s14176_s6 + $0x18] sm:$0xff]  }
 0x138   :  { %v8882_v25 = vld [vmem:[%s14173_s3 + $0x28] sm:$0xff]  }
 0x139   :  { %v550_v32 = vadd.f32 %v8214_v29, %v501_v24  ;;  %v570_v33 = vadd.f32 %v569_v30, %v567_v28  ;;  %v8899_v24 = vld [vmem:[%s14176_s6 + $0x58] sm:$0xff]   ;;  %v8903_v29 = vld [vmem:[%s14176_s6 + $0x50] sm:$0xff]  }
 0x13a   :  { %v8884_v28 = vld [vmem:[%s14173_s3 + $0x38] sm:$0xff]   ;;  %v9410_v30 = vld [vmem:[%s14176_s6 + $0x10] sm:$0xff]  }
 0x13b   :  { %v557_v34 = vadd.f32 %v556_v31, %v550_v32  ;;  %v568_v35 = vmul.f32 %v550_v32, %v550_v32  ;;  %v9415_v31 = vld [vmem:[%s14176_s6 + $0xd8] sm:$0xff]  }
 0x13c   :  { %8297 = vmatprep.subr.bf16.mxu0 %v9415_v31  ;;  %v8925_v31 = vld [vmem:[%s14176_s6 + $0x158] sm:$0xff]  }
 0x13d   :  { %v558_v36 = vrot.slane %v557_v34, 4  ;;  %v571_v37 = vadd.f32 %v570_v33, %v568_v35  ;;  %v9158_v33 = vmov 0.0   ;;  %v8908_v35 = vld [vmem:[%s14176_s6 + $0x8] sm:$0xff]  }
 0x13e   :  { %608 = vst [vmem:[#allocation6 + $0x8] sm:$0xff] %v9158_v33  ;;  %609 = vst [vmem:[#allocation6 + $0x10] sm:$0xff] %v9158_v33 }
 0x13f   :  { %v559_v38 = vadd.f32 %v558_v36, %v557_v34  ;;  %v572_v39 = vrot.slane %v571_v37, 4  ;;  %611 = vst [vmem:[#allocation6 + $0xf8] sm:$0xff] %v9158_v33  ;;  %612 = vst [vmem:[#allocation6 + $0x100] sm:$0xff] %v9158_v33  ;;  %v8907_v34 = vld [vmem:[%s14176_s6 + $0x48] sm:$0xff]   ;;  %v8909_v36 = vld [vmem:[%s14176_s6 + $0xd0] sm:$0xff]  }
 0x140   :  { %615 = vst [vmem:[#allocation6 + $0xe0] sm:$0xff] %v9158_v33  ;;  %616 = vst [vmem:[#allocation6 + $0xe8] sm:$0xff] %v9158_v33 }
 0x141   :  { %v560_v40 = vrot.slane %v559_v38, 2  ;;  %v573_v41 = vadd.f32 %v572_v39, %v571_v37  ;;  %618 = vst [vmem:[#allocation6 + $0x1d0] sm:$0xff] %v9158_v33  ;;  %619 = vst [vmem:[#allocation6 + $0x1d8] sm:$0xff] %v9158_v33  ;;  %v8910_v37 = vld [vmem:[%s14176_s6 + $0x90] sm:$0xff]   ;;  %v8912_v39 = vld [vmem:[%s14176_s6] sm:$0xff]  }
 0x142   :  { %621 = vst [vmem:[#allocation6 + $0x18] sm:$0xff] %v9158_v33  ;;  %622 = vst [vmem:[#allocation6 + $0x30] sm:$0xff] %v9158_v33 }
 0x143   :  { %v561_v42 = vadd.f32 %v560_v40, %v559_v38  ;;  %v574_v43 = vrot.slane %v573_v41, 2  ;;  %623 = vst [vmem:[#allocation6 + $0x48] sm:$0xff] %v9158_v33  ;;  %624 = vst [vmem:[#allocation6 + $0x60] sm:$0xff] %v9158_v33  ;;  %v8911_v38 = vld [vmem:[%s14176_s6 + $0x40] sm:$0xff]   ;;  %v8913_v40 = vld [vmem:[%s14176_s6 + $0xc8] sm:$0xff]  }
 0x144   :  { %625 = vst [vmem:[#allocation6 + $0x78] sm:$0xff] %v9158_v33  ;;  %626 = vst [vmem:[#allocation6 + $0x90] sm:$0xff] %v9158_v33 }
 0x145   :  { %v562_v44 = vrot.slane %v561_v42, 1  ;;  %v575_v45 = vadd.f32 %v574_v43, %v573_v41  ;;  %627 = vst [vmem:[#allocation6 + $0xa8] sm:$0xff] %v9158_v33  ;;  %628 = vst [vmem:[#allocation6 + $0xc0] sm:$0xff] %v9158_v33  ;;  %v8914_v41 = vld [vmem:[%s14176_s6 + $0x88] sm:$0xff]   ;;  %v8916_v43 = vld [vmem:[%s14176_s6 + $0xc0] sm:$0xff]  }
 0x146   :  { %631 = vst [vmem:[#allocation6 + $0x108] sm:$0xff] %v9158_v33  ;;  %632 = vst [vmem:[#allocation6 + $0x120] sm:$0xff] %v9158_v33 }
 0x147   :  { %v563_v46 = vadd.f32 %v562_v44, %v561_v42  ;;  %v576_v47 = vrot.slane %v575_v45, 1  ;;  %633 = vst [vmem:[#allocation6 + $0x138] sm:$0xff] %v9158_v33  ;;  %634 = vst [vmem:[#allocation6 + $0x150] sm:$0xff] %v9158_v33  ;;  %v8915_v42 = vld [vmem:[%s14176_s6 + $0x178] sm:$0xff]   ;;  %v8918_v44 = vld [vmem:[%s14176_s6 + $0x80] sm:$0xff]  }
 0x148   :  { %635 = vst [vmem:[#allocation6 + $0x168] sm:$0xff] %v9158_v33  ;;  %636 = vst [vmem:[#allocation6 + $0x180] sm:$0xff] %v9158_v33 }
 0x149   :  { %v564_v48 = vmul.f32 0.03125, %v563_v46  ;;  %v577_v49 = vadd.f32 %v576_v47, %v575_v45  ;;  %637 = vst [vmem:[#allocation6 + $0x198] sm:$0xff] %v9158_v33  ;;  %638 = vst [vmem:[#allocation6 + $0x1b0] sm:$0xff] %v9158_v33  ;;  %v8926_v45 = vld [vmem:[%s14176_s6 + $0x1f8] sm:$0xff]  }
 0x14a   :  { %641 = vst [vmem:[#allocation6 + $0x28] sm:$0x1] %v9158_v33  ;;  %642 = vst [vmem:[#allocation6 + $0x40] sm:$0x1] %v9158_v33 }
 0x14b   :  { %v578_v50 = vmul.f32 0.03125, %v577_v49  ;;  %v579_v51 = vmul.f32 %v564_v48, %v564_v48  ;;  %643 = vst [vmem:[#allocation6 + $0x58] sm:$0x1] %v9158_v33  ;;  %644 = vst [vmem:[#allocation6 + $0x70] sm:$0x1] %v9158_v33 }
 0x14c   :  { %645 = vst [vmem:[#allocation6 + $0x88] sm:$0x1] %v9158_v33  ;;  %646 = vst [vmem:[#allocation6 + $0xa0] sm:$0x1] %v9158_v33 }
 0x14d   :  { %v580_v52 = vsub.f32 %v578_v50, %v579_v51  ;;  %647 = vst [vmem:[#allocation6 + $0xb8] sm:$0x1] %v9158_v33  ;;  %648 = vst [vmem:[#allocation6 + $0xd0] sm:$0x1] %v9158_v33 }
 0x14e   :  { %651 = vst [vmem:[#allocation6 + $0x118] sm:$0x1] %v9158_v33  ;;  %652 = vst [vmem:[#allocation6 + $0x130] sm:$0x1] %v9158_v33 }
 0x14f   :  { %v581_v53 = vmax.f32 %v580_v52, 0.0  ;;  %653 = vst [vmem:[#allocation6 + $0x148] sm:$0x1] %v9158_v33  ;;  %654 = vst [vmem:[#allocation6 + $0x160] sm:$0x1] %v9158_v33 }
 0x150   :  { %655 = vst [vmem:[#allocation6 + $0x178] sm:$0x1] %v9158_v33  ;;  %656 = vst [vmem:[#allocation6 + $0x190] sm:$0x1] %v9158_v33 }
 0x151   :  { %v582_v54 = vadd.f32 1e-05, %v581_v53  ;;  %657 = vst [vmem:[#allocation6 + $0x1a8] sm:$0x1] %v9158_v33  ;;  %658 = vst [vmem:[#allocation6 + $0x1c0] sm:$0x1] %v9158_v33 }
 0x152   :  { %2298 = vst [vmem:[#allocation7 + $0x8] sm:$0xff] %v9158_v33  ;;  %2299 = vst [vmem:[#allocation7 + $0x10] sm:$0xff] %v9158_v33 }
 0x153   :  { %8957 = vrsqrt.f32 %v582_v54  ;;  %2300 = vst [vmem:[#allocation7 + $0x18] sm:$0xff] %v9158_v33  ;;  %2302 = vst [vmem:[#allocation7 + $0x248] sm:$0xff] %v9158_v33 }
 0x154   :  { %2303 = vst [vmem:[#allocation7 + $0x250] sm:$0xff] %v9158_v33  ;;  %2304 = vst [vmem:[#allocation7 + $0x258] sm:$0xff] %v9158_v33 }
 0x155   :  { %2307 = vst [vmem:[#allocation7 + $0x228] sm:$0xff] %v9158_v33  ;;  %2308 = vst [vmem:[#allocation7 + $0x230] sm:$0xff] %v9158_v33 }
 0x156   :  { %2309 = vst [vmem:[#allocation7 + $0x238] sm:$0xff] %v9158_v33  ;;  %2311 = vst [vmem:[#allocation7 + $0x468] sm:$0xff] %v9158_v33 }
 0x157   :  { %2312 = vst [vmem:[#allocation7 + $0x470] sm:$0xff] %v9158_v33  ;;  %2313 = vst [vmem:[#allocation7 + $0x478] sm:$0xff] %v9158_v33 }
 0x158   :  { %2315 = vst [vmem:[#allocation7 + $0x20] sm:$0xff] %v9158_v33  ;;  %2316 = vst [vmem:[#allocation7 + $0x40] sm:$0xff] %v9158_v33 }
 0x159   :  { %2317 = vst [vmem:[#allocation7 + $0x60] sm:$0xff] %v9158_v33  ;;  %2318 = vst [vmem:[#allocation7 + $0x80] sm:$0xff] %v9158_v33 }
 0x15a   :  { %2319 = vst [vmem:[#allocation7 + $0xa0] sm:$0xff] %v9158_v33  ;;  %2320 = vst [vmem:[#allocation7 + $0xc0] sm:$0xff] %v9158_v33 }
 0x15b   :  { %2321 = vst [vmem:[#allocation7 + $0xe0] sm:$0xff] %v9158_v33  ;;  %2322 = vst [vmem:[#allocation7 + $0x100] sm:$0xff] %v9158_v33 }
 0x15c   :  { %2323 = vst [vmem:[#allocation7 + $0x120] sm:$0xff] %v9158_v33  ;;  %2324 = vst [vmem:[#allocation7 + $0x140] sm:$0xff] %v9158_v33 }
 0x15d   :  { %2325 = vst [vmem:[#allocation7 + $0x160] sm:$0xff] %v9158_v33  ;;  %2326 = vst [vmem:[#allocation7 + $0x180] sm:$0xff] %v9158_v33 }
 0x15e   :  { %2327 = vst [vmem:[#allocation7 + $0x1a0] sm:$0xff] %v9158_v33  ;;  %2328 = vst [vmem:[#allocation7 + $0x1c0] sm:$0xff] %v9158_v33 }
 0x15f   :  { %2329 = vst [vmem:[#allocation7 + $0x1e0] sm:$0xff] %v9158_v33  ;;  %2330 = vst [vmem:[#allocation7 + $0x200] sm:$0xff] %v9158_v33 }
 0x160   :  { %v8958_v59 = vpop.eup %8957  ;;  %2333 = vst [vmem:[#allocation7 + $0x260] sm:$0xff] %v9158_v33  ;;  %2334 = vst [vmem:[#allocation7 + $0x280] sm:$0xff] %v9158_v33 }
 0x161   :  { %v584_v60 = vmul.f32 %v8958_v59, %v553_v57  ;;  %2335 = vst [vmem:[#allocation7 + $0x2a0] sm:$0xff] %v9158_v33  ;;  %2336 = vst [vmem:[#allocation7 + $0x2c0] sm:$0xff] %v9158_v33  ;;  %v8917_v59 = vld [vmem:[%s14176_s6 + $0x138] sm:$0xff]  }
 0x162   :  { %2337 = vst [vmem:[#allocation7 + $0x2e0] sm:$0xff] %v9158_v33  ;;  %2338 = vst [vmem:[#allocation7 + $0x300] sm:$0xff] %v9158_v33 }
 0x163   :  { %v585_v62 = vmul.f32 %v584_v60, %v564_v48  ;;  %v591_v63 = vrot.slane %v584_v60, %v9339_v58  ;;  %2339 = vst [vmem:[#allocation7 + $0x320] sm:$0xff] %v9158_v33  ;;  %2340 = vst [vmem:[#allocation7 + $0x340] sm:$0xff] %v9158_v33 }
 0x164   :  { %2341 = vst [vmem:[#allocation7 + $0x360] sm:$0xff] %v9158_v33  ;;  %2342 = vst [vmem:[#allocation7 + $0x380] sm:$0xff] %v9158_v33 }
 0x165   :  { %v586_v0 = vsub.f32 %v554_v61, %v585_v62  ;;  %v595_v1 = vmul.f32 %v591_v63, %v547_v23  ;;  %v596_v2 = vmul.f32 %v591_v63, %v550_v32  ;;  %v593_v4 = vmul.f32 %v591_v63, %v539_v19  ;;  %v8880_v19 = vld [vmem:[%s14173_s3 + $0x18] sm:$0xff]   ;;  %v8896_v23 = vld [vmem:[%s14176_s6 + $0x20] sm:$0xff]   ;;  %2343 = vst [vmem:[#allocation7 + $0x3a0] sm:$0xff] %v9158_v33  ;;  %v8919_v61 = vld [vmem:[%s14176_s6 + $0x170] sm:$0xff]  }
 0x166   :  { %v594_v5 = vmul.f32 %v591_v63, %v542_v14  ;;  %v8879_v14 = vld [vmem:[%s14173_s3 + $0x10] sm:$0xff]   ;;  %v9420_v32 = vld [vmem:[%s14176_s6 + $0x98] sm:$0xff]   ;;  %2344 = vst [vmem:[#allocation7 + $0x3c0] sm:$0xff] %v9158_v33  ;;  %2345 = vst [vmem:[#allocation7 + $0x3e0] sm:$0xff] %v9158_v33 }
 0x167   :  { %v601_v3 = vrot.slane %v586_v0, %v9339_v58  ;;  %2346 = vst [vmem:[#allocation7 + $0x400] sm:$0xff] %v9158_v33  ;;  %2347 = vst [vmem:[#allocation7 + $0x420] sm:$0xff] %v9158_v33  ;;  %8298 = vmatpush3.bf16.msra.mxu0 %v9420_v32 }
 0x168   :  { %2348 = vst [vmem:[#allocation7 + $0x440] sm:$0xff] %v9158_v33  ;;  %2351 = vst [vmem:[#allocation7 + $0x38] sm:$0x1] %v9158_v33  ;;  %8299 = vmatprep.subr.bf16.mxu0 %v8909_v36 }
 0x169   :  { %v605_v6 = vadd.f32 %v601_v3, %v595_v1  ;;  %v606_v7 = vadd.f32 %v601_v3, %v596_v2  ;;  %v603_v8 = vadd.f32 %v601_v3, %v593_v4  ;;  %v604_v9 = vadd.f32 %v601_v3, %v594_v5  ;;  %2352 = vst [vmem:[#allocation7 + $0x58] sm:$0x1] %v9158_v33  ;;  %v8920_v5 = vld [vmem:[%s14176_s6 + $0x130] sm:$0xff]  }
 0x16a   :  { %2353 = vst [vmem:[#allocation7 + $0x78] sm:$0x1] %v9158_v33  ;;  %2354 = vst [vmem:[#allocation7 + $0x98] sm:$0x1] %v9158_v33 }
 0x16b   :  { %v677_v10 = vpack.c.bf16 %v606_v7, %v605_v6  ;;  %v676_v11 = vpack.c.bf16 %v604_v9, %v603_v8  ;;  %2355 = vst [vmem:[#allocation7 + $0xb8] sm:$0x1] %v9158_v33  ;;  %2356 = vst [vmem:[#allocation7 + $0xd8] sm:$0x1] %v9158_v33  ;;  %8300 = vmatpush3.bf16.msra.mxu0 %v8910_v37  ;;  %v8921_v7 = vld [vmem:[%s14176_s6 + $0x168] sm:$0xff]   ;;  %v8937_v37 = vld [vmem:[%s14176_s6 + $0x1e0] sm:$0xff]  }
 0x16c   :  { %2357 = vst [vmem:[#allocation7 + $0xf8] sm:$0x1] %v9158_v33  ;;  %2358 = vst [vmem:[#allocation7 + $0x118] sm:$0x1] %v9158_v33  ;;  %8301 = vmatprep.subr.bf16.mxu0 %v8913_v40 }
 0x16d   :  { %8613 = vmatprep.subr.bf16.mxu1 %v677_v10  ;;  %2359 = vst [vmem:[#allocation7 + $0x138] sm:$0x1] %v9158_v33  ;;  %2360 = vst [vmem:[#allocation7 + $0x158] sm:$0x1] %v9158_v33 }
 0x16e   :  { %8614 = vmatpush3.bf16.msra.mxu1 %v677_v10  ;;  %2361 = vst [vmem:[#allocation7 + $0x178] sm:$0x1] %v9158_v33  ;;  %2362 = vst [vmem:[#allocation7 + $0x198] sm:$0x1] %v9158_v33 }
 0x16f   :  { %8615 = vmatprep.subr.bf16.mxu1 %v676_v11  ;;  %2363 = vst [vmem:[#allocation7 + $0x1b8] sm:$0x1] %v9158_v33  ;;  %2364 = vst [vmem:[#allocation7 + $0x1d8] sm:$0x1] %v9158_v33  ;;  %8302 = vmatpush3.bf16.msra.mxu0 %v8914_v41  ;;  %v8929_v41 = vld [vmem:[%s14176_s6 + $0x150] sm:$0xff]  }
 0x170   :  { %2365 = vst [vmem:[#allocation7 + $0x1f8] sm:$0x1] %v9158_v33  ;;  %2366 = vst [vmem:[#allocation7 + $0x218] sm:$0x1] %v9158_v33  ;;  %8303 = vmatprep.subr.bf16.mxu0 %v8916_v43 }
 0x171   :  { %2369 = vst [vmem:[#allocation7 + $0x278] sm:$0x1] %v9158_v33  ;;  %2370 = vst [vmem:[#allocation7 + $0x298] sm:$0x1] %v9158_v33 }
 0x172   :  { %8616 = vmatpush3.bf16.msra.mxu1 %v676_v11  ;;  %2371 = vst [vmem:[#allocation7 + $0x2b8] sm:$0x1] %v9158_v33  ;;  %2372 = vst [vmem:[#allocation7 + $0x2d8] sm:$0x1] %v9158_v33  ;;  %v8928_v11 = vld [vmem:[%s14176_s6 + $0x1b8] sm:$0xff]  }
 0x173   :  { %8225 = vmatprep.subr.bf16.mxu1 %v8885_v12  ;;  %2373 = vst [vmem:[#allocation7 + $0x2f8] sm:$0x1] %v9158_v33  ;;  %2374 = vst [vmem:[#allocation7 + $0x318] sm:$0x1] %v9158_v33  ;;  %8304 = vmatpush3.bf16.msra.mxu0 %v8918_v44  ;;  %v8938_v44 = vld [vmem:[%s14176_s6 + $0x1a0] sm:$0xff]  }
 0x174   :  { %2375 = vst [vmem:[#allocation7 + $0x338] sm:$0x1] %v9158_v33  ;;  %2376 = vst [vmem:[#allocation7 + $0x358] sm:$0x1] %v9158_v33  ;;  %8417 = vmatprep.subr.bf16.mxu0 %v8926_v45 }
 0x175   :  { %8618 = vmatmul.mubr.msk.bf16.vlgmr.msra.gmra.mxu1 %vm718_vm0, %v8878_v13  ;;  %2377 = vst [vmem:[#allocation7 + $0x378] sm:$0x1] %v9158_v33  ;;  %2378 = vst [vmem:[#allocation7 + $0x398] sm:$0x1] %v9158_v33 }
 0x176   :  { %8621 = vmatprep.mubr.msk.bf16.mxu1 %vm718_vm0, %v8879_v14  ;;  %8226 = vmatpush3.bf16.msra.mxu1 %v8886_v15  ;;  %2379 = vst [vmem:[#allocation7 + $0x3b8] sm:$0x1] %v9158_v33  ;;  %2380 = vst [vmem:[#allocation7 + $0x3d8] sm:$0x1] %v9158_v33  ;;  %v8930_v14 = vld [vmem:[%s14176_s6 + $0x1f0] sm:$0xff]  }
 0x177   :  { %8227 = vmatprep.subr.bf16.mxu1 %v8887_v16  ;;  %2381 = vst [vmem:[#allocation7 + $0x3f8] sm:$0x1] %v9158_v33  ;;  %2382 = vst [vmem:[#allocation7 + $0x418] sm:$0x1] %v9158_v33  ;;  %v8922_v16 = vld [vmem:[%s14176_s6 + $0x128] sm:$0xff]  }
 0x178   :  { %2383 = vst [vmem:[#allocation7 + $0x438] sm:$0x1] %v9158_v33  ;;  %2384 = vst [vmem:[#allocation7 + $0x458] sm:$0x1] %v9158_v33 }
 0x179   :  { %620 = vst [vmem:[#allocation6] sm:$0xff] %v9158_v33  ;;  %629 = vst [vmem:[#allocation6 + $0xd8] sm:$0xff] %v9158_v33 }
 0x17a   :  { %8228 = vmatpush3.bf16.msra.mxu1 %v8888_v17  ;;  %630 = vst [vmem:[#allocation6 + $0xf0] sm:$0xff] %v9158_v33  ;;  %639 = vst [vmem:[#allocation6 + $0x1c8] sm:$0xff] %v9158_v33 }
 0x17b   :  { %8229 = vmatprep.subr.bf16.mxu1 %v8891_v18  ;;  %2314 = vst [vmem:[#allocation7] sm:$0xff] %v9158_v33  ;;  %2331 = vst [vmem:[#allocation7 + $0x220] sm:$0xff] %v9158_v33  ;;  %v8923_v18 = vld [vmem:[%s14176_s6 + $0x160] sm:$0xff]  }
 0x17c   :  { %2332 = vst [vmem:[#allocation7 + $0x240] sm:$0xff] %v9158_v33  ;;  %2349 = vst [vmem:[#allocation7 + $0x460] sm:$0xff] %v9158_v33 }
 0x17d   :  { %8622 = vmatmul.mubr.msk.bf16.gmra.mxu1 %vm718_vm0, %v8880_v19  ;;  %640 = vst [vmem:[#allocation6 + $0x10] sm:$0x1] %v9158_v33  ;;  %649 = vst [vmem:[#allocation6 + $0xe8] sm:$0x1] %v9158_v33 }
 0x17e   :  { %8625 = vmatprep.mubr.msk.bf16.mxu1 %vm718_vm0, %v8881_v20  ;;  %8230 = vmatpush3.bf16.msra.mxu1 %v8892_v21  ;;  %650 = vst [vmem:[#allocation6 + $0x100] sm:$0x1] %v9158_v33  ;;  %659 = vst [vmem:[#allocation6 + $0x1d8] sm:$0x1] %v9158_v33  ;;  %v8932_v21 = vld [vmem:[%s14176_s6 + $0x1b0] sm:$0xff]  }
 0x17f   :  { %8231 = vmatprep.subr.bf16.mxu1 %v8895_v22  ;;  %2350 = vst [vmem:[#allocation7 + $0x18] sm:$0x1] %v9158_v33  ;;  %2367 = vst [vmem:[#allocation7 + $0x238] sm:$0x1] %v9158_v33 }
 0x180   :  { %2368 = vst [vmem:[#allocation7 + $0x258] sm:$0x1] %v9158_v33  ;;  %2385 = vst [vmem:[#allocation7 + $0x478] sm:$0x1] %v9158_v33  ;;  %v857_v53 = vld [vmem:[#allocation6 + $0x7] sm:$0xff] }
 0x182   :  { %8232 = vmatpush3.bf16.msra.mxu1 %v8896_v23  ;;  %v8933_v23 = vld [vmem:[%s14176_s6 + $0x1e8] sm:$0xff]  }
 0x183   :  { %8233 = vmatprep.subr.bf16.mxu1 %v8899_v24 }
 0x184   :  { %v905_v0 = vld [vmem:[#allocation6 + $0x9] sm:$0xff] }
 0x185   :  { %8626 = vmatmul.mubr.msk.bf16.gmra.mxu1 %vm718_vm0, %v8882_v25 }
 0x186   :  { %8629 = vmatprep.mubr.msk.bf16.mxu1 %vm718_vm0, %v8883_v26  ;;  %8234 = vmatpush3.bf16.msra.mxu1 %v8900_v27  ;;  %v8924_v27 = vld [vmem:[%s14176_s6 + $0x120] sm:$0xff]  }
 0x187   :  { %8235 = vmatprep.subr.bf16.mxu1 %v8903_v29 }
 0x18a   :  { %8236 = vmatpush3.bf16.msra.mxu1 %v9410_v30 }
 0x18b   :  { %8237 = vmatprep.subr.bf16.mxu1 %v8907_v34 }
 0x18d   :  { %8630 = vmatmul.mubr.msk.bf16.gmra.mxu1 %vm718_vm0, %v8884_v28 }
 0x18e   :  { %8238 = vmatpush3.bf16.msra.mxu1 %v8908_v35  ;;  %v8934_v35 = vld [vmem:[%s14176_s6 + $0x1a8] sm:$0xff]  }
 0x18f   :  { %8239 = vmatprep.subr.bf16.mxu1 %v8911_v38 }
 0x192   :  { %8240 = vmatpush3.bf16.msra.mxu1 %v8912_v39  ;;  %v8927_v39 = vld [vmem:[%s14176_s6 + $0x118] sm:$0xff]  }
 0x193   :  { %8353 = vmatprep.subr.bf16.mxu1 %v8915_v42 }
 0x235   :  { %v8619_v46 = vpop.f32.mrf.mxu1 }
 0x236   :  { %843 = vst [vmem:[#allocation6 + $0x50] sm:$0xff] %v8619_v46 }
 0x237   :  { %v9593_v47 = vpop.f32.mrf.mxu1 }
 0x238   :  { %841 = vst [vmem:[#allocation6 + $0x20] sm:$0xff] %v9593_v47  ;;  %v897_v48 = vpack.c.bf16 %v9593_v47, %v9158_v33 }
 0x239   :  { %v9598_v49 = vpop.f32.mrf.mxu1 }
 0x23a   :  { %844 = vst [vmem:[#allocation6 + $0x68] sm:$0xff] %v9598_v49  ;;  %1682 = vmatprep.mubr.bf16.mxu1 %v897_v48 }
 0x23b   :  { %v9601_v50 = vpop.f32.mrf.mxu1 }
 0x23c   :  { %842 = vst [vmem:[#allocation6 + $0x38] sm:$0xff] %v9601_v50  ;;  %v969_v51 = vpack.c.bf16 %v9601_v50, %v9593_v47  ;;  %v9621_v63 = vpack.c.bf16 %v8619_v46, %v9601_v50  ;;  %v8939_v46 = vld [vmem:[%s14176_s6 + $0x1d8] sm:$0xff]   ;;  %v8952_v47 = vld [vmem:[%s14176_s6 + $0x220] sm:$0xff]  }
 0x23d   :  { %v9606_v52 = vpop.f32.mrf.mxu1  ;;  %v931_v9 = vld [vmem:[#allocation6 + $0x4f] sm:$0xff] }
 0x23e   :  { %847 = vst [vmem:[#allocation6 + $0xb0] sm:$0xff] %v9606_v52  ;;  %v9683_v29 = vld [vmem:[#allocation6 + $0x51] sm:$0xff] }
 0x23f   :  { %v9609_v54 = vpop.f32.mrf.mxu1  ;;  %v858_v57 = vld [vmem:[#allocation6 + $0x1f] sm:$0xff] }
 0x240   :  { %845 = vst [vmem:[#allocation6 + $0x80] sm:$0xff] %v9609_v54  ;;  %v873_v60 = vpack.c.bf16 %v858_v57, %v857_v53  ;;  %v9624_v1 = vld [vmem:[#allocation6 + $0x21] sm:$0xff]  ;;  %v9661_v19 = vpack.c.bf16 %v9609_v54, %v9598_v49 }
 0x241   :  { %v9618_v62 = vpop.f32.mrf.mxu1  ;;  %v932_v4 = vld [vmem:[#allocation6 + $0x67] sm:$0xff]  ;;  %v921_v8 = vpack.c.bf16 %v9624_v1, %v905_v0 }
 0x242   :  { %848 = vst [vmem:[#allocation6 + $0xc8] sm:$0xff] %v9618_v62  ;;  %1683 = vmatmul.mubr.bf16.vlgmr.msra.gmra.mxu1 %v873_v60  ;;  %v946_v13 = vpack.c.bf16 %v932_v4, %v931_v9  ;;  %v9742_v60 = vld [vmem:[#allocation6 + $0x69] sm:$0xff] }
 0x243   :  { %8354 = vmatpush3.bf16.msra.mxu1 %v8917_v59  ;;  %v9626_v2 = vpop.f32.mrf.mxu1  ;;  %1690 = vmatprep.mubr.bf16.mxu1 %v9621_v63  ;;  %v930_v3 = vld [vmem:[#allocation6 + $0x37] sm:$0xff] }
 0x244   :  { %846 = vst [vmem:[#allocation6 + $0x98] sm:$0xff] %v9626_v2  ;;  %v945_v6 = vpack.c.bf16 %v930_v3, %v858_v57  ;;  %8355 = vmatprep.subr.bf16.mxu1 %v8919_v61  ;;  %v971_v12 = vpack.c.bf16 %v9626_v2, %v9609_v54  ;;  %v9653_v17 = vpack.c.bf16 %v931_v9, %v930_v3  ;;  %v9670_v22 = vld [vmem:[#allocation6 + $0x39] sm:$0xff]  ;;  %v8931_v57 = vld [vmem:[%s14176_s6 + $0x110] sm:$0xff]   ;;  %v8935_v61 = vld [vmem:[%s14176_s6 + $0x148] sm:$0xff]  }
 0x245   :  { %v9637_v10 = vpop.f32.mrf.mxu1  ;;  %v9691_v32 = vpack.c.bf16 %v9683_v29, %v9670_v22  ;;  %v9718_v42 = vpack.c.bf16 %v9606_v52, %v9626_v2  ;;  %v935_v48 = vld [vmem:[#allocation6 + $0xaf] sm:$0xff]  ;;  %v8956_v54 = vld [vmem:[%s14176_s6 + $0x200] sm:$0xff]  }
 0x246   :  { %1779 = vmatprep.mubr.bf16.mxu0 %v945_v6  ;;  %851 = vst [vmem:[#allocation6 + $0x140] sm:$0xff] %v9637_v10  ;;  %v8940_v3 = vld [vmem:[%s14176_s6 + $0x198] sm:$0xff]   ;;  %v8936_v6 = vld [vmem:[%s14176_s6 + $0x108] sm:$0xff]  }
 0x247   :  { %1780 = vmatmul.mubr.bf16.vlgmr.msra.gmra.mxu0 %v921_v8  ;;  %8356 = vmatpush3.bf16.msra.mxu1 %v8920_v5  ;;  %v9648_v15 = vpop.f32.mrf.mxu1  ;;  %v933_v24 = vld [vmem:[#allocation6 + $0x7f] sm:$0xff]  ;;  %v8943_v5 = vld [vmem:[%s14176_s6 + $0x1d0] sm:$0xff]  }
 0x248   :  { %1787 = vmatprep.mubr.bf16.mxu0 %v946_v13  ;;  %849 = vst [vmem:[#allocation6 + $0x110] sm:$0xff] %v9648_v15  ;;  %8357 = vmatprep.subr.bf16.mxu1 %v8921_v7  ;;  %v9710_v40 = vpack.c.bf16 %v933_v24, %v932_v4  ;;  %v9726_v45 = vld [vmem:[#allocation6 + $0x81] sm:$0xff]  ;;  %v901_v9 = vpack.c.bf16 %v9648_v15, %v9158_v33 }
 0x249   :  { %v9663_v20 = vpop.f32.mrf.mxu1  ;;  %8418 = vmatpush3.bf16.msra.mxu0 %v8928_v11  ;;  %v9733_v52 = vld [vmem:[#allocation6 + $0xc7] sm:$0xff]  ;;  %v9750_v0 = vpack.c.bf16 %v9726_v45, %v9742_v60  ;;  %v8941_v8 = vld [vmem:[%s14176_s6 + $0x140] sm:$0xff]  }
 0x24a   :  { %1691 = vmatmul.mubr.bf16.gmra.mxu1 %v9653_v17  ;;  %852 = vst [vmem:[#allocation6 + $0x158] sm:$0xff] %v9663_v20  ;;  %8419 = vmatprep.subr.bf16.mxu0 %v8930_v14  ;;  %v974_v28 = vpack.c.bf16 %v9663_v20, %v9637_v10  ;;  %v948_v4 = vpack.c.bf16 %v9733_v52, %v935_v48  ;;  %v8944_v14 = vld [vmem:[%s14176_s6 + $0x190] sm:$0xff]  }
 0x24b   :  { %1698 = vmatprep.mubr.bf16.mxu1 %v9661_v19  ;;  %v934_v25 = vld [vmem:[#allocation6 + $0x97] sm:$0xff]  ;;  %v9676_v26 = vpop.f32.mrf.mxu1  ;;  %8358 = vmatpush3.bf16.msra.mxu1 %v8922_v16 }
 0x24c   :  { %v947_v30 = vpack.c.bf16 %v934_v25, %v933_v24  ;;  %850 = vst [vmem:[#allocation6 + $0x128] sm:$0xff] %v9676_v26  ;;  %8359 = vmatprep.subr.bf16.mxu1 %v8923_v18  ;;  %v973_v36 = vpack.c.bf16 %v9676_v26, %v9648_v15  ;;  %v9763_v7 = vpack.c.bf16 %v935_v48, %v934_v25  ;;  %v9774_v16 = vld [vmem:[#allocation6 + $0x99] sm:$0xff]  ;;  %v9776_v18 = vld [vmem:[#allocation6 + $0xb1] sm:$0xff] }
 0x24d   :  { %v9693_v34 = vpop.f32.mrf.mxu1  ;;  %8420 = vmatpush3.bf16.msra.mxu0 %v8932_v21  ;;  %v8945_v21 = vld [vmem:[%s14176_s6 + $0x1c8] sm:$0xff]   ;;  %v8947_v25 = vld [vmem:[%s14176_s6 + $0x238] sm:$0xff]   ;;  %v995_v50 = vpack.c.bf16 %v9774_v16, %v9726_v45 }
 0x24e   :  { %855 = vst [vmem:[#allocation6 + $0x1a0] sm:$0xff] %v9693_v34  ;;  %8421 = vmatprep.subr.bf16.mxu0 %v8933_v23  ;;  %v8942_v23 = vld [vmem:[%s14176_s6 + $0x100] sm:$0xff]  }
 0x24f   :  { %1788 = vmatmul.mubr.bf16.gmra.mxu0 %v9691_v32  ;;  %v9705_v38 = vpop.f32.mrf.mxu1  ;;  %8360 = vmatpush3.bf16.msra.mxu1 %v8924_v27  ;;  %v937_v11 = vld [vmem:[#allocation6 + $0x10f] sm:$0xff]  ;;  %v9789_v27 = vpack.c.bf16 %v9776_v18, %v9774_v16  ;;  %v939_v48 = vld [vmem:[#allocation6 + $0x13f] sm:$0xff] }
 0x250   :  { %1795 = vmatprep.mubr.bf16.mxu0 %v947_v30  ;;  %853 = vst [vmem:[#allocation6 + $0x170] sm:$0xff] %v9705_v38  ;;  %8361 = vmatprep.subr.bf16.mxu1 %v8925_v31  ;;  %v865_v30 = vld [vmem:[#allocation6 + $0xf7] sm:$0xff]  ;;  %v8946_v31 = vld [vmem:[%s14176_s6 + $0x188] sm:$0xff]  }
 0x251   :  { %v9720_v43 = vpop.f32.mrf.mxu1  ;;  %8422 = vmatpush3.bf16.msra.mxu0 %v8934_v35  ;;  %v8948_v35 = vld [vmem:[%s14176_s6 + $0x1c0] sm:$0xff]  }
 0x252   :  { %1699 = vmatmul.mubr.bf16.gmra.mxu1 %v9710_v40  ;;  %856 = vst [vmem:[#allocation6 + $0x1b8] sm:$0xff] %v9720_v43  ;;  %8423 = vmatprep.subr.bf16.mxu0 %v8937_v37  ;;  %v976_v59 = vpack.c.bf16 %v9720_v43, %v9693_v34  ;;  %v877_v37 = vpack.c.bf16 %v937_v11, %v865_v30 }
 0x253   :  { %1706 = vmatprep.mubr.bf16.mxu1 %v9718_v42  ;;  %8362 = vmatpush3.bf16.msra.mxu1 %v8927_v39  ;;  %v9735_v53 = vpop.f32.mrf.mxu1  ;;  %v938_v13 = vld [vmem:[#allocation6 + $0x127] sm:$0xff]  ;;  %v9800_v39 = vpack.c.bf16 %v9637_v10, %v9676_v26  ;;  %v1017_v10 = vld [vmem:[#allocation6 + $0x1cf] sm:$0xff] }
 0x254   :  { %854 = vst [vmem:[#allocation6 + $0x188] sm:$0xff] %v9735_v53  ;;  %8363 = vmatprep.subr.bf16.mxu1 %v8929_v41  ;;  %v949_v24 = vpack.c.bf16 %v938_v13, %v937_v11  ;;  %v8949_v41 = vld [vmem:[%s14176_s6 + $0x180] sm:$0xff]   ;;  %v975_v15 = vpack.c.bf16 %v9735_v53, %v9705_v38 }
 0x255   :  { %8424 = vmatpush3.bf16.msra.mxu0 %v8938_v44  ;;  %v913_v44 = vld [vmem:[#allocation6 + $0xf9] sm:$0xff] }
 0x256   :  { %8425 = vmatprep.subr.bf16.mxu0 %v8939_v46  ;;  %v9805_v46 = vld [vmem:[#allocation6 + $0x111] sm:$0xff] }
 0x257   :  { %1796 = vmatmul.mubr.bf16.gmra.mxu0 %v9750_v0  ;;  %8364 = vmatpush3.bf16.msra.mxu1 %v8931_v57  ;;  %v940_v57 = vld [vmem:[#allocation6 + $0x157] sm:$0xff]  ;;  %v941_v11 = vld [vmem:[#allocation6 + $0x16f] sm:$0xff] }
 0x258   :  { %1803 = vmatprep.mubr.bf16.mxu0 %v948_v4  ;;  %8365 = vmatprep.subr.bf16.mxu1 %v8935_v61  ;;  %v925_v61 = vpack.c.bf16 %v9805_v46, %v913_v44  ;;  %v9809_v4 = vpack.c.bf16 %v939_v48, %v938_v13  ;;  %v9826_v13 = vpack.c.bf16 %v941_v11, %v940_v57  ;;  %v9835_v30 = vld [vmem:[#allocation6 + $0x171] sm:$0xff] }
 0x259   :  { %8426 = vmatpush3.bf16.msra.mxu0 %v8940_v3  ;;  %v950_v3 = vpack.c.bf16 %v940_v57, %v939_v48  ;;  %v993_v48 = vpack.c.bf16 %v9670_v22, %v9624_v1  ;;  %v994_v1 = vpack.c.bf16 %v9742_v60, %v9683_v29  ;;  %v8951_v22 = vld [vmem:[%s14176_s6 + $0x228] sm:$0xff]  }
 0x25a   :  { %1707 = vmatmul.mubr.bf16.gmra.mxu1 %v9763_v7  ;;  %8427 = vmatprep.subr.bf16.mxu0 %v8943_v5  ;;  %v9813_v5 = vpack.c.bf16 %v9705_v38, %v9663_v20  ;;  %v8955_v29 = vld [vmem:[%s14176_s6 + $0x208] sm:$0xff]  }
 0x25b   :  { %1714 = vmatprep.mubr.bf16.mxu1 %v901_v9  ;;  %8366 = vmatpush3.bf16.msra.mxu1 %v8936_v6  ;;  %v942_v6 = vld [vmem:[#allocation6 + $0x187] sm:$0xff] }
 0x25c   :  { %8367 = vmatprep.subr.bf16.mxu1 %v8941_v8  ;;  %v9816_v8 = vld [vmem:[#allocation6 + $0x129] sm:$0xff]  ;;  %v9818_v9 = vld [vmem:[#allocation6 + $0x141] sm:$0xff] }
 0x25d   :  { %8428 = vmatpush3.bf16.msra.mxu0 %v8944_v14  ;;  %v951_v14 = vpack.c.bf16 %v942_v6, %v941_v11  ;;  %v9851_v57 = vld [vmem:[#allocation6 + $0x189] sm:$0xff]  ;;  %v997_v2 = vpack.c.bf16 %v9816_v8, %v9805_v46 }
 0x25e   :  { %8429 = vmatprep.subr.bf16.mxu0 %v8945_v21  ;;  %v9823_v21 = vpack.c.bf16 %v9818_v9, %v9816_v8  ;;  %v955_v11 = vld [vmem:[#allocation6 + $0x50] sm:$0xff] }
 0x25f   :  { %1804 = vmatmul.mubr.bf16.gmra.mxu0 %v9789_v27  ;;  %8368 = vmatpush3.bf16.msra.mxu1 %v8942_v23  ;;  %v9830_v23 = vpack.c.bf16 %v9693_v34, %v9735_v53 }
 0x260   :  { %1811 = vmatprep.mubr.bf16.mxu0 %v949_v24  ;;  %8633 = vmatprep.subr.bf16.mxu1 %v8947_v25  ;;  %v9833_v24 = vld [vmem:[#allocation6 + $0x159] sm:$0xff] }
 0x261   :  { %8430 = vmatpush3.bf16.msra.mxu0 %v8946_v31  ;;  %v943_v31 = vld [vmem:[#allocation6 + $0x19f] sm:$0xff] }
 0x262   :  { %1715 = vmatmul.mubr.bf16.gmra.mxu1 %v877_v37  ;;  %8431 = vmatprep.subr.bf16.mxu0 %v8948_v35  ;;  %v9838_v35 = vld [vmem:[#allocation6 + $0x1b7] sm:$0xff]  ;;  %v9842_v37 = vpack.c.bf16 %v9835_v30, %v9833_v24  ;;  %v9846_v44 = vpack.c.bf16 %v943_v31, %v942_v6  ;;  %v8950_v6 = vld [vmem:[%s14176_s6 + $0x230] sm:$0xff]  }
 0x263   :  { %1722 = vmatprep.mubr.bf16.mxu1 %v9800_v39  ;;  %v1025_v20 = vpack.c.bf16 %v1017_v10, %v9838_v35 }
 0x265   :  { %8432 = vmatpush3.bf16.msra.mxu0 %v8949_v41  ;;  %v952_v41 = vpack.c.bf16 %v9838_v35, %v943_v31 }
 0x267   :  { %1812 = vmatmul.mubr.bf16.gmra.mxu0 %v925_v61  ;;  %v9853_v61 = vld [vmem:[#allocation6 + $0x1a1] sm:$0xff] }
 0x268   :  { %1819 = vmatprep.mubr.bf16.mxu0 %v950_v3  ;;  %v9857_v3 = vpack.c.bf16 %v9853_v61, %v9851_v57 }
 0x26a   :  { %1723 = vmatmul.mubr.bf16.gmra.mxu1 %v9809_v4 }
 0x26b   :  { %1730 = vmatprep.mubr.bf16.mxu1 %v9813_v5 }
 0x26f   :  { %1820 = vmatmul.mubr.bf16.gmra.mxu0 %v9823_v21 }
 0x270   :  { %1827 = vmatprep.mubr.bf16.mxu0 %v951_v14 }
 0x272   :  { %1731 = vmatmul.mubr.bf16.gmra.mxu1 %v9826_v13 }
 0x273   :  { %1738 = vmatprep.mubr.bf16.mxu1 %v9830_v23 }
 0x277   :  { %1828 = vmatmul.mubr.bf16.gmra.mxu0 %v9842_v37 }
 0x278   :  { %1835 = vmatprep.mubr.bf16.mxu0 %v952_v41 }
 0x27a   :  { %1739 = vmatmul.mubr.bf16.gmra.mxu1 %v9846_v44 }
 0x27b   :  { %1876 = vmatprep.mubr.bf16.mxu1 %v993_v48 }
 0x27f   :  { %1836 = vmatmul.mubr.bf16.gmra.mxu0 %v9857_v3 }
 0x280   :  { %1973 = vmatprep.mubr.bf16.mxu0 %v9621_v63  ;;  %v970_v63 = vpack.c.bf16 %v9598_v49, %v955_v11  ;;  %v8954_v49 = vld [vmem:[%s14176_s6 + $0x210] sm:$0xff]  }
 0x282   :  { %1877 = vmatmul.mubr.bf16.vlgmr.msra.gmra.mxu1 %v969_v51  ;;  %v8953_v51 = vld [vmem:[%s14176_s6 + $0x218] sm:$0xff]  }
 0x283   :  { %8634 = vmatpush3.bf16.msra.mxu1 %v8947_v25  ;;  %1884 = vmatprep.mubr.bf16.mxu1 %v994_v1 }
 0x284   :  { %8635 = vmatprep.subr.bf16.mxu1 %v8950_v6 }
 0x287   :  { %1974 = vmatmul.mubr.bf16.vlgmr.msra.gmra.mxu0 %v9653_v17  ;;  %8636 = vmatpush3.bf16.msra.mxu1 %v8950_v6  ;;  %v984_v17 = vld [vmem:[#allocation6 + $0xc9] sm:$0xff] }
 0x288   :  { %1981 = vmatprep.mubr.bf16.mxu0 %v9661_v19  ;;  %8637 = vmatprep.subr.bf16.mxu1 %v8951_v22  ;;  %v996_v19 = vpack.c.bf16 %v984_v17, %v9776_v18 }
 0x28a   :  { %1885 = vmatmul.mubr.bf16.gmra.mxu1 %v970_v63 }
 0x28b   :  { %1892 = vmatprep.mubr.bf16.mxu1 %v995_v50  ;;  %8638 = vmatpush3.bf16.msra.mxu1 %v8951_v22 }
 0x28c   :  { %8639 = vmatprep.subr.bf16.mxu1 %v8952_v47 }
 0x28f   :  { %1982 = vmatmul.mubr.bf16.gmra.mxu0 %v9710_v40  ;;  %8640 = vmatpush3.bf16.msra.mxu1 %v8952_v47  ;;  %v959_v40 = vld [vmem:[#allocation6 + $0xb0] sm:$0xff] }
 0x290   :  { %1989 = vmatprep.mubr.bf16.mxu0 %v9718_v42  ;;  %8641 = vmatprep.subr.bf16.mxu1 %v8953_v51  ;;  %v1045_v42 = vpack.c.bf16 %v9158_v33, %v9618_v62  ;;  %v972_v45 = vpack.c.bf16 %v9618_v62, %v959_v40  ;;  %v998_v62 = vpack.c.bf16 %v9833_v24, %v9818_v9 }
 0x292   :  { %1893 = vmatmul.mubr.bf16.gmra.mxu1 %v971_v12  ;;  %v1009_v12 = vld [vmem:[#allocation6 + $0xdf] sm:$0xff] }
 0x293   :  { %1900 = vmatprep.mubr.bf16.mxu1 %v996_v19  ;;  %8642 = vmatpush3.bf16.msra.mxu1 %v8953_v51  ;;  %v1021_v60 = vpack.c.bf16 %v1009_v12, %v9733_v52  ;;  %v992_v52 = vld [vmem:[#allocation6 + $0x1b9] sm:$0xff] }
 0x294   :  { %8643 = vmatprep.subr.bf16.mxu1 %v8954_v49  ;;  %v1000_v26 = vpack.c.bf16 %v992_v52, %v9853_v61 }
 0x297   :  { %1990 = vmatmul.mubr.bf16.gmra.mxu0 %v9763_v7  ;;  %8644 = vmatpush3.bf16.msra.mxu1 %v8954_v49  ;;  %v999_v7 = vpack.c.bf16 %v9851_v57, %v9835_v30 }
 0x298   :  { %1997 = vmatprep.mubr.bf16.mxu0 %v1045_v42  ;;  %8645 = vmatprep.subr.bf16.mxu1 %v8955_v29 }
 0x29a   :  { %1901 = vmatmul.mubr.bf16.gmra.mxu1 %v972_v45 }
 0x29b   :  { %1908 = vmatprep.mubr.bf16.mxu1 %v997_v2  ;;  %8646 = vmatpush3.bf16.msra.mxu1 %v8955_v29 }
 0x29c   :  { %8647 = vmatprep.subr.bf16.mxu1 %v8956_v54 }
 0x29f   :  { %1998 = vmatmul.mubr.bf16.gmra.mxu0 %v1021_v60  ;;  %8648 = vmatpush3.bf16.msra.mxu1 %v8956_v54 }
 0x2a0   :  { %2005 = vmatprep.mubr.bf16.mxu0 %v9800_v39 }
 0x2a2   :  { %1909 = vmatmul.mubr.bf16.gmra.mxu1 %v973_v36  ;;  %v1049_v36 = vpack.c.bf16 %v9158_v33, %v9720_v43  ;;  %v1065_v33 = vld [vmem:[#allocation6 + $0x1d1] sm:$0xff] }
 0x2a3   :  { %1916 = vmatprep.mubr.bf16.mxu1 %v998_v62  ;;  %v1073_v34 = vpack.c.bf16 %v1065_v33, %v992_v52 }
 0x2a7   :  { %2006 = vmatmul.mubr.bf16.gmra.mxu0 %v9809_v4 }
 0x2a8   :  { %2013 = vmatprep.mubr.bf16.mxu0 %v9813_v5 }
 0x2aa   :  { %1917 = vmatmul.mubr.bf16.gmra.mxu1 %v974_v28  ;;  %v1057_v28 = vld [vmem:[#allocation6 + $0xe1] sm:$0xff] }
 0x2ab   :  { %1924 = vmatprep.mubr.bf16.mxu1 %v999_v7  ;;  %v1069_v38 = vpack.c.bf16 %v1057_v28, %v984_v17 }
 0x2af   :  { %2014 = vmatmul.mubr.bf16.gmra.mxu0 %v9826_v13 }
 0x2b0   :  { %2021 = vmatprep.mubr.bf16.mxu0 %v9830_v23 }
 0x2b2   :  { %1925 = vmatmul.mubr.bf16.gmra.mxu1 %v975_v15 }
 0x2b3   :  { %1932 = vmatprep.mubr.bf16.mxu1 %v1000_v26 }
 0x2b7   :  { %2022 = vmatmul.mubr.bf16.gmra.mxu0 %v9846_v44 }
 0x2b8   :  { %2029 = vmatprep.mubr.bf16.mxu0 %v1049_v36 }
 0x2ba   :  { %1933 = vmatmul.mubr.bf16.gmra.mxu1 %v976_v59 }
 0x2bb   :  { %8649 = vmatprep.mubr.bf16.mxu1 %v9691_v32 }
 0x2bf   :  { %2030 = vmatmul.mubr.bf16.gmra.mxu0 %v1025_v20 }
 0x2c2   :  { %8650 = vmatmul.mubr.bf16.vlgmr.msra.gmra.mxu1 %v9750_v0 }
 0x2c3   :  { %8653 = vmatprep.mubr.bf16.mxu1 %v9789_v27 }
 0x2ca   :  { %8654 = vmatmul.mubr.bf16.gmra.mxu1 %v1069_v38 }
 0x2cb   :  { %8657 = vmatprep.mubr.bf16.mxu1 %v9823_v21 }
 0x2d2   :  { %8658 = vmatmul.mubr.bf16.gmra.mxu1 %v9842_v37 }
 0x2d3   :  { %8661 = vmatprep.mubr.bf16.mxu1 %v9857_v3 }
 0x2da   :  { %8662 = vmatmul.mubr.bf16.gmra.mxu1 %v1073_v34 }
 0x302   :  { %v8241_v32 = vpop.f32.mrf.mxu1 }
 0x304   :  { %v8242_v43 = vpop.f32.mrf.mxu1 }
 0x305   :  { %v8243_v53 = vadd.f32 %v8242_v43, %v8241_v32 }
 0x306   :  { %v8244_v59 = vpop.f32.mrf.mxu1 }
 0x307   :  { %v8305_v16 = vpop.f32.mrf.mxu0 }
 0x308   :  { %v8245_v0 = vpop.f32.mrf.mxu1 }
 0x309   :  { %v8246_v18 = vadd.f32 %v8245_v0, %v8244_v59  ;;  %v8306_v25 = vpop.f32.mrf.mxu0 }
 0x30a   :  { %v8307_v27 = vadd.f32 %v8306_v25, %v8305_v16  ;;  %v8247_v39 = vpop.f32.mrf.mxu1 }
 0x30b   :  { %v8308_v46 = vpop.f32.mrf.mxu0 }
 0x30c   :  { %v9936_v4 = vadd.f32 %v8307_v27, %v8243_v53  ;;  %v8248_v5 = vpop.f32.mrf.mxu1 }
 0x30d   :  { %v8249_v8 = vadd.f32 %v8248_v5, %v8247_v39  ;;  %v8309_v9 = vpop.f32.mrf.mxu0 }
 0x30e   :  { %v8310_v14 = vadd.f32 %v8309_v9, %v8308_v46  ;;  %v8250_v21 = vpop.f32.mrf.mxu1 }
 0x30f   :  { %v8311_v13 = vpop.f32.mrf.mxu0 }
 0x310   :  { %v9938_v23 = vadd.f32 %v8310_v14, %v8246_v18  ;;  %v8251_v24 = vpop.f32.mrf.mxu1 }
 0x311   :  { %v8252_v30 = vadd.f32 %v8251_v24, %v8250_v21  ;;  %v8312_v31 = vpop.f32.mrf.mxu0 }
 0x312   :  { %v8313_v35 = vadd.f32 %v8312_v31, %v8311_v13  ;;  %v8253_v37 = vpop.f32.mrf.mxu1 }
 0x313   :  { %v8314_v41 = vpop.f32.mrf.mxu0 }
 0x314   :  { %v9940_v44 = vadd.f32 %v8313_v35, %v8249_v8  ;;  %v8254_v48 = vpop.f32.mrf.mxu1 }
 0x315   :  { %v8255_v57 = vadd.f32 %v8254_v48, %v8253_v37  ;;  %v8315_v61 = vpop.f32.mrf.mxu0 }
 0x316   :  { %v8316_v3 = vadd.f32 %v8315_v61, %v8314_v41  ;;  %v8256_v6 = vpop.f32.mrf.mxu1 }
 0x317   :  { %v8317_v1 = vpop.f32.mrf.mxu0 }
 0x318   :  { %v9942_v22 = vadd.f32 %v8316_v3, %v8252_v30  ;;  %v8257_v11 = vpop.f32.mrf.mxu1 }
 0x319   :  { %v8258_v63 = vadd.f32 %v8257_v11, %v8256_v6  ;;  %v8318_v47 = vpop.f32.mrf.mxu0 }
 0x31a   :  { %v8319_v50 = vadd.f32 %v8318_v47, %v8317_v1  ;;  %v8259_v51 = vpop.f32.mrf.mxu1 }
 0x31b   :  { %v8320_v17 = vpop.f32.mrf.mxu0 }
 0x31c   :  { %v9944_v49 = vadd.f32 %v8319_v50, %v8255_v57  ;;  %v8260_v19 = vpop.f32.mrf.mxu1 }
 0x31d   :  { %v8261_v29 = vadd.f32 %v8260_v19, %v8259_v51  ;;  %v8321_v40 = vpop.f32.mrf.mxu0 }
 0x31e   :  { %v8322_v42 = vadd.f32 %v8321_v40, %v8320_v17  ;;  %v8262_v45 = vpop.f32.mrf.mxu1 }
 0x31f   :  { %v8323_v54 = vpop.f32.mrf.mxu0 }
 0x320   :  { %v9946_v2 = vadd.f32 %v8322_v42, %v8258_v63  ;;  %v8263_v12 = vpop.f32.mrf.mxu1 }
 0x321   :  { %v8264_v60 = vadd.f32 %v8263_v12, %v8262_v45  ;;  %v8324_v62 = vpop.f32.mrf.mxu0 }
 0x322   :  { %v8325_v7 = vadd.f32 %v8324_v62, %v8323_v54  ;;  %v8265_v52 = vpop.f32.mrf.mxu1 }
 0x323   :  { %v8326_v15 = vpop.f32.mrf.mxu0 }
 0x324   :  { %v9948_v26 = vadd.f32 %v8325_v7, %v8261_v29  ;;  %v8266_v36 = vpop.f32.mrf.mxu1 }
 0x325   :  { %v8267_v10 = vadd.f32 %v8266_v36, %v8265_v52  ;;  %v8327_v20 = vpop.f32.mrf.mxu0 }
 0x326   :  { %v8328_v28 = vadd.f32 %v8327_v20, %v8326_v15  ;;  %v8268_v38 = vpop.f32.mrf.mxu1 }
 0x327   :  { %v8329_v33 = vpop.f32.mrf.mxu0 }
 0x328   :  { %v9950_v34 = vadd.f32 %v8328_v28, %v8264_v60  ;;  %v8269_v32 = vpop.f32.mrf.mxu1 }
 0x329   :  { %v8270_v43 = vadd.f32 %v8269_v32, %v8268_v38  ;;  %v8330_v53 = vpop.f32.mrf.mxu0 }
 0x32a   :  { %v8331_v59 = vadd.f32 %v8330_v53, %v8329_v33  ;;  %v8271_v16 = vpop.f32.mrf.mxu1 }
 0x32b   :  { %v8332_v0 = vpop.f32.mrf.mxu0 }
 0x32c   :  { %v9952_v18 = vadd.f32 %v8331_v59, %v8267_v10  ;;  %v8272_v25 = vpop.f32.mrf.mxu1 }
 0x32d   :  { %v8273_v27 = vadd.f32 %v8272_v25, %v8271_v16  ;;  %v8333_v39 = vpop.f32.mrf.mxu0 }
 0x32e   :  { %v8334_v46 = vadd.f32 %v8333_v39, %v8332_v0  ;;  %v8274_v5 = vpop.f32.mrf.mxu1 }
 0x32f   :  { %v8335_v8 = vpop.f32.mrf.mxu0 }
 0x330   :  { %v9954_v9 = vadd.f32 %v8334_v46, %v8270_v43  ;;  %v8275_v14 = vpop.f32.mrf.mxu1 }
 0x331   :  { %v8276_v21 = vadd.f32 %v8275_v14, %v8274_v5  ;;  %v8336_v13 = vpop.f32.mrf.mxu0 }
 0x332   :  { %14610 = vst [vmem:[#allocation24_spill] sm:$0xff] %v9954_v9  ;;  %v8337_v24 = vadd.f32 %v8336_v13, %v8335_v8  ;;  %v8277_v30 = vpop.f32.mrf.mxu1 }
 0x333   :  { %v8338_v31 = vpop.f32.mrf.mxu0 }
 0x334   :  { %v9956_v35 = vadd.f32 %v8337_v24, %v8273_v27  ;;  %v8278_v37 = vpop.f32.mrf.mxu1 }
 0x335   :  { %v8279_v41 = vadd.f32 %v8278_v37, %v8277_v30  ;;  %v8339_v48 = vpop.f32.mrf.mxu0 }
 0x336   :  { %14611 = vst [vmem:[#allocation25_spill] sm:$0xff] %v9956_v35  ;;  %v8340_v57 = vadd.f32 %v8339_v48, %v8338_v31  ;;  %v8280_v61 = vpop.f32.mrf.mxu1 }
 0x337   :  { %v8341_v3 = vpop.f32.mrf.mxu0 }
 0x338   :  { %v9958_v6 = vadd.f32 %v8340_v57, %v8276_v21  ;;  %v8281_v1 = vpop.f32.mrf.mxu1 }
 0x339   :  { %v8282_v11 = vadd.f32 %v8281_v1, %v8280_v61  ;;  %v8342_v63 = vpop.f32.mrf.mxu0 }
 0x33a   :  { %14612 = vst [vmem:[#allocation26_spill] sm:$0xff] %v9958_v6  ;;  %v8343_v47 = vadd.f32 %v8342_v63, %v8341_v3  ;;  %v8283_v50 = vpop.f32.mrf.mxu1 }
 0x33b   :  { %v8344_v51 = vpop.f32.mrf.mxu0 }
 0x33c   :  { %v9960_v17 = vadd.f32 %v8343_v47, %v8279_v41  ;;  %v8284_v19 = vpop.f32.mrf.mxu1 }
 0x33d   :  { %v8285_v29 = vadd.f32 %v8284_v19, %v8283_v50  ;;  %v8345_v40 = vpop.f32.mrf.mxu0 }
 0x33e   :  { %14613 = vst [vmem:[#allocation27_spill] sm:$0xff] %v9960_v17  ;;  %v8346_v42 = vadd.f32 %v8345_v40, %v8344_v51  ;;  %v8286_v45 = vpop.f32.mrf.mxu1 }
 0x33f   :  { %v8347_v54 = vpop.f32.mrf.mxu0 }
 0x340   :  { %v9962_v12 = vadd.f32 %v8346_v42, %v8282_v11  ;;  %v8287_v60 = vpop.f32.mrf.mxu1 }
 0x341   :  { %v9964_v62 = vadd.f32 %v8287_v60, %v8286_v45  ;;  %v8348_v7 = vpop.f32.mrf.mxu0 }
 0x342   :  { %14614 = vst [vmem:[#allocation28_spill] sm:$0xff] %v9962_v12  ;;  %v8349_v52 = vadd.f32 %v8348_v7, %v8347_v54  ;;  %v8369_v15 = vpop.f32.mrf.mxu1 }
 0x343   :  { %14615 = vst [vmem:[#allocation29_spill] sm:$0xff] %v9964_v62  ;;  %v9966_v36 = vpop.f32.mrf.mxu0 }
 0x344   :  { %14616 = vst [vmem:[#allocation30_spill] sm:$0xff] %v9966_v36  ;;  %v9968_v10 = vadd.f32 %v8349_v52, %v8285_v29  ;;  %v8370_v20 = vpop.f32.mrf.mxu1 }
 0x345   :  { %v9970_v28 = vpop.f32.mrf.mxu0  ;;  %v8371_v38 = vadd.f32 %v8370_v20, %v8369_v15 }
 0x346   :  { %14617 = vst [vmem:[#allocation31_spill] sm:$0xff] %v9968_v10  ;;  %14618 = vst [vmem:[#allocation32_spill] sm:$0xff] %v9970_v28  ;;  %v8372_v33 = vpop.f32.mrf.mxu1 }
 0x347   :  { %v9973_v32 = vadd.f32 %v8371_v38, %v9936_v4  ;;  %v8433_v43 = vpop.f32.mrf.mxu0 }
 0x348   :  { %v8373_v53 = vpop.f32.mrf.mxu1 }
 0x349   :  { %v8434_v59 = vpop.f32.mrf.mxu0  ;;  %v8374_v36 = vadd.f32 %v8373_v53, %v8372_v33 }
 0x34a   :  { %v8375_v16 = vpop.f32.mrf.mxu1 }
 0x34b   :  { %v8436_v0 = vpop.f32.mrf.mxu0 }
 0x34c   :  { %v8376_v25 = vpop.f32.mrf.mxu1 }
 0x34d   :  { %v8437_v27 = vpop.f32.mrf.mxu0 }
 0x34e   :  { %v8378_v39 = vpop.f32.mrf.mxu1 }
 0x34f   :  { %v8439_v46 = vpop.f32.mrf.mxu0 }
 0x350   :  { %v8379_v5 = vpop.f32.mrf.mxu1 }
 0x351   :  { %v8440_v8 = vpop.f32.mrf.mxu0 }
 0x352   :  { %v8381_v14 = vpop.f32.mrf.mxu1 }
 0x353   :  { %v8442_v21 = vpop.f32.mrf.mxu0 }
 0x354   :  { %v8382_v13 = vpop.f32.mrf.mxu1 }
 0x355   :  { %v8443_v24 = vpop.f32.mrf.mxu0 }
 0x356   :  { %v8384_v30 = vpop.f32.mrf.mxu1 }
 0x357   :  { %v8445_v31 = vpop.f32.mrf.mxu0 }
 0x358   :  { %v8385_v37 = vpop.f32.mrf.mxu1 }
 0x359   :  { %v8446_v4 = vpop.f32.mrf.mxu0 }
 0x35a   :  { %v8387_v41 = vpop.f32.mrf.mxu1 }
 0x35b   :  { %v9975_v48 = vpop.f32.mrf.mxu0 }
 0x35c   :  { %v8388_v57 = vpop.f32.mrf.mxu1 }
 0x35d   :  { %v9977_v61 = vpop.f32.mrf.mxu0 }
 0x35e   :  { %v8390_v3 = vpop.f32.mrf.mxu1 }
 0x35f   :  { %v8451_v1 = vpop.f32.mrf.mxu0 }
 0x360   :  { %v8391_v11 = vpop.f32.mrf.mxu1 }
 0x361   :  { %v8452_v63 = vpop.f32.mrf.mxu0 }
 0x362   :  { %v8393_v47 = vpop.f32.mrf.mxu1 }
 0x363   :  { %v8454_v50 = vpop.f32.mrf.mxu0 }
 0x364   :  { %v8394_v51 = vpop.f32.mrf.mxu1 }
 0x365   :  { %v8455_v19 = vpop.f32.mrf.mxu0 }
 0x366   :  { %v9979_v29 = vpop.f32.mrf.mxu1 }
 0x367   :  { %v9981_v40 = vpop.f32.mrf.mxu0 }
 0x368   :  { %v9983_v42 = vpop.f32.mrf.mxu1 }
 0x369   :  { %v9985_v45 = vpop.f32.mrf.mxu0 }
 0x36a   :  { %v9987_v54 = vpop.f32.mrf.mxu1 }
 0x36b   :  { %v9989_v60 = vpop.f32.mrf.mxu0 }
 0x36c   :  { %v9991_v7 = vpop.f32.mrf.mxu1 }
 0x36d   :  { %v9993_v52 = vpop.f32.mrf.mxu0 }
 0x36e   :  { %14619 = vst [vmem:[#allocation33_spill] sm:$0xff] %v9993_v52  ;;  %v9995_v15 = vpop.f32.mrf.mxu1  ;;  %v8447_v52 = vadd.f32 %v8446_v4, %v8445_v31 }
 0x36f   :  { %14620 = vst [vmem:[#allocation34_spill] sm:$0xff] %v9995_v15  ;;  %v9997_v20 = vpop.f32.mrf.mxu0 }
 0x370   :  { %14621 = vst [vmem:[#allocation35_spill] sm:$0xff] %v9997_v20  ;;  %v9999_v38 = vpop.f32.mrf.mxu1 }
 0x371   :  { %14622 = vst [vmem:[#allocation36_spill] sm:$0xff] %v9999_v38  ;;  %v10001_v55 = vpop.f32.mrf.mxu0  ;;  %v8441_v38 = vadd.f32 %v8440_v8, %v8439_v46 }
 0x372   :  { %14623 = vst [vmem:[#allocation37_spill] sm:$0xff] %v10001_v55  ;;  %v10003_v56 = vpop.f32.mrf.mxu1  ;;  %v8377_v55 = vadd.f32 %v8376_v25, %v8375_v16 }
 0x373   :  { %14624 = vst [vmem:[#allocation38_spill] sm:$0xff] %v10003_v56  ;;  %v10007_v10 = vpop.f32.mrf.mxu0 }
 0x374   :  { %v10005_v58 = vpop.f32.mrf.mxu1  ;;  %14626 = vst [vmem:[#allocation40_spill] sm:$0xff] %v10007_v10 }
 0x375   :  { %14625 = vst [vmem:[#allocation39_spill] sm:$0xff] %v10005_v58  ;;  %v10013_v17 = vpop.f32.mrf.mxu0  ;;  %v8435_v58 = vadd.f32 %v8434_v59, %v8433_v43 }
 0x376   :  { %v10009_v12 = vpop.f32.mrf.mxu1  ;;  %14629 = vst [vmem:[#allocation43_spill] sm:$0xff] %v10013_v17  ;;  %v8383_v17 = vadd.f32 %v8382_v13, %v8381_v14  ;;  %v8459_v13 = vadd.f32 %v9985_v45, %v9981_v40 }
 0x377   :  { %14627 = vst [vmem:[#allocation41_spill] sm:$0xff] %v10009_v12  ;;  %v10019_v9 = vpop.f32.mrf.mxu0  ;;  %v8438_v12 = vadd.f32 %v8437_v27, %v8436_v0  ;;  %v1976_v33 = vadd.f32 %v8435_v58, %v9973_v32  ;;  %v8386_v27 = vadd.f32 %v8385_v37, %v8384_v30 }
 0x378   :  { %v10011_v62 = vpop.f32.mrf.mxu1  ;;  %14632 = vst [vmem:[#allocation46_spill] sm:$0xff] %v10019_v9  ;;  %v8444_v9 = vadd.f32 %v8443_v24, %v8442_v21  ;;  %v1895_v16 = vadd.f32 %v8383_v17, %v9944_v49  ;;  %v8395_v49 = vadd.f32 %v8394_v51, %v8393_v47 }
 0x379   :  { %14628 = vst [vmem:[#allocation42_spill] sm:$0xff] %v10011_v62  ;;  %v10025_v10 = vpop.f32.mrf.mxu0  ;;  %v8380_v62 = vadd.f32 %v8379_v5, %v8378_v39  ;;  %v1898_v8 = vadd.f32 %v8386_v27, %v9946_v2 }
 0x37a   :  { %v10015_v6 = vpop.f32.mrf.mxu1  ;;  %v1992_v58 = vadd.f32 %v8447_v52, %v1895_v16  ;;  %v1911_v2 = vadd.f32 %v8395_v49, %v9952_v18 }
 0x37b   :  { %14630 = vst [vmem:[#allocation44_spill] sm:$0xff] %v10015_v6  ;;  %v1882_v6 = vadd.f32 %v8374_v36, %v9938_v23  ;;  %v1890_v59 = vadd.f32 %v8380_v62, %v9942_v22  ;;  %v8389_v23 = vadd.f32 %v8388_v57, %v8387_v41  ;;  %v8392_v36 = vadd.f32 %v8391_v11, %v8390_v3 }
 0x37c   :  { %v10017_v35 = vpop.f32.mrf.mxu1  ;;  %v8450_v22 = vadd.f32 %v9977_v61, %v9975_v48  ;;  %v8398_v11 = vadd.f32 %v9983_v42, %v9979_v29  ;;  %v2008_v18 = vadd.f32 %v8459_v13, %v1911_v2  ;;  %v14635_v29 = vld [vmem:[#allocation34_spill] sm:$0xff]  ;;  %v14636_v42 = vld [vmem:[#allocation36_spill] sm:$0xff] }
 0x37d   :  { %14631 = vst [vmem:[#allocation45_spill] sm:$0xff] %v10017_v35  ;;  %v1887_v35 = vadd.f32 %v8377_v55, %v9940_v44  ;;  %v1979_v53 = vadd.f32 %v8438_v12, %v1882_v6  ;;  %v1987_v46 = vadd.f32 %v8444_v9, %v1890_v59  ;;  %v8453_v6 = vadd.f32 %v8452_v63, %v8451_v1 }
 0x37e   :  { %v10021_v28 = vpop.f32.mrf.mxu1  ;;  %v1903_v14 = vadd.f32 %v8389_v23, %v9948_v26  ;;  %v1906_v21 = vadd.f32 %v8392_v36, %v9950_v34  ;;  %v1995_v57 = vadd.f32 %v8450_v22, %v1898_v8  ;;  %v8401_v63 = vadd.f32 %v9991_v7, %v9987_v54  ;;  %v14637_v54 = vld [vmem:[#allocation35_spill] sm:$0xff]  ;;  %v14638_v7 = vld [vmem:[#allocation37_spill] sm:$0xff] }
 0x37f   :  { %14633 = vst [vmem:[#allocation47_spill] sm:$0xff] %v10021_v28  ;;  %v10029_v28 = vpop.f32.mrf.mxu0  ;;  %v1984_v0 = vadd.f32 %v8441_v38, %v1887_v35  ;;  %v8456_v35 = vadd.f32 %v8455_v19, %v8454_v50  ;;  %v8404_v38 = vadd.f32 %v14636_v42, %v14635_v29 }
 0x380   :  { %v10023_v56 = vpop.f32.mrf.mxu1  ;;  %v2000_v48 = vadd.f32 %v8453_v6, %v1903_v14  ;;  %v14644_v6 = vld [vmem:[#allocation25_spill] sm:$0xff] }
 0x381   :  { %v10036_v55 = vpop.f32.mrf.mxu0  ;;  %v2003_v1 = vadd.f32 %v8456_v35, %v1906_v21  ;;  %v1919_v49 = vadd.f32 %v8401_v63, %v14644_v6  ;;  %v14645_v35 = vld [vmem:[#allocation40_spill] sm:$0xff]  ;;  %v14651_v63 = vld [vmem:[#allocation42_spill] sm:$0xff] }
 0x382   :  { %v8651_v20 = vpop.f32.mrf.mxu1 }
 0x383   :  { %v10038_v44 = vadd.f32 %v8651_v20, %v1984_v0  ;;  %v10057_v30 = vpop.f32.mrf.mxu0 }
 0x384   :  { %v2072_v15 = vpop.f32.mrf.mxu1 }
 0x385   :  { %v10034_v25 = vadd.f32 %v2072_v15, %v1976_v33  ;;  %v2161_v31 = vmul.f32 %v10038_v44, %v10038_v44  ;;  %v8476_v51 = vpop.f32.mrf.mxu0  ;;  %v14634_v15 = vld [vmem:[#allocation33_spill] sm:$0xff]  ;;  %v8465_v33 = vadd.f32 %v14638_v7, %v14637_v54  ;;  %v8474_v7 = vadd.f32 %v10036_v55, %v10029_v28  ;;  %v14657_v28 = vld [vmem:[#allocation31_spill] sm:$0xff] }
 0x386   :  { %v8652_v43 = vpop.f32.mrf.mxu1  ;;  %v8462_v20 = vadd.f32 %v14634_v15, %v9989_v60  ;;  %v14642_v60 = vld [vmem:[#allocation32_spill] sm:$0xff] }
 0x387   :  { %v2159_v12 = vmul.f32 %v10034_v25, %v10034_v25  ;;  %v10046_v62 = vadd.f32 %v8652_v43, %v1987_v46  ;;  %v14639_v43 = vld [vmem:[#allocation38_spill] sm:$0xff]  ;;  %v2016_v2 = vadd.f32 %v8465_v33, %v1919_v49  ;;  %v14654_v33 = vld [vmem:[#allocation47_spill] sm:$0xff] }
 0x388   :  { %v2075_v39 = vpop.f32.mrf.mxu1 }
 0x389   :  { %v10040_v5 = vadd.f32 %v2075_v39, %v1979_v53  ;;  %v2162_v34 = vmul.f32 %v10046_v62, %v10046_v62  ;;  %v14640_v53 = vld [vmem:[#allocation39_spill] sm:$0xff]  ;;  %v14641_v39 = vld [vmem:[#allocation30_spill] sm:$0xff] }
 0x38a   :  { %v8655_v17 = vpop.f32.mrf.mxu1  ;;  %v8407_v59 = vadd.f32 %v14640_v53, %v14639_v43  ;;  %v8352_v46 = vadd.f32 %v14642_v60, %v14641_v39  ;;  %v8416_v43 = vadd.f32 %v10023_v56, %v14654_v33  ;;  %v8477_v53 = vadd.f32 %v8476_v51, %v10057_v30  ;;  %v14655_v60 = vld [vmem:[#allocation29_spill] sm:$0xff] }
 0x38b   :  { %v2137_v32 = vadd.f32 %v10040_v5, %v10034_v25  ;;  %v2160_v9 = vmul.f32 %v10040_v5, %v10040_v5  ;;  %v10072_v47 = vadd.f32 %v8655_v17, %v2000_v48  ;;  %v14646_v17 = vld [vmem:[#allocation43_spill] sm:$0xff] }
 0x38c   :  { %v2088_v24 = vpop.f32.mrf.mxu1 }
 0x38d   :  { %v2138_v37 = vadd.f32 %v2137_v32, %v10038_v44  ;;  %v2175_v4 = vadd.f32 %v2160_v9, %v2159_v12  ;;  %v10062_v41 = vadd.f32 %v2088_v24, %v1992_v58  ;;  %v14643_v58 = vld [vmem:[#allocation24_spill] sm:$0xff]  ;;  %v8468_v12 = vadd.f32 %v14646_v17, %v14645_v35  ;;  %v8478_v9 = vpop.f32.mrf.mxu0  ;;  %v14647_v24 = vld [vmem:[#allocation26_spill] sm:$0xff] }
 0x38e   :  { %v8656_v26 = vpop.f32.mrf.mxu1  ;;  %v1914_v22 = vadd.f32 %v8398_v11, %v14643_v58  ;;  %v2165_v8 = vmul.f32 %v10072_v47, %v10072_v47  ;;  %v14650_v11 = vld [vmem:[#allocation41_spill] sm:$0xff]  ;;  %v1841_v58 = vadd.f32 %v8352_v46, %v14655_v60 }
 0x38f   :  { %v2176_v61 = vadd.f32 %v2175_v4, %v2161_v31  ;;  %v2139_v3 = vadd.f32 %v2138_v37, %v10046_v62  ;;  %v2163_v40 = vmul.f32 %v10062_v41, %v10062_v41  ;;  %v10087_v27 = vadd.f32 %v8656_v26, %v2003_v1  ;;  %v14648_v37 = vld [vmem:[#allocation46_spill] sm:$0xff]  ;;  %v8479_v29 = vpop.f32.mrf.mxu0 }
 0x390   :  { %v2091_v50 = vpop.f32.mrf.mxu1  ;;  %v1922_v31 = vadd.f32 %v8404_v38, %v14647_v24  ;;  %v8471_v4 = vadd.f32 %v10025_v10, %v14648_v37  ;;  %v2011_v26 = vadd.f32 %v8462_v20, %v1914_v22  ;;  %v14656_v22 = vld [vmem:[#allocation28_spill] sm:$0xff]  ;;  %v8480_v49 = vadd.f32 %v8479_v29, %v8478_v9 }
 0x391   :  { %v2140_v19 = vadd.f32 %v2139_v3, %v10062_v41  ;;  %v2177_v45 = vadd.f32 %v2176_v61, %v2162_v34  ;;  %v10077_v52 = vadd.f32 %v2091_v50, %v1995_v57  ;;  %v14649_v57 = vld [vmem:[#allocation27_spill] sm:$0xff]  ;;  %v2166_v61 = vmul.f32 %v10087_v27, %v10087_v27 }
 0x392   :  { %v8659_v16 = vpop.f32.mrf.mxu1  ;;  %v1927_v34 = vadd.f32 %v8407_v59, %v14649_v57  ;;  %v8410_v50 = vadd.f32 %v14651_v63, %v14650_v11  ;;  %v2019_v10 = vadd.f32 %v8468_v12, %v1922_v31  ;;  %v1938_v12 = vadd.f32 %v8416_v43, %v1841_v58 }
 0x393   :  { %v2178_v0 = vadd.f32 %v2177_v45, %v2163_v40  ;;  %v2141_v23 = vadd.f32 %v2140_v19, %v10077_v52  ;;  %v2164_v36 = vmul.f32 %v10077_v52, %v10077_v52  ;;  %v14653_v19 = vld [vmem:[#allocation45_spill] sm:$0xff]  ;;  %v10114_v45 = vadd.f32 %v8659_v16, %v2016_v2 }
 0x394   :  { %v2104_v32 = vpop.f32.mrf.mxu1  ;;  %v2024_v16 = vadd.f32 %v8471_v4, %v1927_v34  ;;  %v1930_v6 = vadd.f32 %v8410_v50, %v14656_v22  ;;  %v2035_v9 = vadd.f32 %v8480_v49, %v1938_v12  ;;  %v2136_v49 = vld [vmem:[%s14178_s8] sm:$0x1] }
 0x395   :  { %v2142_v14 = vadd.f32 %v2141_v23, %v10072_v47  ;;  %v2179_v21 = vadd.f32 %v2178_v0, %v2164_v36  ;;  %v10101_v13 = vadd.f32 %v2104_v32, %v2008_v18  ;;  %v14652_v18 = vld [vmem:[#allocation44_spill] sm:$0xff]  ;;  %v2169_v30 = vmul.f32 %v10114_v45, %v10114_v45 }
 0x396   :  { %v8660_v48 = vpop.f32.mrf.mxu1  ;;  %v8413_v40 = vadd.f32 %v14653_v19, %v14652_v18  ;;  %v2027_v24 = vadd.f32 %v8474_v7, %v1930_v6  ;;  %v2135_v6 = vld [vmem:[%s14177_s7] sm:$0x1] }
 0x397   :  { %v2180_v3 = vadd.f32 %v2179_v21, %v2165_v8  ;;  %v2143_v1 = vadd.f32 %v2142_v14, %v10087_v27  ;;  %v2167_v42 = vmul.f32 %v10101_v13, %v10101_v13  ;;  %v10126_v23 = vadd.f32 %v8660_v48, %v2019_v10 }
 0x398   :  { %v2107_v15 = vpop.f32.mrf.mxu1  ;;  %v1935_v55 = vadd.f32 %v8413_v40, %v14657_v28 }
 0x399   :  { %v2144_v20 = vadd.f32 %v2143_v1, %v10101_v13  ;;  %v2181_v38 = vadd.f32 %v2180_v3, %v2166_v61  ;;  %v10119_v54 = vadd.f32 %v2107_v15, %v2011_v26  ;;  %v2170_v14 = vmul.f32 %v10126_v23, %v10126_v23 }
 0x39a   :  { %v8663_v59 = vpop.f32.mrf.mxu1  ;;  %v2032_v32 = vadd.f32 %v8477_v53, %v1935_v55 }
 0x39b   :  { %v2182_v0 = vadd.f32 %v2181_v38, %v2167_v42  ;;  %v2145_v36 = vadd.f32 %v2144_v20, %v10119_v54  ;;  %v2168_v39 = vmul.f32 %v10119_v54, %v10119_v54 }
 0x39c   :  { %v2120_v56 = vpop.f32.mrf.mxu1  ;;  %v2129_v31 = vadd.f32 %v8663_v59, %v2032_v32 }
 0x39d   :  { %v2146_v51 = vadd.f32 %v2145_v36, %v10114_v45  ;;  %v2183_v35 = vadd.f32 %v2182_v0, %v2168_v39  ;;  %v2121_v17 = vadd.f32 %v2120_v56, %v2024_v16 }
 0x39e   :  { %v8664_v8 = vpop.f32.mrf.mxu1  ;;  %v2173_v1 = vmul.f32 %v2129_v31, %v2129_v31 }
 0x39f   :  { %v2184_v46 = vadd.f32 %v2183_v35, %v2169_v30  ;;  %v2147_v21 = vadd.f32 %v2146_v51, %v10126_v23  ;;  %v2171_v2 = vmul.f32 %v2121_v17, %v2121_v17  ;;  %v2132_v34 = vadd.f32 %v8664_v8, %v2035_v9  ;;  %v14658_v30 = vld [vmem:[#allocation23_spill] sm:$0xff] }
 0x3a0   :  { %v2123_v37 = vpop.f32.mrf.mxu1 }
 0x3a1   :  { %v2148_v4 = vadd.f32 %v2147_v21, %v2121_v17  ;;  %v2185_v48 = vadd.f32 %v2184_v46, %v2170_v14  ;;  %v2124_v26 = vadd.f32 %v2123_v37, %v2027_v24  ;;  %v2174_v50 = vmul.f32 %v2132_v34, %v2132_v34 }
 0x3a3   :  { %v2186_v57 = vadd.f32 %v2185_v48, %v2171_v2  ;;  %v2149_v61 = vadd.f32 %v2148_v4, %v2124_v26  ;;  %v2172_v3 = vmul.f32 %v2124_v26, %v2124_v26 }
 0x3a5   :  { %v2150_v11 = vadd.f32 %v2149_v61, %v2129_v31  ;;  %v2187_v63 = vadd.f32 %v2186_v57, %v2172_v3 }
 0x3a7   :  { %v2151_v18 = vadd.f32 %v2150_v11, %v2132_v34  ;;  %v2188_v19 = vadd.f32 %v2187_v63, %v2173_v1 }
 0x3a9   :  { %v2152_v40 = vrot.slane %v2151_v18, 4  ;;  %v2189_v10 = vadd.f32 %v2188_v19, %v2174_v50 }
 0x3ab   :  { %v2153_v15 = vadd.f32 %v2152_v40, %v2151_v18  ;;  %v2190_v29 = vrot.slane %v2189_v10, 4 }
 0x3ad   :  { %v2154_v20 = vrot.slane %v2153_v15, 2  ;;  %v2191_v42 = vadd.f32 %v2190_v29, %v2189_v10 }
 0x3af   :  { %v2155_v38 = vadd.f32 %v2154_v20, %v2153_v15  ;;  %v2192_v7 = vrot.slane %v2191_v42, 2 }
 0x3b1   :  { %v2156_v33 = vrot.slane %v2155_v38, 1  ;;  %v2193_v43 = vadd.f32 %v2192_v7, %v2191_v42 }
 0x3b3   :  { %v2157_v53 = vadd.f32 %v2156_v33, %v2155_v38  ;;  %v2194_v59 = vrot.slane %v2193_v43, 1 }
 0x3b5   :  { %v2158_v16 = vmul.f32 0.0078125, %v2157_v53  ;;  %v2195_v0 = vadd.f32 %v2194_v59, %v2193_v43 }
 0x3b7   :  { %v2196_v36 = vmul.f32 0.0078125, %v2195_v0  ;;  %v2197_v39 = vmul.f32 %v2158_v16, %v2158_v16 }
 0x3b9   :  { %v2198_v60 = vsub.f32 %v2196_v36, %v2197_v39 }
 0x3bb   :  { %v2199_v58 = vmax.f32 %v2198_v60, 0.0 }
 0x3bd   :  { %v2200_v22 = vadd.f32 0.8, %v2199_v58 }
 0x3bf   :  { %8959 = vrsqrt.f32 %v2200_v22 }
 0x3cc   :  { %v8960_v28 = vpop.eup %8959 }
 0x3cd   :  { %v2202_v55 = vmul.f32 %v8960_v28, %v2135_v6 }
 0x3cf   :  { %v2203_v56 = vmul.f32 %v2202_v55, %v2158_v16  ;;  %v2209_v51 = vrot.slane %v2202_v55, %v14658_v30 }
 0x3d1   :  { %v2204_v35 = vsub.f32 %v2136_v49, %v2203_v56  ;;  %v2211_v12 = vmul.f32 %v2209_v51, %v10034_v25  ;;  %v2212_v32 = vmul.f32 %v2209_v51, %v10040_v5  ;;  %v2216_v8 = vmul.f32 %v2209_v51, %v10077_v52 }
 0x3d2   :  { %v2217_v14 = vmul.f32 %v2209_v51, %v10072_v47  ;;  %v2218_v46 = vmul.f32 %v2209_v51, %v10087_v27  ;;  %v2219_v21 = vmul.f32 %v2209_v51, %v10101_v13  ;;  %v2220_v24 = vmul.f32 %v2209_v51, %v10119_v54 }
 0x3d3   :  { %v2221_v9 = vmul.f32 %v2209_v51, %v10114_v45  ;;  %v2222_v37 = vmul.f32 %v2209_v51, %v10126_v23  ;;  %v2223_v4 = vmul.f32 %v2209_v51, %v2121_v17  ;;  %v2224_v2 = vmul.f32 %v2209_v51, %v2124_v26 }
 0x3d4   :  { %v2225_v48 = vmul.f32 %v2209_v51, %v2129_v31  ;;  %v2213_v25 = vmul.f32 %v2209_v51, %v10038_v44  ;;  %v2214_v5 = vmul.f32 %v2209_v51, %v10046_v62  ;;  %v2226_v52 = vmul.f32 %v2209_v51, %v2132_v34 }
 0x3d5   :  { %v2231_v47 = vrot.slane %v2204_v35, %v14658_v30  ;;  %v2215_v27 = vmul.f32 %v2209_v51, %v10062_v41 }
 0x3d7   :  { %v2233_v57 = vadd.f32 %v2231_v47, %v2211_v12  ;;  %v2234_v13 = vadd.f32 %v2231_v47, %v2212_v32  ;;  %v2235_v61 = vadd.f32 %v2231_v47, %v2213_v25  ;;  %v2236_v54 = vadd.f32 %v2231_v47, %v2214_v5 }
 0x3d8   :  { %v2237_v3 = vadd.f32 %v2231_v47, %v2215_v27  ;;  %v2238_v45 = vadd.f32 %v2231_v47, %v2216_v8  ;;  %v2239_v1 = vadd.f32 %v2231_v47, %v2217_v14  ;;  %v2240_v23 = vadd.f32 %v2231_v47, %v2218_v46 }
 0x3d9   :  { %v2241_v17 = vadd.f32 %v2231_v47, %v2219_v21  ;;  %v2242_v26 = vadd.f32 %v2231_v47, %v2220_v24  ;;  %v2243_v31 = vadd.f32 %v2231_v47, %v2221_v9  ;;  %v2244_v11 = vadd.f32 %v2231_v47, %v2222_v37 }
 0x3da   :  { %v2245_v44 = vadd.f32 %v2231_v47, %v2223_v4  ;;  %v2246_v63 = vadd.f32 %v2231_v47, %v2224_v2  ;;  %v2247_v62 = vadd.f32 %v2231_v47, %v2225_v48  ;;  %v2248_v34 = vadd.f32 %v2231_v47, %v2226_v52 }
 0x3db   :  { %vm2249_vm1 = vcmp.gt.f32.partialorder %v2233_v57, 0.0  ;;  %vm2250_vm2 = vcmp.gt.f32.partialorder %v2234_v13, 0.0  ;;  %vm2251_vm3 = vcmp.gt.f32.partialorder %v2235_v61, 0.0  ;;  %vm2252_vm4 = vcmp.gt.f32.partialorder %v2236_v54, 0.0 }
 0x3dc   :  { %vm2253_vm5 = vcmp.gt.f32.partialorder %v2237_v3, 0.0  ;;  %vm2254_vm6 = vcmp.gt.f32.partialorder %v2238_v45, 0.0  ;;  %vm2255_vm7 = vcmp.gt.f32.partialorder %v2239_v1, 0.0  ;;  %vm2256_vm8 = vcmp.gt.f32.partialorder %v2240_v23, 0.0 }
 0x3dd   :  { %vm2257_vm9 = vcmp.gt.f32.partialorder %v2241_v17, 0.0  ;;  %vm2258_vm10 = vcmp.gt.f32.partialorder %v2242_v26, 0.0  ;;  %vm2259_vm11 = vcmp.gt.f32.partialorder %v2243_v31, 0.0  ;;  %vm2260_vm12 = vcmp.gt.f32.partialorder %v2244_v11, 0.0 }
 0x3de   :  { %vm2261_vm13 = vcmp.gt.f32.partialorder %v2245_v44, 0.0  ;;  %vm2262_vm14 = vcmp.gt.f32.partialorder %v2246_v63, 0.0  ;;  %vm2263_vm15 = vcmp.gt.f32.partialorder %v2247_v62, 0.0  ;;  %vm2264_vm0 = vcmp.gt.f32.partialorder %v2248_v34, 0.0 }
 0x3df   :  { %v2265_v41 = vmul.f32 0.2, %v2233_v57  ;;  %v2266_v50 = vmul.f32 0.2, %v2234_v13  ;;  %v2267_v18 = vmul.f32 0.2, %v2235_v61 }
 0x3e0   :  { %v2268_v19 = vmul.f32 0.2, %v2236_v54  ;;  %v2269_v40 = vmul.f32 0.2, %v2237_v3  ;;  %v2270_v10 = vmul.f32 0.2, %v2238_v45 }
 0x3e1   :  { %v2271_v15 = vmul.f32 0.2, %v2239_v1  ;;  %v2272_v29 = vmul.f32 0.2, %v2240_v23  ;;  %v2273_v20 = vmul.f32 0.2, %v2241_v17  ;;  %v10161_v42 = vsel %vm2249_vm1, %v2233_v57, %v2265_v41 }
 0x3e2   :  { %v2274_v38 = vmul.f32 0.2, %v2242_v26  ;;  %v2275_v7 = vmul.f32 0.2, %v2243_v31  ;;  %v2276_v33 = vmul.f32 0.2, %v2244_v11  ;;  %v10164_v43 = vsel %vm2250_vm2, %v2234_v13, %v2266_v50 }
 0x3e3   :  { %v2277_v53 = vmul.f32 0.2, %v2245_v44  ;;  %v2278_v59 = vmul.f32 0.2, %v2246_v63  ;;  %v2279_v16 = vmul.f32 0.2, %v2247_v62  ;;  %v10167_v0 = vsel %vm2251_vm3, %v2235_v61, %v2267_v18 }
 0x3e4   :  { %v2280_v36 = vmul.f32 0.2, %v2248_v34  ;;  %v10170_v39 = vsel %vm2252_vm4, %v2236_v54, %v2268_v19  ;;  %v10173_v60 = vsel %vm2253_vm5, %v2237_v3, %v2269_v40  ;;  %v10176_v58 = vsel %vm2254_vm6, %v2238_v45, %v2270_v10 }
 0x3e5   :  { %v2287_v22 = vsel %vm2255_vm7, %v2239_v1, %v2271_v15  ;;  %v2288_v6 = vsel %vm2256_vm8, %v2240_v23, %v2272_v29  ;;  %v2289_v28 = vsel %vm2257_vm9, %v2241_v17, %v2273_v20  ;;  %v2290_v55 = vsel %vm2258_vm10, %v2242_v26, %v2274_v38 }
 0x3e6   :  { %v2291_v49 = vsel %vm2259_vm11, %v2243_v31, %v2275_v7  ;;  %v2292_v56 = vsel %vm2260_vm12, %v2244_v11, %v2276_v33  ;;  %v2293_v51 = vsel %vm2261_vm13, %v2245_v44, %v2277_v53  ;;  %v2294_v35 = vsel %vm2262_vm14, %v2246_v63, %v2278_v59 }
 0x3e7   :  { %v2295_v12 = vsel %vm2263_vm15, %v2247_v62, %v2279_v16  ;;  %v2296_v32 = vsel %vm2264_vm0, %v2248_v34, %v2280_v36  ;;  %v2460_v14 = vpack.c.bf16 %v2294_v35, %v2293_v51 }
 0x3e8   :  { %v2461_v8 = vpack.c.bf16 %v2296_v32, %v2295_v12 }
 0x3e9   :  { %9147 = dma.done.wait [#allocation5], 4096 }
 0x3ea   :  { %9148 = vsyncadd [#allocation5], 4294963200  ;;  %8665 = vmatprep.subr.bf16.mxu0 %v2461_v8  ;;  %v2459_v46 = vpack.c.bf16 %v2292_v56, %v2291_v49  ;;  %v10188_v21 = vld [vmem:[#allocation7 + $0x7] sm:$0xff]  ;;  %v10190_v24 = vld [vmem:[#allocation7 + $0xf] sm:$0xff]  ;;  %v2458_v37 = vpack.c.bf16 %v2290_v55, %v2289_v28  ;;  %v2457_v31 = vpack.c.bf16 %v2288_v6, %v2287_v22  ;;  %v2456_v33 = vpack.c.bf16 %v10176_v58, %v10173_v60 }
 0x3eb   :  { %8666 = vmatpush3.bf16.msra.mxu0 %v2461_v8  ;;  %v10192_v9 = vld [vmem:[#allocation7 + $0x247] sm:$0xff]  ;;  %v10194_v4 = vld [vmem:[#allocation7 + $0x24f] sm:$0xff]  ;;  %v8961_v7 = vld [vmem:[#allocation2] sm:$0xff]   ;;  %v2455_v53 = vpack.c.bf16 %v10170_v39, %v10167_v0  ;;  %v2454_v59 = vpack.c.bf16 %v10164_v43, %v10161_v42 }
 0x3ec   :  { %8667 = vmatprep.subr.bf16.mxu0 %v2460_v14  ;;  %14659 = vst [vmem:[#allocation33_spill] sm:$0xff] %v10192_v9  ;;  %14660 = vst [vmem:[#allocation34_spill] sm:$0xff] %v10194_v4  ;;  %v10198_v48 = vld [vmem:[#allocation7 + $0x8] sm:$0xff]  ;;  %v10200_v25 = vld [vmem:[#allocation7 + $0x10] sm:$0xff]  ;;  %8681 = vmatprep.mubr.bf16.mxu0 %v8961_v7 }
 0x3ed   :  { %v10204_v52 = vld [vmem:[#allocation7 + $0x248] sm:$0xff]  ;;  %v10206_v47 = vld [vmem:[#allocation7 + $0x250] sm:$0xff]  ;;  %v8965_v60 = vld [vmem:[#allocation2 + $0x20] sm:$0xff]  }
 0x3ee   :  { %14661 = vst [vmem:[#allocation36_spill] sm:$0xff] %v10204_v52  ;;  %14662 = vst [vmem:[#allocation35_spill] sm:$0xff] %v10206_v47  ;;  %v10210_v57 = vld [vmem:[#allocation7 + $0x9] sm:$0xff]  ;;  %v10214_v61 = vld [vmem:[#allocation7 + $0x11] sm:$0xff] }
 0x3ef   :  { %8668 = vmatpush3.bf16.msra.mxu0 %v2460_v14  ;;  %v10216_v54 = vld [vmem:[#allocation7 + $0x249] sm:$0xff]  ;;  %v10218_v3 = vld [vmem:[#allocation7 + $0x251] sm:$0xff]  ;;  %v8969_v39 = vld [vmem:[#allocation2 + $0x40] sm:$0xff]  }
 0x3f0   :  { %8669 = vmatprep.subr.bf16.mxu0 %v2459_v46  ;;  %14663 = vst [vmem:[#allocation37_spill] sm:$0xff] %v10216_v54  ;;  %14664 = vst [vmem:[#allocation38_spill] sm:$0xff] %v10218_v3  ;;  %v10224_v23 = vld [vmem:[#allocation7 + $0x227] sm:$0xff]  ;;  %v10226_v17 = vld [vmem:[#allocation7 + $0x22f] sm:$0xff] }
 0x3f1   :  { %14665 = vst [vmem:[#allocation39_spill] sm:$0xff] %v10224_v23  ;;  %14666 = vst [vmem:[#allocation30_spill] sm:$0xff] %v10226_v17  ;;  %v10228_v26 = vld [vmem:[#allocation7 + $0x467] sm:$0xff]  ;;  %v10230_v11 = vld [vmem:[#allocation7 + $0x46f] sm:$0xff] }
 0x3f2   :  { %14667 = vst [vmem:[#allocation32_spill] sm:$0xff] %v10228_v26  ;;  %14668 = vst [vmem:[#allocation24_spill] sm:$0xff] %v10230_v11  ;;  %v10234_v63 = vld [vmem:[#allocation7 + $0x228] sm:$0xff]  ;;  %v10236_v62 = vld [vmem:[#allocation7 + $0x230] sm:$0xff] }
 0x3f3   :  { %8670 = vmatpush3.bf16.msra.mxu0 %v2459_v46  ;;  %14669 = vst [vmem:[#allocation25_spill] sm:$0xff] %v10234_v63  ;;  %14670 = vst [vmem:[#allocation40_spill] sm:$0xff] %v10236_v62  ;;  %v10240_v41 = vld [vmem:[#allocation7 + $0x468] sm:$0xff]  ;;  %v10242_v50 = vld [vmem:[#allocation7 + $0x470] sm:$0xff] }
 0x3f4   :  { %8671 = vmatprep.subr.bf16.mxu0 %v2458_v37  ;;  %14671 = vst [vmem:[#allocation43_spill] sm:$0xff] %v10240_v41  ;;  %14672 = vst [vmem:[#allocation26_spill] sm:$0xff] %v10242_v50  ;;  %v10246_v19 = vld [vmem:[#allocation7 + $0x229] sm:$0xff]  ;;  %v10250_v10 = vld [vmem:[#allocation7 + $0x231] sm:$0xff] }
 0x3f5   :  { %14673 = vst [vmem:[#allocation46_spill] sm:$0xff] %v10246_v19  ;;  %14674 = vst [vmem:[#allocation27_spill] sm:$0xff] %v10250_v10  ;;  %v10252_v15 = vld [vmem:[#allocation7 + $0x469] sm:$0xff]  ;;  %v10254_v29 = vld [vmem:[#allocation7 + $0x471] sm:$0xff] }
 0x3f6   :  { %14675 = vst [vmem:[#allocation41_spill] sm:$0xff] %v10252_v15  ;;  %14676 = vst [vmem:[#allocation42_spill] sm:$0xff] %v10254_v29  ;;  %v8962_v16 = vld [vmem:[#allocation2 + $0x8] sm:$0xff]   ;;  %v8963_v36 = vld [vmem:[#allocation2 + $0x10] sm:$0xff]  }
 0x3f7   :  { %8672 = vmatpush3.bf16.msra.mxu0 %v2458_v37  ;;  %v8964_v22 = vld [vmem:[#allocation2 + $0x18] sm:$0xff]   ;;  %v8966_v58 = vld [vmem:[#allocation2 + $0x28] sm:$0xff]   ;;  %v8967_v6 = vld [vmem:[#allocation2 + $0x30] sm:$0xff]  }
 0x3f8   :  { %8673 = vmatprep.subr.bf16.mxu0 %v2457_v31  ;;  %v8968_v0 = vld [vmem:[#allocation2 + $0x38] sm:$0xff]   ;;  %v8970_v42 = vld [vmem:[#allocation2 + $0x48] sm:$0xff]   ;;  %v8971_v43 = vld [vmem:[#allocation2 + $0x50] sm:$0xff]  }
 0x3f9   :  { %v8972_v28 = vld [vmem:[#allocation2 + $0x58] sm:$0xff]   ;;  %v8973_v55 = vld [vmem:[#allocation2 + $0x60] sm:$0xff]   ;;  %v8974_v49 = vld [vmem:[#allocation2 + $0x68] sm:$0xff]  }
 0x3fa   :  { %v8975_v56 = vld [vmem:[#allocation2 + $0x70] sm:$0xff]   ;;  %v8976_v51 = vld [vmem:[#allocation2 + $0x78] sm:$0xff]   ;;  %v8977_v35 = vld [vmem:[#allocation2 + $0x80] sm:$0xff]  }
 0x3fb   :  { %8674 = vmatpush3.bf16.msra.mxu0 %v2457_v31  ;;  %v8978_v12 = vld [vmem:[#allocation2 + $0x88] sm:$0xff]   ;;  %v8979_v32 = vld [vmem:[#allocation2 + $0x90] sm:$0xff]   ;;  %v8980_v8 = vld [vmem:[#allocation2 + $0x98] sm:$0xff]  }
 0x3fc   :  { %8675 = vmatprep.subr.bf16.mxu0 %v2456_v33  ;;  %v8981_v14 = vld [vmem:[#allocation2 + $0xa0] sm:$0xff]   ;;  %v8982_v46 = vld [vmem:[#allocation2 + $0xa8] sm:$0xff]   ;;  %v8983_v37 = vld [vmem:[#allocation2 + $0xb0] sm:$0xff]  }
 0x3fd   :  { %v8984_v31 = vld [vmem:[#allocation2 + $0xb8] sm:$0xff]   ;;  %v8985_v7 = vld [vmem:[#allocation2 + $0xc0] sm:$0xff]  }
 0x3ff   :  { %8676 = vmatpush3.bf16.msra.mxu0 %v2456_v33  ;;  %v8986_v33 = vld [vmem:[#allocation2 + $0xc8] sm:$0xff]  }
 0x400   :  { %8677 = vmatprep.subr.bf16.mxu0 %v2455_v53 }
 0x403   :  { %8678 = vmatpush3.bf16.msra.mxu0 %v2455_v53  ;;  %v8987_v53 = vld [vmem:[#allocation2 + $0xd0] sm:$0xff]  }
 0x404   :  { %8679 = vmatprep.subr.bf16.mxu0 %v2454_v59 }
 0x407   :  { %8680 = vmatpush3.bf16.msra.mxu0 %v2454_v59  ;;  %v8988_v59 = vld [vmem:[#allocation2 + $0xd8] sm:$0xff]  }
 0x40a   :  { %8682 = vmatmul.mubr.bf16.vlgmr.msra.gmra.mxu0 %v8962_v16  ;;  %v8989_v16 = vld [vmem:[#allocation2 + $0xe0] sm:$0xff]  }
 0x40b   :  { %8685 = vmatprep.mubr.bf16.mxu0 %v8963_v36  ;;  %v8990_v36 = vld [vmem:[#allocation2 + $0xe8] sm:$0xff]  }
 0x412   :  { %8686 = vmatmul.mubr.bf16.gmra.mxu0 %v8964_v22  ;;  %v8991_v22 = vld [vmem:[#allocation2 + $0xf0] sm:$0xff]  }
 0x413   :  { %8689 = vmatprep.mubr.bf16.mxu0 %v8965_v60  ;;  %v8992_v60 = vld [vmem:[#allocation2 + $0xf8] sm:$0xff]  }
 0x41a   :  { %8690 = vmatmul.mubr.bf16.gmra.mxu0 %v8966_v58 }
 0x41b   :  { %8693 = vmatprep.mubr.bf16.mxu0 %v8967_v6 }
 0x422   :  { %8694 = vmatmul.mubr.bf16.gmra.mxu0 %v8968_v0 }
 0x423   :  { %8697 = vmatprep.mubr.bf16.mxu0 %v8969_v39 }
 0x42a   :  { %8698 = vmatmul.mubr.bf16.gmra.mxu0 %v8970_v42 }
 0x42b   :  { %8701 = vmatprep.mubr.bf16.mxu0 %v8971_v43 }
 0x432   :  { %8702 = vmatmul.mubr.bf16.gmra.mxu0 %v8972_v28 }
 0x433   :  { %8705 = vmatprep.mubr.bf16.mxu0 %v8973_v55 }
 0x43a   :  { %8706 = vmatmul.mubr.bf16.gmra.mxu0 %v8974_v49 }
 0x43b   :  { %8709 = vmatprep.mubr.bf16.mxu0 %v8975_v56 }
 0x442   :  { %8710 = vmatmul.mubr.bf16.gmra.mxu0 %v8976_v51 }
 0x443   :  { %8713 = vmatprep.mubr.bf16.mxu0 %v8977_v35 }
 0x44a   :  { %8714 = vmatmul.mubr.bf16.gmra.mxu0 %v8978_v12 }
 0x44b   :  { %8717 = vmatprep.mubr.bf16.mxu0 %v8979_v32 }
 0x452   :  { %8718 = vmatmul.mubr.bf16.gmra.mxu0 %v8980_v8 }
 0x453   :  { %8721 = vmatprep.mubr.bf16.mxu0 %v8981_v14 }
 0x45a   :  { %8722 = vmatmul.mubr.bf16.gmra.mxu0 %v8982_v46 }
 0x45b   :  { %8725 = vmatprep.mubr.bf16.mxu0 %v8983_v37 }
 0x462   :  { %8726 = vmatmul.mubr.bf16.gmra.mxu0 %v8984_v31 }
 0x463   :  { %8729 = vmatprep.mubr.bf16.mxu0 %v8985_v7 }
 0x46a   :  { %8730 = vmatmul.mubr.bf16.gmra.mxu0 %v8986_v33 }
 0x46b   :  { %8733 = vmatprep.mubr.bf16.mxu0 %v8987_v53 }
 0x472   :  { %8734 = vmatmul.mubr.bf16.gmra.mxu0 %v8988_v59 }
 0x473   :  { %8737 = vmatprep.mubr.bf16.mxu0 %v8989_v16 }
 0x47a   :  { %8738 = vmatmul.mubr.bf16.gmra.mxu0 %v8990_v36 }
 0x47b   :  { %8741 = vmatprep.mubr.bf16.mxu0 %v8991_v22 }
 0x482   :  { %8742 = vmatmul.mubr.bf16.gmra.mxu0 %v8992_v60 }
 0x4ca   :  { %v8683_v58 = vpop.f32.mrf.mxu0 }
 0x4cb   :  { %2946 = vst [vmem:[#allocation7 + $0x48] sm:$0xff] %v8683_v58 }
 0x4cc   :  { %v2688_v6 = vpop.f32.mrf.mxu0 }
 0x4cd   :  { %2944 = vst [vmem:[#allocation7 + $0x28] sm:$0xff] %v2688_v6 }
 0x4ce   :  { %v8684_v0 = vpop.f32.mrf.mxu0 }
 0x4cf   :  { %2947 = vst [vmem:[#allocation7 + $0x50] sm:$0xff] %v8684_v0  ;;  %v10266_v39 = vpack.c.bf16 %v8684_v0, %v8683_v58 }
 0x4d0   :  { %v2691_v42 = vpop.f32.mrf.mxu0 }
 0x4d1   :  { %2945 = vst [vmem:[#allocation7 + $0x30] sm:$0xff] %v2691_v42  ;;  %v10268_v43 = vpack.c.bf16 %v2691_v42, %v2688_v6 }
 0x4d2   :  { %v8687_v28 = vpop.f32.mrf.mxu0  ;;  %v3012_v49 = vld [vmem:[#allocation7 + $0x47] sm:$0xff] }
 0x4d3   :  { %2950 = vst [vmem:[#allocation7 + $0x88] sm:$0xff] %v8687_v28 }
 0x4d4   :  { %v2704_v55 = vpop.f32.mrf.mxu0  ;;  %v3010_v32 = vld [vmem:[#allocation7 + $0x27] sm:$0xff] }
 0x4d5   :  { %2948 = vst [vmem:[#allocation7 + $0x68] sm:$0xff] %v2704_v55 }
 0x4d6   :  { %v3013_v56 = vld [vmem:[#allocation7 + $0x4f] sm:$0xff]  ;;  %v8688_v12 = vpop.f32.mrf.mxu0 }
 0x4d7   :  { %v3204_v51 = vld [vmem:[#allocation7 + $0x49] sm:$0xff]  ;;  %v3205_v35 = vld [vmem:[#allocation7 + $0x51] sm:$0xff]  ;;  %v10270_v8 = vpack.c.bf16 %v3013_v56, %v3012_v49  ;;  %2951 = vst [vmem:[#allocation7 + $0x90] sm:$0xff] %v8688_v12  ;;  %v10274_v46 = vpack.c.bf16 %v8688_v12, %v8687_v28 }
 0x4d8   :  { %v10272_v14 = vpack.c.bf16 %v3205_v35, %v3204_v51  ;;  %v3011_v37 = vld [vmem:[#allocation7 + $0x2f] sm:$0xff]  ;;  %v2707_v33 = vpop.f32.mrf.mxu0 }
 0x4d9   :  { %v3202_v31 = vld [vmem:[#allocation7 + $0x29] sm:$0xff]  ;;  %v3203_v7 = vld [vmem:[#allocation7 + $0x31] sm:$0xff]  ;;  %v10276_v53 = vpack.c.bf16 %v3011_v37, %v3010_v32  ;;  %2949 = vst [vmem:[#allocation7 + $0x70] sm:$0xff] %v2707_v33  ;;  %v10280_v16 = vpack.c.bf16 %v2707_v33, %v2704_v55 }
 0x4da   :  { %v10278_v59 = vpack.c.bf16 %v3203_v7, %v3202_v31  ;;  %v8691_v36 = vpop.f32.mrf.mxu0  ;;  %v3016_v60 = vld [vmem:[#allocation7 + $0x87] sm:$0xff] }
 0x4db   :  { %2954 = vst [vmem:[#allocation7 + $0xc8] sm:$0xff] %v8691_v36 }
 0x4dc   :  { %v2720_v22 = vpop.f32.mrf.mxu0  ;;  %v3014_v28 = vld [vmem:[#allocation7 + $0x67] sm:$0xff] }
 0x4dd   :  { %2952 = vst [vmem:[#allocation7 + $0xa8] sm:$0xff] %v2720_v22 }
 0x4de   :  { %v3017_v58 = vld [vmem:[#allocation7 + $0x8f] sm:$0xff]  ;;  %v8692_v42 = vpop.f32.mrf.mxu0 }
 0x4df   :  { %v3208_v6 = vld [vmem:[#allocation7 + $0x89] sm:$0xff]  ;;  %v3209_v0 = vld [vmem:[#allocation7 + $0x91] sm:$0xff]  ;;  %v10282_v49 = vpack.c.bf16 %v3017_v58, %v3016_v60  ;;  %2955 = vst [vmem:[#allocation7 + $0xd0] sm:$0xff] %v8692_v42  ;;  %v10286_v51 = vpack.c.bf16 %v8692_v42, %v8691_v36 }
 0x4e0   :  { %v10284_v56 = vpack.c.bf16 %v3209_v0, %v3208_v6  ;;  %v3015_v35 = vld [vmem:[#allocation7 + $0x6f] sm:$0xff]  ;;  %v2723_v32 = vpop.f32.mrf.mxu0 }
 0x4e1   :  { %v3206_v55 = vld [vmem:[#allocation7 + $0x69] sm:$0xff]  ;;  %v3207_v12 = vld [vmem:[#allocation7 + $0x71] sm:$0xff]  ;;  %v10288_v37 = vpack.c.bf16 %v3015_v35, %v3014_v28  ;;  %2953 = vst [vmem:[#allocation7 + $0xb0] sm:$0xff] %v2723_v32  ;;  %v10292_v7 = vpack.c.bf16 %v2723_v32, %v2720_v22 }
 0x4e2   :  { %v10290_v31 = vpack.c.bf16 %v3207_v12, %v3206_v55  ;;  %v8695_v33 = vpop.f32.mrf.mxu0  ;;  %v3020_v58 = vld [vmem:[#allocation7 + $0xc7] sm:$0xff] }
 0x4e3   :  { %2958 = vst [vmem:[#allocation7 + $0x108] sm:$0xff] %v8695_v33 }
 0x4e4   :  { %v2736_v60 = vpop.f32.mrf.mxu0  ;;  %v3018_v38 = vld [vmem:[#allocation7 + $0xa7] sm:$0xff] }
 0x4e5   :  { %2956 = vst [vmem:[#allocation7 + $0xe8] sm:$0xff] %v2736_v60 }
 0x4e6   :  { %v3021_v6 = vld [vmem:[#allocation7 + $0xcf] sm:$0xff]  ;;  %v8696_v42 = vpop.f32.mrf.mxu0 }
 0x4e7   :  { %v3212_v0 = vld [vmem:[#allocation7 + $0xc9] sm:$0xff]  ;;  %v3213_v36 = vld [vmem:[#allocation7 + $0xd1] sm:$0xff]  ;;  %v10294_v20 = vpack.c.bf16 %v3021_v6, %v3020_v58  ;;  %2959 = vst [vmem:[#allocation7 + $0x110] sm:$0xff] %v8696_v42  ;;  %v10298_v28 = vpack.c.bf16 %v8696_v42, %v8695_v33 }
 0x4e8   :  { %v10296_v34 = vpack.c.bf16 %v3213_v36, %v3212_v0  ;;  %v3019_v35 = vld [vmem:[#allocation7 + $0xaf] sm:$0xff]  ;;  %v2739_v12 = vpop.f32.mrf.mxu0 }
 0x4e9   :  { %v3210_v22 = vld [vmem:[#allocation7 + $0xa9] sm:$0xff]  ;;  %v3211_v55 = vld [vmem:[#allocation7 + $0xb1] sm:$0xff]  ;;  %v10300_v32 = vpack.c.bf16 %v3019_v35, %v3018_v38  ;;  %2957 = vst [vmem:[#allocation7 + $0xf0] sm:$0xff] %v2739_v12  ;;  %v10304_v44 = vpack.c.bf16 %v2739_v12, %v2736_v60 }
 0x4ea   :  { %v10302_v40 = vpack.c.bf16 %v3211_v55, %v3210_v22  ;;  %v8699_v18 = vpop.f32.mrf.mxu0  ;;  %v3024_v6 = vld [vmem:[#allocation7 + $0x107] sm:$0xff] }
 0x4eb   :  { %2962 = vst [vmem:[#allocation7 + $0x148] sm:$0xff] %v8699_v18 }
 0x4ec   :  { %v2752_v58 = vpop.f32.mrf.mxu0  ;;  %v3022_v1 = vld [vmem:[#allocation7 + $0xe7] sm:$0xff] }
 0x4ed   :  { %2960 = vst [vmem:[#allocation7 + $0x128] sm:$0xff] %v2752_v58 }
 0x4ee   :  { %v3025_v0 = vld [vmem:[#allocation7 + $0x10f] sm:$0xff]  ;;  %v8700_v42 = vpop.f32.mrf.mxu0 }
 0x4ef   :  { %v3216_v36 = vld [vmem:[#allocation7 + $0x109] sm:$0xff]  ;;  %v3217_v33 = vld [vmem:[#allocation7 + $0x111] sm:$0xff]  ;;  %v10306_v5 = vpack.c.bf16 %v3025_v0, %v3024_v6  ;;  %2963 = vst [vmem:[#allocation7 + $0x150] sm:$0xff] %v8700_v42  ;;  %v10310_v38 = vpack.c.bf16 %v8700_v42, %v8699_v18 }
 0x4f0   :  { %v10308_v13 = vpack.c.bf16 %v3217_v33, %v3216_v36  ;;  %v3023_v35 = vld [vmem:[#allocation7 + $0xef] sm:$0xff]  ;;  %v2755_v55 = vpop.f32.mrf.mxu0 }
 0x4f1   :  { %v3214_v60 = vld [vmem:[#allocation7 + $0xe9] sm:$0xff]  ;;  %v3215_v22 = vld [vmem:[#allocation7 + $0xf1] sm:$0xff]  ;;  %v10312_v12 = vpack.c.bf16 %v3023_v35, %v3022_v1  ;;  %2961 = vst [vmem:[#allocation7 + $0x130] sm:$0xff] %v2755_v55  ;;  %v10316_v2 = vpack.c.bf16 %v2755_v55, %v2752_v58 }
 0x4f2   :  { %v10314_v45 = vpack.c.bf16 %v3215_v22, %v3214_v60  ;;  %v8703_v27 = vpop.f32.mrf.mxu0  ;;  %v3028_v0 = vld [vmem:[#allocation7 + $0x147] sm:$0xff] }
 0x4f3   :  { %2966 = vst [vmem:[#allocation7 + $0x188] sm:$0xff] %v8703_v27 }
 0x4f4   :  { %v2768_v6 = vpop.f32.mrf.mxu0  ;;  %v3026_v30 = vld [vmem:[#allocation7 + $0x127] sm:$0xff] }
 0x4f5   :  { %2964 = vst [vmem:[#allocation7 + $0x168] sm:$0xff] %v2768_v6 }
 0x4f6   :  { %v3029_v36 = vld [vmem:[#allocation7 + $0x14f] sm:$0xff]  ;;  %v8704_v42 = vpop.f32.mrf.mxu0 }
 0x4f7   :  { %v3220_v33 = vld [vmem:[#allocation7 + $0x149] sm:$0xff]  ;;  %v3221_v18 = vld [vmem:[#allocation7 + $0x151] sm:$0xff]  ;;  %v10318_v15 = vpack.c.bf16 %v3029_v36, %v3028_v0  ;;  %2967 = vst [vmem:[#allocation7 + $0x190] sm:$0xff] %v8704_v42  ;;  %v10322_v1 = vpack.c.bf16 %v8704_v42, %v8703_v27 }
 0x4f8   :  { %v10320_v29 = vpack.c.bf16 %v3221_v18, %v3220_v33  ;;  %v3027_v35 = vld [vmem:[#allocation7 + $0x12f] sm:$0xff]  ;;  %v2771_v22 = vpop.f32.mrf.mxu0 }
 0x4f9   :  { %v3218_v58 = vld [vmem:[#allocation7 + $0x129] sm:$0xff]  ;;  %v3219_v60 = vld [vmem:[#allocation7 + $0x131] sm:$0xff]  ;;  %v10324_v55 = vpack.c.bf16 %v3027_v35, %v3026_v30  ;;  %2965 = vst [vmem:[#allocation7 + $0x170] sm:$0xff] %v2771_v22  ;;  %v10328_v10 = vpack.c.bf16 %v2771_v22, %v2768_v6 }
 0x4fa   :  { %v10326_v19 = vpack.c.bf16 %v3219_v60, %v3218_v58  ;;  %v8707_v26 = vpop.f32.mrf.mxu0  ;;  %v3032_v36 = vld [vmem:[#allocation7 + $0x187] sm:$0xff] }
 0x4fb   :  { %2970 = vst [vmem:[#allocation7 + $0x1c8] sm:$0xff] %v8707_v26 }
 0x4fc   :  { %v2784_v0 = vpop.f32.mrf.mxu0  ;;  %v3030_v11 = vld [vmem:[#allocation7 + $0x167] sm:$0xff] }
 0x4fd   :  { %2968 = vst [vmem:[#allocation7 + $0x1a8] sm:$0xff] %v2784_v0 }
 0x4fe   :  { %v3033_v33 = vld [vmem:[#allocation7 + $0x18f] sm:$0xff]  ;;  %v8708_v42 = vpop.f32.mrf.mxu0 }
 0x4ff   :  { %v3224_v18 = vld [vmem:[#allocation7 + $0x189] sm:$0xff]  ;;  %v3225_v27 = vld [vmem:[#allocation7 + $0x191] sm:$0xff]  ;;  %v10330_v41 = vpack.c.bf16 %v3033_v33, %v3032_v36  ;;  %2971 = vst [vmem:[#allocation7 + $0x1d0] sm:$0xff] %v8708_v42  ;;  %v10334_v30 = vpack.c.bf16 %v8708_v42, %v8707_v26 }
 0x500   :  { %v10332_v50 = vpack.c.bf16 %v3225_v27, %v3224_v18  ;;  %v3031_v35 = vld [vmem:[#allocation7 + $0x16f] sm:$0xff]  ;;  %v2787_v60 = vpop.f32.mrf.mxu0 }
 0x501   :  { %14677 = vst [vmem:[#allocation44_spill] sm:$0xff] %v10334_v30  ;;  %v3222_v6 = vld [vmem:[#allocation7 + $0x169] sm:$0xff]  ;;  %v3223_v58 = vld [vmem:[#allocation7 + $0x171] sm:$0xff]  ;;  %v10336_v22 = vpack.c.bf16 %v3031_v35, %v3030_v11  ;;  %2969 = vst [vmem:[#allocation7 + $0x1b0] sm:$0xff] %v2787_v60  ;;  %v10340_v17 = vpack.c.bf16 %v2787_v60, %v2784_v0 }
 0x502   :  { %v10338_v23 = vpack.c.bf16 %v3223_v58, %v3222_v6  ;;  %v8711_v63 = vpop.f32.mrf.mxu0  ;;  %v3036_v33 = vld [vmem:[#allocation7 + $0x1c7] sm:$0xff] }
 0x503   :  { %2974 = vst [vmem:[#allocation7 + $0x208] sm:$0xff] %v8711_v63 }
 0x504   :  { %v2800_v36 = vpop.f32.mrf.mxu0  ;;  %v3034_v62 = vld [vmem:[#allocation7 + $0x1a7] sm:$0xff] }
 0x505   :  { %2972 = vst [vmem:[#allocation7 + $0x1e8] sm:$0xff] %v2800_v36 }
 0x506   :  { %v3037_v18 = vld [vmem:[#allocation7 + $0x1cf] sm:$0xff]  ;;  %v8712_v42 = vpop.f32.mrf.mxu0 }
 0x507   :  { %v3228_v27 = vld [vmem:[#allocation7 + $0x1c9] sm:$0xff]  ;;  %v3229_v26 = vld [vmem:[#allocation7 + $0x1d1] sm:$0xff]  ;;  %v10342_v54 = vpack.c.bf16 %v3037_v18, %v3036_v33  ;;  %2975 = vst [vmem:[#allocation7 + $0x210] sm:$0xff] %v8712_v42  ;;  %v10346_v11 = vpack.c.bf16 %v8712_v42, %v8711_v63 }
 0x508   :  { %v10344_v3 = vpack.c.bf16 %v3229_v26, %v3228_v27  ;;  %v3035_v35 = vld [vmem:[#allocation7 + $0x1af] sm:$0xff]  ;;  %v2803_v58 = vpop.f32.mrf.mxu0 }
 0x509   :  { %14678 = vst [vmem:[#allocation45_spill] sm:$0xff] %v10342_v54  ;;  %14680 = vst [vmem:[#allocation29_spill] sm:$0xff] %v10346_v11  ;;  %v3226_v0 = vld [vmem:[#allocation7 + $0x1a9] sm:$0xff]  ;;  %v3227_v6 = vld [vmem:[#allocation7 + $0x1b1] sm:$0xff]  ;;  %v10348_v60 = vpack.c.bf16 %v3035_v35, %v3034_v62  ;;  %v10352_v4 = vpack.c.bf16 %v2803_v58, %v2800_v36 }
 0x50a   :  { %14679 = vst [vmem:[#allocation47_spill] sm:$0xff] %v10344_v3  ;;  %v10350_v9 = vpack.c.bf16 %v3227_v6, %v3226_v0  ;;  %2973 = vst [vmem:[#allocation7 + $0x1f0] sm:$0xff] %v2803_v58  ;;  %v8715_v52 = vpop.f32.mrf.mxu0  ;;  %v3326_v18 = vld [vmem:[#allocation7 + $0x207] sm:$0xff] }
 0x50b   :  { %14682 = vst [vmem:[#allocation31_spill] sm:$0xff] %v10352_v4  ;;  %2978 = vst [vmem:[#allocation7 + $0x288] sm:$0xff] %v8715_v52 }
 0x50c   :  { %14681 = vst [vmem:[#allocation28_spill] sm:$0xff] %v10350_v9  ;;  %v2816_v33 = vpop.f32.mrf.mxu0  ;;  %v3038_v11 = vld [vmem:[#allocation7 + $0x1e7] sm:$0xff] }
 0x50d   :  { %2976 = vst [vmem:[#allocation7 + $0x268] sm:$0xff] %v2816_v33 }
 0x50e   :  { %v3327_v27 = vld [vmem:[#allocation7 + $0x20f] sm:$0xff]  ;;  %v8716_v42 = vpop.f32.mrf.mxu0 }
 0x50f   :  { %v3518_v26 = vld [vmem:[#allocation7 + $0x209] sm:$0xff]  ;;  %v3519_v63 = vld [vmem:[#allocation7 + $0x211] sm:$0xff]  ;;  %v10354_v47 = vpack.c.bf16 %v3327_v27, %v3326_v18  ;;  %2979 = vst [vmem:[#allocation7 + $0x290] sm:$0xff] %v8716_v42  ;;  %v10358_v62 = vpack.c.bf16 %v8716_v42, %v8715_v52 }
 0x510   :  { %v10356_v3 = vpack.c.bf16 %v3519_v63, %v3518_v26  ;;  %v2819_v6 = vpop.f32.mrf.mxu0 }
 0x511   :  { %14683 = vst [vmem:[#allocation48_spill] sm:$0xff] %v10354_v47  ;;  %14685 = vst [vmem:[#allocation50_spill] sm:$0xff] %v10358_v62  ;;  %v3039_v35 = vld [vmem:[#allocation7 + $0x1ef] sm:$0xff]  ;;  %v10364_v30 = vpack.c.bf16 %v2819_v6, %v2816_v33 }
 0x512   :  { %14684 = vst [vmem:[#allocation49_spill] sm:$0xff] %v10356_v3  ;;  %v3230_v36 = vld [vmem:[#allocation7 + $0x1e9] sm:$0xff]  ;;  %v3231_v0 = vld [vmem:[#allocation7 + $0x1f1] sm:$0xff]  ;;  %v10360_v58 = vpack.c.bf16 %v3039_v35, %v3038_v11  ;;  %2977 = vst [vmem:[#allocation7 + $0x270] sm:$0xff] %v2819_v6  ;;  %v8719_v9 = vpop.f32.mrf.mxu0 }
 0x513   :  { %v10362_v4 = vpack.c.bf16 %v3231_v0, %v3230_v36  ;;  %14688 = vst [vmem:[#allocation53_spill] sm:$0xff] %v10364_v30  ;;  %2982 = vst [vmem:[#allocation7 + $0x2c8] sm:$0xff] %v8719_v9  ;;  %v3044_v27 = vld [vmem:[#allocation7 + $0x287] sm:$0xff] }
 0x514   :  { %14686 = vst [vmem:[#allocation51_spill] sm:$0xff] %v10360_v58  ;;  %v2832_v18 = vpop.f32.mrf.mxu0  ;;  %v3042_v3 = vld [vmem:[#allocation7 + $0x267] sm:$0xff] }
 0x515   :  { %14687 = vst [vmem:[#allocation52_spill] sm:$0xff] %v10362_v4  ;;  %2980 = vst [vmem:[#allocation7 + $0x2a8] sm:$0xff] %v2832_v18 }
 0x516   :  { %v3045_v26 = vld [vmem:[#allocation7 + $0x28f] sm:$0xff]  ;;  %v8720_v42 = vpop.f32.mrf.mxu0 }
 0x517   :  { %v3236_v63 = vld [vmem:[#allocation7 + $0x289] sm:$0xff]  ;;  %v3237_v52 = vld [vmem:[#allocation7 + $0x291] sm:$0xff]  ;;  %v10366_v62 = vpack.c.bf16 %v3045_v26, %v3044_v27  ;;  %2983 = vst [vmem:[#allocation7 + $0x2d0] sm:$0xff] %v8720_v42  ;;  %v10370_v11 = vpack.c.bf16 %v8720_v42, %v8719_v9 }
 0x518   :  { %v10368_v47 = vpack.c.bf16 %v3237_v52, %v3236_v63  ;;  %v2835_v0 = vpop.f32.mrf.mxu0 }
 0x519   :  { %14689 = vst [vmem:[#allocation54_spill] sm:$0xff] %v10366_v62  ;;  %14691 = vst [vmem:[#allocation56_spill] sm:$0xff] %v10370_v11  ;;  %v3043_v35 = vld [vmem:[#allocation7 + $0x26f] sm:$0xff]  ;;  %v10376_v4 = vpack.c.bf16 %v2835_v0, %v2832_v18 }
 0x51a   :  { %14690 = vst [vmem:[#allocation55_spill] sm:$0xff] %v10368_v47  ;;  %v3234_v33 = vld [vmem:[#allocation7 + $0x269] sm:$0xff]  ;;  %v3235_v36 = vld [vmem:[#allocation7 + $0x271] sm:$0xff]  ;;  %v10372_v6 = vpack.c.bf16 %v3043_v35, %v3042_v3  ;;  %2981 = vst [vmem:[#allocation7 + $0x2b0] sm:$0xff] %v2835_v0  ;;  %v8723_v58 = vpop.f32.mrf.mxu0 }
 0x51b   :  { %v10374_v30 = vpack.c.bf16 %v3235_v36, %v3234_v33  ;;  %14694 = vst [vmem:[#allocation59_spill] sm:$0xff] %v10376_v4  ;;  %2986 = vst [vmem:[#allocation7 + $0x308] sm:$0xff] %v8723_v58  ;;  %v3048_v26 = vld [vmem:[#allocation7 + $0x2c7] sm:$0xff] }
 0x51c   :  { %14692 = vst [vmem:[#allocation57_spill] sm:$0xff] %v10372_v6  ;;  %v2848_v27 = vpop.f32.mrf.mxu0  ;;  %v3046_v11 = vld [vmem:[#allocation7 + $0x2a7] sm:$0xff] }
 0x51d   :  { %14693 = vst [vmem:[#allocation58_spill] sm:$0xff] %v10374_v30  ;;  %2984 = vst [vmem:[#allocation7 + $0x2e8] sm:$0xff] %v2848_v27 }
 0x51e   :  { %v3049_v63 = vld [vmem:[#allocation7 + $0x2cf] sm:$0xff]  ;;  %v8724_v42 = vpop.f32.mrf.mxu0 }
 0x51f   :  { %v3240_v52 = vld [vmem:[#allocation7 + $0x2c9] sm:$0xff]  ;;  %v3241_v9 = vld [vmem:[#allocation7 + $0x2d1] sm:$0xff]  ;;  %v10378_v47 = vpack.c.bf16 %v3049_v63, %v3048_v26  ;;  %2987 = vst [vmem:[#allocation7 + $0x310] sm:$0xff] %v8724_v42  ;;  %v10382_v3 = vpack.c.bf16 %v8724_v42, %v8723_v58 }
 0x520   :  { %v10380_v62 = vpack.c.bf16 %v3241_v9, %v3240_v52  ;;  %v2851_v36 = vpop.f32.mrf.mxu0 }
 0x521   :  { %14695 = vst [vmem:[#allocation60_spill] sm:$0xff] %v10378_v47  ;;  %14697 = vst [vmem:[#allocation62_spill] sm:$0xff] %v10382_v3  ;;  %v3047_v35 = vld [vmem:[#allocation7 + $0x2af] sm:$0xff]  ;;  %v10388_v30 = vpack.c.bf16 %v2851_v36, %v2848_v27 }
 0x522   :  { %14696 = vst [vmem:[#allocation61_spill] sm:$0xff] %v10380_v62  ;;  %v3238_v18 = vld [vmem:[#allocation7 + $0x2a9] sm:$0xff]  ;;  %v3239_v33 = vld [vmem:[#allocation7 + $0x2b1] sm:$0xff]  ;;  %v10384_v0 = vpack.c.bf16 %v3047_v35, %v3046_v11  ;;  %2985 = vst [vmem:[#allocation7 + $0x2f0] sm:$0xff] %v2851_v36  ;;  %v8727_v6 = vpop.f32.mrf.mxu0 }
 0x523   :  { %v10386_v4 = vpack.c.bf16 %v3239_v33, %v3238_v18  ;;  %14700 = vst [vmem:[#allocation65_spill] sm:$0xff] %v10388_v30  ;;  %2990 = vst [vmem:[#allocation7 + $0x348] sm:$0xff] %v8727_v6  ;;  %v3052_v63 = vld [vmem:[#allocation7 + $0x307] sm:$0xff] }
 0x524   :  { %14698 = vst [vmem:[#allocation63_spill] sm:$0xff] %v10384_v0  ;;  %v2864_v26 = vpop.f32.mrf.mxu0  ;;  %v3050_v3 = vld [vmem:[#allocation7 + $0x2e7] sm:$0xff] }
 0x525   :  { %14699 = vst [vmem:[#allocation64_spill] sm:$0xff] %v10386_v4  ;;  %2988 = vst [vmem:[#allocation7 + $0x328] sm:$0xff] %v2864_v26 }
 0x526   :  { %v3053_v52 = vld [vmem:[#allocation7 + $0x30f] sm:$0xff]  ;;  %v8728_v42 = vpop.f32.mrf.mxu0 }
 0x527   :  { %v3244_v9 = vld [vmem:[#allocation7 + $0x309] sm:$0xff]  ;;  %v3245_v58 = vld [vmem:[#allocation7 + $0x311] sm:$0xff]  ;;  %v10390_v62 = vpack.c.bf16 %v3053_v52, %v3052_v63  ;;  %2991 = vst [vmem:[#allocation7 + $0x350] sm:$0xff] %v8728_v42  ;;  %v10394_v11 = vpack.c.bf16 %v8728_v42, %v8727_v6 }
 0x528   :  { %v10392_v47 = vpack.c.bf16 %v3245_v58, %v3244_v9  ;;  %v2867_v33 = vpop.f32.mrf.mxu0 }
 0x529   :  { %14701 = vst [vmem:[#allocation66_spill] sm:$0xff] %v10390_v62  ;;  %14703 = vst [vmem:[#allocation68_spill] sm:$0xff] %v10394_v11  ;;  %v3051_v35 = vld [vmem:[#allocation7 + $0x2ef] sm:$0xff]  ;;  %v10400_v4 = vpack.c.bf16 %v2867_v33, %v2864_v26 }
 0x52a   :  { %14702 = vst [vmem:[#allocation67_spill] sm:$0xff] %v10392_v47  ;;  %v3242_v27 = vld [vmem:[#allocation7 + $0x2e9] sm:$0xff]  ;;  %v3243_v18 = vld [vmem:[#allocation7 + $0x2f1] sm:$0xff]  ;;  %v10396_v36 = vpack.c.bf16 %v3051_v35, %v3050_v3  ;;  %2989 = vst [vmem:[#allocation7 + $0x330] sm:$0xff] %v2867_v33  ;;  %v8731_v0 = vpop.f32.mrf.mxu0 }
 0x52b   :  { %v10398_v30 = vpack.c.bf16 %v3243_v18, %v3242_v27  ;;  %14706 = vst [vmem:[#allocation71_spill] sm:$0xff] %v10400_v4  ;;  %2994 = vst [vmem:[#allocation7 + $0x388] sm:$0xff] %v8731_v0  ;;  %v3056_v52 = vld [vmem:[#allocation7 + $0x347] sm:$0xff] }
 0x52c   :  { %14704 = vst [vmem:[#allocation69_spill] sm:$0xff] %v10396_v36  ;;  %v2880_v63 = vpop.f32.mrf.mxu0  ;;  %v3054_v11 = vld [vmem:[#allocation7 + $0x327] sm:$0xff] }
 0x52d   :  { %14705 = vst [vmem:[#allocation70_spill] sm:$0xff] %v10398_v30  ;;  %2992 = vst [vmem:[#allocation7 + $0x368] sm:$0xff] %v2880_v63 }
 0x52e   :  { %v3057_v9 = vld [vmem:[#allocation7 + $0x34f] sm:$0xff]  ;;  %v8732_v42 = vpop.f32.mrf.mxu0 }
 0x52f   :  { %v3248_v58 = vld [vmem:[#allocation7 + $0x349] sm:$0xff]  ;;  %v3249_v6 = vld [vmem:[#allocation7 + $0x351] sm:$0xff]  ;;  %v10402_v47 = vpack.c.bf16 %v3057_v9, %v3056_v52  ;;  %2995 = vst [vmem:[#allocation7 + $0x390] sm:$0xff] %v8732_v42  ;;  %v10406_v3 = vpack.c.bf16 %v8732_v42, %v8731_v0 }
 0x530   :  { %v10404_v62 = vpack.c.bf16 %v3249_v6, %v3248_v58  ;;  %v2883_v18 = vpop.f32.mrf.mxu0 }
 0x531   :  { %14707 = vst [vmem:[#allocation72_spill] sm:$0xff] %v10402_v47  ;;  %14709 = vst [vmem:[#allocation74_spill] sm:$0xff] %v10406_v3  ;;  %v3055_v35 = vld [vmem:[#allocation7 + $0x32f] sm:$0xff]  ;;  %v10412_v30 = vpack.c.bf16 %v2883_v18, %v2880_v63 }
 0x532   :  { %14708 = vst [vmem:[#allocation73_spill] sm:$0xff] %v10404_v62  ;;  %v3246_v26 = vld [vmem:[#allocation7 + $0x329] sm:$0xff]  ;;  %v3247_v27 = vld [vmem:[#allocation7 + $0x331] sm:$0xff]  ;;  %v10408_v33 = vpack.c.bf16 %v3055_v35, %v3054_v11  ;;  %2993 = vst [vmem:[#allocation7 + $0x370] sm:$0xff] %v2883_v18  ;;  %v8735_v36 = vpop.f32.mrf.mxu0 }
 0x533   :  { %v10410_v4 = vpack.c.bf16 %v3247_v27, %v3246_v26  ;;  %14712 = vst [vmem:[#allocation77_spill] sm:$0xff] %v10412_v30  ;;  %2998 = vst [vmem:[#allocation7 + $0x3c8] sm:$0xff] %v8735_v36  ;;  %v3060_v9 = vld [vmem:[#allocation7 + $0x387] sm:$0xff] }
 0x534   :  { %14710 = vst [vmem:[#allocation75_spill] sm:$0xff] %v10408_v33  ;;  %v2896_v52 = vpop.f32.mrf.mxu0  ;;  %v3058_v3 = vld [vmem:[#allocation7 + $0x367] sm:$0xff] }
 0x535   :  { %14711 = vst [vmem:[#allocation76_spill] sm:$0xff] %v10410_v4  ;;  %2996 = vst [vmem:[#allocation7 + $0x3a8] sm:$0xff] %v2896_v52 }
 0x536   :  { %v3061_v58 = vld [vmem:[#allocation7 + $0x38f] sm:$0xff]  ;;  %v8736_v42 = vpop.f32.mrf.mxu0 }
 0x537   :  { %v3252_v6 = vld [vmem:[#allocation7 + $0x389] sm:$0xff]  ;;  %v3253_v0 = vld [vmem:[#allocation7 + $0x391] sm:$0xff]  ;;  %v10414_v62 = vpack.c.bf16 %v3061_v58, %v3060_v9  ;;  %2999 = vst [vmem:[#allocation7 + $0x3d0] sm:$0xff] %v8736_v42  ;;  %v10418_v11 = vpack.c.bf16 %v8736_v42, %v8735_v36 }
 0x538   :  { %v10416_v47 = vpack.c.bf16 %v3253_v0, %v3252_v6  ;;  %v2899_v27 = vpop.f32.mrf.mxu0 }
 0x539   :  { %14713 = vst [vmem:[#allocation78_spill] sm:$0xff] %v10414_v62  ;;  %14715 = vst [vmem:[#allocation80_spill] sm:$0xff] %v10418_v11  ;;  %v3059_v35 = vld [vmem:[#allocation7 + $0x36f] sm:$0xff]  ;;  %v10424_v4 = vpack.c.bf16 %v2899_v27, %v2896_v52 }
 0x53a   :  { %14714 = vst [vmem:[#allocation79_spill] sm:$0xff] %v10416_v47  ;;  %v3250_v63 = vld [vmem:[#allocation7 + $0x369] sm:$0xff]  ;;  %v3251_v26 = vld [vmem:[#allocation7 + $0x371] sm:$0xff]  ;;  %v10420_v18 = vpack.c.bf16 %v3059_v35, %v3058_v3  ;;  %2997 = vst [vmem:[#allocation7 + $0x3b0] sm:$0xff] %v2899_v27  ;;  %v8739_v33 = vpop.f32.mrf.mxu0 }
 0x53b   :  { %v10422_v30 = vpack.c.bf16 %v3251_v26, %v3250_v63  ;;  %14718 = vst [vmem:[#allocation83_spill] sm:$0xff] %v10424_v4  ;;  %3002 = vst [vmem:[#allocation7 + $0x408] sm:$0xff] %v8739_v33  ;;  %v3064_v58 = vld [vmem:[#allocation7 + $0x3c7] sm:$0xff] }
 0x53c   :  { %14716 = vst [vmem:[#allocation81_spill] sm:$0xff] %v10420_v18  ;;  %v2912_v9 = vpop.f32.mrf.mxu0  ;;  %v3062_v11 = vld [vmem:[#allocation7 + $0x3a7] sm:$0xff] }
 0x53d   :  { %14717 = vst [vmem:[#allocation82_spill] sm:$0xff] %v10422_v30  ;;  %3000 = vst [vmem:[#allocation7 + $0x3e8] sm:$0xff] %v2912_v9 }
 0x53e   :  { %v3065_v6 = vld [vmem:[#allocation7 + $0x3cf] sm:$0xff]  ;;  %v8740_v42 = vpop.f32.mrf.mxu0 }
 0x53f   :  { %v3256_v0 = vld [vmem:[#allocation7 + $0x3c9] sm:$0xff]  ;;  %v3257_v36 = vld [vmem:[#allocation7 + $0x3d1] sm:$0xff]  ;;  %v10426_v47 = vpack.c.bf16 %v3065_v6, %v3064_v58  ;;  %3003 = vst [vmem:[#allocation7 + $0x410] sm:$0xff] %v8740_v42  ;;  %v10430_v3 = vpack.c.bf16 %v8740_v42, %v8739_v33 }
 0x540   :  { %v10428_v62 = vpack.c.bf16 %v3257_v36, %v3256_v0  ;;  %v2915_v26 = vpop.f32.mrf.mxu0 }
 0x541   :  { %14719 = vst [vmem:[#allocation84_spill] sm:$0xff] %v10426_v47  ;;  %14721 = vst [vmem:[#allocation86_spill] sm:$0xff] %v10430_v3  ;;  %v3063_v35 = vld [vmem:[#allocation7 + $0x3af] sm:$0xff]  ;;  %v10436_v30 = vpack.c.bf16 %v2915_v26, %v2912_v9 }
 0x542   :  { %14720 = vst [vmem:[#allocation85_spill] sm:$0xff] %v10428_v62  ;;  %v3254_v52 = vld [vmem:[#allocation7 + $0x3a9] sm:$0xff]  ;;  %v3255_v63 = vld [vmem:[#allocation7 + $0x3b1] sm:$0xff]  ;;  %v10432_v27 = vpack.c.bf16 %v3063_v35, %v3062_v11  ;;  %3001 = vst [vmem:[#allocation7 + $0x3f0] sm:$0xff] %v2915_v26  ;;  %v8743_v18 = vpop.f32.mrf.mxu0 }
 0x543   :  { %v10434_v4 = vpack.c.bf16 %v3255_v63, %v3254_v52  ;;  %14724 = vst [vmem:[#allocation89_spill] sm:$0xff] %v10436_v30  ;;  %3006 = vst [vmem:[#allocation7 + $0x448] sm:$0xff] %v8743_v18  ;;  %v3068_v6 = vld [vmem:[#allocation7 + $0x407] sm:$0xff] }
 0x544   :  { %14722 = vst [vmem:[#allocation87_spill] sm:$0xff] %v10432_v27  ;;  %v2928_v58 = vpop.f32.mrf.mxu0  ;;  %v3066_v3 = vld [vmem:[#allocation7 + $0x3e7] sm:$0xff] }
 0x545   :  { %14723 = vst [vmem:[#allocation88_spill] sm:$0xff] %v10434_v4  ;;  %3004 = vst [vmem:[#allocation7 + $0x428] sm:$0xff] %v2928_v58 }
 0x546   :  { %v3069_v0 = vld [vmem:[#allocation7 + $0x40f] sm:$0xff]  ;;  %v8744_v42 = vpop.f32.mrf.mxu0 }
 0x547   :  { %v3260_v36 = vld [vmem:[#allocation7 + $0x409] sm:$0xff]  ;;  %v3261_v33 = vld [vmem:[#allocation7 + $0x411] sm:$0xff]  ;;  %v10438_v62 = vpack.c.bf16 %v3069_v0, %v3068_v6  ;;  %3007 = vst [vmem:[#allocation7 + $0x450] sm:$0xff] %v8744_v42  ;;  %v10442_v11 = vpack.c.bf16 %v8744_v42, %v8743_v18 }
 0x548   :  { %v10440_v47 = vpack.c.bf16 %v3261_v33, %v3260_v36  ;;  %v2931_v63 = vpop.f32.mrf.mxu0 }
 0x549   :  { %14725 = vst [vmem:[#allocation90_spill] sm:$0xff] %v10438_v62  ;;  %14727 = vst [vmem:[#allocation92_spill] sm:$0xff] %v10442_v11  ;;  %v3067_v35 = vld [vmem:[#allocation7 + $0x3ef] sm:$0xff]  ;;  %v10448_v4 = vpack.c.bf16 %v2931_v63, %v2928_v58 }
 0x54a   :  { %14726 = vst [vmem:[#allocation91_spill] sm:$0xff] %v10440_v47  ;;  %v3258_v9 = vld [vmem:[#allocation7 + $0x3e9] sm:$0xff]  ;;  %v3259_v52 = vld [vmem:[#allocation7 + $0x3f1] sm:$0xff]  ;;  %v10444_v26 = vpack.c.bf16 %v3067_v35, %v3066_v3  ;;  %3005 = vst [vmem:[#allocation7 + $0x430] sm:$0xff] %v2931_v63 }
 0x54b   :  { %v10446_v30 = vpack.c.bf16 %v3259_v52, %v3258_v9  ;;  %v3358_v27 = vld [vmem:[#allocation7 + $0x447] sm:$0xff] }
 0x54c   :  { %14728 = vst [vmem:[#allocation93_spill] sm:$0xff] %v10444_v26  ;;  %v3070_v36 = vld [vmem:[#allocation7 + $0x427] sm:$0xff] }
 0x54e   :  { %v3359_v54 = vld [vmem:[#allocation7 + $0x44f] sm:$0xff] }
 0x54f   :  { %v3550_v6 = vld [vmem:[#allocation7 + $0x449] sm:$0xff]  ;;  %v3551_v0 = vld [vmem:[#allocation7 + $0x451] sm:$0xff]  ;;  %v10450_v33 = vpack.c.bf16 %v3359_v54, %v3358_v27 }
 0x550   :  { %v10452_v18 = vpack.c.bf16 %v3551_v0, %v3550_v6 }
 0x551   :  { %14729 = vst [vmem:[#allocation94_spill] sm:$0xff] %v10450_v33  ;;  %v3071_v42 = vld [vmem:[#allocation7 + $0x42f] sm:$0xff] }
 0x552   :  { %14730 = vst [vmem:[#allocation95_spill] sm:$0xff] %v10452_v18  ;;  %v3262_v11 = vld [vmem:[#allocation7 + $0x429] sm:$0xff]  ;;  %v3263_v47 = vld [vmem:[#allocation7 + $0x431] sm:$0xff]  ;;  %v10454_v62 = vpack.c.bf16 %v3071_v42, %v3070_v36 }
 0x553   :  { %v10456_v3 = vpack.c.bf16 %v3263_v47, %v3262_v11 }
 0x554   :  { %9149 = dma.done.wait [#allocation5 + $0x1], 9216 }
 0x555   :  { %9150 = vsyncadd [#allocation5 + $0x1], 4294958080  ;;  %v14731_v58 = vpack.c.bf16 %v10200_v25, %v10198_v48  ;;  %4774 = vmatprep.mubr.bf16.mxu0 %v10276_v53  ;;  %v14260_v35 = vmov 0   ;;  %v10464_v54 = vld [vmem:[#allocation7 + $0x7] sm:$0xff]  ;;  %v10466_v27 = vld [vmem:[#allocation7 + $0xf] sm:$0xff] }
 0x556   :  { %4453 = vmatprep.subr.bf16.mxu1 %v14260_v35  ;;  %4742 = vmatprep.subr.bf16.mxu0 %v14260_v35  ;;  %14732 = vst [vmem:[#allocation96_spill] sm:$0xff] %v10464_v54  ;;  %14733 = vst [vmem:[#allocation97_spill] sm:$0xff] %v10466_v27  ;;  %v10468_v9 = vld [vmem:[#allocation7 + $0x247] sm:$0xff]  ;;  %v10470_v47 = vld [vmem:[#allocation7 + $0x24f] sm:$0xff] }
 0x557   :  { %4485 = vmatprep.mubr.bf16.mxu1 %v14731_v58  ;;  %14734 = vst [vmem:[#allocation98_spill] sm:$0xff] %v10468_v9  ;;  %14735 = vst [vmem:[#allocation99_spill] sm:$0xff] %v10470_v47  ;;  %v10474_v48 = vld [vmem:[#allocation7 + $0x8] sm:$0xff]  ;;  %v10476_v25 = vld [vmem:[#allocation7 + $0x10] sm:$0xff] }
 0x558   :  { %14736 = vst [vmem:[#allocation100_spill] sm:$0xff] %v10474_v48  ;;  %14737 = vst [vmem:[#allocation101_spill] sm:$0xff] %v10476_v25  ;;  %v10480_v63 = vld [vmem:[#allocation7 + $0x248] sm:$0xff]  ;;  %v10482_v6 = vld [vmem:[#allocation7 + $0x250] sm:$0xff] }
 0x559   :  { %14738 = vst [vmem:[#allocation102_spill] sm:$0xff] %v10480_v63  ;;  %14739 = vst [vmem:[#allocation103_spill] sm:$0xff] %v10482_v6  ;;  %v10486_v36 = vld [vmem:[#allocation7 + $0x9] sm:$0xff]  ;;  %v10490_v58 = vld [vmem:[#allocation7 + $0x11] sm:$0xff] }
 0x55a   :  { %14740 = vst [vmem:[#allocation104_spill] sm:$0xff] %v10486_v36  ;;  %14741 = vst [vmem:[#allocation105_spill] sm:$0xff] %v10490_v58  ;;  %v10492_v11 = vld [vmem:[#allocation7 + $0x249] sm:$0xff]  ;;  %v10494_v35 = vld [vmem:[#allocation7 + $0x251] sm:$0xff] }
 0x55b   :  { %14742 = vst [vmem:[#allocation106_spill] sm:$0xff] %v10492_v11  ;;  %14743 = vst [vmem:[#allocation107_spill] sm:$0xff] %v10494_v35  ;;  %v10500_v47 = vld [vmem:[#allocation7 + $0x227] sm:$0xff]  ;;  %v10502_v0 = vld [vmem:[#allocation7 + $0x22f] sm:$0xff] }
 0x55c   :  { %14744 = vst [vmem:[#allocation108_spill] sm:$0xff] %v10500_v47  ;;  %14745 = vst [vmem:[#allocation109_spill] sm:$0xff] %v10502_v0  ;;  %v10504_v54 = vld [vmem:[#allocation7 + $0x467] sm:$0xff]  ;;  %v10506_v27 = vld [vmem:[#allocation7 + $0x46f] sm:$0xff] }
 0x55d   :  { %14746 = vst [vmem:[#allocation110_spill] sm:$0xff] %v10504_v54  ;;  %14747 = vst [vmem:[#allocation111_spill] sm:$0xff] %v10506_v27  ;;  %v10510_v63 = vld [vmem:[#allocation7 + $0x228] sm:$0xff]  ;;  %v10512_v6 = vld [vmem:[#allocation7 + $0x230] sm:$0xff] }
 0x55e   :  { %14748 = vst [vmem:[#allocation112_spill] sm:$0xff] %v10510_v63  ;;  %14749 = vst [vmem:[#allocation113_spill] sm:$0xff] %v10512_v6  ;;  %v10516_v36 = vld [vmem:[#allocation7 + $0x468] sm:$0xff]  ;;  %v10518_v9 = vld [vmem:[#allocation7 + $0x470] sm:$0xff]  ;;  %v14756_v63 = vmov 0  }
 0x55f   :  { %14750 = vst [vmem:[#allocation114_spill] sm:$0xff] %v10516_v36  ;;  %14751 = vst [vmem:[#allocation115_spill] sm:$0xff] %v10518_v9  ;;  %v10522_v35 = vld [vmem:[#allocation7 + $0x229] sm:$0xff]  ;;  %v10526_v42 = vld [vmem:[#allocation7 + $0x231] sm:$0xff] }
 0x560   :  { %14752 = vst [vmem:[#allocation116_spill] sm:$0xff] %v10522_v35  ;;  %14753 = vst [vmem:[#allocation117_spill] sm:$0xff] %v10526_v42  ;;  %v10528_v47 = vld [vmem:[#allocation7 + $0x469] sm:$0xff]  ;;  %v10530_v0 = vld [vmem:[#allocation7 + $0x471] sm:$0xff] }
 0x561   :  { %14754 = vst [vmem:[#allocation118_spill] sm:$0xff] %v10528_v47  ;;  %14755 = vst [vmem:[#allocation119_spill] sm:$0xff] %v10530_v0  ;;  %v8993_v27 = vld [vmem:[#allocation3 + $0x38] sm:$0xff]   ;;  %v8995_v11 = vld [vmem:[#allocation3 + $0x30] sm:$0xff]  }
 0x562   :  { %v8994_v48 = vld [vmem:[#allocation3 + $0xb8] sm:$0xff]   ;;  %4454 = vmatpush1.bf16.msra.mxu1 %v8993_v27  ;;  %v8996_v58 = vld [vmem:[#allocation3 + $0xb0] sm:$0xff]   ;;  %v8997_v36 = vld [vmem:[#allocation3 + $0x28] sm:$0xff]  }
 0x563   :  { %4743 = vmatpush1.bf16.msra.mxu0 %v8994_v48  ;;  %4455 = vmatprep.subr.bf16.mxu1 %v14756_v63  ;;  %v8998_v9 = vld [vmem:[#allocation3 + $0xa8] sm:$0xff]   ;;  %v8999_v54 = vld [vmem:[#allocation3 + $0x20] sm:$0xff]   ;;  %v9001_v48 = vld [vmem:[#allocation3 + $0x18] sm:$0xff]  }
 0x564   :  { %4744 = vmatprep.subr.bf16.mxu0 %v14756_v63  ;;  %v9000_v27 = vld [vmem:[#allocation3 + $0xa0] sm:$0xff]   ;;  %v9014_v52 = vld [vmem:[#allocation3 + $0xe8] sm:$0xff]  }
 0x565   :  { %v14770_v0 = vld [vmem:[#allocation57_spill] sm:$0xff]  ;;  %v9055_v35 = vld [vmem:[#allocation3 + $0x1c8] sm:$0xff]  }
 0x566   :  { %4456 = vmatpush1.bf16.msra.mxu1 %v8995_v11  ;;  %v9002_v11 = vld [vmem:[#allocation3 + $0x98] sm:$0xff]  }
 0x567   :  { %4745 = vmatpush1.bf16.msra.mxu0 %v8996_v58  ;;  %4457 = vmatprep.subr.bf16.mxu1 %v14756_v63  ;;  %v9003_v58 = vld [vmem:[#allocation3 + $0x10] sm:$0xff]   ;;  %v14772_v42 = vld [vmem:[#allocation33_spill] sm:$0xff] }
 0x568   :  { %4746 = vmatprep.subr.bf16.mxu0 %v14756_v63  ;;  %v14775_v25 = vld [vmem:[#allocation37_spill] sm:$0xff] }
 0x56a   :  { %4458 = vmatpush1.bf16.msra.mxu1 %v8997_v36  ;;  %v9004_v36 = vld [vmem:[#allocation3 + $0x90] sm:$0xff]  }
 0x56b   :  { %4747 = vmatpush1.bf16.msra.mxu0 %v8998_v9  ;;  %4459 = vmatprep.subr.bf16.mxu1 %v14756_v63  ;;  %v9005_v9 = vld [vmem:[#allocation3 + $0x8] sm:$0xff]  }
 0x56c   :  { %4748 = vmatprep.subr.bf16.mxu0 %v14756_v63 }
 0x56e   :  { %4460 = vmatpush1.bf16.msra.mxu1 %v8999_v54  ;;  %v9006_v54 = vld [vmem:[#allocation3 + $0x88] sm:$0xff]  }
 0x56f   :  { %4749 = vmatpush1.bf16.msra.mxu0 %v9000_v27  ;;  %4461 = vmatprep.subr.bf16.mxu1 %v14756_v63  ;;  %v9007_v27 = vld [vmem:[#allocation3] sm:$0xff]  }
 0x570   :  { %4750 = vmatprep.subr.bf16.mxu0 %v14756_v63 }
 0x572   :  { %4462 = vmatpush1.bf16.msra.mxu1 %v9001_v48  ;;  %v9008_v48 = vld [vmem:[#allocation3 + $0x80] sm:$0xff]  }
 0x573   :  { %4751 = vmatpush1.bf16.msra.mxu0 %v9002_v11  ;;  %4463 = vmatprep.subr.bf16.mxu1 %v14756_v63  ;;  %v9009_v11 = vld [vmem:[#allocation3 + $0x78] sm:$0xff]  }
 0x574   :  { %4752 = vmatprep.subr.bf16.mxu0 %v14756_v63 }
 0x576   :  { %4464 = vmatpush1.bf16.msra.mxu1 %v9003_v58  ;;  %v9010_v58 = vld [vmem:[#allocation3 + $0xf8] sm:$0xff]  }
 0x577   :  { %4753 = vmatpush1.bf16.msra.mxu0 %v9004_v36  ;;  %4465 = vmatprep.subr.bf16.mxu1 %v14756_v63  ;;  %v9011_v36 = vld [vmem:[#allocation3 + $0x70] sm:$0xff]  }
 0x578   :  { %4754 = vmatprep.subr.bf16.mxu0 %v14756_v63 }
 0x57a   :  { %4466 = vmatpush1.bf16.msra.mxu1 %v9005_v9  ;;  %v9012_v9 = vld [vmem:[#allocation3 + $0xf0] sm:$0xff]  }
 0x57b   :  { %4755 = vmatpush1.bf16.msra.mxu0 %v9006_v54  ;;  %4467 = vmatprep.subr.bf16.mxu1 %v14756_v63  ;;  %v9013_v54 = vld [vmem:[#allocation3 + $0x68] sm:$0xff]  }
 0x57c   :  { %4756 = vmatprep.subr.bf16.mxu0 %v14756_v63 }
 0x57e   :  { %4468 = vmatpush1.bf16.msra.mxu1 %v9007_v27  ;;  %v9015_v27 = vld [vmem:[#allocation3 + $0x60] sm:$0xff]  }
 0x57f   :  { %4757 = vmatpush1.bf16.msra.mxu0 %v9008_v48  ;;  %4469 = vmatprep.subr.bf16.mxu1 %v14756_v63  ;;  %v9016_v48 = vld [vmem:[#allocation3 + $0xe0] sm:$0xff]  }
 0x580   :  { %4758 = vmatprep.subr.bf16.mxu0 %v14756_v63 }
 0x582   :  { %4470 = vmatpush2.bf16.msra.mxu1 %v9009_v11  ;;  %v9017_v11 = vld [vmem:[#allocation3 + $0x58] sm:$0xff]  }
 0x583   :  { %4759 = vmatpush2.bf16.msra.mxu0 %v9010_v58  ;;  %4471 = vmatprep.subr.bf16.mxu1 %v14756_v63  ;;  %v9018_v58 = vld [vmem:[#allocation3 + $0xd8] sm:$0xff]  }
 0x584   :  { %4760 = vmatprep.subr.bf16.mxu0 %v14756_v63 }
 0x586   :  { %4472 = vmatpush2.bf16.msra.mxu1 %v9011_v36  ;;  %v9019_v36 = vld [vmem:[#allocation3 + $0x50] sm:$0xff]  }
 0x587   :  { %4761 = vmatpush2.bf16.msra.mxu0 %v9012_v9  ;;  %4473 = vmatprep.subr.bf16.mxu1 %v14756_v63  ;;  %v9020_v9 = vld [vmem:[#allocation3 + $0xd0] sm:$0xff]  }
 0x588   :  { %4762 = vmatprep.subr.bf16.mxu0 %v14756_v63 }
 0x58a   :  { %4474 = vmatpush2.bf16.msra.mxu1 %v9013_v54  ;;  %v9022_v54 = vld [vmem:[#allocation3 + $0xc8] sm:$0xff]  }
 0x58b   :  { %4763 = vmatpush2.bf16.msra.mxu0 %v9014_v52  ;;  %4475 = vmatprep.subr.bf16.mxu1 %v14756_v63  ;;  %v9021_v52 = vld [vmem:[#allocation3 + $0x48] sm:$0xff]  }
 0x58c   :  { %4764 = vmatprep.subr.bf16.mxu0 %v14756_v63 }
 0x58e   :  { %4476 = vmatpush2.bf16.msra.mxu1 %v9015_v27  ;;  %v9023_v27 = vld [vmem:[#allocation3 + $0x40] sm:$0xff]  }
 0x58f   :  { %4765 = vmatpush2.bf16.msra.mxu0 %v9016_v48  ;;  %4477 = vmatprep.subr.bf16.mxu1 %v14756_v63  ;;  %v9024_v48 = vld [vmem:[#allocation3 + $0xc0] sm:$0xff]  }
 0x590   :  { %4766 = vmatprep.subr.bf16.mxu0 %v14756_v63 }
 0x592   :  { %4478 = vmatpush2.bf16.msra.mxu1 %v9017_v11  ;;  %v9025_v11 = vld [vmem:[#allocation3 + $0x138] sm:$0xff]  }
 0x593   :  { %4767 = vmatpush2.bf16.msra.mxu0 %v9018_v58  ;;  %4479 = vmatprep.subr.bf16.mxu1 %v14756_v63  ;;  %v14757_v58 = vpack.c.bf16 %v10190_v24, %v10188_v21  ;;  %v9027_v21 = vld [vmem:[#allocation3 + $0x128] sm:$0xff]   ;;  %v9028_v24 = vld [vmem:[#allocation3 + $0x120] sm:$0xff]  }
 0x594   :  { %4768 = vmatprep.subr.bf16.mxu0 %v14756_v63 }
 0x596   :  { %4480 = vmatpush2.bf16.msra.mxu1 %v9019_v36  ;;  %v14758_v36 = vpack.c.bf16 %v10214_v61, %v10210_v57  ;;  %v9029_v57 = vld [vmem:[#allocation3 + $0x118] sm:$0xff]   ;;  %v9036_v61 = vld [vmem:[#allocation3 + $0x1b0] sm:$0xff]  }
 0x597   :  { %4769 = vmatpush2.bf16.msra.mxu0 %v9020_v9  ;;  %4481 = vmatprep.subr.bf16.mxu1 %v14756_v63  ;;  %v9026_v9 = vld [vmem:[#allocation3 + $0x130] sm:$0xff]  }
 0x598   :  { %4770 = vmatprep.subr.bf16.mxu0 %v14756_v63 }
 0x59a   :  { %4482 = vmatpush2.bf16.msra.mxu1 %v9021_v52  ;;  %v9034_v52 = vld [vmem:[#allocation3 + $0x1b8] sm:$0xff]  }
 0x59b   :  { %4771 = vmatpush2.bf16.msra.mxu0 %v9022_v54  ;;  %4483 = vmatprep.subr.bf16.mxu1 %v14756_v63  ;;  %v9031_v54 = vld [vmem:[#allocation3 + $0x108] sm:$0xff]  }
 0x59c   :  { %4772 = vmatprep.subr.bf16.mxu0 %v14756_v63 }
 0x59e   :  { %4484 = vmatpush2.bf16.msra.mxu1 %v9023_v27  ;;  %v9032_v27 = vld [vmem:[#allocation3 + $0x100] sm:$0xff]  }
 0x59f   :  { %4773 = vmatpush2.bf16.msra.mxu0 %v9024_v48  ;;  %5031 = vmatprep.subr.bf16.mxu1 %v14756_v63  ;;  %v9033_v48 = vld [vmem:[#allocation3 + $0x178] sm:$0xff]  }
 0x5a0   :  { %5320 = vmatprep.subr.bf16.mxu0 %v14756_v63 }
 0x5a1   :  { %4486 = vmatmul.mubr.bf16.vlgmr.msra.gmra.mxu1 %v14757_v58  ;;  %v9035_v58 = vld [vmem:[#allocation3 + $0x170] sm:$0xff]  }
 0x5a2   :  { %4775 = vmatmul.mubr.bf16.vlgmr.msra.gmra.mxu0 %v14758_v36  ;;  %5032 = vmatpush1.bf16.msra.mxu1 %v9025_v11  ;;  %v9038_v11 = vld [vmem:[#allocation3 + $0x1a8] sm:$0xff]  }
 0x5a3   :  { %4493 = vmatprep.mubr.bf16.mxu1 %v10268_v43  ;;  %4782 = vmatprep.mubr.bf16.mxu0 %v10270_v8  ;;  %v9037_v36 = vld [vmem:[#allocation3 + $0x168] sm:$0xff]  }
 0x5a4   :  { %5033 = vmatprep.subr.bf16.mxu1 %v14756_v63  ;;  %5321 = vmatpush1.bf16.msra.mxu0 %v9034_v52  ;;  %v9040_v52 = vld [vmem:[#allocation3 + $0x1a0] sm:$0xff]  }
 0x5a5   :  { %5322 = vmatprep.subr.bf16.mxu0 %v14756_v63 }
 0x5a6   :  { %5034 = vmatpush1.bf16.msra.mxu1 %v9026_v9  ;;  %v9039_v9 = vld [vmem:[#allocation3 + $0x160] sm:$0xff]  }
 0x5a7   :  { %5035 = vmatprep.subr.bf16.mxu1 %v14756_v63 }
 0x5a8   :  { %5323 = vmatpush1.bf16.msra.mxu0 %v9036_v61  ;;  %v9044_v61 = vld [vmem:[#allocation3 + $0x190] sm:$0xff]  }
 0x5a9   :  { %4494 = vmatmul.mubr.bf16.gmra.mxu1 %v10276_v53  ;;  %v9030_v53 = vld [vmem:[#allocation3 + $0x110] sm:$0xff]   ;;  %5324 = vmatprep.subr.bf16.mxu0 %v14756_v63 }
 0x5aa   :  { %4783 = vmatmul.mubr.bf16.gmra.mxu0 %v10278_v59  ;;  %4501 = vmatprep.mubr.bf16.mxu1 %v10266_v39 }
 0x5ab   :  { %4790 = vmatprep.mubr.bf16.mxu0 %v10288_v37  ;;  %5036 = vmatpush1.bf16.msra.mxu1 %v9027_v21  ;;  %v9041_v21 = vld [vmem:[#allocation3 + $0x158] sm:$0xff]  }
 0x5ac   :  { %5037 = vmatprep.subr.bf16.mxu1 %v14756_v63  ;;  %5325 = vmatpush1.bf16.msra.mxu0 %v9038_v11  ;;  %v9048_v11 = vld [vmem:[#allocation3 + $0x1f8] sm:$0xff]  }
 0x5ad   :  { %5326 = vmatprep.subr.bf16.mxu0 %v14756_v63 }
 0x5af   :  { %5038 = vmatpush1.bf16.msra.mxu1 %v9028_v24  ;;  %v9042_v24 = vld [vmem:[#allocation3 + $0x198] sm:$0xff]  }
 0x5b0   :  { %5039 = vmatprep.subr.bf16.mxu1 %v14756_v63  ;;  %5327 = vmatpush1.bf16.msra.mxu0 %v9040_v52  ;;  %v14762_v52 = vld [vmem:[#allocation51_spill] sm:$0xff] }
 0x5b1   :  { %4502 = vmatmul.mubr.bf16.gmra.mxu1 %v10270_v8  ;;  %5328 = vmatprep.subr.bf16.mxu0 %v14756_v63 }
 0x5b2   :  { %4791 = vmatmul.mubr.bf16.gmra.mxu0 %v10272_v14  ;;  %4509 = vmatprep.mubr.bf16.mxu1 %v10280_v16 }
 0x5b3   :  { %4798 = vmatprep.mubr.bf16.mxu0 %v10282_v49  ;;  %5040 = vmatpush1.bf16.msra.mxu1 %v9029_v57  ;;  %v9043_v57 = vld [vmem:[#allocation3 + $0x150] sm:$0xff]  }
 0x5b4   :  { %5041 = vmatprep.subr.bf16.mxu1 %v14756_v63  ;;  %5329 = vmatpush1.bf16.msra.mxu0 %v9042_v24  ;;  %v9051_v24 = vld [vmem:[#allocation3 + $0x1e0] sm:$0xff]  }
 0x5b5   :  { %5330 = vmatprep.subr.bf16.mxu0 %v14756_v63 }
 0x5b7   :  { %5042 = vmatpush1.bf16.msra.mxu1 %v9030_v53  ;;  %v9045_v53 = vld [vmem:[#allocation3 + $0x188] sm:$0xff]  }
 0x5b8   :  { %5043 = vmatprep.subr.bf16.mxu1 %v14756_v63  ;;  %5331 = vmatpush1.bf16.msra.mxu0 %v9044_v61  ;;  %v14764_v61 = vld [vmem:[#allocation31_spill] sm:$0xff] }
 0x5b9   :  { %4510 = vmatmul.mubr.bf16.gmra.mxu1 %v10288_v37  ;;  %5332 = vmatprep.subr.bf16.mxu0 %v14756_v63 }
 0x5ba   :  { %4799 = vmatmul.mubr.bf16.gmra.mxu0 %v10290_v31  ;;  %4517 = vmatprep.mubr.bf16.mxu1 %v10274_v46 }
 0x5bb   :  { %4806 = vmatprep.mubr.bf16.mxu0 %v10300_v32  ;;  %5044 = vmatpush1.bf16.msra.mxu1 %v9031_v54  ;;  %v9046_v54 = vld [vmem:[#allocation3 + $0x180] sm:$0xff]  }
 0x5bc   :  { %5045 = vmatprep.subr.bf16.mxu1 %v14756_v63  ;;  %5333 = vmatpush1.bf16.msra.mxu0 %v9045_v53  ;;  %v14765_v53 = vld [vmem:[#allocation48_spill] sm:$0xff] }
 0x5bd   :  { %5334 = vmatprep.subr.bf16.mxu0 %v14756_v63 }
 0x5bf   :  { %5046 = vmatpush1.bf16.msra.mxu1 %v9032_v27  ;;  %v14759_v27 = vld [vmem:[#allocation45_spill] sm:$0xff] }
 0x5c0   :  { %5047 = vmatprep.subr.bf16.mxu1 %v14756_v63  ;;  %5335 = vmatpush1.bf16.msra.mxu0 %v9046_v54  ;;  %v9052_v54 = vld [vmem:[#allocation3 + $0x140] sm:$0xff]  }
 0x5c1   :  { %4518 = vmatmul.mubr.bf16.gmra.mxu1 %v10282_v49  ;;  %5336 = vmatprep.subr.bf16.mxu0 %v14756_v63 }
 0x5c2   :  { %4807 = vmatmul.mubr.bf16.gmra.mxu0 %v10284_v56  ;;  %4525 = vmatprep.mubr.bf16.mxu1 %v10292_v7 }
 0x5c3   :  { %4814 = vmatprep.mubr.bf16.mxu0 %v10294_v20  ;;  %5048 = vmatpush2.bf16.msra.mxu1 %v9033_v48  ;;  %v9047_v48 = vld [vmem:[#allocation3 + $0x148] sm:$0xff]  }
 0x5c4   :  { %5049 = vmatprep.subr.bf16.mxu1 %v14756_v63  ;;  %5337 = vmatpush2.bf16.msra.mxu0 %v9048_v11  ;;  %v9054_v11 = vld [vmem:[#allocation3 + $0x1d0] sm:$0xff]  }
 0x5c5   :  { %5338 = vmatprep.subr.bf16.mxu0 %v14756_v63 }
 0x5c7   :  { %5050 = vmatpush2.bf16.msra.mxu1 %v9035_v58  ;;  %v9049_v58 = vld [vmem:[#allocation3 + $0x1f0] sm:$0xff]  }
 0x5c8   :  { %5051 = vmatprep.subr.bf16.mxu1 %v14756_v63  ;;  %5339 = vmatpush2.bf16.msra.mxu0 %v9049_v58  ;;  %v14766_v58 = vld [vmem:[#allocation52_spill] sm:$0xff] }
 0x5c9   :  { %4526 = vmatmul.mubr.bf16.gmra.mxu1 %v10300_v32  ;;  %5340 = vmatprep.subr.bf16.mxu0 %v14756_v63 }
 0x5ca   :  { %4815 = vmatmul.mubr.bf16.gmra.mxu0 %v10302_v40  ;;  %4533 = vmatprep.mubr.bf16.mxu1 %v10286_v51 }
 0x5cb   :  { %4822 = vmatprep.mubr.bf16.mxu0 %v10312_v12  ;;  %5052 = vmatpush2.bf16.msra.mxu1 %v9037_v36  ;;  %v14760_v36 = vld [vmem:[#allocation28_spill] sm:$0xff] }
 0x5cc   :  { %5053 = vmatprep.subr.bf16.mxu1 %v14756_v63 }
 0x5cf   :  { %5054 = vmatpush2.bf16.msra.mxu1 %v9039_v9  ;;  %v14761_v9 = vld [vmem:[#allocation44_spill] sm:$0xff] }
 0x5d0   :  { %5055 = vmatprep.subr.bf16.mxu1 %v14756_v63 }
 0x5d1   :  { %4534 = vmatmul.mubr.bf16.gmra.mxu1 %v10294_v20 }
 0x5d2   :  { %4823 = vmatmul.mubr.bf16.gmra.mxu0 %v10296_v34  ;;  %4541 = vmatprep.mubr.bf16.mxu1 %v10304_v44 }
 0x5d3   :  { %4830 = vmatprep.mubr.bf16.mxu0 %v10306_v5  ;;  %5056 = vmatpush2.bf16.msra.mxu1 %v9041_v21  ;;  %v9050_v21 = vld [vmem:[#allocation3 + $0x1e8] sm:$0xff]  }
 0x5d4   :  { %5057 = vmatprep.subr.bf16.mxu1 %v14756_v63  ;;  %5341 = vmatpush2.bf16.msra.mxu0 %v9050_v21  ;;  %v14767_v21 = vld [vmem:[#allocation35_spill] sm:$0xff] }
 0x5d5   :  { %5342 = vmatprep.subr.bf16.mxu0 %v14756_v63 }
 0x5d7   :  { %5058 = vmatpush2.bf16.msra.mxu1 %v9043_v57  ;;  %v14763_v57 = vld [vmem:[#allocation47_spill] sm:$0xff] }
 0x5d8   :  { %5059 = vmatprep.subr.bf16.mxu1 %v14756_v63  ;;  %5343 = vmatpush2.bf16.msra.mxu0 %v9051_v24  ;;  %v14768_v24 = vld [vmem:[#allocation36_spill] sm:$0xff] }
 0x5d9   :  { %4542 = vmatmul.mubr.bf16.gmra.mxu1 %v10312_v12  ;;  %5344 = vmatprep.subr.bf16.mxu0 %v14756_v63  ;;  %v14769_v47 = vpack.c.bf16 %v14767_v21, %v14768_v24  ;;  %v14777_v21 = vld [vmem:[#allocation53_spill] sm:$0xff] }
 0x5da   :  { %4831 = vmatmul.mubr.bf16.gmra.mxu0 %v10314_v45  ;;  %4549 = vmatprep.mubr.bf16.mxu1 %v10298_v28  ;;  %v10676_v24 = vld [vmem:[#allocation3 + $0x238] sm:$0xff]  }
 0x5db   :  { %4838 = vmatprep.mubr.bf16.mxu0 %v10324_v55  ;;  %5060 = vmatpush2.bf16.msra.mxu1 %v9047_v48  ;;  %v9053_v48 = vld [vmem:[#allocation3 + $0x1d8] sm:$0xff]  }
 0x5dc   :  { %5061 = vmatprep.subr.bf16.mxu1 %v14756_v63  ;;  %5345 = vmatpush2.bf16.msra.mxu0 %v9053_v48  ;;  %v14771_v48 = vld [vmem:[#allocation34_spill] sm:$0xff] }
 0x5dd   :  { %5346 = vmatprep.subr.bf16.mxu0 %v14756_v63  ;;  %v14773_v6 = vpack.c.bf16 %v14771_v48, %v14772_v42  ;;  %v14784_v42 = vld [vmem:[#allocation60_spill] sm:$0xff] }
 0x5de   :  { %v14786_v48 = vld [vmem:[#allocation56_spill] sm:$0xff] }
 0x5df   :  { %5062 = vmatpush2.bf16.msra.mxu1 %v9052_v54  ;;  %v9056_v54 = vld [vmem:[#allocation3 + $0x1c0] sm:$0xff]  }
 0x5e0   :  { %5347 = vmatpush2.bf16.msra.mxu0 %v9054_v11  ;;  %v14774_v11 = vld [vmem:[#allocation38_spill] sm:$0xff]  ;;  %8745 = vmatprep.subr.bf16.mxu1 %v10676_v24 }
 0x5e1   :  { %4550 = vmatmul.mubr.bf16.gmra.mxu1 %v10306_v5  ;;  %5348 = vmatprep.subr.bf16.mxu0 %v14756_v63  ;;  %v14776_v18 = vpack.c.bf16 %v14774_v11, %v14775_v25  ;;  %v14782_v25 = vld [vmem:[#allocation55_spill] sm:$0xff]  ;;  %v14788_v11 = vld [vmem:[#allocation61_spill] sm:$0xff] }
 0x5e2   :  { %4839 = vmatmul.mubr.bf16.gmra.mxu0 %v10308_v13  ;;  %4557 = vmatprep.mubr.bf16.mxu1 %v10316_v2 }
 0x5e3   :  { %4846 = vmatprep.mubr.bf16.mxu0 %v10318_v15 }
 0x5e4   :  { %5349 = vmatpush2.bf16.msra.mxu0 %v9055_v35  ;;  %v14779_v35 = vld [vmem:[#allocation58_spill] sm:$0xff] }
 0x5e5   :  { %5350 = vmatprep.subr.bf16.mxu0 %v14756_v63  ;;  %v14780_v63 = vld [vmem:[#allocation50_spill] sm:$0xff] }
 0x5e8   :  { %5351 = vmatpush2.bf16.msra.mxu0 %v9056_v54  ;;  %v14785_v54 = vld [vmem:[#allocation64_spill] sm:$0xff] }
 0x5e9   :  { %4558 = vmatmul.mubr.bf16.gmra.mxu1 %v10324_v55 }
 0x5ea   :  { %4847 = vmatmul.mubr.bf16.gmra.mxu0 %v10326_v19  ;;  %4565 = vmatprep.mubr.bf16.mxu1 %v10310_v38 }
 0x5eb   :  { %4854 = vmatprep.mubr.bf16.mxu0 %v10336_v22 }
 0x5f1   :  { %4566 = vmatmul.mubr.bf16.gmra.mxu1 %v10318_v15 }
 0x5f2   :  { %4855 = vmatmul.mubr.bf16.gmra.mxu0 %v10320_v29  ;;  %4573 = vmatprep.mubr.bf16.mxu1 %v10328_v10 }
 0x5f3   :  { %4862 = vmatprep.mubr.bf16.mxu0 %v10330_v41 }
 0x5f9   :  { %4574 = vmatmul.mubr.bf16.gmra.mxu1 %v10336_v22 }
 0x5fa   :  { %4863 = vmatmul.mubr.bf16.gmra.mxu0 %v10338_v23  ;;  %4581 = vmatprep.mubr.bf16.mxu1 %v10322_v1 }
 0x5fb   :  { %4870 = vmatprep.mubr.bf16.mxu0 %v10348_v60 }
 0x601   :  { %4582 = vmatmul.mubr.bf16.gmra.mxu1 %v10330_v41 }
 0x602   :  { %4871 = vmatmul.mubr.bf16.gmra.mxu0 %v10332_v50  ;;  %4589 = vmatprep.mubr.bf16.mxu1 %v10340_v17 }
 0x603   :  { %4878 = vmatprep.mubr.bf16.mxu0 %v14759_v27 }
 0x609   :  { %4590 = vmatmul.mubr.bf16.gmra.mxu1 %v10348_v60 }
 0x60a   :  { %4879 = vmatmul.mubr.bf16.gmra.mxu0 %v14760_v36  ;;  %4597 = vmatprep.mubr.bf16.mxu1 %v14761_v9 }
 0x60b   :  { %4886 = vmatprep.mubr.bf16.mxu0 %v14762_v52 }
 0x611   :  { %4598 = vmatmul.mubr.bf16.gmra.mxu1 %v14759_v27 }
 0x612   :  { %4887 = vmatmul.mubr.bf16.gmra.mxu0 %v14763_v57  ;;  %4605 = vmatprep.mubr.bf16.mxu1 %v14764_v61  ;;  %v14805_v57 = vld [vmem:[#allocation82_spill] sm:$0xff] }
 0x613   :  { %4894 = vmatprep.mubr.bf16.mxu0 %v14765_v53 }
 0x619   :  { %4606 = vmatmul.mubr.bf16.gmra.mxu1 %v14762_v52 }
 0x61a   :  { %4895 = vmatmul.mubr.bf16.gmra.mxu0 %v14766_v58  ;;  %4613 = vmatprep.mubr.bf16.mxu1 %v14769_v47  ;;  %v14778_v47 = vld [vmem:[#allocation54_spill] sm:$0xff] }
 0x61b   :  { %4902 = vmatprep.mubr.bf16.mxu0 %v14770_v0 }
 0x621   :  { %4614 = vmatmul.mubr.bf16.gmra.mxu1 %v14773_v6  ;;  %v14781_v6 = vld [vmem:[#allocation63_spill] sm:$0xff] }
 0x622   :  { %4903 = vmatmul.mubr.bf16.gmra.mxu0 %v14776_v18  ;;  %4621 = vmatprep.mubr.bf16.mxu1 %v14777_v21  ;;  %v14783_v18 = vld [vmem:[#allocation59_spill] sm:$0xff]  ;;  %v14789_v21 = vld [vmem:[#allocation65_spill] sm:$0xff] }
 0x623   :  { %4910 = vmatprep.mubr.bf16.mxu0 %v14778_v47 }
 0x629   :  { %4622 = vmatmul.mubr.bf16.gmra.mxu1 %v14770_v0  ;;  %v14787_v0 = vld [vmem:[#allocation69_spill] sm:$0xff] }
 0x62a   :  { %4911 = vmatmul.mubr.bf16.gmra.mxu0 %v14779_v35  ;;  %4629 = vmatprep.mubr.bf16.mxu1 %v14780_v63  ;;  %v14800_v63 = vld [vmem:[#allocation73_spill] sm:$0xff]  ;;  %v14803_v35 = vld [vmem:[#allocation78_spill] sm:$0xff] }
 0x62b   :  { %4918 = vmatprep.mubr.bf16.mxu0 %v14781_v6 }
 0x631   :  { %4630 = vmatmul.mubr.bf16.gmra.mxu1 %v14778_v47  ;;  %v14790_v47 = vld [vmem:[#allocation66_spill] sm:$0xff] }
 0x632   :  { %4919 = vmatmul.mubr.bf16.gmra.mxu0 %v14782_v25  ;;  %4637 = vmatprep.mubr.bf16.mxu1 %v14783_v18  ;;  %v14791_v18 = vld [vmem:[#allocation70_spill] sm:$0xff] }
 0x633   :  { %4926 = vmatprep.mubr.bf16.mxu0 %v14784_v42  ;;  %v14792_v25 = vld [vmem:[#allocation62_spill] sm:$0xff] }
 0x639   :  { %4638 = vmatmul.mubr.bf16.gmra.mxu1 %v14781_v6  ;;  %v14793_v6 = vld [vmem:[#allocation75_spill] sm:$0xff] }
 0x63a   :  { %4927 = vmatmul.mubr.bf16.gmra.mxu0 %v14785_v54  ;;  %4645 = vmatprep.mubr.bf16.mxu1 %v14786_v48  ;;  %v14794_v48 = vld [vmem:[#allocation67_spill] sm:$0xff] }
 0x63b   :  { %4934 = vmatprep.mubr.bf16.mxu0 %v14787_v0  ;;  %v14795_v54 = vld [vmem:[#allocation71_spill] sm:$0xff] }
 0x641   :  { %4646 = vmatmul.mubr.bf16.gmra.mxu1 %v14784_v42  ;;  %v14796_v42 = vld [vmem:[#allocation72_spill] sm:$0xff] }
 0x642   :  { %4935 = vmatmul.mubr.bf16.gmra.mxu0 %v14788_v11  ;;  %4653 = vmatprep.mubr.bf16.mxu1 %v14789_v21  ;;  %v14797_v21 = vld [vmem:[#allocation76_spill] sm:$0xff] }
 0x643   :  { %4942 = vmatprep.mubr.bf16.mxu0 %v14790_v47  ;;  %v14798_v11 = vld [vmem:[#allocation68_spill] sm:$0xff] }
 0x649   :  { %4654 = vmatmul.mubr.bf16.gmra.mxu1 %v14787_v0  ;;  %v14799_v0 = vld [vmem:[#allocation81_spill] sm:$0xff] }
 0x64a   :  { %4943 = vmatmul.mubr.bf16.gmra.mxu0 %v14791_v18  ;;  %4661 = vmatprep.mubr.bf16.mxu1 %v14792_v25 }
 0x64b   :  { %4950 = vmatprep.mubr.bf16.mxu0 %v14793_v6 }
 0x651   :  { %4662 = vmatmul.mubr.bf16.gmra.mxu1 %v14790_v47  ;;  %v14801_v47 = vld [vmem:[#allocation77_spill] sm:$0xff] }
 0x652   :  { %4951 = vmatmul.mubr.bf16.gmra.mxu0 %v14794_v48  ;;  %4669 = vmatprep.mubr.bf16.mxu1 %v14795_v54 }
 0x653   :  { %4958 = vmatprep.mubr.bf16.mxu0 %v14796_v42 }
 0x659   :  { %4670 = vmatmul.mubr.bf16.gmra.mxu1 %v14793_v6 }
 0x65a   :  { %4959 = vmatmul.mubr.bf16.gmra.mxu0 %v14797_v21  ;;  %4677 = vmatprep.mubr.bf16.mxu1 %v14798_v11 }
 0x65b   :  { %4966 = vmatprep.mubr.bf16.mxu0 %v14799_v0 }
 0x661   :  { %v4487_v18 = vpop.f32.mrf.mxu1  ;;  %4678 = vmatmul.mubr.bf16.gmra.mxu1 %v14796_v42 }
 0x662   :  { %v4776_v25 = vpop.f32.mrf.mxu0  ;;  %4967 = vmatmul.mubr.bf16.gmra.mxu0 %v14800_v63  ;;  %4685 = vmatprep.mubr.bf16.mxu1 %v14801_v47  ;;  %v14806_v63 = vld [vmem:[#allocation74_spill] sm:$0xff] }
 0x663   :  { %v10710_v48 = vadd.f32 %v4776_v25, %v4487_v18  ;;  %v4489_v54 = vpop.f32.mrf.mxu1  ;;  %4974 = vmatprep.mubr.bf16.mxu0 %v14803_v35 }
 0x664   :  { %v4778_v6 = vpop.f32.mrf.mxu0  ;;  %v14808_v54 = vld [vmem:[#allocation87_spill] sm:$0xff] }
 0x665   :  { %14802 = vst [vmem:[#allocation45_spill] sm:$0xff] %v10710_v48  ;;  %v4490_v53 = vpop.f32.mrf.mxu1 }
 0x666   :  { %v4779_v21 = vpop.f32.mrf.mxu0 }
 0x667   :  { %v10713_v58 = vadd.f32 %v4779_v21, %v4490_v53  ;;  %v4492_v11 = vpop.f32.mrf.mxu1 }
 0x668   :  { %v4781_v52 = vpop.f32.mrf.mxu0 }
 0x669   :  { %14804 = vst [vmem:[#allocation28_spill] sm:$0xff] %v10713_v58  ;;  %v4495_v61 = vpop.f32.mrf.mxu1  ;;  %4686 = vmatmul.mubr.bf16.gmra.mxu1 %v14799_v0  ;;  %v14810_v0 = vld [vmem:[#allocation79_spill] sm:$0xff] }
 0x66a   :  { %v4784_v42 = vpop.f32.mrf.mxu0  ;;  %4975 = vmatmul.mubr.bf16.gmra.mxu0 %v14805_v57  ;;  %4693 = vmatprep.mubr.bf16.mxu1 %v14806_v63  ;;  %v14811_v57 = vld [vmem:[#allocation83_spill] sm:$0xff] }
 0x66b   :  { %v10718_v25 = vadd.f32 %v4784_v42, %v4495_v61  ;;  %v4497_v18 = vpop.f32.mrf.mxu1  ;;  %4982 = vmatprep.mubr.bf16.mxu0 %v14808_v54 }
 0x66c   :  { %v4786_v6 = vpop.f32.mrf.mxu0  ;;  %v14813_v18 = vld [vmem:[#allocation84_spill] sm:$0xff] }
 0x66d   :  { %14807 = vst [vmem:[#allocation44_spill] sm:$0xff] %v10718_v25  ;;  %v4498_v48 = vpop.f32.mrf.mxu1 }
 0x66e   :  { %v4787_v47 = vpop.f32.mrf.mxu0 }
 0x66f   :  { %v10721_v53 = vadd.f32 %v4787_v47, %v4498_v48  ;;  %v4500_v21 = vpop.f32.mrf.mxu1 }
 0x670   :  { %v4789_v52 = vpop.f32.mrf.mxu0 }
 0x671   :  { %14809 = vst [vmem:[#allocation35_spill] sm:$0xff] %v10721_v53  ;;  %v4503_v11 = vpop.f32.mrf.mxu1  ;;  %4694 = vmatmul.mubr.bf16.gmra.mxu1 %v14803_v35  ;;  %v14815_v35 = vld [vmem:[#allocation88_spill] sm:$0xff] }
 0x672   :  { %v4792_v58 = vpop.f32.mrf.mxu0  ;;  %4983 = vmatmul.mubr.bf16.gmra.mxu0 %v14810_v0  ;;  %4701 = vmatprep.mubr.bf16.mxu1 %v14811_v57  ;;  %v14816_v0 = vld [vmem:[#allocation80_spill] sm:$0xff] }
 0x673   :  { %v10726_v61 = vadd.f32 %v4792_v58, %v4503_v11  ;;  %v4505_v42 = vpop.f32.mrf.mxu1  ;;  %4990 = vmatprep.mubr.bf16.mxu0 %v14813_v18 }
 0x674   :  { %v4794_v6 = vpop.f32.mrf.mxu0 }
 0x675   :  { %14812 = vst [vmem:[#allocation36_spill] sm:$0xff] %v10726_v61  ;;  %v4506_v25 = vpop.f32.mrf.mxu1 }
 0x676   :  { %v4795_v63 = vpop.f32.mrf.mxu0 }
 0x677   :  { %v10729_v47 = vadd.f32 %v4795_v63, %v4506_v25  ;;  %v4508_v48 = vpop.f32.mrf.mxu1 }
 0x678   :  { %v4797_v21 = vpop.f32.mrf.mxu0 }
 0x679   :  { %14814 = vst [vmem:[#allocation57_spill] sm:$0xff] %v10729_v47  ;;  %v4511_v52 = vpop.f32.mrf.mxu1  ;;  %4702 = vmatmul.mubr.bf16.gmra.mxu1 %v14808_v54  ;;  %v14819_v54 = vld [vmem:[#allocation85_spill] sm:$0xff] }
 0x67a   :  { %v4800_v53 = vpop.f32.mrf.mxu0  ;;  %4991 = vmatmul.mubr.bf16.gmra.mxu0 %v14815_v35  ;;  %4709 = vmatprep.mubr.bf16.mxu1 %v14816_v0  ;;  %v14820_v35 = vld [vmem:[#allocation89_spill] sm:$0xff] }
 0x67b   :  { %v10734_v58 = vadd.f32 %v4800_v53, %v4511_v52  ;;  %v4513_v11 = vpop.f32.mrf.mxu1  ;;  %4998 = vmatprep.mubr.bf16.mxu0 %v10444_v26 }
 0x67c   :  { %v4802_v42 = vpop.f32.mrf.mxu0  ;;  %v14822_v11 = vld [vmem:[#allocation90_spill] sm:$0xff] }
 0x67d   :  { %14817 = vst [vmem:[#allocation34_spill] sm:$0xff] %v10734_v58  ;;  %v4514_v6 = vpop.f32.mrf.mxu1 }
 0x67e   :  { %v4803_v61 = vpop.f32.mrf.mxu0 }
 0x67f   :  { %v10737_v63 = vadd.f32 %v4803_v61, %v4514_v6  ;;  %v4516_v25 = vpop.f32.mrf.mxu1 }
 0x680   :  { %v4805_v48 = vpop.f32.mrf.mxu0 }
 0x681   :  { %14818 = vst [vmem:[#allocation33_spill] sm:$0xff] %v10737_v63  ;;  %v4519_v21 = vpop.f32.mrf.mxu1  ;;  %4710 = vmatmul.mubr.bf16.gmra.mxu1 %v14813_v18 }
 0x682   :  { %v4808_v47 = vpop.f32.mrf.mxu0  ;;  %4999 = vmatmul.mubr.bf16.gmra.mxu0 %v14819_v54  ;;  %4717 = vmatprep.mubr.bf16.mxu1 %v14820_v35  ;;  %v14824_v54 = vld [vmem:[#allocation86_spill] sm:$0xff] }
 0x683   :  { %v10742_v53 = vadd.f32 %v4808_v47, %v4519_v21  ;;  %v4521_v52 = vpop.f32.mrf.mxu1  ;;  %5006 = vmatprep.mubr.bf16.mxu0 %v14822_v11 }
 0x684   :  { %v4810_v42 = vpop.f32.mrf.mxu0 }
 0x685   :  { %14821 = vst [vmem:[#allocation38_spill] sm:$0xff] %v10742_v53  ;;  %v4522_v58 = vpop.f32.mrf.mxu1 }
 0x686   :  { %v4811_v0 = vpop.f32.mrf.mxu0 }
 0x687   :  { %v10745_v61 = vadd.f32 %v4811_v0, %v4522_v58  ;;  %v4524_v6 = vpop.f32.mrf.mxu1 }
 0x688   :  { %v4813_v25 = vpop.f32.mrf.mxu0 }
 0x689   :  { %14823 = vst [vmem:[#allocation37_spill] sm:$0xff] %v10745_v61  ;;  %v4527_v48 = vpop.f32.mrf.mxu1  ;;  %4718 = vmatmul.mubr.bf16.gmra.mxu1 %v10444_v26  ;;  %v14827_v26 = vld [vmem:[#allocation91_spill] sm:$0xff] }
 0x68a   :  { %v4816_v63 = vpop.f32.mrf.mxu0  ;;  %5007 = vmatmul.mubr.bf16.gmra.mxu0 %v10446_v30  ;;  %4725 = vmatprep.mubr.bf16.mxu1 %v14824_v54 }
 0x68b   :  { %v10750_v47 = vadd.f32 %v4816_v63, %v4527_v48  ;;  %v4529_v21 = vpop.f32.mrf.mxu1  ;;  %5014 = vmatprep.mubr.bf16.mxu0 %v10454_v62 }
 0x68c   :  { %v4818_v52 = vpop.f32.mrf.mxu0 }
 0x68d   :  { %14825 = vst [vmem:[#allocation83_spill] sm:$0xff] %v10750_v47  ;;  %v4530_v42 = vpop.f32.mrf.mxu1 }
 0x68e   :  { %v4819_v53 = vpop.f32.mrf.mxu0 }
 0x68f   :  { %v10753_v0 = vadd.f32 %v4819_v53, %v4530_v42  ;;  %v4532_v58 = vpop.f32.mrf.mxu1 }
 0x690   :  { %v4821_v6 = vpop.f32.mrf.mxu0 }
 0x691   :  { %14826 = vst [vmem:[#allocation84_spill] sm:$0xff] %v10753_v0  ;;  %v4535_v25 = vpop.f32.mrf.mxu1  ;;  %4726 = vmatmul.mubr.bf16.gmra.mxu1 %v14822_v11 }
 0x692   :  { %v4824_v61 = vpop.f32.mrf.mxu0  ;;  %5015 = vmatmul.mubr.bf16.gmra.mxu0 %v14827_v26  ;;  %4733 = vmatprep.mubr.bf16.mxu1 %v10448_v4 }
 0x693   :  { %v10758_v63 = vadd.f32 %v4824_v61, %v4535_v25  ;;  %v4537_v48 = vpop.f32.mrf.mxu1  ;;  %5022 = vmatprep.mubr.bf16.mxu0 %v10450_v33 }
 0x694   :  { %v4826_v21 = vpop.f32.mrf.mxu0 }
 0x695   :  { %14828 = vst [vmem:[#allocation89_spill] sm:$0xff] %v10758_v63  ;;  %v4538_v52 = vpop.f32.mrf.mxu1 }
 0x696   :  { %v4827_v47 = vpop.f32.mrf.mxu0 }
 0x697   :  { %v10761_v53 = vadd.f32 %v4827_v47, %v4538_v52  ;;  %v4540_v42 = vpop.f32.mrf.mxu1 }
 0x698   :  { %v4829_v58 = vpop.f32.mrf.mxu0 }
 0x699   :  { %14829 = vst [vmem:[#allocation90_spill] sm:$0xff] %v10761_v53  ;;  %v4543_v6 = vpop.f32.mrf.mxu1  ;;  %4734 = vmatmul.mubr.bf16.gmra.mxu1 %v10454_v62  ;;  %v9058_v58 = vld [vmem:[#allocation3 + $0x230] sm:$0xff]  }
 0x69a   :  { %v4832_v0 = vpop.f32.mrf.mxu0  ;;  %5023 = vmatmul.mubr.bf16.gmra.mxu0 %v10456_v3  ;;  %5063 = vmatprep.mubr.bf16.mxu1 %v10278_v59 }
 0x69b   :  { %v10766_v61 = vadd.f32 %v4832_v0, %v4543_v6  ;;  %v4545_v25 = vpop.f32.mrf.mxu1  ;;  %5352 = vmatprep.mubr.bf16.mxu0 %v10266_v39 }
 0x69c   :  { %v4834_v48 = vpop.f32.mrf.mxu0 }
 0x69d   :  { %v4546_v21 = vpop.f32.mrf.mxu1 }
 0x69e   :  { %v4835_v33 = vpop.f32.mrf.mxu0 }
 0x69f   :  { %v10769_v47 = vadd.f32 %v4835_v33, %v4546_v21  ;;  %v4548_v52 = vpop.f32.mrf.mxu1  ;;  %v9059_v33 = vld [vmem:[#allocation3 + $0x228] sm:$0xff]  }
 0x6a0   :  { %v4837_v42 = vpop.f32.mrf.mxu0  ;;  %v9060_v52 = vld [vmem:[#allocation3 + $0x220] sm:$0xff]  }
 0x6a1   :  { %v4551_v53 = vpop.f32.mrf.mxu1  ;;  %5064 = vmatmul.mubr.bf16.vlgmr.msra.gmra.mxu1 %v10268_v43 }
 0x6a2   :  { %v4840_v63 = vpop.f32.mrf.mxu0  ;;  %8746 = vmatpush3.bf16.msra.mxu1 %v10676_v24  ;;  %5353 = vmatmul.mubr.bf16.vlgmr.msra.gmra.mxu0 %v10270_v8 }
 0x6a3   :  { %v10774_v59 = vadd.f32 %v4840_v63, %v4551_v53  ;;  %v4553_v0 = vpop.f32.mrf.mxu1  ;;  %5071 = vmatprep.mubr.bf16.mxu1 %v10272_v14  ;;  %5360 = vmatprep.mubr.bf16.mxu0 %v10280_v16 }
 0x6a4   :  { %v4842_v6 = vpop.f32.mrf.mxu0  ;;  %8747 = vmatprep.subr.bf16.mxu1 %v9058_v58  ;;  %v9061_v0 = vld [vmem:[#allocation3 + $0x218] sm:$0xff]  }
 0x6a5   :  { %v4554_v25 = vpop.f32.mrf.mxu1 }
 0x6a6   :  { %v4843_v48 = vpop.f32.mrf.mxu0  ;;  %8748 = vmatpush3.bf16.msra.mxu1 %v9058_v58 }
 0x6a7   :  { %v10778_v21 = vadd.f32 %v4843_v48, %v4554_v25  ;;  %v4556_v43 = vpop.f32.mrf.mxu1  ;;  %8749 = vmatprep.subr.bf16.mxu1 %v9059_v33 }
 0x6a8   :  { %v4845_v24 = vpop.f32.mrf.mxu0 }
 0x6a9   :  { %v4559_v8 = vpop.f32.mrf.mxu1  ;;  %5072 = vmatmul.mubr.bf16.gmra.mxu1 %v10266_v39 }
 0x6aa   :  { %v4848_v63 = vpop.f32.mrf.mxu0  ;;  %5361 = vmatmul.mubr.bf16.gmra.mxu0 %v10288_v37  ;;  %5079 = vmatprep.mubr.bf16.mxu1 %v10290_v31 }
 0x6ab   :  { %v10783_v53 = vadd.f32 %v4848_v63, %v4559_v8  ;;  %v4561_v42 = vpop.f32.mrf.mxu1  ;;  %5368 = vmatprep.mubr.bf16.mxu0 %v10274_v46  ;;  %8750 = vmatpush3.bf16.msra.mxu1 %v9059_v33 }
 0x6ac   :  { %v4850_v58 = vpop.f32.mrf.mxu0  ;;  %8751 = vmatprep.subr.bf16.mxu1 %v9060_v52 }
 0x6ad   :  { %v4562_v6 = vpop.f32.mrf.mxu1 }
 0x6ae   :  { %v4851_v25 = vpop.f32.mrf.mxu0 }
 0x6af   :  { %v10786_v48 = vadd.f32 %v4851_v25, %v4562_v6  ;;  %v4564_v43 = vpop.f32.mrf.mxu1  ;;  %8752 = vmatpush3.bf16.msra.mxu1 %v9060_v52 }
 0x6b0   :  { %v4853_v39 = vpop.f32.mrf.mxu0  ;;  %8753 = vmatprep.subr.bf16.mxu1 %v9061_v0 }
 0x6b1   :  { %v4567_v37 = vpop.f32.mrf.mxu1  ;;  %5080 = vmatmul.mubr.bf16.gmra.mxu1 %v10280_v16 }
 0x6b2   :  { %v4856_v24 = vpop.f32.mrf.mxu0  ;;  %5369 = vmatmul.mubr.bf16.gmra.mxu0 %v10282_v49  ;;  %5087 = vmatprep.mubr.bf16.mxu1 %v10284_v56 }
 0x6b3   :  { %v10791_v33 = vadd.f32 %v4856_v24, %v4567_v37  ;;  %v4569_v8 = vpop.f32.mrf.mxu1  ;;  %5376 = vmatprep.mubr.bf16.mxu0 %v10292_v7  ;;  %8754 = vmatpush3.bf16.msra.mxu1 %v9061_v0 }
 0x6b4   :  { %v4858_v63 = vpop.f32.mrf.mxu0 }
 0x6b5   :  { %v4570_v42 = vpop.f32.mrf.mxu1 }
 0x6b6   :  { %v4859_v58 = vpop.f32.mrf.mxu0 }
 0x6b7   :  { %v10794_v52 = vadd.f32 %v4859_v58, %v4570_v42  ;;  %v4572_v6 = vpop.f32.mrf.mxu1 }
 0x6b8   :  { %v4861_v25 = vpop.f32.mrf.mxu0 }
 0x6b9   :  { %v4575_v43 = vpop.f32.mrf.mxu1  ;;  %5088 = vmatmul.mubr.bf16.gmra.mxu1 %v10274_v46  ;;  %v9062_v25 = vld [vmem:[#allocation3 + $0x210] sm:$0xff]  }
 0x6ba   :  { %v4864_v16 = vpop.f32.mrf.mxu0  ;;  %5377 = vmatmul.mubr.bf16.gmra.mxu0 %v10300_v32  ;;  %5095 = vmatprep.mubr.bf16.mxu1 %v10302_v40 }
 0x6bb   :  { %v10799_v49 = vadd.f32 %v4864_v16, %v4575_v43  ;;  %v4577_v39 = vpop.f32.mrf.mxu1  ;;  %5384 = vmatprep.mubr.bf16.mxu0 %v10286_v51  ;;  %8755 = vmatprep.subr.bf16.mxu1 %v9062_v25 }
 0x6bc   :  { %v4866_v0 = vpop.f32.mrf.mxu0  ;;  %8756 = vmatpush3.bf16.msra.mxu1 %v9062_v25 }
 0x6bd   :  { %v4578_v37 = vpop.f32.mrf.mxu1 }
 0x6be   :  { %v4867_v24 = vpop.f32.mrf.mxu0 }
 0x6bf   :  { %v10802_v8 = vadd.f32 %v4867_v24, %v4578_v37  ;;  %v4580_v63 = vpop.f32.mrf.mxu1 }
 0x6c0   :  { %v4869_v42 = vpop.f32.mrf.mxu0 }
 0x6c1   :  { %v4583_v58 = vpop.f32.mrf.mxu1  ;;  %5096 = vmatmul.mubr.bf16.gmra.mxu1 %v10292_v7 }
 0x6c2   :  { %v4872_v46 = vpop.f32.mrf.mxu0  ;;  %5385 = vmatmul.mubr.bf16.gmra.mxu0 %v10294_v20  ;;  %5103 = vmatprep.mubr.bf16.mxu1 %v10296_v34 }
 0x6c3   :  { %v10807_v32 = vadd.f32 %v4872_v46, %v4583_v58  ;;  %v4585_v6 = vpop.f32.mrf.mxu1  ;;  %5392 = vmatprep.mubr.bf16.mxu0 %v10304_v44 }
 0x6c4   :  { %v4874_v43 = vpop.f32.mrf.mxu0 }
 0x6c5   :  { %v4586_v16 = vpop.f32.mrf.mxu1 }
 0x6c6   :  { %v4875_v39 = vpop.f32.mrf.mxu0 }
 0x6c7   :  { %v10810_v0 = vadd.f32 %v4875_v39, %v4586_v16  ;;  %v4588_v37 = vpop.f32.mrf.mxu1 }
 0x6c8   :  { %v4877_v7 = vpop.f32.mrf.mxu0 }
 0x6c9   :  { %v4591_v24 = vpop.f32.mrf.mxu1  ;;  %5104 = vmatmul.mubr.bf16.gmra.mxu1 %v10286_v51 }
 0x6ca   :  { %v4880_v20 = vpop.f32.mrf.mxu0  ;;  %5393 = vmatmul.mubr.bf16.gmra.mxu0 %v10312_v12  ;;  %5111 = vmatprep.mubr.bf16.mxu1 %v10314_v45 }
 0x6cb   :  { %v10815_v63 = vadd.f32 %v4880_v20, %v4591_v24  ;;  %v4593_v42 = vpop.f32.mrf.mxu1  ;;  %5400 = vmatprep.mubr.bf16.mxu0 %v10298_v28 }
 0x6cc   :  { %v4882_v58 = vpop.f32.mrf.mxu0 }
 0x6cd   :  { %v4594_v46 = vpop.f32.mrf.mxu1 }
 0x6ce   :  { %v4883_v6 = vpop.f32.mrf.mxu0 }
 0x6cf   :  { %v10818_v25 = vadd.f32 %v4883_v6, %v4594_v46  ;;  %v4596_v43 = vpop.f32.mrf.mxu1 }
 0x6d0   :  { %v4885_v16 = vpop.f32.mrf.mxu0 }
 0x6d1   :  { %v4599_v39 = vpop.f32.mrf.mxu1  ;;  %5112 = vmatmul.mubr.bf16.gmra.mxu1 %v10304_v44 }
 0x6d2   :  { %v4888_v51 = vpop.f32.mrf.mxu0  ;;  %5401 = vmatmul.mubr.bf16.gmra.mxu0 %v10306_v5  ;;  %5119 = vmatprep.mubr.bf16.mxu1 %v10308_v13 }
 0x6d3   :  { %v10823_v12 = vadd.f32 %v4888_v51, %v4599_v39  ;;  %v4601_v37 = vpop.f32.mrf.mxu1  ;;  %5408 = vmatprep.mubr.bf16.mxu0 %v10316_v2 }
 0x6d4   :  { %v4890_v7 = vpop.f32.mrf.mxu0 }
 0x6d5   :  { %v4602_v24 = vpop.f32.mrf.mxu1 }
 0x6d6   :  { %v4891_v20 = vpop.f32.mrf.mxu0 }
 0x6d7   :  { %v10826_v42 = vadd.f32 %v4891_v20, %v4602_v24  ;;  %v4604_v58 = vpop.f32.mrf.mxu1 }
 0x6d8   :  { %v4893_v46 = vpop.f32.mrf.mxu0 }
 0x6d9   :  { %v4607_v6 = vpop.f32.mrf.mxu1  ;;  %5120 = vmatmul.mubr.bf16.gmra.mxu1 %v10298_v28 }
 0x6da   :  { %v4896_v44 = vpop.f32.mrf.mxu0  ;;  %5409 = vmatmul.mubr.bf16.gmra.mxu0 %v10324_v55  ;;  %5127 = vmatprep.mubr.bf16.mxu1 %v10326_v19  ;;  %v9063_v55 = vld [vmem:[#allocation3 + $0x208] sm:$0xff]  }
 0x6db   :  { %v10831_v5 = vadd.f32 %v4896_v44, %v4607_v6  ;;  %v4609_v43 = vpop.f32.mrf.mxu1  ;;  %5416 = vmatprep.mubr.bf16.mxu0 %v10310_v38  ;;  %8757 = vmatprep.subr.bf16.mxu1 %v9063_v55 }
 0x6dc   :  { %v4898_v16 = vpop.f32.mrf.mxu0  ;;  %8758 = vmatpush3.bf16.msra.mxu1 %v9063_v55 }
 0x6dd   :  { %v4610_v39 = vpop.f32.mrf.mxu1 }
 0x6de   :  { %v4899_v51 = vpop.f32.mrf.mxu0 }
 0x6df   :  { %v10834_v37 = vadd.f32 %v4899_v51, %v4610_v39  ;;  %v4612_v7 = vpop.f32.mrf.mxu1 }
 0x6e0   :  { %v4901_v24 = vpop.f32.mrf.mxu0 }
 0x6e1   :  { %v4615_v20 = vpop.f32.mrf.mxu1  ;;  %5128 = vmatmul.mubr.bf16.gmra.mxu1 %v10316_v2 }
 0x6e2   :  { %v4904_v28 = vpop.f32.mrf.mxu0  ;;  %5417 = vmatmul.mubr.bf16.gmra.mxu0 %v10318_v15  ;;  %5135 = vmatprep.mubr.bf16.mxu1 %v10320_v29 }
 0x6e3   :  { %v10839_v58 = vadd.f32 %v4904_v28, %v4615_v20  ;;  %v4617_v46 = vpop.f32.mrf.mxu1  ;;  %5424 = vmatprep.mubr.bf16.mxu0 %v10328_v10 }
 0x6e4   :  { %v4906_v6 = vpop.f32.mrf.mxu0 }
 0x6e5   :  { %v4618_v44 = vpop.f32.mrf.mxu1 }
 0x6e6   :  { %v4907_v43 = vpop.f32.mrf.mxu0 }
 0x6e7   :  { %v10842_v16 = vadd.f32 %v4907_v43, %v4618_v44  ;;  %v4620_v39 = vpop.f32.mrf.mxu1 }
 0x6e8   :  { %v4909_v2 = vpop.f32.mrf.mxu0 }
 0x6e9   :  { %14830 = vst [vmem:[#allocation86_spill] sm:$0xff] %v10842_v16  ;;  %v4623_v51 = vpop.f32.mrf.mxu1  ;;  %5136 = vmatmul.mubr.bf16.gmra.mxu1 %v10310_v38 }
 0x6ea   :  { %v4912_v15 = vpop.f32.mrf.mxu0  ;;  %5425 = vmatmul.mubr.bf16.gmra.mxu0 %v10336_v22  ;;  %5143 = vmatprep.mubr.bf16.mxu1 %v10338_v23 }
 0x6eb   :  { %v10847_v7 = vadd.f32 %v4912_v15, %v4623_v51  ;;  %v4625_v24 = vpop.f32.mrf.mxu1  ;;  %5432 = vmatprep.mubr.bf16.mxu0 %v10322_v1 }
 0x6ec   :  { %v4914_v20 = vpop.f32.mrf.mxu0 }
 0x6ed   :  { %14831 = vst [vmem:[#allocation91_spill] sm:$0xff] %v10847_v7  ;;  %v4626_v28 = vpop.f32.mrf.mxu1 }
 0x6ee   :  { %v4915_v55 = vpop.f32.mrf.mxu0 }
 0x6ef   :  { %v10850_v46 = vadd.f32 %v4915_v55, %v4626_v28  ;;  %v4628_v6 = vpop.f32.mrf.mxu1 }
 0x6f0   :  { %v4917_v44 = vpop.f32.mrf.mxu0 }
 0x6f1   :  { %14832 = vst [vmem:[#allocation120_spill] sm:$0xff] %v10850_v46  ;;  %v4631_v43 = vpop.f32.mrf.mxu1  ;;  %5144 = vmatmul.mubr.bf16.gmra.mxu1 %v10328_v10  ;;  %v14854_v46 = vld [vmem:[#allocation39_spill] sm:$0xff] }
 0x6f2   :  { %v4920_v38 = vpop.f32.mrf.mxu0  ;;  %5433 = vmatmul.mubr.bf16.gmra.mxu0 %v10330_v41  ;;  %5151 = vmatprep.mubr.bf16.mxu1 %v10332_v50 }
 0x6f3   :  { %v10855_v22 = vadd.f32 %v4920_v38, %v4631_v43  ;;  %v4633_v39 = vpop.f32.mrf.mxu1  ;;  %5440 = vmatprep.mubr.bf16.mxu0 %v10340_v17 }
 0x6f4   :  { %v4922_v2 = vpop.f32.mrf.mxu0 }
 0x6f5   :  { %14833 = vst [vmem:[#allocation121_spill] sm:$0xff] %v10855_v22  ;;  %v4634_v51 = vpop.f32.mrf.mxu1  ;;  %v14853_v22 = vld [vmem:[#allocation30_spill] sm:$0xff] }
 0x6f6   :  { %v4923_v15 = vpop.f32.mrf.mxu0 }
 0x6f7   :  { %v10858_v24 = vadd.f32 %v4923_v15, %v4634_v51  ;;  %v4636_v20 = vpop.f32.mrf.mxu1 }
 0x6f8   :  { %v4925_v28 = vpop.f32.mrf.mxu0  ;;  %v9064_v20 = vld [vmem:[#allocation3 + $0x200] sm:$0xff]  }
 0x6f9   :  { %14834 = vst [vmem:[#allocation122_spill] sm:$0xff] %v10858_v24  ;;  %v4639_v55 = vpop.f32.mrf.mxu1  ;;  %5152 = vmatmul.mubr.bf16.gmra.mxu1 %v10322_v1  ;;  %8759 = vmatprep.subr.bf16.mxu1 %v9064_v20 }
 0x6fa   :  { %v4928_v10 = vpop.f32.mrf.mxu0  ;;  %5441 = vmatmul.mubr.bf16.gmra.mxu0 %v10348_v60  ;;  %5159 = vmatprep.mubr.bf16.mxu1 %v14760_v36  ;;  %v14837_v60 = vld [vmem:[#allocation47_spill] sm:$0xff] }
 0x6fb   :  { %v10863_v41 = vadd.f32 %v4928_v10, %v4639_v55  ;;  %v4641_v6 = vpop.f32.mrf.mxu1  ;;  %5448 = vmatprep.mubr.bf16.mxu0 %v14761_v9  ;;  %v14839_v10 = vld [vmem:[#allocation31_spill] sm:$0xff]  ;;  %8760 = vmatpush3.bf16.msra.mxu1 %v9064_v20 }
 0x6fc   :  { %v4930_v44 = vpop.f32.mrf.mxu0 }
 0x6fd   :  { %14835 = vst [vmem:[#allocation123_spill] sm:$0xff] %v10863_v41  ;;  %v4642_v43 = vpop.f32.mrf.mxu1 }
 0x6fe   :  { %v4931_v38 = vpop.f32.mrf.mxu0 }
 0x6ff   :  { %v10866_v39 = vadd.f32 %v4931_v38, %v4642_v43  ;;  %v4644_v2 = vpop.f32.mrf.mxu1 }
 0x700   :  { %v4933_v51 = vpop.f32.mrf.mxu0 }
 0x701   :  { %14836 = vst [vmem:[#allocation124_spill] sm:$0xff] %v10866_v39  ;;  %v4647_v15 = vpop.f32.mrf.mxu1  ;;  %5160 = vmatmul.mubr.bf16.gmra.mxu1 %v10340_v17  ;;  %v14841_v39 = vld [vmem:[#allocation51_spill] sm:$0xff] }
 0x702   :  { %v4936_v1 = vpop.f32.mrf.mxu0  ;;  %5449 = vmatmul.mubr.bf16.gmra.mxu0 %v14759_v27  ;;  %5167 = vmatprep.mubr.bf16.mxu1 %v14837_v60 }
 0x703   :  { %v10871_v28 = vadd.f32 %v4936_v1, %v4647_v15  ;;  %v4649_v55 = vpop.f32.mrf.mxu1  ;;  %5456 = vmatprep.mubr.bf16.mxu0 %v14839_v10  ;;  %v14842_v15 = vld [vmem:[#allocation52_spill] sm:$0xff] }
 0x704   :  { %v4938_v6 = vpop.f32.mrf.mxu0 }
 0x705   :  { %14838 = vst [vmem:[#allocation47_spill] sm:$0xff] %v10871_v28  ;;  %v4650_v44 = vpop.f32.mrf.mxu1  ;;  %v14844_v6 = vld [vmem:[#allocation29_spill] sm:$0xff] }
 0x706   :  { %v4939_v43 = vpop.f32.mrf.mxu0 }
 0x707   :  { %v10874_v38 = vadd.f32 %v4939_v43, %v4650_v44  ;;  %v4652_v2 = vpop.f32.mrf.mxu1 }
 0x708   :  { %v4941_v17 = vpop.f32.mrf.mxu0 }
 0x709   :  { %14840 = vst [vmem:[#allocation31_spill] sm:$0xff] %v10874_v38  ;;  %v4655_v51 = vpop.f32.mrf.mxu1  ;;  %5168 = vmatmul.mubr.bf16.gmra.mxu1 %v14761_v9  ;;  %v14846_v38 = vld [vmem:[#allocation48_spill] sm:$0xff] }
 0x70a   :  { %v4944_v27 = vpop.f32.mrf.mxu0  ;;  %5457 = vmatmul.mubr.bf16.gmra.mxu0 %v14841_v39  ;;  %5175 = vmatprep.mubr.bf16.mxu1 %v14842_v15  ;;  %v14847_v39 = vld [vmem:[#allocation49_spill] sm:$0xff] }
 0x70b   :  { %v10879_v1 = vadd.f32 %v4944_v27, %v4655_v51  ;;  %v4657_v55 = vpop.f32.mrf.mxu1  ;;  %5464 = vmatprep.mubr.bf16.mxu0 %v14844_v6 }
 0x70c   :  { %v4946_v28 = vpop.f32.mrf.mxu0  ;;  %v14849_v55 = vld [vmem:[#allocation40_spill] sm:$0xff] }
 0x70d   :  { %14843 = vst [vmem:[#allocation51_spill] sm:$0xff] %v10879_v1  ;;  %v4658_v20 = vpop.f32.mrf.mxu1  ;;  %v14850_v1 = vld [vmem:[#allocation25_spill] sm:$0xff] }
 0x70e   :  { %v4947_v41 = vpop.f32.mrf.mxu0  ;;  %v14851_v28 = vpack.c.bf16 %v14849_v55, %v14850_v1 }
 0x70f   :  { %v10882_v44 = vadd.f32 %v4947_v41, %v4658_v20  ;;  %v4660_v43 = vpop.f32.mrf.mxu1 }
 0x710   :  { %v4949_v2 = vpop.f32.mrf.mxu0 }
 0x711   :  { %14845 = vst [vmem:[#allocation52_spill] sm:$0xff] %v10882_v44  ;;  %v4663_v17 = vpop.f32.mrf.mxu1  ;;  %5176 = vmatmul.mubr.bf16.gmra.mxu1 %v14839_v10 }
 0x712   :  { %v4952_v9 = vpop.f32.mrf.mxu0  ;;  %5465 = vmatmul.mubr.bf16.gmra.mxu0 %v14846_v38  ;;  %5183 = vmatprep.mubr.bf16.mxu1 %v14847_v39 }
 0x713   :  { %v10887_v51 = vadd.f32 %v4952_v9, %v4663_v17  ;;  %v4665_v27 = vpop.f32.mrf.mxu1  ;;  %5472 = vmatprep.mubr.bf16.mxu0 %v14851_v28  ;;  %v14855_v17 = vpack.c.bf16 %v14853_v22, %v14854_v46  ;;  %v14856_v9 = vld [vmem:[#allocation58_spill] sm:$0xff]  ;;  %v14862_v22 = vld [vmem:[#allocation55_spill] sm:$0xff] }
 0x714   :  { %v4954_v24 = vpop.f32.mrf.mxu0  ;;  %v14861_v46 = vld [vmem:[#allocation54_spill] sm:$0xff] }
 0x715   :  { %14848 = vst [vmem:[#allocation29_spill] sm:$0xff] %v10887_v51  ;;  %v4666_v41 = vpop.f32.mrf.mxu1  ;;  %v14858_v24 = vld [vmem:[#allocation50_spill] sm:$0xff] }
 0x716   :  { %v4955_v20 = vpop.f32.mrf.mxu0 }
 0x717   :  { %v10892_v43 = vadd.f32 %v4955_v20, %v4666_v41  ;;  %v4668_v2 = vpop.f32.mrf.mxu1 }
 0x718   :  { %v4957_v44 = vpop.f32.mrf.mxu0 }
 0x719   :  { %14852 = vst [vmem:[#allocation48_spill] sm:$0xff] %v10892_v43  ;;  %v4671_v10 = vpop.f32.mrf.mxu1  ;;  %5184 = vmatmul.mubr.bf16.gmra.mxu1 %v14844_v6  ;;  %v14860_v43 = vld [vmem:[#allocation53_spill] sm:$0xff] }
 0x71a   :  { %v4960_v38 = vpop.f32.mrf.mxu0  ;;  %5473 = vmatmul.mubr.bf16.gmra.mxu0 %v14855_v17  ;;  %5191 = vmatprep.mubr.bf16.mxu1 %v14856_v9  ;;  %v14864_v17 = vld [vmem:[#allocation59_spill] sm:$0xff] }
 0x71b   :  { %v10899_v27 = vadd.f32 %v4960_v38, %v4671_v10  ;;  %v4673_v1 = vpop.f32.mrf.mxu1  ;;  %5480 = vmatprep.mubr.bf16.mxu0 %v14858_v24 }
 0x71c   :  { %v4962_v55 = vpop.f32.mrf.mxu0 }
 0x71d   :  { %14857 = vst [vmem:[#allocation49_spill] sm:$0xff] %v10899_v27  ;;  %v4674_v28 = vpop.f32.mrf.mxu1 }
 0x71e   :  { %v4963_v41 = vpop.f32.mrf.mxu0 }
 0x71f   :  { %v10902_v20 = vadd.f32 %v4963_v41, %v4674_v28  ;;  %v4676_v44 = vpop.f32.mrf.mxu1 }
 0x720   :  { %v4965_v2 = vpop.f32.mrf.mxu0 }
 0x721   :  { %14859 = vst [vmem:[#allocation40_spill] sm:$0xff] %v10902_v20  ;;  %v4679_v6 = vpop.f32.mrf.mxu1  ;;  %5192 = vmatmul.mubr.bf16.gmra.mxu1 %v14860_v43  ;;  %v14866_v20 = vld [vmem:[#allocation63_spill] sm:$0xff] }
 0x722   :  { %v4968_v51 = vpop.f32.mrf.mxu0  ;;  %5481 = vmatmul.mubr.bf16.gmra.mxu0 %v14861_v46  ;;  %5199 = vmatprep.mubr.bf16.mxu1 %v14862_v22  ;;  %v14867_v46 = vld [vmem:[#allocation64_spill] sm:$0xff] }
 0x723   :  { %v10907_v10 = vadd.f32 %v4968_v51, %v4679_v6  ;;  %v4681_v38 = vpop.f32.mrf.mxu1  ;;  %5488 = vmatprep.mubr.bf16.mxu0 %v14864_v17 }
 0x724   :  { %v4970_v9 = vpop.f32.mrf.mxu0  ;;  %v14869_v38 = vld [vmem:[#allocation56_spill] sm:$0xff] }
 0x725   :  { %14863 = vst [vmem:[#allocation25_spill] sm:$0xff] %v10907_v10  ;;  %v4682_v1 = vpop.f32.mrf.mxu1 }
 0x726   :  { %v4971_v55 = vpop.f32.mrf.mxu0 }
 0x727   :  { %v10910_v28 = vadd.f32 %v4971_v55, %v4682_v1  ;;  %v4684_v41 = vpop.f32.mrf.mxu1 }
 0x728   :  { %v4973_v44 = vpop.f32.mrf.mxu0 }
 0x729   :  { %14865 = vst [vmem:[#allocation30_spill] sm:$0xff] %v10910_v28  ;;  %v4687_v2 = vpop.f32.mrf.mxu1  ;;  %5200 = vmatmul.mubr.bf16.gmra.mxu1 %v14858_v24  ;;  %v14871_v28 = vld [vmem:[#allocation60_spill] sm:$0xff] }
 0x72a   :  { %v4976_v43 = vpop.f32.mrf.mxu0  ;;  %5489 = vmatmul.mubr.bf16.gmra.mxu0 %v14866_v20  ;;  %5207 = vmatprep.mubr.bf16.mxu1 %v14867_v46  ;;  %v14872_v20 = vld [vmem:[#allocation61_spill] sm:$0xff] }
 0x72b   :  { %v10915_v51 = vadd.f32 %v4976_v43, %v4687_v2  ;;  %v4689_v6 = vpop.f32.mrf.mxu1  ;;  %5496 = vmatprep.mubr.bf16.mxu0 %v14869_v38 }
 0x72c   :  { %v4978_v9 = vpop.f32.mrf.mxu0  ;;  %v14874_v6 = vld [vmem:[#allocation65_spill] sm:$0xff] }
 0x72d   :  { %14868 = vst [vmem:[#allocation39_spill] sm:$0xff] %v10915_v51  ;;  %v4690_v10 = vpop.f32.mrf.mxu1 }
 0x72e   :  { %v4979_v27 = vpop.f32.mrf.mxu0 }
 0x72f   :  { %v10918_v1 = vadd.f32 %v4979_v27, %v4690_v10  ;;  %v4692_v55 = vpop.f32.mrf.mxu1 }
 0x730   :  { %v4981_v41 = vpop.f32.mrf.mxu0 }
 0x731   :  { %14870 = vst [vmem:[#allocation58_spill] sm:$0xff] %v10918_v1  ;;  %v4695_v44 = vpop.f32.mrf.mxu1  ;;  %5208 = vmatmul.mubr.bf16.gmra.mxu1 %v14864_v17  ;;  %v14876_v1 = vld [vmem:[#allocation69_spill] sm:$0xff] }
 0x732   :  { %v4984_v24 = vpop.f32.mrf.mxu0  ;;  %5497 = vmatmul.mubr.bf16.gmra.mxu0 %v14871_v28  ;;  %5215 = vmatprep.mubr.bf16.mxu1 %v14872_v20  ;;  %v14877_v28 = vld [vmem:[#allocation70_spill] sm:$0xff] }
 0x733   :  { %v10923_v2 = vadd.f32 %v4984_v24, %v4695_v44  ;;  %v4697_v43 = vpop.f32.mrf.mxu1  ;;  %5504 = vmatprep.mubr.bf16.mxu0 %v14874_v6  ;;  %v14902_v20 = vld [vmem:[#allocation78_spill] sm:$0xff] }
 0x734   :  { %v4986_v9 = vpop.f32.mrf.mxu0  ;;  %v14879_v43 = vld [vmem:[#allocation62_spill] sm:$0xff] }
 0x735   :  { %14873 = vst [vmem:[#allocation50_spill] sm:$0xff] %v10923_v2  ;;  %v4698_v51 = vpop.f32.mrf.mxu1 }
 0x736   :  { %v4987_v7 = vpop.f32.mrf.mxu0 }
 0x737   :  { %v10926_v27 = vadd.f32 %v4987_v7, %v4698_v51  ;;  %v4700_v10 = vpop.f32.mrf.mxu1 }
 0x738   :  { %v4989_v55 = vpop.f32.mrf.mxu0 }
 0x739   :  { %14875 = vst [vmem:[#allocation53_spill] sm:$0xff] %v10926_v27  ;;  %v4703_v41 = vpop.f32.mrf.mxu1  ;;  %5216 = vmatmul.mubr.bf16.gmra.mxu1 %v14869_v38  ;;  %v14881_v27 = vld [vmem:[#allocation66_spill] sm:$0xff] }
 0x73a   :  { %v4992_v17 = vpop.f32.mrf.mxu0  ;;  %5505 = vmatmul.mubr.bf16.gmra.mxu0 %v14876_v1  ;;  %5223 = vmatprep.mubr.bf16.mxu1 %v14877_v28  ;;  %v14882_v1 = vld [vmem:[#allocation67_spill] sm:$0xff] }
 0x73b   :  { %v10931_v44 = vadd.f32 %v4992_v17, %v4703_v41  ;;  %v4705_v24 = vpop.f32.mrf.mxu1  ;;  %5512 = vmatprep.mubr.bf16.mxu0 %v14879_v43 }
 0x73c   :  { %v4994_v9 = vpop.f32.mrf.mxu0  ;;  %v14884_v24 = vld [vmem:[#allocation71_spill] sm:$0xff] }
 0x73d   :  { %14878 = vst [vmem:[#allocation54_spill] sm:$0xff] %v10931_v44  ;;  %v4706_v2 = vpop.f32.mrf.mxu1 }
 0x73e   :  { %v4995_v16 = vpop.f32.mrf.mxu0 }
 0x73f   :  { %v10934_v7 = vadd.f32 %v4995_v16, %v4706_v2  ;;  %v4708_v51 = vpop.f32.mrf.mxu1 }
 0x740   :  { %v4997_v10 = vpop.f32.mrf.mxu0 }
 0x741   :  { %14880 = vst [vmem:[#allocation55_spill] sm:$0xff] %v10934_v7  ;;  %v4711_v55 = vpop.f32.mrf.mxu1  ;;  %5224 = vmatmul.mubr.bf16.gmra.mxu1 %v14874_v6  ;;  %v14886_v7 = vld [vmem:[#allocation75_spill] sm:$0xff] }
 0x742   :  { %v5000_v38 = vpop.f32.mrf.mxu0  ;;  %5513 = vmatmul.mubr.bf16.gmra.mxu0 %v14881_v27  ;;  %5231 = vmatprep.mubr.bf16.mxu1 %v14882_v1  ;;  %v14887_v27 = vld [vmem:[#allocation76_spill] sm:$0xff] }
 0x743   :  { %v10939_v41 = vadd.f32 %v5000_v38, %v4711_v55  ;;  %v4713_v17 = vpop.f32.mrf.mxu1  ;;  %5520 = vmatprep.mubr.bf16.mxu0 %v14884_v24 }
 0x744   :  { %v5002_v9 = vpop.f32.mrf.mxu0  ;;  %v14889_v17 = vld [vmem:[#allocation68_spill] sm:$0xff] }
 0x745   :  { %14883 = vst [vmem:[#allocation59_spill] sm:$0xff] %v10939_v41  ;;  %v4714_v44 = vpop.f32.mrf.mxu1 }
 0x746   :  { %v5003_v28 = vpop.f32.mrf.mxu0 }
 0x747   :  { %v10942_v16 = vadd.f32 %v5003_v28, %v4714_v44  ;;  %v4716_v2 = vpop.f32.mrf.mxu1 }
 0x748   :  { %v5005_v51 = vpop.f32.mrf.mxu0 }
 0x749   :  { %14885 = vst [vmem:[#allocation63_spill] sm:$0xff] %v10942_v16  ;;  %v4719_v10 = vpop.f32.mrf.mxu1  ;;  %5232 = vmatmul.mubr.bf16.gmra.mxu1 %v14879_v43  ;;  %v14891_v16 = vld [vmem:[#allocation72_spill] sm:$0xff] }
 0x74a   :  { %v5008_v6 = vpop.f32.mrf.mxu0  ;;  %5521 = vmatmul.mubr.bf16.gmra.mxu0 %v14886_v7  ;;  %5239 = vmatprep.mubr.bf16.mxu1 %v14887_v27  ;;  %v14892_v7 = vld [vmem:[#allocation73_spill] sm:$0xff] }
 0x74b   :  { %v10947_v55 = vadd.f32 %v5008_v6, %v4719_v10  ;;  %v4721_v38 = vpop.f32.mrf.mxu1  ;;  %5528 = vmatprep.mubr.bf16.mxu0 %v14889_v17 }
 0x74c   :  { %v5010_v9 = vpop.f32.mrf.mxu0  ;;  %v14894_v38 = vld [vmem:[#allocation77_spill] sm:$0xff] }
 0x74d   :  { %14888 = vst [vmem:[#allocation64_spill] sm:$0xff] %v10947_v55  ;;  %v4722_v41 = vpop.f32.mrf.mxu1 }
 0x74e   :  { %v5011_v1 = vpop.f32.mrf.mxu0 }
 0x74f   :  { %v10950_v28 = vadd.f32 %v5011_v1, %v4722_v41  ;;  %v4724_v44 = vpop.f32.mrf.mxu1 }
 0x750   :  { %v5013_v2 = vpop.f32.mrf.mxu0 }
 0x751   :  { %14890 = vst [vmem:[#allocation56_spill] sm:$0xff] %v10950_v28  ;;  %v4727_v51 = vpop.f32.mrf.mxu1  ;;  %5240 = vmatmul.mubr.bf16.gmra.mxu1 %v14884_v24  ;;  %v14896_v28 = vld [vmem:[#allocation81_spill] sm:$0xff] }
 0x752   :  { %v5016_v43 = vpop.f32.mrf.mxu0  ;;  %5529 = vmatmul.mubr.bf16.gmra.mxu0 %v14891_v16  ;;  %5247 = vmatprep.mubr.bf16.mxu1 %v14892_v7  ;;  %v14897_v16 = vld [vmem:[#allocation82_spill] sm:$0xff] }
 0x753   :  { %v10955_v10 = vadd.f32 %v5016_v43, %v4727_v51  ;;  %v4729_v6 = vpop.f32.mrf.mxu1  ;;  %5536 = vmatprep.mubr.bf16.mxu0 %v14894_v38 }
 0x754   :  { %v5018_v9 = vpop.f32.mrf.mxu0  ;;  %v14899_v6 = vld [vmem:[#allocation74_spill] sm:$0xff] }
 0x755   :  { %14893 = vst [vmem:[#allocation60_spill] sm:$0xff] %v10955_v10  ;;  %v4730_v55 = vpop.f32.mrf.mxu1 }
 0x756   :  { %v5019_v27 = vpop.f32.mrf.mxu0 }
 0x757   :  { %v10958_v1 = vadd.f32 %v5019_v27, %v4730_v55  ;;  %v4732_v41 = vpop.f32.mrf.mxu1 }
 0x758   :  { %v5021_v44 = vpop.f32.mrf.mxu0 }
 0x759   :  { %14895 = vst [vmem:[#allocation65_spill] sm:$0xff] %v10958_v1  ;;  %v4735_v2 = vpop.f32.mrf.mxu1  ;;  %5248 = vmatmul.mubr.bf16.gmra.mxu1 %v14889_v17  ;;  %v14901_v17 = vld [vmem:[#allocation45_spill] sm:$0xff] }
 0x75a   :  { %v5024_v24 = vpop.f32.mrf.mxu0  ;;  %5537 = vmatmul.mubr.bf16.gmra.mxu0 %v14896_v28  ;;  %5255 = vmatprep.mubr.bf16.mxu1 %v14897_v16  ;;  %v14909_v16 = vld [vmem:[#allocation88_spill] sm:$0xff] }
 0x75b   :  { %v10963_v51 = vadd.f32 %v5024_v24, %v4735_v2  ;;  %v4737_v43 = vpop.f32.mrf.mxu1  ;;  %5544 = vmatprep.mubr.bf16.mxu0 %v14899_v6  ;;  %v14903_v2 = vld [vmem:[#allocation79_spill] sm:$0xff] }
 0x75c   :  { %v5026_v9 = vpop.f32.mrf.mxu0 }
 0x75d   :  { %14898 = vst [vmem:[#allocation69_spill] sm:$0xff] %v10963_v51  ;;  %v4738_v10 = vpop.f32.mrf.mxu1 }
 0x75e   :  { %v5027_v7 = vpop.f32.mrf.mxu0 }
 0x75f   :  { %v10966_v27 = vadd.f32 %v5027_v7, %v4738_v10  ;;  %v4740_v55 = vpop.f32.mrf.mxu1  ;;  %v14905_v10 = vld [vmem:[#allocation28_spill] sm:$0xff] }
 0x760   :  { %v5029_v41 = vpop.f32.mrf.mxu0 }
 0x761   :  { %14900 = vst [vmem:[#allocation62_spill] sm:$0xff] %v10966_v27  ;;  %v5065_v44 = vpop.f32.mrf.mxu1  ;;  %5256 = vmatmul.mubr.bf16.gmra.mxu1 %v14894_v38 }
 0x762   :  { %v5066_v1 = vadd.f32 %v5065_v44, %v14901_v17  ;;  %v5354_v28 = vpop.f32.mrf.mxu0  ;;  %5545 = vmatmul.mubr.bf16.gmra.mxu0 %v14902_v20  ;;  %5263 = vmatprep.mubr.bf16.mxu1 %v14903_v2  ;;  %v14907_v20 = vld [vmem:[#allocation44_spill] sm:$0xff] }
 0x763   :  { %v5067_v24 = vpop.f32.mrf.mxu1  ;;  %5552 = vmatprep.mubr.bf16.mxu0 %v14811_v57 }
 0x764   :  { %v10973_v43 = vadd.f32 %v5354_v28, %v5066_v1  ;;  %v5356_v9 = vpop.f32.mrf.mxu0  ;;  %v14908_v24 = vld [vmem:[#allocation87_spill] sm:$0xff]  ;;  %v14910_v28 = vld [vmem:[#allocation80_spill] sm:$0xff] }
 0x765   :  { %v5068_v7 = vpop.f32.mrf.mxu1 }
 0x766   :  { %14904 = vst [vmem:[#allocation66_spill] sm:$0xff] %v10973_v43  ;;  %v5069_v55 = vadd.f32 %v5068_v7, %v14905_v10  ;;  %v5357_v41 = vpop.f32.mrf.mxu0  ;;  %v14911_v10 = vld [vmem:[#allocation35_spill] sm:$0xff] }
 0x767   :  { %v5070_v27 = vpop.f32.mrf.mxu1 }
 0x768   :  { %v10976_v51 = vadd.f32 %v5357_v41, %v5069_v55  ;;  %v5359_v38 = vpop.f32.mrf.mxu0 }
 0x769   :  { %v5073_v44 = vpop.f32.mrf.mxu1  ;;  %5264 = vmatmul.mubr.bf16.gmra.mxu1 %v14899_v6 }
 0x76a   :  { %14906 = vst [vmem:[#allocation71_spill] sm:$0xff] %v10976_v51  ;;  %v5074_v17 = vadd.f32 %v5073_v44, %v14907_v20  ;;  %v5362_v2 = vpop.f32.mrf.mxu0  ;;  %5553 = vmatmul.mubr.bf16.gmra.mxu0 %v14908_v24  ;;  %5271 = vmatprep.mubr.bf16.mxu1 %v14909_v16  ;;  %v14913_v20 = vld [vmem:[#allocation36_spill] sm:$0xff] }
 0x76b   :  { %v5075_v1 = vpop.f32.mrf.mxu1  ;;  %5560 = vmatprep.mubr.bf16.mxu0 %v14910_v28 }
 0x76c   :  { %v10983_v9 = vadd.f32 %v5362_v2, %v5074_v17  ;;  %v5364_v7 = vpop.f32.mrf.mxu0  ;;  %v14914_v1 = vld [vmem:[#allocation85_spill] sm:$0xff] }
 0x76d   :  { %v5076_v27 = vpop.f32.mrf.mxu1 }
 0x76e   :  { %v5077_v55 = vadd.f32 %v5076_v27, %v14911_v10  ;;  %v5365_v41 = vpop.f32.mrf.mxu0  ;;  %v14915_v10 = vld [vmem:[#allocation57_spill] sm:$0xff] }
 0x76f   :  { %v5078_v38 = vpop.f32.mrf.mxu1 }
 0x770   :  { %v10986_v51 = vadd.f32 %v5365_v41, %v5077_v55  ;;  %v5367_v6 = vpop.f32.mrf.mxu0 }
 0x771   :  { %v5081_v44 = vpop.f32.mrf.mxu1  ;;  %5272 = vmatmul.mubr.bf16.gmra.mxu1 %v14811_v57 }
 0x772   :  { %14912 = vst [vmem:[#allocation75_spill] sm:$0xff] %v10986_v51  ;;  %v5082_v24 = vadd.f32 %v5081_v44, %v14913_v20  ;;  %v5370_v43 = vpop.f32.mrf.mxu0  ;;  %5561 = vmatmul.mubr.bf16.gmra.mxu0 %v14813_v18  ;;  %5279 = vmatprep.mubr.bf16.mxu1 %v14914_v1  ;;  %v14917_v18 = vld [vmem:[#allocation34_spill] sm:$0xff] }
 0x773   :  { %v5083_v2 = vpop.f32.mrf.mxu1  ;;  %5568 = vmatprep.mubr.bf16.mxu0 %v14820_v35 }
 0x774   :  { %v10993_v17 = vadd.f32 %v5370_v43, %v5082_v24  ;;  %v5372_v7 = vpop.f32.mrf.mxu0  ;;  %v14918_v2 = vld [vmem:[#allocation93_spill] sm:$0xff] }
 0x775   :  { %v5084_v27 = vpop.f32.mrf.mxu1 }
 0x776   :  { %v5085_v55 = vadd.f32 %v5084_v27, %v14915_v10  ;;  %v5373_v41 = vpop.f32.mrf.mxu0  ;;  %v14919_v10 = vld [vmem:[#allocation33_spill] sm:$0xff] }
 0x777   :  { %v5086_v38 = vpop.f32.mrf.mxu1 }
 0x778   :  { %v10996_v6 = vadd.f32 %v5373_v41, %v5085_v55  ;;  %v5375_v57 = vpop.f32.mrf.mxu0 }
 0x779   :  { %v5089_v44 = vpop.f32.mrf.mxu1  ;;  %5280 = vmatmul.mubr.bf16.gmra.mxu1 %v14910_v28 }
 0x77a   :  { %14916 = vst [vmem:[#allocation68_spill] sm:$0xff] %v10996_v6  ;;  %v5090_v20 = vadd.f32 %v5089_v44, %v14917_v18  ;;  %v5378_v51 = vpop.f32.mrf.mxu0  ;;  %5569 = vmatmul.mubr.bf16.gmra.mxu0 %v14918_v2  ;;  %5287 = vmatprep.mubr.bf16.mxu1 %v10446_v30  ;;  %v14921_v18 = vld [vmem:[#allocation38_spill] sm:$0xff] }
 0x77b   :  { %v5091_v43 = vpop.f32.mrf.mxu1  ;;  %5576 = vmatprep.mubr.bf16.mxu0 %v14824_v54 }
 0x77c   :  { %v11003_v24 = vadd.f32 %v5378_v51, %v5090_v20  ;;  %v5380_v7 = vpop.f32.mrf.mxu0 }
 0x77d   :  { %v5092_v27 = vpop.f32.mrf.mxu1 }
 0x77e   :  { %v5093_v55 = vadd.f32 %v5092_v27, %v14919_v10  ;;  %v5381_v41 = vpop.f32.mrf.mxu0  ;;  %v14923_v27 = vld [vmem:[#allocation37_spill] sm:$0xff] }
 0x77f   :  { %v5094_v38 = vpop.f32.mrf.mxu1 }
 0x780   :  { %v11006_v57 = vadd.f32 %v5381_v41, %v5093_v55  ;;  %v5383_v28 = vpop.f32.mrf.mxu0 }
 0x781   :  { %v5097_v44 = vpop.f32.mrf.mxu1  ;;  %5288 = vmatmul.mubr.bf16.gmra.mxu1 %v14820_v35 }
 0x782   :  { %14920 = vst [vmem:[#allocation72_spill] sm:$0xff] %v11006_v57  ;;  %v5098_v2 = vadd.f32 %v5097_v44, %v14921_v18  ;;  %v5386_v6 = vpop.f32.mrf.mxu0  ;;  %5577 = vmatmul.mubr.bf16.gmra.mxu0 %v14822_v11  ;;  %5295 = vmatprep.mubr.bf16.mxu1 %v14827_v26  ;;  %v14925_v11 = vld [vmem:[#allocation83_spill] sm:$0xff]  ;;  %v14937_v57 = vld [vmem:[#allocation24_spill] sm:$0xff] }
 0x783   :  { %v5099_v51 = vpop.f32.mrf.mxu1  ;;  %5584 = vmatprep.mubr.bf16.mxu0 %v10448_v4 }
 0x784   :  { %v11013_v20 = vadd.f32 %v5386_v6, %v5098_v2  ;;  %v5388_v43 = vpop.f32.mrf.mxu0  ;;  %v14926_v2 = vld [vmem:[#allocation92_spill] sm:$0xff] }
 0x785   :  { %v5100_v7 = vpop.f32.mrf.mxu1 }
 0x786   :  { %14922 = vst [vmem:[#allocation77_spill] sm:$0xff] %v11013_v20  ;;  %v5101_v10 = vadd.f32 %v5100_v7, %v14923_v27  ;;  %v5389_v55 = vpop.f32.mrf.mxu0  ;;  %v14928_v27 = vld [vmem:[#allocation84_spill] sm:$0xff]  ;;  %v14932_v20 = vld [vmem:[#allocation95_spill] sm:$0xff] }
 0x787   :  { %v5102_v41 = vpop.f32.mrf.mxu1 }
 0x788   :  { %v11016_v38 = vadd.f32 %v5389_v55, %v5101_v10  ;;  %v5391_v35 = vpop.f32.mrf.mxu0 }
 0x789   :  { %v5105_v28 = vpop.f32.mrf.mxu1  ;;  %5296 = vmatmul.mubr.bf16.gmra.mxu1 %v14824_v54 }
 0x78a   :  { %14924 = vst [vmem:[#allocation81_spill] sm:$0xff] %v11016_v38  ;;  %v5106_v44 = vadd.f32 %v5105_v28, %v14925_v11  ;;  %v5394_v18 = vpop.f32.mrf.mxu0  ;;  %5585 = vmatmul.mubr.bf16.gmra.mxu0 %v10454_v62  ;;  %5303 = vmatprep.mubr.bf16.mxu1 %v10456_v3  ;;  %v14930_v62 = vld [vmem:[#allocation89_spill] sm:$0xff] }
 0x78b   :  { %v5107_v6 = vpop.f32.mrf.mxu1  ;;  %5592 = vmatprep.mubr.bf16.mxu0 %v14926_v2 }
 0x78c   :  { %v11023_v51 = vadd.f32 %v5394_v18, %v5106_v44  ;;  %v5396_v43 = vpop.f32.mrf.mxu0  ;;  %v14931_v6 = vld [vmem:[#allocation94_spill] sm:$0xff] }
 0x78d   :  { %v5108_v7 = vpop.f32.mrf.mxu1  ;;  %v14933_v18 = vld [vmem:[#allocation26_spill] sm:$0xff]  ;;  %v14934_v43 = vld [vmem:[#allocation43_spill] sm:$0xff] }
 0x78e   :  { %14927 = vst [vmem:[#allocation74_spill] sm:$0xff] %v11023_v51  ;;  %v5109_v10 = vadd.f32 %v5108_v7, %v14928_v27  ;;  %v5397_v55 = vpop.f32.mrf.mxu0  ;;  %v14935_v51 = vpack.c.bf16 %v14933_v18, %v14934_v43  ;;  %v14938_v18 = vld [vmem:[#allocation32_spill] sm:$0xff] }
 0x78f   :  { %v5110_v41 = vpop.f32.mrf.mxu1 }
 0x790   :  { %v11026_v35 = vadd.f32 %v5397_v55, %v5109_v10  ;;  %v5399_v54 = vpop.f32.mrf.mxu0  ;;  %v14936_v55 = vld [vmem:[#allocation90_spill] sm:$0xff] }
 0x791   :  { %v5113_v28 = vpop.f32.mrf.mxu1  ;;  %5304 = vmatmul.mubr.bf16.gmra.mxu1 %v10448_v4 }
 0x792   :  { %14929 = vst [vmem:[#allocation45_spill] sm:$0xff] %v11026_v35  ;;  %v5114_v11 = vadd.f32 %v5113_v28, %v14930_v62  ;;  %v5402_v38 = vpop.f32.mrf.mxu0  ;;  %5593 = vmatmul.mubr.bf16.gmra.mxu0 %v14931_v6  ;;  %5311 = vmatprep.mubr.bf16.mxu1 %v14932_v20 }
 0x793   :  { %v5115_v44 = vpop.f32.mrf.mxu1  ;;  %5600 = vmatprep.mubr.bf16.mxu0 %v14935_v51  ;;  %v14939_v51 = vpack.c.bf16 %v14937_v57, %v14938_v18 }
 0x794   :  { %v11035_v7 = vadd.f32 %v5402_v38, %v5114_v11  ;;  %v5404_v27 = vpop.f32.mrf.mxu0 }
 0x795   :  { %v5116_v10 = vpop.f32.mrf.mxu1 }
 0x796   :  { %v5117_v41 = vadd.f32 %v5116_v10, %v14936_v55  ;;  %v5405_v54 = vpop.f32.mrf.mxu0 }
 0x797   :  { %v5118_v4 = vpop.f32.mrf.mxu1 }
 0x798   :  { %v11038_v35 = vadd.f32 %v5405_v54, %v5117_v41  ;;  %v5407_v28 = vpop.f32.mrf.mxu0 }
 0x799   :  { %v5121_v62 = vpop.f32.mrf.mxu1  ;;  %5312 = vmatmul.mubr.bf16.gmra.mxu1 %v14926_v2 }
 0x79a   :  { %v5122_v6 = vadd.f32 %v5121_v62, %v10766_v61  ;;  %v5410_v44 = vpop.f32.mrf.mxu0  ;;  %5601 = vmatmul.mubr.bf16.gmra.mxu0 %v14939_v51  ;;  %8761 = vmatprep.mubr.bf16.mxu1 %v10272_v14 }
 0x79b   :  { %v5123_v38 = vpop.f32.mrf.mxu1 }
 0x79c   :  { %v11046_v11 = vadd.f32 %v5410_v44, %v5122_v6  ;;  %v5412_v43 = vpop.f32.mrf.mxu0 }
 0x79d   :  { %v5124_v27 = vpop.f32.mrf.mxu1 }
 0x79e   :  { %v5125_v10 = vadd.f32 %v5124_v27, %v10769_v47  ;;  %v5413_v55 = vpop.f32.mrf.mxu0 }
 0x79f   :  { %v5126_v41 = vpop.f32.mrf.mxu1 }
 0x7a0   :  { %v11049_v54 = vadd.f32 %v5413_v55, %v5125_v10  ;;  %v5415_v2 = vpop.f32.mrf.mxu0 }
 0x7a1   :  { %v5129_v61 = vpop.f32.mrf.mxu1  ;;  %8762 = vmatmul.mubr.bf16.vlgmr.msra.gmra.mxu1 %v10290_v31 }
 0x7a2   :  { %v5130_v57 = vadd.f32 %v5129_v61, %v10774_v59  ;;  %v5418_v4 = vpop.f32.mrf.mxu0  ;;  %8765 = vmatprep.mubr.bf16.mxu1 %v10284_v56 }
 0x7a3   :  { %v5131_v14 = vpop.f32.mrf.mxu1 }
 0x7a4   :  { %v11054_v28 = vadd.f32 %v5418_v4, %v5130_v57  ;;  %v5420_v62 = vpop.f32.mrf.mxu0 }
 0x7a5   :  { %v5132_v6 = vpop.f32.mrf.mxu1 }
 0x7a6   :  { %v5133_v47 = vadd.f32 %v5132_v6, %v10778_v21  ;;  %v5421_v44 = vpop.f32.mrf.mxu0 }
 0x7a7   :  { %v5134_v18 = vpop.f32.mrf.mxu1 }
 0x7a8   :  { %v11057_v51 = vadd.f32 %v5421_v44, %v5133_v47  ;;  %v5423_v38 = vpop.f32.mrf.mxu0 }
 0x7a9   :  { %v5137_v43 = vpop.f32.mrf.mxu1  ;;  %8766 = vmatmul.mubr.bf16.gmra.mxu1 %v10302_v40 }
 0x7aa   :  { %v5138_v31 = vadd.f32 %v5137_v43, %v10783_v53  ;;  %v5426_v59 = vpop.f32.mrf.mxu0  ;;  %8769 = vmatprep.mubr.bf16.mxu1 %v10296_v34 }
 0x7ab   :  { %v5139_v56 = vpop.f32.mrf.mxu1 }
 0x7ac   :  { %v11062_v27 = vadd.f32 %v5426_v59, %v5138_v31  ;;  %v5428_v10 = vpop.f32.mrf.mxu0 }
 0x7ad   :  { %v5140_v55 = vpop.f32.mrf.mxu1 }
 0x7ae   :  { %v5141_v21 = vadd.f32 %v5140_v55, %v10786_v48  ;;  %v5429_v41 = vpop.f32.mrf.mxu0 }
 0x7af   :  { %v5142_v2 = vpop.f32.mrf.mxu1 }
 0x7b0   :  { %v11065_v61 = vadd.f32 %v5429_v41, %v5141_v21  ;;  %v5431_v57 = vpop.f32.mrf.mxu0 }
 0x7b1   :  { %v5145_v4 = vpop.f32.mrf.mxu1  ;;  %8770 = vmatmul.mubr.bf16.gmra.mxu1 %v10314_v45 }
 0x7b2   :  { %v5146_v40 = vadd.f32 %v5145_v4, %v10791_v33  ;;  %v5434_v53 = vpop.f32.mrf.mxu0  ;;  %8773 = vmatprep.mubr.bf16.mxu1 %v10308_v13 }
 0x7b3   :  { %v5147_v34 = vpop.f32.mrf.mxu1 }
 0x7b4   :  { %v11070_v14 = vadd.f32 %v5434_v53, %v5146_v40  ;;  %v5436_v62 = vpop.f32.mrf.mxu0 }
 0x7b5   :  { %v5148_v6 = vpop.f32.mrf.mxu1 }
 0x7b6   :  { %v5149_v48 = vadd.f32 %v5148_v6, %v10794_v52  ;;  %v5437_v47 = vpop.f32.mrf.mxu0 }
 0x7b7   :  { %v5150_v44 = vpop.f32.mrf.mxu1 }
 0x7b8   :  { %v11073_v18 = vadd.f32 %v5437_v47, %v5149_v48  ;;  %v5439_v38 = vpop.f32.mrf.mxu0 }
 0x7b9   :  { %v5153_v43 = vpop.f32.mrf.mxu1  ;;  %8774 = vmatmul.mubr.bf16.gmra.mxu1 %v10326_v19 }
 0x7ba   :  { %v5154_v45 = vadd.f32 %v5153_v43, %v10799_v49  ;;  %v5442_v33 = vpop.f32.mrf.mxu0  ;;  %8777 = vmatprep.mubr.bf16.mxu1 %v10320_v29 }
 0x7bb   :  { %v5155_v13 = vpop.f32.mrf.mxu1 }
 0x7bc   :  { %v11078_v31 = vadd.f32 %v5442_v33, %v5154_v45  ;;  %v5444_v59 = vpop.f32.mrf.mxu0 }
 0x7bd   :  { %v5156_v56 = vpop.f32.mrf.mxu1 }
 0x7be   :  { %v5157_v52 = vadd.f32 %v5156_v56, %v10802_v8  ;;  %v5445_v10 = vpop.f32.mrf.mxu0 }
 0x7bf   :  { %v5158_v55 = vpop.f32.mrf.mxu1 }
 0x7c0   :  { %v11081_v21 = vadd.f32 %v5445_v10, %v5157_v52  ;;  %v5447_v41 = vpop.f32.mrf.mxu0 }
 0x7c1   :  { %v5161_v2 = vpop.f32.mrf.mxu1  ;;  %8778 = vmatmul.mubr.bf16.gmra.mxu1 %v10338_v23 }
 0x7c2   :  { %v5162_v19 = vadd.f32 %v5161_v2, %v10807_v32  ;;  %v5450_v49 = vpop.f32.mrf.mxu0  ;;  %8781 = vmatprep.mubr.bf16.mxu1 %v10332_v50 }
 0x7c3   :  { %v5163_v29 = vpop.f32.mrf.mxu1 }
 0x7c4   :  { %v11086_v57 = vadd.f32 %v5450_v49, %v5162_v19  ;;  %v5452_v4 = vpop.f32.mrf.mxu0  ;;  %v14940_v29 = vld [vmem:[#allocation27_spill] sm:$0xff] }
 0x7c5   :  { %v5164_v40 = vpop.f32.mrf.mxu1 }
 0x7c6   :  { %v5165_v8 = vadd.f32 %v5164_v40, %v10810_v0  ;;  %v5453_v53 = vpop.f32.mrf.mxu0 }
 0x7c7   :  { %v5166_v34 = vpop.f32.mrf.mxu1 }
 0x7c8   :  { %v11089_v62 = vadd.f32 %v5453_v53, %v5165_v8  ;;  %v5455_v6 = vpop.f32.mrf.mxu0 }
 0x7c9   :  { %v5169_v48 = vpop.f32.mrf.mxu1  ;;  %8782 = vmatmul.mubr.bf16.gmra.mxu1 %v14760_v36 }
 0x7ca   :  { %v5170_v23 = vadd.f32 %v5169_v48, %v10815_v63  ;;  %v5458_v32 = vpop.f32.mrf.mxu0  ;;  %8785 = vmatprep.mubr.bf16.mxu1 %v14837_v60 }
 0x7cb   :  { %v5171_v50 = vpop.f32.mrf.mxu1 }
 0x7cc   :  { %v11094_v47 = vadd.f32 %v5458_v32, %v5170_v23  ;;  %v5460_v44 = vpop.f32.mrf.mxu0 }
 0x7cd   :  { %v5172_v38 = vpop.f32.mrf.mxu1 }
 0x7ce   :  { %v5173_v0 = vadd.f32 %v5172_v38, %v10818_v25  ;;  %v5461_v43 = vpop.f32.mrf.mxu0  ;;  %v14943_v38 = vld [vmem:[#allocation61_spill] sm:$0xff] }
 0x7cf   :  { %v5174_v45 = vpop.f32.mrf.mxu1 }
 0x7d0   :  { %v11097_v33 = vadd.f32 %v5461_v43, %v5173_v0  ;;  %v5463_v13 = vpop.f32.mrf.mxu0 }
 0x7d1   :  { %v5177_v59 = vpop.f32.mrf.mxu1  ;;  %8786 = vmatmul.mubr.bf16.gmra.mxu1 %v14842_v15  ;;  %v14941_v15 = vld [vmem:[#allocation46_spill] sm:$0xff] }
 0x7d2   :  { %v5178_v36 = vadd.f32 %v5177_v59, %v10823_v12  ;;  %v5466_v63 = vpop.f32.mrf.mxu0  ;;  %8789 = vmatprep.mubr.bf16.mxu1 %v14847_v39  ;;  %v14942_v4 = vpack.c.bf16 %v14940_v29, %v14941_v15  ;;  %v14944_v13 = vld [vmem:[#allocation86_spill] sm:$0xff]  ;;  %v14948_v15 = vld [vmem:[#allocation120_spill] sm:$0xff] }
 0x7d3   :  { %v5179_v60 = vpop.f32.mrf.mxu1 }
 0x7d4   :  { %v11102_v56 = vadd.f32 %v5466_v63, %v5178_v36  ;;  %v5468_v52 = vpop.f32.mrf.mxu0 }
 0x7d5   :  { %v5180_v10 = vpop.f32.mrf.mxu1 }
 0x7d6   :  { %v5181_v25 = vadd.f32 %v5180_v10, %v10826_v42  ;;  %v5469_v55 = vpop.f32.mrf.mxu0  ;;  %v14945_v10 = vld [vmem:[#allocation70_spill] sm:$0xff] }
 0x7d7   :  { %v5182_v41 = vpop.f32.mrf.mxu1 }
 0x7d8   :  { %v11105_v2 = vadd.f32 %v5469_v55, %v5181_v25  ;;  %v5471_v19 = vpop.f32.mrf.mxu0  ;;  %v14947_v55 = vld [vmem:[#allocation67_spill] sm:$0xff] }
 0x7d9   :  { %v5185_v49 = vpop.f32.mrf.mxu1  ;;  %8790 = vmatmul.mubr.bf16.gmra.mxu1 %v14942_v4 }
 0x7da   :  { %v5186_v12 = vadd.f32 %v5185_v49, %v10831_v5  ;;  %v5474_v39 = vpop.f32.mrf.mxu0  ;;  %8793 = vmatprep.mubr.bf16.mxu1 %v14862_v22 }
 0x7db   :  { %v5187_v40 = vpop.f32.mrf.mxu1 }
 0x7dc   :  { %v11112_v8 = vadd.f32 %v5474_v39, %v5186_v12  ;;  %v5476_v53 = vpop.f32.mrf.mxu0 }
 0x7dd   :  { %v5188_v42 = vpop.f32.mrf.mxu1 }
 0x7de   :  { %v5189_v34 = vadd.f32 %v5188_v42, %v10834_v37  ;;  %v5477_v6 = vpop.f32.mrf.mxu0 }
 0x7df   :  { %v5190_v48 = vpop.f32.mrf.mxu1 }
 0x7e0   :  { %v11115_v23 = vadd.f32 %v5477_v6, %v5189_v34  ;;  %v5479_v32 = vpop.f32.mrf.mxu0  ;;  %v14949_v34 = vld [vmem:[#allocation76_spill] sm:$0xff]  ;;  %v14950_v6 = vld [vmem:[#allocation121_spill] sm:$0xff] }
 0x7e1   :  { %v5193_v50 = vpop.f32.mrf.mxu1  ;;  %8794 = vmatmul.mubr.bf16.gmra.mxu1 %v14867_v46  ;;  %v14946_v46 = vld [vmem:[#allocation91_spill] sm:$0xff] }
 0x7e2   :  { %v5194_v5 = vadd.f32 %v5193_v50, %v10839_v58  ;;  %v5482_v44 = vpop.f32.mrf.mxu0  ;;  %8797 = vmatprep.mubr.bf16.mxu1 %v14943_v38  ;;  %v14951_v50 = vld [vmem:[#allocation73_spill] sm:$0xff] }
 0x7e3   :  { %v5195_v22 = vpop.f32.mrf.mxu1 }
 0x7e4   :  { %v11120_v0 = vadd.f32 %v5482_v44, %v5194_v5  ;;  %v5484_v43 = vpop.f32.mrf.mxu0 }
 0x7e5   :  { %v5196_v45 = vpop.f32.mrf.mxu1  ;;  %v14952_v43 = vld [vmem:[#allocation122_spill] sm:$0xff] }
 0x7e6   :  { %v5197_v37 = vadd.f32 %v5196_v45, %v14944_v13  ;;  %v5485_v59 = vpop.f32.mrf.mxu0 }
 0x7e7   :  { %v5198_v36 = vpop.f32.mrf.mxu1 }
 0x7e8   :  { %v11123_v63 = vadd.f32 %v5485_v59, %v5197_v37  ;;  %v5487_v60 = vpop.f32.mrf.mxu0 }
 0x7e9   :  { %v5201_v52 = vpop.f32.mrf.mxu1  ;;  %8798 = vmatmul.mubr.bf16.gmra.mxu1 %v14945_v10  ;;  %v14954_v10 = vld [vmem:[#allocation123_spill] sm:$0xff] }
 0x7ea   :  { %v5202_v58 = vadd.f32 %v5201_v52, %v14946_v46  ;;  %v5490_v25 = vpop.f32.mrf.mxu0  ;;  %8801 = vmatprep.mubr.bf16.mxu1 %v14947_v55  ;;  %v14953_v52 = vld [vmem:[#allocation82_spill] sm:$0xff] }
 0x7eb   :  { %v5203_v41 = vpop.f32.mrf.mxu1 }
 0x7ec   :  { %v11128_v19 = vadd.f32 %v5490_v25, %v5202_v58  ;;  %v5492_v49 = vpop.f32.mrf.mxu0  ;;  %v14955_v25 = vld [vmem:[#allocation79_spill] sm:$0xff] }
 0x7ed   :  { %v5204_v29 = vpop.f32.mrf.mxu1 }
 0x7ee   :  { %v5205_v4 = vadd.f32 %v5204_v29, %v14948_v15  ;;  %v5493_v12 = vpop.f32.mrf.mxu0  ;;  %v14956_v15 = vld [vmem:[#allocation124_spill] sm:$0xff] }
 0x7ef   :  { %v5206_v39 = vpop.f32.mrf.mxu1 }
 0x7f0   :  { %v11131_v40 = vadd.f32 %v5493_v12, %v5205_v4  ;;  %v5495_v53 = vpop.f32.mrf.mxu0 }
 0x7f1   :  { %v5209_v42 = vpop.f32.mrf.mxu1  ;;  %8802 = vmatmul.mubr.bf16.gmra.mxu1 %v14949_v34 }
 0x7f2   :  { %v5210_v48 = vadd.f32 %v5209_v42, %v14950_v6  ;;  %v5498_v32 = vpop.f32.mrf.mxu0  ;;  %8805 = vmatprep.mubr.bf16.mxu1 %v14951_v50  ;;  %v14957_v6 = vld [vmem:[#allocation47_spill] sm:$0xff] }
 0x7f3   :  { %v5211_v5 = vpop.f32.mrf.mxu1 }
 0x7f4   :  { %v11136_v44 = vadd.f32 %v5498_v32, %v5210_v48  ;;  %v5500_v38 = vpop.f32.mrf.mxu0 }
 0x7f5   :  { %v5212_v22 = vpop.f32.mrf.mxu1 }
 0x7f6   :  { %v5213_v45 = vadd.f32 %v5212_v22, %v14952_v43  ;;  %v5501_v13 = vpop.f32.mrf.mxu0  ;;  %v14958_v43 = vld [vmem:[#allocation31_spill] sm:$0xff] }
 0x7f7   :  { %v5214_v37 = vpop.f32.mrf.mxu1 }
 0x7f8   :  { %v11139_v59 = vadd.f32 %v5501_v13, %v5213_v45  ;;  %v5503_v36 = vpop.f32.mrf.mxu0 }
 0x7f9   :  { %v5217_v60 = vpop.f32.mrf.mxu1  ;;  %8806 = vmatmul.mubr.bf16.gmra.mxu1 %v14953_v52 }
 0x7fa   :  { %v5218_v46 = vadd.f32 %v5217_v60, %v14954_v10  ;;  %v5506_v58 = vpop.f32.mrf.mxu0  ;;  %8809 = vmatprep.mubr.bf16.mxu1 %v14955_v25 }
 0x7fb   :  { %v5219_v55 = vpop.f32.mrf.mxu1 }
 0x7fc   :  { %v11144_v41 = vadd.f32 %v5506_v58, %v5218_v46  ;;  %v5508_v49 = vpop.f32.mrf.mxu0 }
 0x7fd   :  { %v5220_v29 = vpop.f32.mrf.mxu1  ;;  %v14960_v49 = vld [vmem:[#allocation52_spill] sm:$0xff] }
 0x7fe   :  { %v5221_v4 = vadd.f32 %v5220_v29, %v14956_v15  ;;  %v5509_v12 = vpop.f32.mrf.mxu0 }
 0x7ff   :  { %v5222_v39 = vpop.f32.mrf.mxu1 }
 0x800   :  { %v11147_v53 = vadd.f32 %v5509_v12, %v5221_v4  ;;  %v5511_v42 = vpop.f32.mrf.mxu0 }
 0x801   :  { %v5225_v34 = vpop.f32.mrf.mxu1  ;;  %8810 = vmatmul.mubr.bf16.gmra.mxu1 %v14909_v16  ;;  %v14959_v16 = vld [vmem:[#allocation51_spill] sm:$0xff] }
 0x802   :  { %v5226_v48 = vadd.f32 %v5225_v34, %v14957_v6  ;;  %v5514_v32 = vpop.f32.mrf.mxu0  ;;  %8813 = vmatprep.mubr.bf16.mxu1 %v14914_v1 }
 0x803   :  { %v5227_v50 = vpop.f32.mrf.mxu1 }
 0x804   :  { %v11152_v5 = vadd.f32 %v5514_v32, %v5226_v48  ;;  %v5516_v38 = vpop.f32.mrf.mxu0 }
 0x805   :  { %v5228_v22 = vpop.f32.mrf.mxu1  ;;  %v14962_v38 = vld [vmem:[#allocation48_spill] sm:$0xff] }
 0x806   :  { %v5229_v45 = vadd.f32 %v5228_v22, %v14958_v43  ;;  %v5517_v13 = vpop.f32.mrf.mxu0 }
 0x807   :  { %v5230_v37 = vpop.f32.mrf.mxu1 }
 0x808   :  { %v11155_v36 = vadd.f32 %v5517_v13, %v5229_v45  ;;  %v5519_v60 = vpop.f32.mrf.mxu0 }
 0x809   :  { %v5233_v52 = vpop.f32.mrf.mxu1  ;;  %8814 = vmatmul.mubr.bf16.gmra.mxu1 %v10446_v30  ;;  %v14961_v30 = vld [vmem:[#allocation29_spill] sm:$0xff] }
 0x80a   :  { %v5234_v10 = vadd.f32 %v5233_v52, %v14959_v16  ;;  %v5522_v46 = vpop.f32.mrf.mxu0  ;;  %8817 = vmatprep.mubr.bf16.mxu1 %v14827_v26  ;;  %v14963_v52 = vld [vmem:[#allocation42_spill] sm:$0xff] }
 0x80b   :  { %v5235_v1 = vpop.f32.mrf.mxu1 }
 0x80c   :  { %v11160_v58 = vadd.f32 %v5522_v46, %v5234_v10  ;;  %v5524_v25 = vpop.f32.mrf.mxu0  ;;  %v14966_v10 = vld [vmem:[#allocation49_spill] sm:$0xff] }
 0x80d   :  { %v5236_v55 = vpop.f32.mrf.mxu1 }
 0x80e   :  { %v5237_v29 = vadd.f32 %v5236_v55, %v14960_v49  ;;  %v5525_v15 = vpop.f32.mrf.mxu0 }
 0x80f   :  { %v5238_v4 = vpop.f32.mrf.mxu1 }
 0x810   :  { %v11163_v12 = vadd.f32 %v5525_v15, %v5237_v29  ;;  %v5527_v39 = vpop.f32.mrf.mxu0  ;;  %v14967_v29 = vld [vmem:[#allocation40_spill] sm:$0xff] }
 0x811   :  { %v5241_v42 = vpop.f32.mrf.mxu1  ;;  %8818 = vmatmul.mubr.bf16.gmra.mxu1 %v10456_v3  ;;  %v14964_v3 = vld [vmem:[#allocation41_spill] sm:$0xff] }
 0x812   :  { %v5242_v34 = vadd.f32 %v5241_v42, %v14961_v30  ;;  %v5530_v6 = vpop.f32.mrf.mxu0  ;;  %8821 = vmatprep.mubr.bf16.mxu1 %v14932_v20  ;;  %v14965_v16 = vpack.c.bf16 %v14963_v52, %v14964_v3 }
 0x813   :  { %v5243_v26 = vpop.f32.mrf.mxu1 }
 0x814   :  { %v11168_v48 = vadd.f32 %v5530_v6, %v5242_v34  ;;  %v5532_v32 = vpop.f32.mrf.mxu0  ;;  %v14968_v6 = vld [vmem:[#allocation25_spill] sm:$0xff] }
 0x815   :  { %v5244_v50 = vpop.f32.mrf.mxu1 }
 0x816   :  { %v5245_v22 = vadd.f32 %v5244_v50, %v14962_v38  ;;  %v5533_v43 = vpop.f32.mrf.mxu0 }
 0x817   :  { %v5246_v45 = vpop.f32.mrf.mxu1 }
 0x818   :  { %v11171_v13 = vadd.f32 %v5533_v43, %v5245_v22  ;;  %v5535_v37 = vpop.f32.mrf.mxu0  ;;  %v14969_v45 = vld [vmem:[#allocation30_spill] sm:$0xff] }
 0x819   :  { %v5249_v60 = vpop.f32.mrf.mxu1  ;;  %8822 = vmatmul.mubr.bf16.gmra.mxu1 %v14965_v16 }
 0x81a   :  { %v5250_v46 = vadd.f32 %v5249_v60, %v14966_v10  ;;  %v5538_v20 = vpop.f32.mrf.mxu0 }
 0x81b   :  { %v5251_v1 = vpop.f32.mrf.mxu1 }
 0x81c   :  { %v11177_v25 = vadd.f32 %v5538_v20, %v5250_v46  ;;  %v5540_v55 = vpop.f32.mrf.mxu0  ;;  %v14970_v46 = vld [vmem:[#allocation39_spill] sm:$0xff] }
 0x81d   :  { %v5252_v49 = vpop.f32.mrf.mxu1 }
 0x81e   :  { %v5253_v15 = vadd.f32 %v5252_v49, %v14967_v29  ;;  %v5541_v4 = vpop.f32.mrf.mxu0 }
 0x81f   :  { %v5254_v39 = vpop.f32.mrf.mxu1 }
 0x820   :  { %v11180_v42 = vadd.f32 %v5541_v4, %v5253_v15  ;;  %v5543_v30 = vpop.f32.mrf.mxu0  ;;  %v14971_v4 = vld [vmem:[#allocation58_spill] sm:$0xff] }
 0x821   :  { %v5257_v34 = vpop.f32.mrf.mxu1 }
 0x822   :  { %v5258_v26 = vadd.f32 %v5257_v34, %v14968_v6  ;;  %v5546_v32 = vpop.f32.mrf.mxu0 }
 0x823   :  { %v5259_v50 = vpop.f32.mrf.mxu1 }
 0x824   :  { %v11183_v38 = vadd.f32 %v5546_v32, %v5258_v26  ;;  %v5548_v22 = vpop.f32.mrf.mxu0  ;;  %v14972_v50 = vld [vmem:[#allocation50_spill] sm:$0xff] }
 0x825   :  { %v5260_v43 = vpop.f32.mrf.mxu1 }
 0x826   :  { %v5261_v37 = vadd.f32 %v5260_v43, %v14969_v45  ;;  %v5549_v60 = vpop.f32.mrf.mxu0 }
 0x827   :  { %v5262_v52 = vpop.f32.mrf.mxu1 }
 0x828   :  { %v11186_v3 = vadd.f32 %v5549_v60, %v5261_v37  ;;  %v5551_v16 = vpop.f32.mrf.mxu0 }
 0x829   :  { %v5265_v10 = vpop.f32.mrf.mxu1  ;;  %v14973_v16 = vld [vmem:[#allocation53_spill] sm:$0xff] }
 0x82a   :  { %v5266_v20 = vadd.f32 %v5265_v10, %v14970_v46  ;;  %v5554_v1 = vpop.f32.mrf.mxu0 }
 0x82b   :  { %v5267_v55 = vpop.f32.mrf.mxu1 }
 0x82c   :  { %v11189_v49 = vadd.f32 %v5554_v1, %v5266_v20  ;;  %v5556_v29 = vpop.f32.mrf.mxu0 }
 0x82d   :  { %v5268_v15 = vpop.f32.mrf.mxu1 }
 0x82e   :  { %v5269_v39 = vadd.f32 %v5268_v15, %v14971_v4  ;;  %v5557_v30 = vpop.f32.mrf.mxu0  ;;  %v14975_v15 = vld [vmem:[#allocation54_spill] sm:$0xff] }
 0x82f   :  { %v5270_v34 = vpop.f32.mrf.mxu1 }
 0x830   :  { %v11192_v6 = vadd.f32 %v5557_v30, %v5269_v39  ;;  %v5559_v26 = vpop.f32.mrf.mxu0 }
 0x831   :  { %v5273_v32 = vpop.f32.mrf.mxu1 }
 0x832   :  { %v5274_v22 = vadd.f32 %v5273_v32, %v14972_v50  ;;  %v5562_v43 = vpop.f32.mrf.mxu0  ;;  %v14977_v50 = vld [vmem:[#allocation55_spill] sm:$0xff] }
 0x833   :  { %v5275_v45 = vpop.f32.mrf.mxu1 }
 0x834   :  { %v11195_v37 = vadd.f32 %v5562_v43, %v5274_v22  ;;  %v5564_v60 = vpop.f32.mrf.mxu0 }
 0x835   :  { %v5276_v52 = vpop.f32.mrf.mxu1 }
 0x836   :  { %v5277_v10 = vadd.f32 %v5276_v52, %v14973_v16  ;;  %v5565_v46 = vpop.f32.mrf.mxu0 }
 0x837   :  { %v5278_v20 = vpop.f32.mrf.mxu1 }
 0x838   :  { %v11198_v1 = vadd.f32 %v5565_v46, %v5277_v10  ;;  %v5567_v55 = vpop.f32.mrf.mxu0  ;;  %v14979_v10 = vld [vmem:[#allocation59_spill] sm:$0xff] }
 0x839   :  { %v5281_v29 = vpop.f32.mrf.mxu1 }
 0x83a   :  { %14974 = vst [vmem:[#allocation78_spill] sm:$0xff] %v11198_v1  ;;  %v5282_v4 = vadd.f32 %v5281_v29, %v14975_v15  ;;  %v5570_v39 = vpop.f32.mrf.mxu0 }
 0x83b   :  { %v5283_v30 = vpop.f32.mrf.mxu1 }
 0x83c   :  { %v11201_v34 = vadd.f32 %v5570_v39, %v5282_v4  ;;  %v5572_v26 = vpop.f32.mrf.mxu0  ;;  %v14981_v4 = vld [vmem:[#allocation63_spill] sm:$0xff] }
 0x83d   :  { %v5284_v32 = vpop.f32.mrf.mxu1 }
 0x83e   :  { %14976 = vst [vmem:[#allocation28_spill] sm:$0xff] %v11201_v34  ;;  %v5285_v22 = vadd.f32 %v5284_v32, %v14977_v50  ;;  %v5573_v43 = vpop.f32.mrf.mxu0 }
 0x83f   :  { %v5286_v45 = vpop.f32.mrf.mxu1 }
 0x840   :  { %v11204_v60 = vadd.f32 %v5573_v43, %v5285_v22  ;;  %v5575_v52 = vpop.f32.mrf.mxu0  ;;  %v14983_v22 = vld [vmem:[#allocation64_spill] sm:$0xff] }
 0x841   :  { %v5289_v16 = vpop.f32.mrf.mxu1 }
 0x842   :  { %14978 = vst [vmem:[#allocation44_spill] sm:$0xff] %v11204_v60  ;;  %v5290_v46 = vadd.f32 %v5289_v16, %v14979_v10  ;;  %v5578_v20 = vpop.f32.mrf.mxu0 }
 0x843   :  { %v5291_v55 = vpop.f32.mrf.mxu1 }
 0x844   :  { %v11207_v1 = vadd.f32 %v5578_v20, %v5290_v46  ;;  %v5580_v29 = vpop.f32.mrf.mxu0  ;;  %v14985_v46 = vld [vmem:[#allocation56_spill] sm:$0xff] }
 0x845   :  { %v5292_v15 = vpop.f32.mrf.mxu1 }
 0x846   :  { %14980 = vst [vmem:[#allocation87_spill] sm:$0xff] %v11207_v1  ;;  %v5293_v39 = vadd.f32 %v5292_v15, %v14981_v4  ;;  %v5581_v30 = vpop.f32.mrf.mxu0 }
 0x847   :  { %v5294_v26 = vpop.f32.mrf.mxu1 }
 0x848   :  { %v11210_v34 = vadd.f32 %v5581_v30, %v5293_v39  ;;  %v5583_v32 = vpop.f32.mrf.mxu0  ;;  %v14987_v39 = vld [vmem:[#allocation60_spill] sm:$0xff] }
 0x849   :  { %v5297_v50 = vpop.f32.mrf.mxu1 }
 0x84a   :  { %14982 = vst [vmem:[#allocation88_spill] sm:$0xff] %v11210_v34  ;;  %v5298_v43 = vadd.f32 %v5297_v50, %v14983_v22  ;;  %v5586_v45 = vpop.f32.mrf.mxu0 }
 0x84b   :  { %v5299_v52 = vpop.f32.mrf.mxu1 }
 0x84c   :  { %v11213_v60 = vadd.f32 %v5586_v45, %v5298_v43  ;;  %v5588_v16 = vpop.f32.mrf.mxu0  ;;  %v14989_v43 = vld [vmem:[#allocation65_spill] sm:$0xff] }
 0x84d   :  { %v5300_v10 = vpop.f32.mrf.mxu1 }
 0x84e   :  { %14984 = vst [vmem:[#allocation80_spill] sm:$0xff] %v11213_v60  ;;  %v5301_v20 = vadd.f32 %v5300_v10, %v14985_v46  ;;  %v5589_v55 = vpop.f32.mrf.mxu0 }
 0x84f   :  { %v5302_v29 = vpop.f32.mrf.mxu1 }
 0x850   :  { %v11216_v1 = vadd.f32 %v5589_v55, %v5301_v20  ;;  %v5591_v15 = vpop.f32.mrf.mxu0  ;;  %v14991_v20 = vld [vmem:[#allocation69_spill] sm:$0xff] }
 0x851   :  { %v5305_v4 = vpop.f32.mrf.mxu1 }
 0x852   :  { %14986 = vst [vmem:[#allocation35_spill] sm:$0xff] %v11216_v1  ;;  %v5306_v30 = vadd.f32 %v5305_v4, %v14987_v39  ;;  %v5594_v26 = vpop.f32.mrf.mxu0 }
 0x853   :  { %v5307_v32 = vpop.f32.mrf.mxu1 }
 0x854   :  { %v11219_v34 = vadd.f32 %v5594_v26, %v5306_v30  ;;  %v5596_v50 = vpop.f32.mrf.mxu0  ;;  %v14992_v30 = vld [vmem:[#allocation62_spill] sm:$0xff] }
 0x855   :  { %v5308_v22 = vpop.f32.mrf.mxu1 }
 0x856   :  { %14988 = vst [vmem:[#allocation36_spill] sm:$0xff] %v11219_v34  ;;  %v5309_v45 = vadd.f32 %v5308_v22, %v14989_v43  ;;  %v5597_v52 = vpop.f32.mrf.mxu0 }
 0x857   :  { %v5310_v16 = vpop.f32.mrf.mxu1 }
 0x858   :  { %v11222_v60 = vadd.f32 %v5597_v52, %v5309_v45  ;;  %v5599_v10 = vpop.f32.mrf.mxu0  ;;  %v14994_v16 = vld [vmem:[#allocation66_spill] sm:$0xff] }
 0x859   :  { %v5313_v46 = vpop.f32.mrf.mxu1 }
 0x85a   :  { %14990 = vst [vmem:[#allocation85_spill] sm:$0xff] %v11222_v60  ;;  %v5314_v55 = vadd.f32 %v5313_v46, %v14991_v20  ;;  %v5602_v29 = vpop.f32.mrf.mxu0 }
 0x85b   :  { %v5315_v15 = vpop.f32.mrf.mxu1 }
 0x85c   :  { %v11225_v1 = vadd.f32 %v5602_v29, %v5314_v55  ;;  %v5604_v4 = vpop.f32.mrf.mxu0  ;;  %v14997_v55 = vld [vmem:[#allocation71_spill] sm:$0xff] }
 0x85d   :  { %v5316_v39 = vpop.f32.mrf.mxu1 }
 0x85e   :  { %v5317_v26 = vadd.f32 %v5316_v39, %v14992_v30  ;;  %v5605_v32 = vpop.f32.mrf.mxu0  ;;  %v14999_v39 = vld [vmem:[#allocation75_spill] sm:$0xff] }
 0x85f   :  { %v5318_v50 = vpop.f32.mrf.mxu1 }
 0x860   :  { %v11228_v34 = vadd.f32 %v5605_v32, %v5317_v26  ;;  %v5607_v22 = vpop.f32.mrf.mxu0 }
 0x861   :  { %v8763_v43 = vpop.f32.mrf.mxu1 }
 0x862   :  { %14993 = vst [vmem:[#allocation57_spill] sm:$0xff] %v11228_v34  ;;  %v11234_v20 = vadd.f32 %v8763_v43, %v10983_v9  ;;  %v15005_v34 = vld [vmem:[#allocation72_spill] sm:$0xff] }
 0x863   :  { %v5643_v45 = vpop.f32.mrf.mxu1 }
 0x864   :  { %v11231_v10 = vadd.f32 %v5643_v45, %v14994_v16  ;;  %14996 = vst [vmem:[#allocation93_spill] sm:$0xff] %v11234_v20  ;;  %v5972_v9 = vmul.f32 %v11234_v20, %v11234_v20 }
 0x865   :  { %v8764_v52 = vpop.f32.mrf.mxu1 }
 0x866   :  { %14995 = vst [vmem:[#allocation34_spill] sm:$0xff] %v11231_v10  ;;  %v5970_v4 = vmul.f32 %v11231_v10, %v11231_v10  ;;  %v11242_v30 = vadd.f32 %v8764_v52, %v14999_v39 }
 0x867   :  { %v5646_v46 = vpop.f32.mrf.mxu1 }
 0x868   :  { %v11237_v29 = vadd.f32 %v5646_v46, %v14997_v55  ;;  %15000 = vst [vmem:[#allocation38_spill] sm:$0xff] %v11242_v30  ;;  %v5973_v52 = vmul.f32 %v11242_v30, %v11242_v30 }
 0x869   :  { %v8767_v15 = vpop.f32.mrf.mxu1 }
 0x86a   :  { %14998 = vst [vmem:[#allocation33_spill] sm:$0xff] %v11237_v29  ;;  %v5900_v26 = vadd.f32 %v11237_v29, %v11231_v10  ;;  %v5971_v32 = vmul.f32 %v11237_v29, %v11237_v29  ;;  %v11258_v39 = vadd.f32 %v8767_v15, %v11003_v24 }
 0x86b   :  { %v5659_v50 = vpop.f32.mrf.mxu1 }
 0x86c   :  { %v5901_v22 = vadd.f32 %v5900_v26, %v11234_v20  ;;  %v6034_v43 = vadd.f32 %v5971_v32, %v5970_v4  ;;  %v11252_v45 = vadd.f32 %v5659_v50, %v10993_v17  ;;  %15002 = vst [vmem:[#allocation83_spill] sm:$0xff] %v11258_v39  ;;  %v15003_v32 = vld [vmem:[#allocation68_spill] sm:$0xff] }
 0x86d   :  { %v8768_v16 = vpop.f32.mrf.mxu1 }
 0x86e   :  { %15001 = vst [vmem:[#allocation37_spill] sm:$0xff] %v11252_v45  ;;  %v6035_v46 = vadd.f32 %v6034_v43, %v5972_v9  ;;  %v5902_v55 = vadd.f32 %v5901_v22, %v11242_v30  ;;  %v5974_v26 = vmul.f32 %v11252_v45, %v11252_v45  ;;  %v11267_v60 = vadd.f32 %v8768_v16, %v15005_v34 }
 0x86f   :  { %v5662_v29 = vpop.f32.mrf.mxu1  ;;  %v5976_v22 = vmul.f32 %v11258_v39, %v11258_v39 }
 0x870   :  { %v5903_v10 = vadd.f32 %v5902_v55, %v11252_v45  ;;  %v6036_v4 = vadd.f32 %v6035_v46, %v5973_v52  ;;  %v11264_v17 = vadd.f32 %v5662_v29, %v15003_v32  ;;  %v15006_v46 = vld [vmem:[#allocation77_spill] sm:$0xff]  ;;  %v5977_v34 = vmul.f32 %v11267_v60, %v11267_v60 }
 0x871   :  { %v8771_v50 = vpop.f32.mrf.mxu1  ;;  %v15009_v45 = vld [vmem:[#allocation45_spill] sm:$0xff] }
 0x872   :  { %15004 = vst [vmem:[#allocation92_spill] sm:$0xff] %v11264_v17  ;;  %v6037_v20 = vadd.f32 %v6036_v4, %v5974_v26  ;;  %v5904_v9 = vadd.f32 %v5903_v10, %v11264_v17  ;;  %v5975_v24 = vmul.f32 %v11264_v17, %v11264_v17  ;;  %v15007_v26 = vld [vmem:[#allocation74_spill] sm:$0xff] }
 0x873   :  { %v5675_v15 = vpop.f32.mrf.mxu1  ;;  %v11282_v4 = vadd.f32 %v8771_v50, %v15007_v26 }
 0x874   :  { %v5905_v43 = vadd.f32 %v5904_v9, %v11258_v39  ;;  %v6038_v52 = vadd.f32 %v6037_v20, %v5975_v24  ;;  %v11276_v29 = vadd.f32 %v5675_v15, %v15006_v46  ;;  %v15008_v24 = vld [vmem:[#allocation81_spill] sm:$0xff] }
 0x875   :  { %v8772_v55 = vpop.f32.mrf.mxu1 }
 0x876   :  { %v6039_v16 = vadd.f32 %v6038_v52, %v5976_v22  ;;  %v5906_v10 = vadd.f32 %v5905_v43, %v11267_v60  ;;  %v5978_v9 = vmul.f32 %v11276_v29, %v11276_v29  ;;  %v11291_v30 = vadd.f32 %v8772_v55, %v15009_v45 }
 0x877   :  { %v5678_v32 = vpop.f32.mrf.mxu1  ;;  %v5980_v52 = vmul.f32 %v11282_v4, %v11282_v4 }
 0x878   :  { %v5907_v17 = vadd.f32 %v5906_v10, %v11276_v29  ;;  %v6040_v20 = vadd.f32 %v6039_v16, %v5977_v34  ;;  %v11288_v15 = vadd.f32 %v5678_v32, %v15008_v24  ;;  %v5981_v45 = vmul.f32 %v11291_v30, %v11291_v30 }
 0x879   :  { %v8775_v46 = vpop.f32.mrf.mxu1 }
 0x87a   :  { %v6041_v39 = vadd.f32 %v6040_v20, %v5978_v9  ;;  %v5908_v22 = vadd.f32 %v5907_v17, %v11288_v15  ;;  %v5979_v50 = vmul.f32 %v11288_v15, %v11288_v15  ;;  %v11306_v32 = vadd.f32 %v8775_v46, %v11046_v11 }
 0x87b   :  { %v5691_v43 = vpop.f32.mrf.mxu1 }
 0x87c   :  { %v5909_v10 = vadd.f32 %v5908_v22, %v11282_v4  ;;  %v6042_v34 = vadd.f32 %v6041_v39, %v5979_v50  ;;  %v11300_v16 = vadd.f32 %v5691_v43, %v11035_v7 }
 0x87d   :  { %v8776_v26 = vpop.f32.mrf.mxu1 }
 0x87e   :  { %v6043_v55 = vadd.f32 %v6042_v34, %v5980_v52  ;;  %v5910_v17 = vadd.f32 %v5909_v10, %v11291_v30  ;;  %v5982_v24 = vmul.f32 %v11300_v16, %v11300_v16  ;;  %v11315_v43 = vadd.f32 %v8776_v26, %v11049_v54 }
 0x87f   :  { %v5694_v9 = vpop.f32.mrf.mxu1  ;;  %v5984_v10 = vmul.f32 %v11306_v32, %v11306_v32 }
 0x880   :  { %v5911_v20 = vadd.f32 %v5910_v17, %v11300_v16  ;;  %v6044_v39 = vadd.f32 %v6043_v55, %v5981_v45  ;;  %v11312_v7 = vadd.f32 %v5694_v9, %v11038_v35  ;;  %v5985_v54 = vmul.f32 %v11315_v43, %v11315_v43 }
 0x881   :  { %v8779_v22 = vpop.f32.mrf.mxu1 }
 0x882   :  { %v6045_v50 = vadd.f32 %v6044_v39, %v5982_v24  ;;  %v5912_v52 = vadd.f32 %v5911_v20, %v11312_v7  ;;  %v5983_v11 = vmul.f32 %v11312_v7, %v11312_v7  ;;  %v11330_v9 = vadd.f32 %v8779_v22, %v11062_v27 }
 0x883   :  { %v5707_v46 = vpop.f32.mrf.mxu1 }
 0x884   :  { %v5913_v34 = vadd.f32 %v5912_v52, %v11306_v32  ;;  %v6046_v45 = vadd.f32 %v6045_v50, %v5983_v11  ;;  %v11324_v35 = vadd.f32 %v5707_v46, %v11054_v28 }
 0x885   :  { %v8780_v55 = vpop.f32.mrf.mxu1 }
 0x886   :  { %v6047_v26 = vadd.f32 %v6046_v45, %v5984_v10  ;;  %v5914_v17 = vadd.f32 %v5913_v34, %v11315_v43  ;;  %v5986_v39 = vmul.f32 %v11324_v35, %v11324_v35  ;;  %v11339_v46 = vadd.f32 %v8780_v55, %v11065_v61 }
 0x887   :  { %v5710_v20 = vpop.f32.mrf.mxu1  ;;  %v5988_v34 = vmul.f32 %v11330_v9, %v11330_v9 }
 0x888   :  { %v5915_v24 = vadd.f32 %v5914_v17, %v11324_v35  ;;  %v6048_v50 = vadd.f32 %v6047_v26, %v5985_v54  ;;  %v11336_v28 = vadd.f32 %v5710_v20, %v11057_v51  ;;  %v5989_v61 = vmul.f32 %v11339_v46, %v11339_v46 }
 0x889   :  { %v8783_v52 = vpop.f32.mrf.mxu1 }
 0x88a   :  { %v6049_v11 = vadd.f32 %v6048_v50, %v5986_v39  ;;  %v5916_v10 = vadd.f32 %v5915_v24, %v11336_v28  ;;  %v5987_v27 = vmul.f32 %v11336_v28, %v11336_v28  ;;  %v11354_v20 = vadd.f32 %v8783_v52, %v11078_v31 }
 0x88b   :  { %v5723_v22 = vpop.f32.mrf.mxu1 }
 0x88c   :  { %v5917_v45 = vadd.f32 %v5916_v10, %v11330_v9  ;;  %v6050_v54 = vadd.f32 %v6049_v11, %v5987_v27  ;;  %v11348_v51 = vadd.f32 %v5723_v22, %v11070_v14 }
 0x88d   :  { %v8784_v26 = vpop.f32.mrf.mxu1 }
 0x88e   :  { %v6051_v55 = vadd.f32 %v6050_v54, %v5988_v34  ;;  %v5918_v17 = vadd.f32 %v5917_v45, %v11339_v46  ;;  %v5990_v50 = vmul.f32 %v11348_v51, %v11348_v51  ;;  %v11363_v22 = vadd.f32 %v8784_v26, %v11081_v21 }
 0x88f   :  { %v5726_v24 = vpop.f32.mrf.mxu1  ;;  %v5992_v45 = vmul.f32 %v11354_v20, %v11354_v20 }
 0x890   :  { %v5919_v39 = vadd.f32 %v5918_v17, %v11348_v51  ;;  %v6052_v11 = vadd.f32 %v6051_v55, %v5989_v61  ;;  %v11360_v14 = vadd.f32 %v5726_v24, %v11073_v18  ;;  %v5993_v21 = vmul.f32 %v11363_v22, %v11363_v22 }
 0x891   :  { %v8787_v10 = vpop.f32.mrf.mxu1 }
 0x892   :  { %v6053_v27 = vadd.f32 %v6052_v11, %v5990_v50  ;;  %v5920_v34 = vadd.f32 %v5919_v39, %v11360_v14  ;;  %v5991_v31 = vmul.f32 %v11360_v14, %v11360_v14  ;;  %v11378_v24 = vadd.f32 %v8787_v10, %v11094_v47 }
 0x893   :  { %v5739_v52 = vpop.f32.mrf.mxu1 }
 0x894   :  { %v5921_v54 = vadd.f32 %v5920_v34, %v11354_v20  ;;  %v6054_v61 = vadd.f32 %v6053_v27, %v5991_v31  ;;  %v11372_v18 = vadd.f32 %v5739_v52, %v11086_v57 }
 0x895   :  { %v8788_v55 = vpop.f32.mrf.mxu1 }
 0x896   :  { %v6055_v26 = vadd.f32 %v6054_v61, %v5992_v45  ;;  %v5922_v17 = vadd.f32 %v5921_v54, %v11363_v22  ;;  %v5994_v11 = vmul.f32 %v11372_v18, %v11372_v18  ;;  %v11387_v52 = vadd.f32 %v8788_v55, %v11097_v33 }
 0x897   :  { %v5742_v39 = vpop.f32.mrf.mxu1  ;;  %v5996_v54 = vmul.f32 %v11378_v24, %v11378_v24 }
 0x898   :  { %v5923_v50 = vadd.f32 %v5922_v17, %v11372_v18  ;;  %v6056_v27 = vadd.f32 %v6055_v26, %v5993_v21  ;;  %v11384_v57 = vadd.f32 %v5742_v39, %v11089_v62  ;;  %v5997_v33 = vmul.f32 %v11387_v52, %v11387_v52 }
 0x899   :  { %v8791_v34 = vpop.f32.mrf.mxu1 }
 0x89a   :  { %v6057_v31 = vadd.f32 %v6056_v27, %v5994_v11  ;;  %v5924_v45 = vadd.f32 %v5923_v50, %v11384_v57  ;;  %v5995_v47 = vmul.f32 %v11384_v57, %v11384_v57  ;;  %v11402_v39 = vadd.f32 %v8791_v34, %v11112_v8 }
 0x89b   :  { %v5755_v10 = vpop.f32.mrf.mxu1 }
 0x89c   :  { %v5925_v61 = vadd.f32 %v5924_v45, %v11378_v24  ;;  %v6058_v21 = vadd.f32 %v6057_v31, %v5995_v47  ;;  %v11396_v62 = vadd.f32 %v5755_v10, %v11102_v56 }
 0x89d   :  { %v8792_v26 = vpop.f32.mrf.mxu1 }
 0x89e   :  { %v6059_v55 = vadd.f32 %v6058_v21, %v5996_v54  ;;  %v5926_v17 = vadd.f32 %v5925_v61, %v11387_v52  ;;  %v5998_v27 = vmul.f32 %v11396_v62, %v11396_v62  ;;  %v11411_v10 = vadd.f32 %v8792_v26, %v11115_v23 }
 0x89f   :  { %v5758_v50 = vpop.f32.mrf.mxu1  ;;  %v6000_v61 = vmul.f32 %v11402_v39, %v11402_v39 }
 0x8a0   :  { %v5927_v11 = vadd.f32 %v5926_v17, %v11396_v62  ;;  %v6060_v31 = vadd.f32 %v6059_v55, %v5997_v33  ;;  %v11408_v56 = vadd.f32 %v5758_v50, %v11105_v2  ;;  %v6001_v23 = vmul.f32 %v11411_v10, %v11411_v10 }
 0x8a1   :  { %v8795_v45 = vpop.f32.mrf.mxu1 }
 0x8a2   :  { %v6061_v47 = vadd.f32 %v6060_v31, %v5998_v27  ;;  %v5928_v54 = vadd.f32 %v5927_v11, %v11408_v56  ;;  %v5999_v8 = vmul.f32 %v11408_v56, %v11408_v56  ;;  %v11426_v50 = vadd.f32 %v8795_v45, %v11128_v19 }
 0x8a3   :  { %v5771_v34 = vpop.f32.mrf.mxu1 }
 0x8a4   :  { %v5929_v21 = vadd.f32 %v5928_v54, %v11402_v39  ;;  %v6062_v33 = vadd.f32 %v6061_v47, %v5999_v8  ;;  %v11420_v2 = vadd.f32 %v5771_v34, %v11120_v0 }
 0x8a5   :  { %v8796_v55 = vpop.f32.mrf.mxu1 }
 0x8a6   :  { %v6063_v26 = vadd.f32 %v6062_v33, %v6000_v61  ;;  %v5930_v17 = vadd.f32 %v5929_v21, %v11411_v10  ;;  %v6002_v31 = vmul.f32 %v11420_v2, %v11420_v2  ;;  %v11435_v34 = vadd.f32 %v8796_v55, %v11131_v40 }
 0x8a7   :  { %v5774_v11 = vpop.f32.mrf.mxu1  ;;  %v6004_v21 = vmul.f32 %v11426_v50, %v11426_v50 }
 0x8a8   :  { %v5931_v27 = vadd.f32 %v5930_v17, %v11420_v2  ;;  %v6064_v47 = vadd.f32 %v6063_v26, %v6001_v23  ;;  %v11432_v0 = vadd.f32 %v5774_v11, %v11123_v63  ;;  %v6005_v40 = vmul.f32 %v11435_v34, %v11435_v34 }
 0x8a9   :  { %v8799_v54 = vpop.f32.mrf.mxu1 }
 0x8aa   :  { %v6065_v8 = vadd.f32 %v6064_v47, %v6002_v31  ;;  %v5932_v61 = vadd.f32 %v5931_v27, %v11432_v0  ;;  %v6003_v19 = vmul.f32 %v11432_v0, %v11432_v0  ;;  %v11450_v11 = vadd.f32 %v8799_v54, %v11144_v41 }
 0x8ab   :  { %v5787_v45 = vpop.f32.mrf.mxu1 }
 0x8ac   :  { %v5933_v33 = vadd.f32 %v5932_v61, %v11426_v50  ;;  %v6066_v23 = vadd.f32 %v6065_v8, %v6003_v19  ;;  %v11444_v63 = vadd.f32 %v5787_v45, %v11136_v44 }
 0x8ad   :  { %v8800_v26 = vpop.f32.mrf.mxu1 }
 0x8ae   :  { %v6067_v55 = vadd.f32 %v6066_v23, %v6004_v21  ;;  %v5934_v17 = vadd.f32 %v5933_v33, %v11435_v34  ;;  %v6006_v47 = vmul.f32 %v11444_v63, %v11444_v63  ;;  %v11459_v45 = vadd.f32 %v8800_v26, %v11147_v53 }
 0x8af   :  { %v5790_v27 = vpop.f32.mrf.mxu1  ;;  %v6008_v33 = vmul.f32 %v11450_v11, %v11450_v11 }
 0x8b0   :  { %v5935_v31 = vadd.f32 %v5934_v17, %v11444_v63  ;;  %v6068_v8 = vadd.f32 %v6067_v55, %v6005_v40  ;;  %v11456_v44 = vadd.f32 %v5790_v27, %v11139_v59  ;;  %v6009_v53 = vmul.f32 %v11459_v45, %v11459_v45 }
 0x8b1   :  { %v8803_v61 = vpop.f32.mrf.mxu1 }
 0x8b2   :  { %v6069_v19 = vadd.f32 %v6068_v8, %v6006_v47  ;;  %v5936_v21 = vadd.f32 %v5935_v31, %v11456_v44  ;;  %v6007_v41 = vmul.f32 %v11456_v44, %v11456_v44  ;;  %v11474_v27 = vadd.f32 %v8803_v61, %v11160_v58 }
 0x8b3   :  { %v5803_v54 = vpop.f32.mrf.mxu1 }
 0x8b4   :  { %v5937_v23 = vadd.f32 %v5936_v21, %v11450_v11  ;;  %v6070_v40 = vadd.f32 %v6069_v19, %v6007_v41  ;;  %v11468_v59 = vadd.f32 %v5803_v54, %v11152_v5 }
 0x8b5   :  { %v8804_v55 = vpop.f32.mrf.mxu1 }
 0x8b6   :  { %v6071_v26 = vadd.f32 %v6070_v40, %v6008_v33  ;;  %v5938_v17 = vadd.f32 %v5937_v23, %v11459_v45  ;;  %v6010_v8 = vmul.f32 %v11468_v59, %v11468_v59  ;;  %v11483_v54 = vadd.f32 %v8804_v55, %v11163_v12 }
 0x8b7   :  { %v5806_v31 = vpop.f32.mrf.mxu1  ;;  %v6012_v23 = vmul.f32 %v11474_v27, %v11474_v27 }
 0x8b8   :  { %v5939_v47 = vadd.f32 %v5938_v17, %v11468_v59  ;;  %v6072_v19 = vadd.f32 %v6071_v26, %v6009_v53  ;;  %v11480_v5 = vadd.f32 %v5806_v31, %v11155_v36  ;;  %v6013_v12 = vmul.f32 %v11483_v54, %v11483_v54 }
 0x8b9   :  { %v8807_v21 = vpop.f32.mrf.mxu1 }
 0x8ba   :  { %v6073_v41 = vadd.f32 %v6072_v19, %v6010_v8  ;;  %v5940_v33 = vadd.f32 %v5939_v47, %v11480_v5  ;;  %v6011_v58 = vmul.f32 %v11480_v5, %v11480_v5  ;;  %v11498_v31 = vadd.f32 %v8807_v21, %v11177_v25 }
 0x8bb   :  { %v5819_v61 = vpop.f32.mrf.mxu1 }
 0x8bc   :  { %v5941_v40 = vadd.f32 %v5940_v33, %v11474_v27  ;;  %v6074_v53 = vadd.f32 %v6073_v41, %v6011_v58  ;;  %v11492_v36 = vadd.f32 %v5819_v61, %v11168_v48  ;;  %15010 = vst [vmem:[#allocation84_spill] sm:$0xff] %v11498_v31 }
 0x8bd   :  { %v8808_v26 = vpop.f32.mrf.mxu1 }
 0x8be   :  { %v6075_v55 = vadd.f32 %v6074_v53, %v6012_v23  ;;  %v5942_v17 = vadd.f32 %v5941_v40, %v11483_v54  ;;  %v6014_v19 = vmul.f32 %v11492_v36, %v11492_v36  ;;  %v11507_v61 = vadd.f32 %v8808_v26, %v11180_v42 }
 0x8bf   :  { %v5822_v47 = vpop.f32.mrf.mxu1  ;;  %v6016_v40 = vmul.f32 %v11498_v31, %v11498_v31 }
 0x8c0   :  { %v5943_v8 = vadd.f32 %v5942_v17, %v11492_v36  ;;  %v6076_v41 = vadd.f32 %v6075_v55, %v6013_v12  ;;  %v11504_v48 = vadd.f32 %v5822_v47, %v11171_v13  ;;  %15011 = vst [vmem:[#allocation89_spill] sm:$0xff] %v11507_v61  ;;  %v6017_v42 = vmul.f32 %v11507_v61, %v11507_v61 }
 0x8c1   :  { %v8811_v33 = vpop.f32.mrf.mxu1 }
 0x8c2   :  { %v6077_v58 = vadd.f32 %v6076_v41, %v6014_v19  ;;  %v5944_v23 = vadd.f32 %v5943_v8, %v11504_v48  ;;  %v6015_v25 = vmul.f32 %v11504_v48, %v11504_v48  ;;  %v11522_v47 = vadd.f32 %v8811_v33, %v11189_v49 }
 0x8c3   :  { %v5835_v21 = vpop.f32.mrf.mxu1 }
 0x8c4   :  { %v5945_v53 = vadd.f32 %v5944_v23, %v11498_v31  ;;  %v6078_v12 = vadd.f32 %v6077_v58, %v6015_v25  ;;  %v11516_v13 = vadd.f32 %v5835_v21, %v11183_v38  ;;  %15013 = vst [vmem:[#allocation95_spill] sm:$0xff] %v11522_v47 }
 0x8c5   :  { %v8812_v55 = vpop.f32.mrf.mxu1 }
 0x8c6   :  { %15012 = vst [vmem:[#allocation94_spill] sm:$0xff] %v11516_v13  ;;  %v6079_v26 = vadd.f32 %v6078_v12, %v6016_v40  ;;  %v5946_v17 = vadd.f32 %v5945_v53, %v11507_v61  ;;  %v6018_v41 = vmul.f32 %v11516_v13, %v11516_v13  ;;  %v11531_v21 = vadd.f32 %v8812_v55, %v11192_v6 }
 0x8c7   :  { %v5838_v8 = vpop.f32.mrf.mxu1  ;;  %v6020_v53 = vmul.f32 %v11522_v47, %v11522_v47 }
 0x8c8   :  { %v5947_v19 = vadd.f32 %v5946_v17, %v11516_v13  ;;  %v6080_v58 = vadd.f32 %v6079_v26, %v6017_v42  ;;  %v11528_v38 = vadd.f32 %v5838_v8, %v11186_v3  ;;  %15015 = vst [vmem:[#allocation43_spill] sm:$0xff] %v11531_v21  ;;  %v6021_v6 = vmul.f32 %v11531_v21, %v11531_v21  ;;  %v15017_v8 = vld [vmem:[#allocation28_spill] sm:$0xff] }
 0x8c9   :  { %v8815_v23 = vpop.f32.mrf.mxu1 }
 0x8ca   :  { %15014 = vst [vmem:[#allocation26_spill] sm:$0xff] %v11528_v38  ;;  %v6081_v25 = vadd.f32 %v6080_v58, %v6018_v41  ;;  %v5948_v40 = vadd.f32 %v5947_v19, %v11528_v38  ;;  %v6019_v49 = vmul.f32 %v11528_v38, %v11528_v38  ;;  %v11546_v19 = vadd.f32 %v8815_v23, %v15017_v8  ;;  %v15021_v38 = vld [vmem:[#allocation44_spill] sm:$0xff] }
 0x8cb   :  { %v5851_v33 = vpop.f32.mrf.mxu1 }
 0x8cc   :  { %v5949_v12 = vadd.f32 %v5948_v40, %v11522_v47  ;;  %v6082_v42 = vadd.f32 %v6081_v25, %v6019_v49  ;;  %v11540_v3 = vadd.f32 %v5851_v33, %v11195_v37  ;;  %15018 = vst [vmem:[#allocation24_spill] sm:$0xff] %v11546_v19  ;;  %v15019_v49 = vld [vmem:[#allocation78_spill] sm:$0xff] }
 0x8cd   :  { %v8816_v26 = vpop.f32.mrf.mxu1 }
 0x8ce   :  { %15016 = vst [vmem:[#allocation90_spill] sm:$0xff] %v11540_v3  ;;  %v6083_v55 = vadd.f32 %v6082_v42, %v6020_v53  ;;  %v5950_v17 = vadd.f32 %v5949_v12, %v11531_v21  ;;  %v6022_v40 = vmul.f32 %v11540_v3, %v11540_v3  ;;  %v11555_v13 = vadd.f32 %v8816_v26, %v15021_v38 }
 0x8cf   :  { %v5854_v41 = vpop.f32.mrf.mxu1  ;;  %v6024_v42 = vmul.f32 %v11546_v19, %v11546_v19 }
 0x8d0   :  { %v5951_v58 = vadd.f32 %v5950_v17, %v11540_v3  ;;  %v6084_v25 = vadd.f32 %v6083_v55, %v6021_v6  ;;  %v11552_v37 = vadd.f32 %v5854_v41, %v15019_v49  ;;  %15022 = vst [vmem:[#allocation27_spill] sm:$0xff] %v11555_v13  ;;  %v15023_v55 = vld [vmem:[#allocation87_spill] sm:$0xff]  ;;  %v6025_v38 = vmul.f32 %v11555_v13, %v11555_v13 }
 0x8d1   :  { %v8819_v33 = vpop.f32.mrf.mxu1  ;;  %v15029_v3 = vld [vmem:[#allocation35_spill] sm:$0xff] }
 0x8d2   :  { %15020 = vst [vmem:[#allocation32_spill] sm:$0xff] %v11552_v37  ;;  %v6085_v47 = vadd.f32 %v6084_v25, %v6022_v40  ;;  %v5952_v53 = vadd.f32 %v5951_v58, %v11552_v37  ;;  %v6023_v23 = vmul.f32 %v11552_v37, %v11552_v37  ;;  %v15025_v40 = vld [vmem:[#allocation80_spill] sm:$0xff] }
 0x8d3   :  { %v5867_v12 = vpop.f32.mrf.mxu1  ;;  %v11570_v25 = vadd.f32 %v8819_v33, %v15025_v40 }
 0x8d4   :  { %v5953_v17 = vadd.f32 %v5952_v53, %v11546_v19  ;;  %v6086_v6 = vadd.f32 %v6085_v47, %v6023_v23  ;;  %v11564_v8 = vadd.f32 %v5867_v12, %v15023_v55  ;;  %v15027_v23 = vld [vmem:[#allocation88_spill] sm:$0xff] }
 0x8d5   :  { %v8820_v41 = vpop.f32.mrf.mxu1  ;;  %15026 = vst [vmem:[#allocation61_spill] sm:$0xff] %v11570_v25 }
 0x8d6   :  { %15024 = vst [vmem:[#allocation46_spill] sm:$0xff] %v11564_v8  ;;  %v6087_v26 = vadd.f32 %v6086_v6, %v6024_v42  ;;  %v5954_v58 = vadd.f32 %v5953_v17, %v11555_v13  ;;  %v6026_v53 = vmul.f32 %v11564_v8, %v11564_v8  ;;  %v11579_v21 = vadd.f32 %v8820_v41, %v15029_v3 }
 0x8d7   :  { %v5870_v49 = vpop.f32.mrf.mxu1  ;;  %v6028_v6 = vmul.f32 %v11570_v25, %v11570_v25 }
 0x8d8   :  { %v5955_v37 = vadd.f32 %v5954_v58, %v11564_v8  ;;  %v6088_v47 = vadd.f32 %v6087_v26, %v6025_v38  ;;  %v11576_v12 = vadd.f32 %v5870_v49, %v15027_v23  ;;  %15030 = vst [vmem:[#allocation70_spill] sm:$0xff] %v11579_v21  ;;  %v15031_v26 = vld [vmem:[#allocation36_spill] sm:$0xff]  ;;  %v6029_v3 = vmul.f32 %v11579_v21, %v11579_v21 }
 0x8d9   :  { %v8823_v55 = vpop.f32.mrf.mxu1 }
 0x8da   :  { %15028 = vst [vmem:[#allocation86_spill] sm:$0xff] %v11576_v12  ;;  %v6089_v19 = vadd.f32 %v6088_v47, %v6026_v53  ;;  %v5956_v42 = vadd.f32 %v5955_v37, %v11576_v12  ;;  %v6027_v33 = vmul.f32 %v11576_v12, %v11576_v12  ;;  %v11594_v53 = vadd.f32 %v8823_v55, %v11225_v1 }
 0x8db   :  { %v5883_v17 = vpop.f32.mrf.mxu1 }
 0x8dc   :  { %v5957_v58 = vadd.f32 %v5956_v42, %v11570_v25  ;;  %v6090_v38 = vadd.f32 %v6089_v19, %v6027_v33  ;;  %v11588_v40 = vadd.f32 %v5883_v17, %v15031_v26  ;;  %15033 = vst [vmem:[#allocation67_spill] sm:$0xff] %v11594_v53  ;;  %v15034_v33 = vld [vmem:[#allocation85_spill] sm:$0xff]  ;;  %v6032_v55 = vmul.f32 %v11594_v53, %v11594_v53 }
 0x8dd   :  { %v8824_v49 = vpop.f32.mrf.mxu1  ;;  %v15036_v25 = vld [vmem:[#allocation57_spill] sm:$0xff] }
 0x8de   :  { %15032 = vst [vmem:[#allocation91_spill] sm:$0xff] %v11588_v40  ;;  %v6091_v41 = vadd.f32 %v6090_v38, %v6028_v6  ;;  %v5958_v37 = vadd.f32 %v5957_v58, %v11579_v21  ;;  %v6030_v42 = vmul.f32 %v11588_v40, %v11588_v40  ;;  %v11603_v12 = vadd.f32 %v8824_v49, %v15036_v25 }
 0x8df   :  { %v5886_v47 = vpop.f32.mrf.mxu1 }
 0x8e0   :  { %v5959_v23 = vadd.f32 %v5958_v37, %v11588_v40  ;;  %v6092_v19 = vadd.f32 %v6091_v41, %v6029_v3  ;;  %v11600_v17 = vadd.f32 %v5886_v47, %v15034_v33  ;;  %v6033_v3 = vmul.f32 %v11603_v12, %v11603_v12 }
 0x8e2   :  { %15035 = vst [vmem:[#allocation120_spill] sm:$0xff] %v11600_v17  ;;  %v6093_v26 = vadd.f32 %v6092_v19, %v6030_v42  ;;  %v5960_v6 = vadd.f32 %v5959_v23, %v11600_v17  ;;  %v6031_v1 = vmul.f32 %v11600_v17, %v11600_v17 }
 0x8e4   :  { %v5961_v58 = vadd.f32 %v5960_v6, %v11594_v53  ;;  %v6094_v38 = vadd.f32 %v6093_v26, %v6031_v1 }
 0x8e6   :  { %v5962_v41 = vadd.f32 %v5961_v58, %v11603_v12  ;;  %v6095_v37 = vadd.f32 %v6094_v38, %v6032_v55  ;;  %v5898_v55 = vld [vmem:[%s14182_s12] sm:$0x1] }
 0x8e8   :  { %v5963_v47 = vrot.slane %v5962_v41, 4  ;;  %v6096_v25 = vadd.f32 %v6095_v37, %v6033_v3  ;;  %v15040_v37 = vld [vmem:[#allocation93_spill] sm:$0xff] }
 0x8ea   :  { %v5964_v49 = vadd.f32 %v5963_v47, %v5962_v41  ;;  %v6097_v42 = vrot.slane %v6096_v25, 4 }
 0x8ec   :  { %v5965_v23 = vrot.slane %v5964_v49, 2  ;;  %v6098_v19 = vadd.f32 %v6097_v42, %v6096_v25  ;;  %v15041_v25 = vld [vmem:[#allocation38_spill] sm:$0xff]  ;;  %v15042_v42 = vld [vmem:[#allocation37_spill] sm:$0xff] }
 0x8ee   :  { %v5966_v33 = vadd.f32 %v5965_v23, %v5964_v49  ;;  %v6099_v40 = vrot.slane %v6098_v19, 2 }
 0x8f0   :  { %v5967_v21 = vrot.slane %v5966_v33, 1  ;;  %v6100_v8 = vadd.f32 %v6099_v40, %v6098_v19  ;;  %v11620_v40 = vld [vmem:[%s14183_s13] sm:$0x1]  ;;  %v15043_v19 = vld [vmem:[#allocation92_spill] sm:$0xff] }
 0x8f2   :  { %v5968_v17 = vadd.f32 %v5967_v21, %v5966_v33  ;;  %v6101_v13 = vrot.slane %v6100_v8, 1 }
 0x8f4   :  { %v5969_v6 = vmul.f32 0.001953125, %v5968_v17  ;;  %v6102_v26 = vadd.f32 %v6101_v13, %v6100_v8  ;;  %v15037_v13 = vld [vmem:[#allocation23_spill] sm:$0xff]  ;;  %v15039_v17 = vld [vmem:[#allocation33_spill] sm:$0xff] }
 0x8f6   :  { %v6103_v1 = vmul.f32 0.001953125, %v6102_v26  ;;  %v6104_v53 = vmul.f32 %v5969_v6, %v5969_v6 }
 0x8f8   :  { %v6105_v61 = vsub.f32 %v6103_v1, %v6104_v53 }
 0x8fa   :  { %v6106_v31 = vmax.f32 %v6105_v61, 0.0  ;;  %v15038_v61 = vld [vmem:[#allocation34_spill] sm:$0xff] }
 0x8fc   :  { %v6107_v58 = vadd.f32 0.8, %v6106_v31 }
 0x8fe   :  { %9065 = vrsqrt.f32 %v6107_v58 }
 0x90b   :  { %v9066_v38 = vpop.eup %9065 }
 0x90c   :  { %v6109_v3 = vmul.f32 %v9066_v38, %v5898_v55 }
 0x90e   :  { %v11622_v21 = vmul.f32 %v6109_v3, %v5969_v6  ;;  %v11625_v8 = vrot.slane %v6109_v3, %v15037_v13  ;;  %v15044_v6 = vld [vmem:[#allocation83_spill] sm:$0xff] }
 0x910   :  { %v6111_v31 = vsub.f32 %v11620_v40, %v11622_v21  ;;  %v11631_v53 = vmul.f32 %v11625_v8, %v15038_v61  ;;  %v11635_v41 = vmul.f32 %v11625_v8, %v15039_v17  ;;  %v11639_v47 = vmul.f32 %v11625_v8, %v15040_v37  ;;  %v15045_v40 = vld [vmem:[#allocation84_spill] sm:$0xff]  ;;  %v15046_v21 = vld [vmem:[#allocation89_spill] sm:$0xff]  ;;  %v15047_v61 = vld [vmem:[#allocation94_spill] sm:$0xff] }
 0x911   :  { %v11643_v49 = vmul.f32 %v11625_v8, %v15041_v25  ;;  %v11647_v23 = vmul.f32 %v11625_v8, %v15042_v42  ;;  %v11651_v33 = vmul.f32 %v11625_v8, %v15043_v19  ;;  %v11655_v26 = vmul.f32 %v11625_v8, %v15044_v6  ;;  %v15048_v17 = vld [vmem:[#allocation26_spill] sm:$0xff]  ;;  %v15050_v37 = vld [vmem:[#allocation95_spill] sm:$0xff] }
 0x912   :  { %v11659_v1 = vmul.f32 %v11625_v8, %v11267_v60  ;;  %v11663_v58 = vmul.f32 %v11625_v8, %v11276_v29  ;;  %v11667_v55 = vmul.f32 %v11625_v8, %v11288_v15  ;;  %v11671_v38 = vmul.f32 %v11625_v8, %v11282_v4  ;;  %v15052_v25 = vld [vmem:[#allocation43_spill] sm:$0xff]  ;;  %v15054_v19 = vld [vmem:[#allocation90_spill] sm:$0xff] }
 0x913   :  { %v11675_v3 = vmul.f32 %v11625_v8, %v11291_v30  ;;  %v11679_v60 = vmul.f32 %v11625_v8, %v11300_v16  ;;  %v11683_v29 = vmul.f32 %v11625_v8, %v11312_v7  ;;  %v11687_v15 = vmul.f32 %v11625_v8, %v11306_v32 }
 0x914   :  { %v11691_v4 = vmul.f32 %v11625_v8, %v11315_v43  ;;  %v11695_v30 = vmul.f32 %v11625_v8, %v11324_v35  ;;  %v11699_v16 = vmul.f32 %v11625_v8, %v11336_v28  ;;  %v11703_v7 = vmul.f32 %v11625_v8, %v11330_v9 }
 0x915   :  { %v11707_v32 = vmul.f32 %v11625_v8, %v11339_v46  ;;  %v11711_v43 = vmul.f32 %v11625_v8, %v11348_v51  ;;  %v11715_v35 = vmul.f32 %v11625_v8, %v11360_v14  ;;  %v11719_v28 = vmul.f32 %v11625_v8, %v11354_v20 }
 0x916   :  { %v11723_v9 = vmul.f32 %v11625_v8, %v11363_v22  ;;  %v11727_v46 = vmul.f32 %v11625_v8, %v11372_v18  ;;  %v11731_v51 = vmul.f32 %v11625_v8, %v11384_v57  ;;  %v11735_v14 = vmul.f32 %v11625_v8, %v11378_v24 }
 0x917   :  { %v11739_v20 = vmul.f32 %v11625_v8, %v11387_v52  ;;  %v11743_v22 = vmul.f32 %v11625_v8, %v11396_v62  ;;  %v11747_v18 = vmul.f32 %v11625_v8, %v11408_v56  ;;  %v11751_v57 = vmul.f32 %v11625_v8, %v11402_v39 }
 0x918   :  { %v11755_v24 = vmul.f32 %v11625_v8, %v11411_v10  ;;  %v11759_v52 = vmul.f32 %v11625_v8, %v11420_v2  ;;  %v11763_v62 = vmul.f32 %v11625_v8, %v11432_v0  ;;  %v11767_v56 = vmul.f32 %v11625_v8, %v11426_v50 }
 0x919   :  { %v11771_v39 = vmul.f32 %v11625_v8, %v11435_v34  ;;  %v11775_v10 = vmul.f32 %v11625_v8, %v11444_v63  ;;  %v11779_v2 = vmul.f32 %v11625_v8, %v11456_v44  ;;  %v11783_v0 = vmul.f32 %v11625_v8, %v11450_v11 }
 0x91a   :  { %v11787_v50 = vmul.f32 %v11625_v8, %v11459_v45  ;;  %v11791_v34 = vmul.f32 %v11625_v8, %v11468_v59  ;;  %v11795_v63 = vmul.f32 %v11625_v8, %v11480_v5  ;;  %v11799_v44 = vmul.f32 %v11625_v8, %v11474_v27 }
 0x91b   :  { %v11803_v11 = vmul.f32 %v11625_v8, %v11483_v54  ;;  %v11807_v45 = vmul.f32 %v11625_v8, %v11492_v36  ;;  %v11811_v59 = vmul.f32 %v11625_v8, %v11504_v48  ;;  %v11815_v5 = vmul.f32 %v11625_v8, %v15045_v40  ;;  %v15056_v40 = vld [vmem:[#allocation32_spill] sm:$0xff] }
 0x91c   :  { %v11819_v27 = vmul.f32 %v11625_v8, %v15046_v21  ;;  %v11823_v54 = vmul.f32 %v11625_v8, %v15047_v61  ;;  %v11827_v36 = vmul.f32 %v11625_v8, %v15048_v17  ;;  %v11831_v48 = vmul.f32 %v11625_v8, %v15050_v37  ;;  %v15058_v61 = vld [vmem:[#allocation24_spill] sm:$0xff] }
 0x91d   :  { %v11835_v42 = vmul.f32 %v11625_v8, %v15052_v25  ;;  %v11839_v6 = vmul.f32 %v11625_v8, %v15054_v19  ;;  %v11843_v21 = vmul.f32 %v11625_v8, %v15056_v40  ;;  %v11847_v17 = vmul.f32 %v11625_v8, %v15058_v61 }
 0x91e   :  { %15049 = vst [vmem:[#allocation76_spill] sm:$0xff] %v11827_v36  ;;  %15051 = vst [vmem:[#allocation121_spill] sm:$0xff] %v11831_v48  ;;  %v15060_v36 = vld [vmem:[#allocation27_spill] sm:$0xff]  ;;  %v15062_v48 = vld [vmem:[#allocation120_spill] sm:$0xff]  ;;  %v11867_v61 = vmul.f32 %v11625_v8, %v11603_v12 }
 0x91f   :  { %15053 = vst [vmem:[#allocation73_spill] sm:$0xff] %v11835_v42  ;;  %15055 = vst [vmem:[#allocation122_spill] sm:$0xff] %v11839_v6  ;;  %v11851_v37 = vmul.f32 %v11625_v8, %v15060_v36  ;;  %v11855_v25 = vmul.f32 %v11625_v8, %v15062_v48  ;;  %v15064_v42 = vld [vmem:[#allocation46_spill] sm:$0xff]  ;;  %v15067_v36 = vld [vmem:[#allocation61_spill] sm:$0xff] }
 0x920   :  { %15057 = vst [vmem:[#allocation82_spill] sm:$0xff] %v11843_v21  ;;  %15059 = vst [vmem:[#allocation123_spill] sm:$0xff] %v11847_v17  ;;  %v11859_v19 = vmul.f32 %v11625_v8, %v15064_v42  ;;  %v15066_v6 = vld [vmem:[#allocation86_spill] sm:$0xff]  ;;  %v11870_v17 = vrot.slane %v6111_v31, %v15037_v13  ;;  %v15069_v21 = vld [vmem:[#allocation91_spill] sm:$0xff] }
 0x921   :  { %15061 = vst [vmem:[#allocation79_spill] sm:$0xff] %v11851_v37  ;;  %15063 = vst [vmem:[#allocation124_spill] sm:$0xff] %v11855_v25  ;;  %v11863_v40 = vmul.f32 %v11625_v8, %v15066_v6  ;;  %v6176_v37 = vmul.f32 %v11625_v8, %v15067_v36  ;;  %v15068_v48 = vld [vmem:[#allocation70_spill] sm:$0xff]  ;;  %v6178_v42 = vmul.f32 %v11625_v8, %v15069_v21 }
 0x922   :  { %15065 = vst [vmem:[#allocation47_spill] sm:$0xff] %v11859_v19  ;;  %v6177_v25 = vmul.f32 %v11625_v8, %v15068_v48  ;;  %v15070_v19 = vld [vmem:[#allocation67_spill] sm:$0xff]  ;;  %v11884_v12 = vadd.f32 %v11870_v17, %v11631_v53  ;;  %v11888_v31 = vadd.f32 %v11870_v17, %v11635_v41  ;;  %v11892_v36 = vadd.f32 %v11870_v17, %v11639_v47 }
 0x923   :  { %v11880_v6 = vmul.f32 %v11625_v8, %v15070_v19  ;;  %v11896_v48 = vadd.f32 %v11870_v17, %v11643_v49  ;;  %v11900_v8 = vadd.f32 %v11870_v17, %v11647_v23  ;;  %v11904_v53 = vadd.f32 %v11870_v17, %v11651_v33 }
 0x924   :  { %v11908_v41 = vadd.f32 %v11870_v17, %v11655_v26  ;;  %v11912_v47 = vadd.f32 %v11870_v17, %v11659_v1  ;;  %v11916_v49 = vadd.f32 %v11870_v17, %v11663_v58  ;;  %v11920_v23 = vadd.f32 %v11870_v17, %v11667_v55 }
 0x925   :  { %v11924_v33 = vadd.f32 %v11870_v17, %v11671_v38  ;;  %v11928_v26 = vadd.f32 %v11870_v17, %v11675_v3  ;;  %v11932_v1 = vadd.f32 %v11870_v17, %v11679_v60  ;;  %v11936_v58 = vadd.f32 %v11870_v17, %v11683_v29  ;;  %v15075_v21 = vld [vmem:[#allocation76_spill] sm:$0xff]  ;;  %v15077_v19 = vld [vmem:[#allocation121_spill] sm:$0xff] }
 0x926   :  { %v11940_v55 = vadd.f32 %v11870_v17, %v11687_v15  ;;  %v11944_v38 = vadd.f32 %v11870_v17, %v11691_v4  ;;  %v11948_v3 = vadd.f32 %v11870_v17, %v11695_v30  ;;  %v11952_v60 = vadd.f32 %v11870_v17, %v11699_v16  ;;  %v15079_v13 = vld [vmem:[#allocation73_spill] sm:$0xff] }
 0x927   :  { %v11956_v29 = vadd.f32 %v11870_v17, %v11703_v7  ;;  %v11960_v15 = vadd.f32 %v11870_v17, %v11707_v32  ;;  %v11964_v4 = vadd.f32 %v11870_v17, %v11711_v43  ;;  %v11968_v30 = vadd.f32 %v11870_v17, %v11715_v35 }
 0x928   :  { %v11972_v16 = vadd.f32 %v11870_v17, %v11719_v28  ;;  %v11976_v7 = vadd.f32 %v11870_v17, %v11723_v9  ;;  %v11980_v32 = vadd.f32 %v11870_v17, %v11727_v46  ;;  %v11984_v43 = vadd.f32 %v11870_v17, %v11731_v51 }
 0x929   :  { %v11988_v35 = vadd.f32 %v11870_v17, %v11735_v14  ;;  %v11992_v28 = vadd.f32 %v11870_v17, %v11739_v20  ;;  %v11996_v9 = vadd.f32 %v11870_v17, %v11743_v22  ;;  %v12000_v46 = vadd.f32 %v11870_v17, %v11747_v18 }
 0x92a   :  { %v12004_v51 = vadd.f32 %v11870_v17, %v11751_v57  ;;  %v12008_v14 = vadd.f32 %v11870_v17, %v11755_v24  ;;  %v12012_v20 = vadd.f32 %v11870_v17, %v11759_v52  ;;  %v12016_v22 = vadd.f32 %v11870_v17, %v11763_v62 }
 0x92b   :  { %v12020_v18 = vadd.f32 %v11870_v17, %v11767_v56  ;;  %v12024_v57 = vadd.f32 %v11870_v17, %v11771_v39  ;;  %v12028_v24 = vadd.f32 %v11870_v17, %v11775_v10  ;;  %v12032_v52 = vadd.f32 %v11870_v17, %v11779_v2 }
 0x92c   :  { %v12036_v62 = vadd.f32 %v11870_v17, %v11783_v0  ;;  %v12040_v56 = vadd.f32 %v11870_v17, %v11787_v50  ;;  %v12044_v39 = vadd.f32 %v11870_v17, %v11791_v34  ;;  %v12048_v10 = vadd.f32 %v11870_v17, %v11795_v63 }
 0x92d   :  { %v12052_v2 = vadd.f32 %v11870_v17, %v11799_v44  ;;  %v12056_v0 = vadd.f32 %v11870_v17, %v11803_v11  ;;  %v12060_v50 = vadd.f32 %v11870_v17, %v11807_v45  ;;  %v12064_v34 = vadd.f32 %v11870_v17, %v11811_v59 }
 0x92e   :  { %15071 = vst [vmem:[#allocation31_spill] sm:$0xff] %v12048_v10  ;;  %v12068_v63 = vadd.f32 %v11870_v17, %v11815_v5  ;;  %v12072_v44 = vadd.f32 %v11870_v17, %v11819_v27  ;;  %v12076_v11 = vadd.f32 %v11870_v17, %v11823_v54  ;;  %v12080_v45 = vadd.f32 %v11870_v17, %v15075_v21 }
 0x92f   :  { %v12084_v59 = vadd.f32 %v11870_v17, %v15077_v19  ;;  %v12088_v5 = vadd.f32 %v11870_v17, %v15079_v13  ;;  %vm6252_vm1 = vcmp.gt.f32.partialorder %v11884_v12, 0.0  ;;  %vm6253_vm2 = vcmp.gt.f32.partialorder %v11888_v31, 0.0 }
 0x930   :  { %15072 = vst [vmem:[#allocation51_spill] sm:$0xff] %v12068_v63  ;;  %15073 = vst [vmem:[#allocation52_spill] sm:$0xff] %v12072_v44  ;;  %v15080_v63 = vld [vmem:[#allocation122_spill] sm:$0xff]  ;;  %vm6254_vm3 = vcmp.gt.f32.partialorder %v11892_v36, 0.0  ;;  %vm6255_vm4 = vcmp.gt.f32.partialorder %v11896_v48, 0.0  ;;  %vm6256_vm5 = vcmp.gt.f32.partialorder %v11900_v8, 0.0 }
 0x931   :  { %15074 = vst [vmem:[#allocation29_spill] sm:$0xff] %v12076_v11  ;;  %15076 = vst [vmem:[#allocation48_spill] sm:$0xff] %v12080_v45  ;;  %v12092_v27 = vadd.f32 %v11870_v17, %v15080_v63  ;;  %v15082_v44 = vld [vmem:[#allocation82_spill] sm:$0xff]  ;;  %v15084_v11 = vld [vmem:[#allocation123_spill] sm:$0xff]  ;;  %v12112_v63 = vadd.f32 %v11870_v17, %v11863_v40  ;;  %v12133_v40 = vadd.f32 %v11870_v17, %v11867_v61  ;;  %vm6257_vm6 = vcmp.gt.f32.partialorder %v11904_v53, 0.0 }
 0x932   :  { %15078 = vst [vmem:[#allocation42_spill] sm:$0xff] %v12084_v59  ;;  %v12096_v54 = vadd.f32 %v11870_v17, %v15082_v44  ;;  %v12100_v21 = vadd.f32 %v11870_v17, %v15084_v11  ;;  %v15086_v45 = vld [vmem:[#allocation79_spill] sm:$0xff]  ;;  %v12118_v44 = vadd.f32 %v11870_v17, %v6177_v25  ;;  %v12121_v11 = vadd.f32 %v11870_v17, %v6178_v42 }
 0x933   :  { %15081 = vst [vmem:[#allocation41_spill] sm:$0xff] %v12092_v27  ;;  %v12104_v19 = vadd.f32 %v11870_v17, %v15086_v45  ;;  %v15088_v59 = vld [vmem:[#allocation47_spill] sm:$0xff]  ;;  %15090 = vst [vmem:[#allocation39_spill] sm:$0xff] %v12112_v63  ;;  %v12115_v27 = vadd.f32 %v11870_v17, %v6176_v37  ;;  %vm6258_vm7 = vcmp.gt.f32.partialorder %v11908_v41, 0.0  ;;  %vm6259_vm8 = vcmp.gt.f32.partialorder %v11912_v47, 0.0 }
 0x934   :  { %15083 = vst [vmem:[#allocation49_spill] sm:$0xff] %v12096_v54  ;;  %15085 = vst [vmem:[#allocation40_spill] sm:$0xff] %v12100_v21  ;;  %v12108_v13 = vadd.f32 %v11870_v17, %v15088_v59  ;;  %v15094_v21 = vld [vmem:[#allocation124_spill] sm:$0xff]  ;;  %v12129_v59 = vadd.f32 %v11870_v17, %v11880_v6  ;;  %vm6260_vm9 = vcmp.gt.f32.partialorder %v11916_v49, 0.0  ;;  %vm6261_vm10 = vcmp.gt.f32.partialorder %v11920_v23, 0.0 }
 0x935   :  { %15087 = vst [vmem:[#allocation25_spill] sm:$0xff] %v12104_v19  ;;  %15091 = vst [vmem:[#allocation58_spill] sm:$0xff] %v12115_v27  ;;  %v12125_v45 = vadd.f32 %v11870_v17, %v15094_v21  ;;  %v6316_v17 = vmul.f32 0.2, %v11884_v12  ;;  %v6317_v37 = vmul.f32 0.2, %v11888_v31 }
 0x936   :  { %15089 = vst [vmem:[#allocation30_spill] sm:$0xff] %v12108_v13  ;;  %15092 = vst [vmem:[#allocation50_spill] sm:$0xff] %v12118_v44  ;;  %v6318_v25 = vmul.f32 0.2, %v11892_v36  ;;  %vm6262_vm11 = vcmp.gt.f32.partialorder %v11924_v33, 0.0  ;;  %vm6263_vm12 = vcmp.gt.f32.partialorder %v11928_v26, 0.0 }
 0x937   :  { %15093 = vst [vmem:[#allocation53_spill] sm:$0xff] %v12121_v11  ;;  %15095 = vst [vmem:[#allocation54_spill] sm:$0xff] %v12125_v45  ;;  %v6319_v61 = vmul.f32 0.2, %v11896_v48  ;;  %v6320_v42 = vmul.f32 0.2, %v11900_v8  ;;  %v12159_v45 = vsel %vm6252_vm1, %v11884_v12, %v6316_v17  ;;  %v12172_v63 = vsel %vm6253_vm2, %v11888_v31, %v6317_v37 }
 0x938   :  { %15096 = vst [vmem:[#allocation55_spill] sm:$0xff] %v12129_v59  ;;  %15097 = vst [vmem:[#allocation59_spill] sm:$0xff] %v12133_v40  ;;  %v6321_v6 = vmul.f32 0.2, %v11904_v53  ;;  %v6322_v21 = vmul.f32 0.2, %v11908_v41  ;;  %v12188_v19 = vsel %vm6254_vm3, %v11892_v36, %v6318_v25 }
 0x939   :  { %v6323_v40 = vmul.f32 0.2, %v11912_v47  ;;  %v6324_v59 = vmul.f32 0.2, %v11916_v49  ;;  %15098 = vst [vmem:[#allocation63_spill] sm:$0xff] %v12159_v45  ;;  %vm6264_vm13 = vcmp.gt.f32.partialorder %v11932_v1, 0.0  ;;  %v12204_v54 = vsel %vm6255_vm4, %v11896_v48, %v6319_v61 }
 0x93a   :  { %v6325_v11 = vmul.f32 0.2, %v11920_v23  ;;  %v12164_v44 = vmul.f32 0.2, %v11924_v33  ;;  %v12167_v27 = vmul.f32 0.2, %v11928_v26 }
 0x93b   :  { %15099 = vst [vmem:[#allocation64_spill] sm:$0xff] %v12172_v63  ;;  %6444 = vst [vmem:[#allocation7 + $0x28] sm:$0xff] %v12159_v45  ;;  %vm6265_vm14 = vcmp.gt.f32.partialorder %v11936_v58, 0.0  ;;  %v12177_v12 = vmul.f32 0.2, %v11932_v1  ;;  %vm6266_vm15 = vcmp.gt.f32.partialorder %v11940_v55, 0.0 }
 0x93c   :  { %v12180_v17 = vmul.f32 0.2, %v11936_v58  ;;  %v12183_v13 = vmul.f32 0.2, %v11940_v55  ;;  %15100 = vst [vmem:[#allocation56_spill] sm:$0xff] %v12188_v19  ;;  %6445 = vst [vmem:[#allocation7 + $0x30] sm:$0xff] %v12172_v63 }
 0x93d   :  { %v12193_v31 = vmul.f32 0.2, %v11944_v38  ;;  %v12196_v37 = vmul.f32 0.2, %v11948_v3  ;;  %v12199_v45 = vmul.f32 0.2, %v11952_v60 }
 0x93e   :  { %15102 = vst [vmem:[#allocation65_spill] sm:$0xff] %v12204_v54  ;;  %6446 = vst [vmem:[#allocation7 + $0x48] sm:$0xff] %v12188_v19  ;;  %vm6267_vm0 = vcmp.gt.f32.partialorder %v11944_v38, 0.0  ;;  %v12209_v36 = vmul.f32 0.2, %v11956_v29  ;;  %vm6268_vm1 = vcmp.gt.f32.partialorder %v11948_v3, 0.0 }
 0x93f   :  { %15101 = vst [vmem:[#allocation60_spill] sm:$0xff] %v12199_v45  ;;  %v12212_v25 = vmul.f32 0.2, %v11960_v15  ;;  %v12215_v63 = vmul.f32 0.2, %v11964_v4  ;;  %v12220_v45 = vsel %vm6256_vm5, %v11900_v8, %v6320_v42  ;;  %6447 = vst [vmem:[#allocation7 + $0x50] sm:$0xff] %v12204_v54 }
 0x940   :  { %15104 = vst [vmem:[#allocation62_spill] sm:$0xff] %v12220_v45  ;;  %v12225_v48 = vmul.f32 0.2, %v11968_v30  ;;  %v12228_v61 = vmul.f32 0.2, %v11972_v16  ;;  %6448 = vst [vmem:[#allocation7 + $0x68] sm:$0xff] %v12220_v45 }
 0x941   :  { %15103 = vst [vmem:[#allocation69_spill] sm:$0xff] %v12215_v63  ;;  %v12231_v19 = vmul.f32 0.2, %v11976_v7  ;;  %v12236_v63 = vsel %vm6257_vm6, %v11904_v53, %v6321_v6  ;;  %vm6269_vm2 = vcmp.gt.f32.partialorder %v11952_v60, 0.0  ;;  %v12241_v8 = vmul.f32 0.2, %v11980_v32 }
 0x942   :  { %15106 = vst [vmem:[#allocation71_spill] sm:$0xff] %v12236_v63  ;;  %v12244_v42 = vmul.f32 0.2, %v11984_v43  ;;  %v12247_v54 = vmul.f32 0.2, %v11988_v35  ;;  %6449 = vst [vmem:[#allocation7 + $0x70] sm:$0xff] %v12236_v63 }
 0x943   :  { %15105 = vst [vmem:[#allocation66_spill] sm:$0xff] %v12231_v19  ;;  %v12252_v19 = vsel %vm6258_vm7, %v11908_v41, %v6322_v21  ;;  %vm6270_vm3 = vcmp.gt.f32.partialorder %v11956_v29, 0.0  ;;  %v12257_v53 = vmul.f32 0.2, %v11992_v28  ;;  %v12260_v6 = vmul.f32 0.2, %v11996_v9 }
 0x944   :  { %15107 = vst [vmem:[#allocation75_spill] sm:$0xff] %v12247_v54  ;;  %15108 = vst [vmem:[#allocation68_spill] sm:$0xff] %v12252_v19  ;;  %v12263_v45 = vmul.f32 0.2, %v12000_v46  ;;  %v12268_v54 = vsel %vm6259_vm8, %v11912_v47, %v6323_v40  ;;  %vm6271_vm4 = vcmp.gt.f32.partialorder %v11960_v15, 0.0  ;;  %v12286_v47 = vsel %vm6260_vm9, %v11916_v49, %v6324_v59 }
 0x945   :  { %15109 = vst [vmem:[#allocation72_spill] sm:$0xff] %v12268_v54  ;;  %6450 = vst [vmem:[#allocation7 + $0x88] sm:$0xff] %v12252_v19  ;;  %v12275_v41 = vmul.f32 0.2, %v12004_v51  ;;  %v12278_v21 = vmul.f32 0.2, %v12008_v14  ;;  %v12305_v49 = vsel %vm6261_vm10, %v11920_v23, %v6325_v11  ;;  %v12325_v23 = vsel %vm6262_vm11, %v11924_v33, %v12164_v44 }
 0x946   :  { %v12281_v63 = vmul.f32 0.2, %v12012_v20  ;;  %15111 = vst [vmem:[#allocation74_spill] sm:$0xff] %v12286_v47  ;;  %6451 = vst [vmem:[#allocation7 + $0x90] sm:$0xff] %v12268_v54  ;;  %vm6274_vm7 = vcmp.gt.f32.partialorder %v11972_v16, 0.0  ;;  %vm6278_vm9 = vcmp.gt.f32.partialorder %v11988_v35, 0.0  ;;  %v12345_v33 = vsel %vm6263_vm12, %v11928_v26, %v12167_v27 }
 0x947   :  { %v12294_v40 = vmul.f32 0.2, %v12016_v22  ;;  %v12297_v19 = vmul.f32 0.2, %v12020_v18  ;;  %15113 = vst [vmem:[#allocation45_spill] sm:$0xff] %v12305_v49  ;;  %6452 = vst [vmem:[#allocation7 + $0xa8] sm:$0xff] %v12286_v47  ;;  %v12365_v26 = vsel %vm6264_vm13, %v11932_v1, %v12177_v12  ;;  %v12385_v1 = vsel %vm6265_vm14, %v11936_v58, %v12180_v17 }
 0x948   :  { %15110 = vst [vmem:[#allocation77_spill] sm:$0xff] %v12281_v63  ;;  %v12300_v63 = vmul.f32 0.2, %v12024_v57  ;;  %v12313_v59 = vmul.f32 0.2, %v12028_v24  ;;  %15115 = vst [vmem:[#allocation78_spill] sm:$0xff] %v12325_v23  ;;  %v12405_v58 = vsel %vm6266_vm15, %v11940_v55, %v12183_v13  ;;  %v12425_v55 = vsel %vm6267_vm0, %v11944_v38, %v12193_v31 }
 0x949   :  { %v12316_v54 = vmul.f32 0.2, %v12032_v52  ;;  %6453 = vst [vmem:[#allocation7 + $0xb0] sm:$0xff] %v12305_v49  ;;  %vm6282_vm10 = vcmp.gt.f32.partialorder %v12004_v51, 0.0  ;;  %v12333_v11 = vmul.f32 0.2, %v12040_v56  ;;  %v12445_v38 = vsel %vm6268_vm1, %v11948_v3, %v12196_v37 }
 0x94a   :  { %15112 = vst [vmem:[#allocation81_spill] sm:$0xff] %v12300_v63  ;;  %v12319_v63 = vmul.f32 0.2, %v12036_v62  ;;  %v12336_v47 = vmul.f32 0.2, %v12044_v39  ;;  %15117 = vst [vmem:[#allocation87_spill] sm:$0xff] %v12345_v33 }
 0x94b   :  { %6454 = vst [vmem:[#allocation7 + $0xc8] sm:$0xff] %v12325_v23  ;;  %vm6286_vm11 = vcmp.gt.f32.partialorder %v12020_v18, 0.0  ;;  %v12353_v44 = vmul.f32 0.2, %v12052_v2  ;;  %v12356_v49 = vmul.f32 0.2, %v12056_v0 }
 0x94c   :  { %15114 = vst [vmem:[#allocation28_spill] sm:$0xff] %v12319_v63  ;;  %v12339_v63 = vmul.f32 0.2, %v12048_v10  ;;  %15121 = vst [vmem:[#allocation36_spill] sm:$0xff] %v12365_v26  ;;  %vm6290_vm12 = vcmp.gt.f32.partialorder %v12036_v62, 0.0  ;;  %v15123_v23 = vld [vmem:[#allocation51_spill] sm:$0xff] }
 0x94d   :  { %15118 = vst [vmem:[#allocation80_spill] sm:$0xff] %v12353_v44  ;;  %15119 = vst [vmem:[#allocation88_spill] sm:$0xff] %v12356_v49  ;;  %v12373_v27 = vmul.f32 0.2, %v12064_v34  ;;  %v15125_v49 = vld [vmem:[#allocation52_spill] sm:$0xff]  ;;  %vm6294_vm13 = vcmp.gt.f32.partialorder %v12052_v2, 0.0 }
 0x94e   :  { %15116 = vst [vmem:[#allocation44_spill] sm:$0xff] %v12339_v63  ;;  %v12359_v63 = vmul.f32 0.2, %v12060_v50  ;;  %6455 = vst [vmem:[#allocation7 + $0xd0] sm:$0xff] %v12345_v33  ;;  %v12379_v44 = vmul.f32 0.2, %v15125_v49 }
 0x94f   :  { %15122 = vst [vmem:[#allocation85_spill] sm:$0xff] %v12373_v27  ;;  %15127 = vst [vmem:[#allocation33_spill] sm:$0xff] %v12385_v1  ;;  %v15128_v12 = vld [vmem:[#allocation29_spill] sm:$0xff]  ;;  %v15132_v27 = vld [vmem:[#allocation42_spill] sm:$0xff]  ;;  %vm6298_vm14 = vcmp.gt.f32.partialorder %v15123_v23, 0.0 }
 0x950   :  { %15120 = vst [vmem:[#allocation35_spill] sm:$0xff] %v12359_v63  ;;  %v12376_v63 = vmul.f32 0.2, %v15123_v23  ;;  %15126 = vst [vmem:[#allocation34_spill] sm:$0xff] %v12379_v44  ;;  %v12393_v33 = vmul.f32 0.2, %v15128_v12 }
 0x951   :  { %6456 = vst [vmem:[#allocation7 + $0xe8] sm:$0xff] %v12365_v26  ;;  %v15130_v44 = vld [vmem:[#allocation48_spill] sm:$0xff]  ;;  %v12399_v10 = vmul.f32 0.2, %v15132_v27  ;;  %15134 = vst [vmem:[#allocation92_spill] sm:$0xff] %v12405_v58  ;;  %v15136_v26 = vld [vmem:[#allocation41_spill] sm:$0xff] }
 0x952   :  { %15124 = vst [vmem:[#allocation57_spill] sm:$0xff] %v12376_v63  ;;  %15129 = vst [vmem:[#allocation93_spill] sm:$0xff] %v12393_v33  ;;  %v12396_v63 = vmul.f32 0.2, %v15130_v44  ;;  %v12413_v17 = vmul.f32 0.2, %v12088_v5 }
 0x953   :  { %15133 = vst [vmem:[#allocation37_spill] sm:$0xff] %v12399_v10  ;;  %6457 = vst [vmem:[#allocation7 + $0xf0] sm:$0xff] %v12385_v1  ;;  %v12416_v10 = vmul.f32 0.2, %v15136_v26  ;;  %vm6302_vm15 = vcmp.gt.f32.partialorder %v15132_v27, 0.0  ;;  %v15141_v13 = vld [vmem:[#allocation40_spill] sm:$0xff] }
 0x954   :  { %15131 = vst [vmem:[#allocation38_spill] sm:$0xff] %v12396_v63  ;;  %15135 = vst [vmem:[#allocation83_spill] sm:$0xff] %v12413_v17  ;;  %v15138_v63 = vld [vmem:[#allocation49_spill] sm:$0xff]  ;;  %v12433_v1 = vmul.f32 0.2, %v15141_v13  ;;  %v15145_v17 = vld [vmem:[#allocation30_spill] sm:$0xff] }
 0x955   :  { %15137 = vst [vmem:[#allocation84_spill] sm:$0xff] %v12416_v10  ;;  %v12419_v33 = vmul.f32 0.2, %v15138_v63  ;;  %15140 = vst [vmem:[#allocation94_spill] sm:$0xff] %v12425_v55  ;;  %v12439_v44 = vmul.f32 0.2, %v15145_v17 }
 0x956   :  { %6458 = vst [vmem:[#allocation7 + $0x108] sm:$0xff] %v12405_v58  ;;  %15142 = vst [vmem:[#allocation26_spill] sm:$0xff] %v12433_v1  ;;  %vm6306_vm0 = vcmp.gt.f32.partialorder %v15141_v13, 0.0  ;;  %v15148_v31 = vld [vmem:[#allocation39_spill] sm:$0xff]  ;;  %v15152_v1 = vld [vmem:[#allocation50_spill] sm:$0xff] }
 0x957   :  { %15139 = vst [vmem:[#allocation89_spill] sm:$0xff] %v12419_v33  ;;  %v15143_v33 = vld [vmem:[#allocation25_spill] sm:$0xff]  ;;  %15146 = vst [vmem:[#allocation43_spill] sm:$0xff] %v12439_v44  ;;  %v12453_v58 = vmul.f32 0.2, %v15148_v31  ;;  %v15150_v44 = vld [vmem:[#allocation58_spill] sm:$0xff] }
 0x958   :  { %v12436_v10 = vmul.f32 0.2, %v15143_v33  ;;  %15147 = vst [vmem:[#allocation90_spill] sm:$0xff] %v12445_v38  ;;  %6459 = vst [vmem:[#allocation7 + $0x110] sm:$0xff] %v12425_v55  ;;  %v12459_v63 = vmul.f32 0.2, %v15152_v1 }
 0x959   :  { %15149 = vst [vmem:[#allocation32_spill] sm:$0xff] %v12453_v58  ;;  %v15154_v3 = vld [vmem:[#allocation60_spill] sm:$0xff]  ;;  %6460 = vst [vmem:[#allocation7 + $0x128] sm:$0xff] %v12445_v38  ;;  %vm6310_vm1 = vcmp.gt.f32.partialorder %v15150_v44, 0.0  ;;  %vm6311_vm5 = vcmp.gt.f32.partialorder %v15152_v1, 0.0  ;;  %v15155_v55 = vld [vmem:[#allocation53_spill] sm:$0xff] }
 0x95a   :  { %15144 = vst [vmem:[#allocation95_spill] sm:$0xff] %v12436_v10  ;;  %v12456_v10 = vmul.f32 0.2, %v15150_v44  ;;  %15153 = vst [vmem:[#allocation27_spill] sm:$0xff] %v12459_v63  ;;  %v12465_v37 = vsel %vm6269_vm2, %v11952_v60, %v15154_v3  ;;  %vm6312_vm6 = vcmp.gt.f32.partialorder %v15155_v55, 0.0  ;;  %v15156_v31 = vld [vmem:[#allocation54_spill] sm:$0xff]  ;;  %v12485_v60 = vsel %vm6270_vm3, %v11956_v29, %v12209_v36 }
 0x95b   :  { %v12476_v63 = vmul.f32 0.2, %v15156_v31  ;;  %v15157_v58 = vld [vmem:[#allocation55_spill] sm:$0xff]  ;;  %6461 = vst [vmem:[#allocation7 + $0x130] sm:$0xff] %v12465_v37  ;;  %v15160_v31 = vld [vmem:[#allocation69_spill] sm:$0xff]  ;;  %vm15161_vm3 = vcmp.gt.f32.partialorder %v11964_v4, 0.0 }
 0x95c   :  { %15151 = vst [vmem:[#allocation24_spill] sm:$0xff] %v12456_v10  ;;  %v12473_v10 = vmul.f32 0.2, %v15155_v55  ;;  %v12479_v17 = vmul.f32 0.2, %v15157_v58  ;;  %v15159_v3 = vld [vmem:[#allocation59_spill] sm:$0xff]  ;;  %v12503_v29 = vsel %vm15161_vm3, %v11964_v4, %v15160_v31 }
 0x95d   :  { %vm6315_vm8 = vcmp.gt.f32.partialorder %v15159_v3, 0.0  ;;  %v12491_v38 = vmul.f32 0.2, %v15159_v3  ;;  %vm15162_vm2 = vcmp.gt.f32.partialorder %v11968_v30, 0.0  ;;  %6462 = vst [vmem:[#allocation7 + $0x148] sm:$0xff] %v12485_v60  ;;  %vm15165_vm3 = vcmp.gt.f32.partialorder %v11980_v32, 0.0 }
 0x95e   :  { %15158 = vst [vmem:[#allocation120_spill] sm:$0xff] %v12479_v17  ;;  %v12497_v17 = vsel %vm6271_vm4, %v11960_v15, %v12212_v25  ;;  %v12509_v36 = vsel %vm15162_vm2, %v11968_v30, %v12225_v48  ;;  %v12516_v15 = vsel %vm6274_vm7, %v11972_v16, %v12228_v61  ;;  %v15163_v25 = vld [vmem:[#allocation66_spill] sm:$0xff]  ;;  %vm15164_vm4 = vcmp.gt.f32.partialorder %v11976_v7, 0.0  ;;  %6464 = vst [vmem:[#allocation7 + $0x168] sm:$0xff] %v12503_v29  ;;  %v15167_v16 = vld [vmem:[#allocation75_spill] sm:$0xff] }
 0x95f   :  { %v12522_v4 = vsel %vm15164_vm4, %v11976_v7, %v15163_v25  ;;  %v12528_v30 = vsel %vm15165_vm3, %v11980_v32, %v12241_v8  ;;  %vm15166_vm2 = vcmp.gt.f32.partialorder %v11984_v43, 0.0  ;;  %6463 = vst [vmem:[#allocation7 + $0x150] sm:$0xff] %v12497_v17  ;;  %6465 = vst [vmem:[#allocation7 + $0x170] sm:$0xff] %v12509_v36  ;;  %v12543_v7 = vsel %vm6278_vm9, %v11988_v35, %v15167_v16  ;;  %v15207_v25 = vld [vmem:[#allocation93_spill] sm:$0xff] }
 0x960   :  { %v12534_v48 = vsel %vm15166_vm2, %v11984_v43, %v12244_v42  ;;  %vm15168_vm7 = vcmp.gt.f32.partialorder %v11992_v28, 0.0  ;;  %vm15169_vm4 = vcmp.gt.f32.partialorder %v11996_v9, 0.0  ;;  %vm15170_vm3 = vcmp.gt.f32.partialorder %v12000_v46, 0.0  ;;  %6466 = vst [vmem:[#allocation7 + $0x188] sm:$0xff] %v12516_v15  ;;  %6467 = vst [vmem:[#allocation7 + $0x190] sm:$0xff] %v12522_v4 }
 0x961   :  { %v12549_v32 = vsel %vm15168_vm7, %v11992_v28, %v12257_v53  ;;  %v12555_v43 = vsel %vm15169_vm4, %v11996_v9, %v12260_v6  ;;  %v12561_v61 = vsel %vm15170_vm3, %v12000_v46, %v12263_v45  ;;  %6468 = vst [vmem:[#allocation7 + $0x1a8] sm:$0xff] %v12528_v30  ;;  %6469 = vst [vmem:[#allocation7 + $0x1b0] sm:$0xff] %v12534_v48  ;;  %vm15172_vm9 = vcmp.gt.f32.partialorder %v12008_v14, 0.0  ;;  %v15174_v9 = vld [vmem:[#allocation77_spill] sm:$0xff]  ;;  %v15196_v6 = vld [vmem:[#allocation35_spill] sm:$0xff] }
 0x962   :  { %v12571_v35 = vsel %vm6282_vm10, %v12004_v51, %v12275_v41  ;;  %v12577_v28 = vsel %vm15172_vm9, %v12008_v14, %v12278_v21  ;;  %vm15175_vm2 = vcmp.gt.f32.partialorder %v12012_v20, 0.0  ;;  %vm15176_vm7 = vcmp.gt.f32.partialorder %v12016_v22, 0.0  ;;  %6470 = vst [vmem:[#allocation7 + $0x1c8] sm:$0xff] %v12543_v7  ;;  %6471 = vst [vmem:[#allocation7 + $0x1d0] sm:$0xff] %v12549_v32  ;;  %v15177_v14 = vld [vmem:[#allocation81_spill] sm:$0xff] }
 0x963   :  { %15171 = vst [vmem:[#allocation46_spill] sm:$0xff] %v12571_v35  ;;  %15173 = vst [vmem:[#allocation86_spill] sm:$0xff] %v12577_v28  ;;  %v12583_v46 = vsel %vm15175_vm2, %v12012_v20, %v15174_v9  ;;  %v12589_v45 = vsel %vm15176_vm7, %v12016_v22, %v12294_v40  ;;  %v12599_v51 = vsel %vm6286_vm11, %v12020_v18, %v12297_v19  ;;  %vm15178_vm10 = vcmp.gt.f32.partialorder %v12024_v57, 0.0  ;;  %v15181_v18 = vld [vmem:[#allocation28_spill] sm:$0xff]  ;;  %v15188_v19 = vld [vmem:[#allocation31_spill] sm:$0xff] }
 0x964   :  { %6472 = vst [vmem:[#allocation7 + $0x1e8] sm:$0xff] %v12555_v43  ;;  %6473 = vst [vmem:[#allocation7 + $0x1f0] sm:$0xff] %v12561_v61  ;;  %v12605_v20 = vsel %vm15178_vm10, %v12024_v57, %v15177_v14  ;;  %vm15179_vm4 = vcmp.gt.f32.partialorder %v12028_v24, 0.0  ;;  %vm15180_vm3 = vcmp.gt.f32.partialorder %v12032_v52, 0.0  ;;  %v12627_v57 = vsel %vm6290_vm12, %v12036_v62, %v15181_v18  ;;  %v15191_v62 = vld [vmem:[#allocation80_spill] sm:$0xff]  ;;  %v15199_v21 = vld [vmem:[#allocation85_spill] sm:$0xff] }
 0x965   :  { %v12611_v22 = vsel %vm15179_vm4, %v12028_v24, %v12313_v59  ;;  %v12617_v8 = vsel %vm15180_vm3, %v12032_v52, %v12316_v54  ;;  %6474 = vst [vmem:[#allocation7 + $0x208] sm:$0xff] %v12571_v35  ;;  %6475 = vst [vmem:[#allocation7 + $0x210] sm:$0xff] %v12577_v28  ;;  %vm15183_vm11 = vcmp.gt.f32.partialorder %v12040_v56, 0.0  ;;  %vm15185_vm9 = vcmp.gt.f32.partialorder %v12044_v39, 0.0  ;;  %v15187_v54 = vld [vmem:[#allocation44_spill] sm:$0xff]  ;;  %v15202_v59 = vld [vmem:[#allocation57_spill] sm:$0xff] }
 0x966   :  { %6476 = vst [vmem:[#allocation7 + $0x268] sm:$0xff] %v12583_v46  ;;  %6477 = vst [vmem:[#allocation7 + $0x270] sm:$0xff] %v12589_v45  ;;  %v12633_v24 = vsel %vm15183_vm11, %v12040_v56, %v12333_v11  ;;  %v12639_v52 = vsel %vm15185_vm9, %v12044_v39, %v12336_v47  ;;  %vm15189_vm2 = vcmp.gt.f32.partialorder %v15188_v19, 0.0  ;;  %v12655_v56 = vsel %vm6294_vm13, %v12052_v2, %v15191_v62  ;;  %v15193_v39 = vld [vmem:[#allocation88_spill] sm:$0xff]  ;;  %v12679_v2 = vld [vmem:[#allocation7 + $0x27] sm:$0xff] }
 0x967   :  { %15182 = vst [vmem:[#allocation61_spill] sm:$0xff] %v12627_v57  ;;  %15184 = vst [vmem:[#allocation70_spill] sm:$0xff] %v12633_v24  ;;  %v12645_v42 = vsel %vm15189_vm2, %v15188_v19, %v15187_v54  ;;  %vm15194_vm12 = vcmp.gt.f32.partialorder %v12056_v0, 0.0  ;;  %vm15197_vm7 = vcmp.gt.f32.partialorder %v12060_v50, 0.0  ;;  %vm15200_vm10 = vcmp.gt.f32.partialorder %v12064_v34, 0.0  ;;  %v12685_v40 = vld [vmem:[#allocation7 + $0x4f] sm:$0xff] }
 0x968   :  { %15186 = vst [vmem:[#allocation91_spill] sm:$0xff] %v12639_v52  ;;  %15190 = vst [vmem:[#allocation67_spill] sm:$0xff] %v12645_v42  ;;  %v12661_v53 = vsel %vm15194_vm12, %v12056_v0, %v15193_v39  ;;  %v12667_v41 = vsel %vm15197_vm7, %v12060_v50, %v15196_v6  ;;  %v12673_v47 = vsel %vm15200_vm10, %v12064_v34, %v15199_v21  ;;  %v12681_v0 = vld [vmem:[#allocation7 + $0x2f] sm:$0xff]  ;;  %v12683_v50 = vld [vmem:[#allocation7 + $0x47] sm:$0xff]  ;;  %vm15205_vm13 = vcmp.gt.f32.partialorder %v15125_v49, 0.0 }
 0x969   :  { %6478 = vst [vmem:[#allocation7 + $0x288] sm:$0xff] %v12599_v51  ;;  %6479 = vst [vmem:[#allocation7 + $0x290] sm:$0xff] %v12605_v20  ;;  %v12691_v34 = vsel %vm6298_vm14, %v15123_v23, %v15202_v59  ;;  %v15204_v11 = vld [vmem:[#allocation34_spill] sm:$0xff]  ;;  %vm15208_vm4 = vcmp.gt.f32.partialorder %v15128_v12, 0.0  ;;  %v15211_v14 = vld [vmem:[#allocation48_spill] sm:$0xff]  ;;  %vm15216_vm14 = vcmp.gt.f32.partialorder %v12088_v5, 0.0 }
 0x96a   :  { %6480 = vst [vmem:[#allocation7 + $0x2a8] sm:$0xff] %v12611_v22  ;;  %6481 = vst [vmem:[#allocation7 + $0x2b0] sm:$0xff] %v12617_v8  ;;  %v12697_v31 = vsel %vm15205_vm13, %v15125_v49, %v15204_v11  ;;  %v12703_v16 = vsel %vm15208_vm4, %v15128_v12, %v15207_v25  ;;  %v15210_v9 = vld [vmem:[#allocation38_spill] sm:$0xff]  ;;  %vm15212_vm3 = vcmp.gt.f32.partialorder %v15211_v14, 0.0  ;;  %v12717_v23 = vld [vmem:[#allocation7 + $0x6f] sm:$0xff]  ;;  %vm15219_vm11 = vcmp.gt.f32.partialorder %v15136_v26, 0.0 }
 0x96b   :  { %15192 = vst [vmem:[#allocation76_spill] sm:$0xff] %v12655_v56  ;;  %15195 = vst [vmem:[#allocation121_spill] sm:$0xff] %v12661_v53  ;;  %v12709_v18 = vsel %vm15212_vm3, %v15211_v14, %v15210_v9  ;;  %v12715_v49 = vld [vmem:[#allocation7 + $0x67] sm:$0xff]  ;;  %v6517_v54 = vld [vmem:[#allocation7 + $0x8f] sm:$0xff] }
 0x96c   :  { %15198 = vst [vmem:[#allocation73_spill] sm:$0xff] %v12667_v41  ;;  %15201 = vst [vmem:[#allocation122_spill] sm:$0xff] %v12673_v47  ;;  %v12719_v12 = vld [vmem:[#allocation7 + $0x87] sm:$0xff]  ;;  %v6519_v62 = vld [vmem:[#allocation7 + $0xaf] sm:$0xff] }
 0x96d   :  { %6482 = vst [vmem:[#allocation7 + $0x2c8] sm:$0xff] %v12627_v57  ;;  %6483 = vst [vmem:[#allocation7 + $0x2d0] sm:$0xff] %v12633_v24  ;;  %v6518_v19 = vld [vmem:[#allocation7 + $0xa7] sm:$0xff]  ;;  %v6521_v6 = vld [vmem:[#allocation7 + $0xcf] sm:$0xff] }
 0x96e   :  { %6484 = vst [vmem:[#allocation7 + $0x2e8] sm:$0xff] %v12639_v52  ;;  %6485 = vst [vmem:[#allocation7 + $0x2f0] sm:$0xff] %v12645_v42  ;;  %v6520_v39 = vld [vmem:[#allocation7 + $0xc7] sm:$0xff]  ;;  %v15214_v21 = vld [vmem:[#allocation37_spill] sm:$0xff] }
 0x96f   :  { %15203 = vst [vmem:[#allocation82_spill] sm:$0xff] %v12691_v34  ;;  %15206 = vst [vmem:[#allocation123_spill] sm:$0xff] %v12697_v31  ;;  %v12725_v59 = vsel %vm6302_vm15, %v15132_v27, %v15214_v21  ;;  %v15215_v11 = vld [vmem:[#allocation83_spill] sm:$0xff]  ;;  %v15218_v9 = vld [vmem:[#allocation84_spill] sm:$0xff]  ;;  %vm15227_vm15 = vcmp.gt.f32.partialorder %v15143_v33, 0.0 }
 0x970   :  { %15209 = vst [vmem:[#allocation79_spill] sm:$0xff] %v12703_v16  ;;  %15213 = vst [vmem:[#allocation47_spill] sm:$0xff] %v12709_v18  ;;  %v12731_v25 = vsel %vm15216_vm14, %v12088_v5, %v15215_v11  ;;  %v12737_v14 = vsel %vm15219_vm11, %v15136_v26, %v15218_v9  ;;  %v15221_v28 = vld [vmem:[#allocation89_spill] sm:$0xff]  ;;  %v6522_v5 = vld [vmem:[#allocation7 + $0xe7] sm:$0xff] }
 0x971   :  { %6486 = vst [vmem:[#allocation7 + $0x308] sm:$0xff] %v12655_v56  ;;  %6487 = vst [vmem:[#allocation7 + $0x310] sm:$0xff] %v12661_v53  ;;  %v15222_v35 = vld [vmem:[#allocation49_spill] sm:$0xff]  ;;  %v6523_v27 = vld [vmem:[#allocation7 + $0xef] sm:$0xff] }
 0x972   :  { %6488 = vst [vmem:[#allocation7 + $0x328] sm:$0xff] %v12667_v41  ;;  %6489 = vst [vmem:[#allocation7 + $0x330] sm:$0xff] %v12673_v47  ;;  %vm15223_vm9 = vcmp.gt.f32.partialorder %v15222_v35, 0.0  ;;  %v6524_v21 = vld [vmem:[#allocation7 + $0x107] sm:$0xff]  ;;  %v6525_v11 = vld [vmem:[#allocation7 + $0x10f] sm:$0xff] }
 0x973   :  { %15217 = vst [vmem:[#allocation124_spill] sm:$0xff] %v12731_v25  ;;  %15220 = vst [vmem:[#allocation51_spill] sm:$0xff] %v12737_v14  ;;  %v12743_v47 = vsel %vm15223_vm9, %v15222_v35, %v15221_v28  ;;  %v6526_v26 = vld [vmem:[#allocation7 + $0x127] sm:$0xff]  ;;  %v6527_v9 = vld [vmem:[#allocation7 + $0x12f] sm:$0xff] }
 0x974   :  { %15224 = vst [vmem:[#allocation52_spill] sm:$0xff] %v12743_v47  ;;  %6490 = vst [vmem:[#allocation7 + $0x348] sm:$0xff] %v12691_v34  ;;  %v6528_v41 = vld [vmem:[#allocation7 + $0x147] sm:$0xff]  ;;  %v6529_v53 = vld [vmem:[#allocation7 + $0x14f] sm:$0xff] }
 0x975   :  { %6491 = vst [vmem:[#allocation7 + $0x350] sm:$0xff] %v12697_v31  ;;  %6492 = vst [vmem:[#allocation7 + $0x368] sm:$0xff] %v12703_v16  ;;  %v15225_v56 = vld [vmem:[#allocation26_spill] sm:$0xff]  ;;  %v15226_v28 = vld [vmem:[#allocation95_spill] sm:$0xff] }
 0x976   :  { %6493 = vst [vmem:[#allocation7 + $0x370] sm:$0xff] %v12709_v18  ;;  %v12753_v35 = vsel %vm6306_vm0, %v15141_v13, %v15225_v56  ;;  %v12759_v16 = vsel %vm15227_vm15, %v15143_v33, %v15226_v28  ;;  %v15228_v18 = vld [vmem:[#allocation43_spill] sm:$0xff]  ;;  %v15229_v31 = vld [vmem:[#allocation30_spill] sm:$0xff]  ;;  %v15231_v42 = vld [vmem:[#allocation32_spill] sm:$0xff] }
 0x977   :  { %vm15230_vm2 = vcmp.gt.f32.partialorder %v15229_v31, 0.0  ;;  %v15232_v52 = vld [vmem:[#allocation39_spill] sm:$0xff]  ;;  %6494 = vst [vmem:[#allocation7 + $0x388] sm:$0xff] %v12725_v59  ;;  %6495 = vst [vmem:[#allocation7 + $0x390] sm:$0xff] %v12731_v25 }
 0x978   :  { %v12765_v34 = vsel %vm15230_vm2, %v15229_v31, %v15228_v18  ;;  %vm15233_vm12 = vcmp.gt.f32.partialorder %v15232_v52, 0.0  ;;  %6496 = vst [vmem:[#allocation7 + $0x3a8] sm:$0xff] %v12737_v14  ;;  %6497 = vst [vmem:[#allocation7 + $0x3b0] sm:$0xff] %v12743_v47  ;;  %v6530_v33 = vld [vmem:[#allocation7 + $0x167] sm:$0xff]  ;;  %v6531_v13 = vld [vmem:[#allocation7 + $0x16f] sm:$0xff]  ;;  %v12793_v47 = vsel %vm6312_vm6, %v15155_v55, %v12473_v10 }
 0x979   :  { %v12771_v24 = vsel %vm15233_vm12, %v15232_v52, %v15231_v42  ;;  %v6532_v56 = vld [vmem:[#allocation7 + $0x187] sm:$0xff]  ;;  %v6533_v28 = vld [vmem:[#allocation7 + $0x18f] sm:$0xff]  ;;  %15239 = vst [vmem:[#allocation40_spill] sm:$0xff] %v12793_v47  ;;  %6498 = vst [vmem:[#allocation7 + $0x3c8] sm:$0xff] %v12753_v35 }
 0x97a   :  { %15234 = vst [vmem:[#allocation29_spill] sm:$0xff] %v12771_v24  ;;  %v6534_v31 = vld [vmem:[#allocation7 + $0x1a7] sm:$0xff]  ;;  %v15235_v18 = vld [vmem:[#allocation24_spill] sm:$0xff]  ;;  %6499 = vst [vmem:[#allocation7 + $0x3d0] sm:$0xff] %v12759_v16 }
 0x97b   :  { %v12781_v57 = vsel %vm6310_vm1, %v15150_v44, %v15235_v18  ;;  %v15237_v52 = vld [vmem:[#allocation27_spill] sm:$0xff]  ;;  %v15240_v14 = vld [vmem:[#allocation54_spill] sm:$0xff]  ;;  %6500 = vst [vmem:[#allocation7 + $0x3e8] sm:$0xff] %v12765_v34  ;;  %6501 = vst [vmem:[#allocation7 + $0x3f0] sm:$0xff] %v12771_v24 }
 0x97c   :  { %15236 = vst [vmem:[#allocation42_spill] sm:$0xff] %v12781_v57  ;;  %v12787_v42 = vsel %vm6311_vm5, %v15152_v1, %v15237_v52  ;;  %vm15241_vm0 = vcmp.gt.f32.partialorder %v15240_v14, 0.0  ;;  %v6535_v44 = vld [vmem:[#allocation7 + $0x1af] sm:$0xff]  ;;  %v6536_v1 = vld [vmem:[#allocation7 + $0x1c7] sm:$0xff]  ;;  %vm15244_vm5 = vcmp.gt.f32.partialorder %v15157_v58, 0.0  ;;  %6502 = vst [vmem:[#allocation7 + $0x408] sm:$0xff] %v12781_v57  ;;  %v12848_v57 = vpack.c.bf16 %v6529_v53, %v6528_v41 }
 0x97d   :  { %15238 = vst [vmem:[#allocation41_spill] sm:$0xff] %v12787_v42  ;;  %v12799_v25 = vsel %vm15241_vm0, %v15240_v14, %v12476_v63  ;;  %v6537_v18 = vld [vmem:[#allocation7 + $0x1cf] sm:$0xff]  ;;  %v12815_v63 = vsel %vm6315_vm8, %v15159_v3, %v12491_v38  ;;  %6503 = vst [vmem:[#allocation7 + $0x410] sm:$0xff] %v12787_v42  ;;  %v6538_v55 = vld [vmem:[#allocation7 + $0x1e7] sm:$0xff]  ;;  %v12836_v42 = vpack.c.bf16 %v6517_v54, %v12719_v12 }
 0x97e   :  { %15242 = vst [vmem:[#allocation25_spill] sm:$0xff] %v12799_v25  ;;  %v15243_v52 = vld [vmem:[#allocation120_spill] sm:$0xff]  ;;  %15246 = vst [vmem:[#allocation50_spill] sm:$0xff] %v12815_v63  ;;  %v6542_v24 = vld [vmem:[#allocation7 + $0x267] sm:$0xff]  ;;  %v12850_v12 = vpack.c.bf16 %v6531_v13, %v6530_v33  ;;  %v12852_v54 = vpack.c.bf16 %v6533_v28, %v6532_v56 }
 0x97f   :  { %v12809_v10 = vsel %vm15244_vm5, %v15157_v58, %v15243_v52  ;;  %6504 = vst [vmem:[#allocation7 + $0x428] sm:$0xff] %v12793_v47  ;;  %6505 = vst [vmem:[#allocation7 + $0x430] sm:$0xff] %v12799_v25  ;;  %v6539_v14 = vld [vmem:[#allocation7 + $0x1ef] sm:$0xff]  ;;  %v12823_v58 = vpack.c.bf16 %v12681_v0, %v12679_v2  ;;  %v12827_v52 = vpack.c.bf16 %v12685_v40, %v12683_v50  ;;  %v6544_v3 = vld [vmem:[#allocation7 + $0x287] sm:$0xff] }
 0x980   :  { %15245 = vst [vmem:[#allocation58_spill] sm:$0xff] %v12809_v10  ;;  %6506 = vst [vmem:[#allocation7 + $0x448] sm:$0xff] %v12809_v10  ;;  %v6543_v38 = vld [vmem:[#allocation7 + $0x26f] sm:$0xff]  ;;  %v12833_v25 = vpack.c.bf16 %v12717_v23, %v12715_v49  ;;  %v12838_v2 = vpack.c.bf16 %v6519_v62, %v6518_v19  ;;  %v12840_v0 = vpack.c.bf16 %v6521_v6, %v6520_v39  ;;  %v6546_v50 = vld [vmem:[#allocation7 + $0x2a7] sm:$0xff] }
 0x981   :  { %15247 = vst [vmem:[#allocation60_spill] sm:$0xff] %v12823_v58  ;;  %15248 = vst [vmem:[#allocation53_spill] sm:$0xff] %v12827_v52  ;;  %v6545_v47 = vld [vmem:[#allocation7 + $0x28f] sm:$0xff]  ;;  %v6548_v58 = vld [vmem:[#allocation7 + $0x2c7] sm:$0xff]  ;;  %v12842_v52 = vpack.c.bf16 %v6523_v27, %v6522_v5  ;;  %v12846_v10 = vpack.c.bf16 %v6527_v9, %v6526_v26  ;;  %v12854_v19 = vpack.c.bf16 %v6535_v44, %v6534_v31 }
 0x982   :  { %6507 = vst [vmem:[#allocation7 + $0x450] sm:$0xff] %v12815_v63  ;;  %15249 = vst [vmem:[#allocation55_spill] sm:$0xff] %v12833_v25  ;;  %v6547_v40 = vld [vmem:[#allocation7 + $0x2af] sm:$0xff]  ;;  %v12844_v63 = vpack.c.bf16 %v6525_v11, %v6524_v21  ;;  %v6550_v23 = vld [vmem:[#allocation7 + $0x2e7] sm:$0xff]  ;;  %v12856_v62 = vpack.c.bf16 %v6537_v18, %v6536_v1  ;;  %v12858_v27 = vpack.c.bf16 %v6539_v14, %v6538_v55 }
 0x983   :  { %v6549_v49 = vld [vmem:[#allocation7 + $0x2cf] sm:$0xff]  ;;  %v6552_v39 = vld [vmem:[#allocation7 + $0x307] sm:$0xff]  ;;  %v12860_v21 = vpack.c.bf16 %v6543_v38, %v6542_v24  ;;  %v12862_v53 = vpack.c.bf16 %v6545_v47, %v6544_v3  ;;  %v12864_v41 = vpack.c.bf16 %v6547_v40, %v6546_v50  ;;  %v15261_v38 = vld [vmem:[#allocation65_spill] sm:$0xff] }
 0x984   :  { %v6551_v25 = vld [vmem:[#allocation7 + $0x2ef] sm:$0xff]  ;;  %v6554_v5 = vld [vmem:[#allocation7 + $0x327] sm:$0xff]  ;;  %v12866_v33 = vpack.c.bf16 %v6549_v49, %v6548_v58  ;;  %7454 = vmatprep.subr.bf16.mxu1 %v12844_v63 }
 0x985   :  { %v6553_v6 = vld [vmem:[#allocation7 + $0x30f] sm:$0xff]  ;;  %15250 = vst [vmem:[#allocation59_spill] sm:$0xff] %v12860_v21  ;;  %15251 = vst [vmem:[#allocation69_spill] sm:$0xff] %v12862_v53  ;;  %v6556_v26 = vld [vmem:[#allocation7 + $0x347] sm:$0xff]  ;;  %v12868_v13 = vpack.c.bf16 %v6551_v25, %v6550_v23 }
 0x986   :  { %15252 = vst [vmem:[#allocation66_spill] sm:$0xff] %v12864_v41  ;;  %v6555_v11 = vld [vmem:[#allocation7 + $0x32f] sm:$0xff]  ;;  %15253 = vst [vmem:[#allocation75_spill] sm:$0xff] %v12866_v33  ;;  %v12870_v56 = vpack.c.bf16 %v6553_v6, %v6552_v39  ;;  %v6558_v1 = vld [vmem:[#allocation7 + $0x367] sm:$0xff] }
 0x987   :  { %v6557_v9 = vld [vmem:[#allocation7 + $0x34f] sm:$0xff]  ;;  %15254 = vst [vmem:[#allocation77_spill] sm:$0xff] %v12868_v13  ;;  %v6560_v18 = vld [vmem:[#allocation7 + $0x387] sm:$0xff]  ;;  %v12876_v47 = vpack.c.bf16 %v6555_v11, %v6554_v5  ;;  %v15268_v11 = vld [vmem:[#allocation45_spill] sm:$0xff] }
 0x988   :  { %15255 = vst [vmem:[#allocation81_spill] sm:$0xff] %v12870_v56  ;;  %v15256_v28 = vld [vmem:[#allocation63_spill] sm:$0xff]  ;;  %v15257_v31 = vld [vmem:[#allocation64_spill] sm:$0xff]  ;;  %v12878_v55 = vpack.c.bf16 %v6557_v9, %v6556_v26  ;;  %v15262_v58 = vld [vmem:[#allocation62_spill] sm:$0xff] }
 0x989   :  { %v12874_v44 = vpack.c.bf16 %v15257_v31, %v15256_v28  ;;  %v6559_v24 = vld [vmem:[#allocation7 + $0x36f] sm:$0xff]  ;;  %15258 = vst [vmem:[#allocation28_spill] sm:$0xff] %v12876_v47  ;;  %v6562_v49 = vld [vmem:[#allocation7 + $0x3a7] sm:$0xff] }
 0x98a   :  { %15259 = vst [vmem:[#allocation44_spill] sm:$0xff] %v12878_v55  ;;  %v15260_v14 = vld [vmem:[#allocation56_spill] sm:$0xff]  ;;  %v15263_v25 = vld [vmem:[#allocation71_spill] sm:$0xff]  ;;  %v12888_v39 = vpack.c.bf16 %v6559_v24, %v6558_v1  ;;  %v15267_v5 = vld [vmem:[#allocation74_spill] sm:$0xff] }
 0x98b   :  { %v12882_v3 = vpack.c.bf16 %v15261_v38, %v15260_v14  ;;  %v12886_v50 = vpack.c.bf16 %v15263_v25, %v15262_v58  ;;  %v6561_v40 = vld [vmem:[#allocation7 + $0x38f] sm:$0xff]  ;;  %v12896_v26 = vpack.c.bf16 %v15268_v11, %v15267_v5  ;;  %v15269_v9 = vld [vmem:[#allocation78_spill] sm:$0xff]  ;;  %v15274_v24 = vld [vmem:[#allocation33_spill] sm:$0xff] }
 0x98c   :  { %v6563_v23 = vld [vmem:[#allocation7 + $0x3af] sm:$0xff]  ;;  %15264 = vst [vmem:[#allocation31_spill] sm:$0xff] %v12888_v39  ;;  %v6564_v55 = vld [vmem:[#allocation7 + $0x3c7] sm:$0xff]  ;;  %v12902_v21 = vpack.c.bf16 %v6561_v40, %v6560_v18  ;;  %v12922_v18 = vpack.c.bf16 %v12497_v17, %v12485_v60  ;;  %v12926_v40 = vpack.c.bf16 %v12509_v36, %v12503_v29  ;;  %v12944_v36 = vpack.c.bf16 %v12549_v32, %v12543_v7  ;;  %v15285_v32 = vld [vmem:[#allocation61_spill] sm:$0xff] }
 0x98d   :  { %v15265_v6 = vld [vmem:[#allocation68_spill] sm:$0xff]  ;;  %v15270_v14 = vld [vmem:[#allocation87_spill] sm:$0xff]  ;;  %v12904_v53 = vpack.c.bf16 %v6563_v23, %v6562_v49  ;;  %v12960_v7 = vpack.c.bf16 %v12617_v8, %v12611_v22  ;;  %v15297_v22 = vld [vmem:[#allocation82_spill] sm:$0xff] }
 0x98e   :  { %v15266_v28 = vld [vmem:[#allocation72_spill] sm:$0xff]  ;;  %v12900_v38 = vpack.c.bf16 %v15270_v14, %v15269_v9  ;;  %v6566_v25 = vld [vmem:[#allocation7 + $0x3e7] sm:$0xff]  ;;  %15271 = vst [vmem:[#allocation80_spill] sm:$0xff] %v12902_v21 }
 0x98f   :  { %v12892_v31 = vpack.c.bf16 %v15266_v28, %v15265_v6  ;;  %v6565_v58 = vld [vmem:[#allocation7 + $0x3cf] sm:$0xff]  ;;  %15272 = vst [vmem:[#allocation88_spill] sm:$0xff] %v12904_v53  ;;  %v15276_v28 = vld [vmem:[#allocation94_spill] sm:$0xff]  ;;  %15284 = vst [vmem:[#allocation48_spill] sm:$0xff] %v12960_v7 }
 0x990   :  { %v15273_v1 = vld [vmem:[#allocation36_spill] sm:$0xff]  ;;  %v6568_v11 = vld [vmem:[#allocation7 + $0x407] sm:$0xff]  ;;  %v12914_v9 = vpack.c.bf16 %v6565_v58, %v6564_v55  ;;  %v12934_v55 = vpack.c.bf16 %v12522_v4, %v12516_v15  ;;  %v12952_v15 = vpack.c.bf16 %v12589_v45, %v12583_v46  ;;  %v15292_v53 = vld [vmem:[#allocation121_spill] sm:$0xff] }
 0x991   :  { %v12908_v39 = vpack.c.bf16 %v15274_v24, %v15273_v1  ;;  %v15275_v6 = vld [vmem:[#allocation92_spill] sm:$0xff]  ;;  %v15278_v14 = vld [vmem:[#allocation90_spill] sm:$0xff]  ;;  %v6702_v17 = vld [vmem:[#allocation7 + $0x29] sm:$0xff] }
 0x992   :  { %v12912_v41 = vpack.c.bf16 %v15276_v28, %v15275_v6  ;;  %v6567_v5 = vld [vmem:[#allocation7 + $0x3ef] sm:$0xff]  ;;  %15277 = vst [vmem:[#allocation35_spill] sm:$0xff] %v12914_v9  ;;  %v12918_v13 = vpack.c.bf16 %v12465_v37, %v15278_v14  ;;  %v6570_v49 = vld [vmem:[#allocation7 + $0x427] sm:$0xff]  ;;  %v12938_v37 = vpack.c.bf16 %v12534_v48, %v12528_v30  ;;  %15282 = vst [vmem:[#allocation93_spill] sm:$0xff] %v12952_v15 }
 0x993   :  { %v6569_v33 = vld [vmem:[#allocation7 + $0x40f] sm:$0xff]  ;;  %v12928_v1 = vpack.c.bf16 %v6567_v5, %v6566_v25  ;;  %v12956_v5 = vpack.c.bf16 %v12605_v20, %v12599_v51  ;;  %v15294_v51 = vld [vmem:[#allocation73_spill] sm:$0xff]  ;;  %v15295_v20 = vld [vmem:[#allocation122_spill] sm:$0xff]  ;;  %7413 = vmatprep.subr.bf16.mxu0 %v12908_v39 }
 0x994   :  { %v6571_v23 = vld [vmem:[#allocation7 + $0x42f] sm:$0xff]  ;;  %v12930_v24 = vpack.c.bf16 %v6569_v33, %v6568_v11  ;;  %v12948_v33 = vpack.c.bf16 %v12561_v61, %v12555_v43  ;;  %v15286_v43 = vld [vmem:[#allocation70_spill] sm:$0xff] }
 0x995   :  { %15279 = vst [vmem:[#allocation85_spill] sm:$0xff] %v12928_v1  ;;  %v6703_v60 = vld [vmem:[#allocation7 + $0x31] sm:$0xff]  ;;  %v6704_v58 = vld [vmem:[#allocation7 + $0x49] sm:$0xff]  ;;  %v12940_v29 = vpack.c.bf16 %v6571_v23, %v6570_v49  ;;  %15283 = vst [vmem:[#allocation38_spill] sm:$0xff] %v12956_v5  ;;  %v12964_v61 = vpack.c.bf16 %v15286_v43, %v15285_v32  ;;  %v12976_v1 = vpack.c.bf16 %v15295_v20, %v15294_v51 }
 0x996   :  { %15280 = vst [vmem:[#allocation57_spill] sm:$0xff] %v12930_v24  ;;  %v6705_v6 = vld [vmem:[#allocation7 + $0x51] sm:$0xff]  ;;  %v6706_v4 = vld [vmem:[#allocation7 + $0x69] sm:$0xff]  ;;  %v12996_v51 = vpack.c.bf16 %v12759_v16, %v12753_v35  ;;  %v15309_v20 = vld [vmem:[#allocation29_spill] sm:$0xff]  ;;  %v13010_v16 = vpack.c.bf16 %v6703_v60, %v6702_v17 }
 0x997   :  { %15281 = vst [vmem:[#allocation34_spill] sm:$0xff] %v12940_v29  ;;  %v6707_v30 = vld [vmem:[#allocation7 + $0x71] sm:$0xff]  ;;  %v6708_v48 = vld [vmem:[#allocation7 + $0x89] sm:$0xff]  ;;  %15287 = vst [vmem:[#allocation37_spill] sm:$0xff] %v12964_v61  ;;  %v13012_v35 = vpack.c.bf16 %v6705_v6, %v6704_v58 }
 0x998   :  { %v6709_v25 = vld [vmem:[#allocation7 + $0x91] sm:$0xff]  ;;  %v6710_v28 = vld [vmem:[#allocation7 + $0xa9] sm:$0xff]  ;;  %15296 = vst [vmem:[#allocation89_spill] sm:$0xff] %v12976_v1  ;;  %15308 = vst [vmem:[#allocation30_spill] sm:$0xff] %v12996_v51 }
 0x999   :  { %v15288_v11 = vld [vmem:[#allocation91_spill] sm:$0xff]  ;;  %v6711_v14 = vld [vmem:[#allocation7 + $0xb1] sm:$0xff]  ;;  %v13016_v56 = vpack.c.bf16 %v6709_v25, %v6708_v48 }
 0x99a   :  { %v15289_v46 = vld [vmem:[#allocation67_spill] sm:$0xff]  ;;  %v6713_v23 = vld [vmem:[#allocation7 + $0xd1] sm:$0xff] }
 0x99b   :  { %v12968_v45 = vpack.c.bf16 %v15289_v46, %v15288_v11  ;;  %v6712_v49 = vld [vmem:[#allocation7 + $0xc9] sm:$0xff]  ;;  %v15291_v21 = vld [vmem:[#allocation76_spill] sm:$0xff] }
 0x99c   :  { %v12972_v9 = vpack.c.bf16 %v15292_v53, %v15291_v21  ;;  %v15298_v8 = vld [vmem:[#allocation123_spill] sm:$0xff]  ;;  %v6715_v46 = vld [vmem:[#allocation7 + $0xf1] sm:$0xff] }
 0x99d   :  { %15290 = vst [vmem:[#allocation83_spill] sm:$0xff] %v12968_v45  ;;  %v12980_v24 = vpack.c.bf16 %v15298_v8, %v15297_v22  ;;  %v15300_v32 = vld [vmem:[#allocation79_spill] sm:$0xff]  ;;  %v15303_v5 = vld [vmem:[#allocation124_spill] sm:$0xff]  ;;  %v13000_v22 = vpack.c.bf16 %v15309_v20, %v12765_v34 }
 0x99e   :  { %15293 = vst [vmem:[#allocation84_spill] sm:$0xff] %v12972_v9  ;;  %v15301_v43 = vld [vmem:[#allocation47_spill] sm:$0xff]  ;;  %v12988_v7 = vpack.c.bf16 %v15303_v5, %v12725_v59  ;;  %v15306_v53 = vld [vmem:[#allocation52_spill] sm:$0xff]  ;;  %v15315_v5 = vld [vmem:[#allocation25_spill] sm:$0xff] }
 0x99f   :  { %15299 = vst [vmem:[#allocation49_spill] sm:$0xff] %v12980_v24  ;;  %v12984_v29 = vpack.c.bf16 %v15301_v43, %v15300_v32  ;;  %v6714_v11 = vld [vmem:[#allocation7 + $0xe9] sm:$0xff]  ;;  %15310 = vst [vmem:[#allocation32_spill] sm:$0xff] %v13000_v22  ;;  %v6717_v8 = vld [vmem:[#allocation7 + $0x111] sm:$0xff]  ;;  %v13014_v22 = vpack.c.bf16 %v6707_v30, %v6706_v4 }
 0x9a0   :  { %v6716_v15 = vld [vmem:[#allocation7 + $0x109] sm:$0xff]  ;;  %15304 = vst [vmem:[#allocation95_spill] sm:$0xff] %v12988_v7  ;;  %v6719_v43 = vld [vmem:[#allocation7 + $0x131] sm:$0xff]  ;;  %v15311_v24 = vld [vmem:[#allocation42_spill] sm:$0xff] }
 0x9a1   :  { %15302 = vst [vmem:[#allocation26_spill] sm:$0xff] %v12984_v29  ;;  %v15305_v21 = vld [vmem:[#allocation51_spill] sm:$0xff]  ;;  %v15312_v29 = vld [vmem:[#allocation41_spill] sm:$0xff]  ;;  %v15314_v59 = vld [vmem:[#allocation40_spill] sm:$0xff]  ;;  %v13024_v17 = vpack.c.bf16 %v6717_v8, %v6716_v15 }
 0x9a2   :  { %v12992_v61 = vpack.c.bf16 %v15306_v53, %v15305_v21  ;;  %v6718_v32 = vld [vmem:[#allocation7 + $0x129] sm:$0xff]  ;;  %v13004_v45 = vpack.c.bf16 %v15312_v29, %v15311_v24  ;;  %v13008_v7 = vpack.c.bf16 %v15315_v5, %v15314_v59  ;;  %v6721_v53 = vld [vmem:[#allocation7 + $0x151] sm:$0xff]  ;;  %v13018_v24 = vpack.c.bf16 %v6711_v14, %v6710_v28 }
 0x9a3   :  { %v6720_v21 = vld [vmem:[#allocation7 + $0x149] sm:$0xff]  ;;  %v6723_v34 = vld [vmem:[#allocation7 + $0x171] sm:$0xff]  ;;  %v13020_v29 = vpack.c.bf16 %v6713_v23, %v6712_v49  ;;  %v13026_v60 = vpack.c.bf16 %v6719_v43, %v6718_v32 }
 0x9a4   :  { %15307 = vst [vmem:[#allocation43_spill] sm:$0xff] %v12992_v61  ;;  %15313 = vst [vmem:[#allocation39_spill] sm:$0xff] %v13004_v45  ;;  %v6722_v61 = vld [vmem:[#allocation7 + $0x169] sm:$0xff]  ;;  %v6725_v51 = vld [vmem:[#allocation7 + $0x191] sm:$0xff]  ;;  %v13028_v58 = vpack.c.bf16 %v6721_v53, %v6720_v21 }
 0x9a5   :  { %15316 = vst [vmem:[#allocation24_spill] sm:$0xff] %v13008_v7  ;;  %v6724_v20 = vld [vmem:[#allocation7 + $0x189] sm:$0xff]  ;;  %v6727_v5 = vld [vmem:[#allocation7 + $0x1b1] sm:$0xff]  ;;  %v13022_v7 = vpack.c.bf16 %v6715_v46, %v6714_v11  ;;  %v13030_v48 = vpack.c.bf16 %v6723_v34, %v6722_v61 }
 0x9a6   :  { %v6726_v59 = vld [vmem:[#allocation7 + $0x1a9] sm:$0xff]  ;;  %v6729_v6 = vld [vmem:[#allocation7 + $0x1d1] sm:$0xff]  ;;  %v13032_v25 = vpack.c.bf16 %v6725_v51, %v6724_v20 }
 0x9a7   :  { %v6728_v45 = vld [vmem:[#allocation7 + $0x1c9] sm:$0xff]  ;;  %v6731_v30 = vld [vmem:[#allocation7 + $0x1f1] sm:$0xff]  ;;  %v13034_v28 = vpack.c.bf16 %v6727_v5, %v6726_v59 }
 0x9a8   :  { %v6730_v4 = vld [vmem:[#allocation7 + $0x1e9] sm:$0xff]  ;;  %v6735_v46 = vld [vmem:[#allocation7 + $0x271] sm:$0xff]  ;;  %v13038_v8 = vpack.c.bf16 %v6729_v6, %v6728_v45 }
 0x9a9   :  { %v6734_v11 = vld [vmem:[#allocation7 + $0x269] sm:$0xff]  ;;  %v13040_v32 = vpack.c.bf16 %v6731_v30, %v6730_v4  ;;  %v6737_v9 = vld [vmem:[#allocation7 + $0x291] sm:$0xff] }
 0x9aa   :  { %v6736_v15 = vld [vmem:[#allocation7 + $0x289] sm:$0xff]  ;;  %v6739_v34 = vld [vmem:[#allocation7 + $0x2b1] sm:$0xff]  ;;  %v13044_v51 = vpack.c.bf16 %v6735_v46, %v6734_v11 }
 0x9ab   :  { %v6738_v61 = vld [vmem:[#allocation7 + $0x2a9] sm:$0xff]  ;;  %v6741_v59 = vld [vmem:[#allocation7 + $0x2d1] sm:$0xff]  ;;  %v13046_v47 = vpack.c.bf16 %v6737_v9, %v6736_v15 }
 0x9ac   :  { %15321 = vst [vmem:[#allocation27_spill] sm:$0xff] %v13044_v51  ;;  %v6740_v20 = vld [vmem:[#allocation7 + $0x2c9] sm:$0xff]  ;;  %v13048_v23 = vpack.c.bf16 %v6739_v34, %v6738_v61  ;;  %v6743_v1 = vld [vmem:[#allocation7 + $0x2f1] sm:$0xff] }
 0x9ad   :  { %v6742_v5 = vld [vmem:[#allocation7 + $0x2e9] sm:$0xff]  ;;  %15322 = vst [vmem:[#allocation54_spill] sm:$0xff] %v13046_v47  ;;  %v6745_v6 = vld [vmem:[#allocation7 + $0x311] sm:$0xff]  ;;  %v13050_v4 = vpack.c.bf16 %v6741_v59, %v6740_v20 }
 0x9ae   :  { %15323 = vst [vmem:[#allocation120_spill] sm:$0xff] %v13048_v23  ;;  %v6744_v45 = vld [vmem:[#allocation7 + $0x309] sm:$0xff]  ;;  %v6747_v14 = vld [vmem:[#allocation7 + $0x331] sm:$0xff]  ;;  %v13052_v43 = vpack.c.bf16 %v6743_v1, %v6742_v5 }
 0x9af   :  { %15324 = vst [vmem:[#allocation63_spill] sm:$0xff] %v13050_v4  ;;  %v6746_v30 = vld [vmem:[#allocation7 + $0x329] sm:$0xff]  ;;  %v13054_v21 = vpack.c.bf16 %v6745_v6, %v6744_v45  ;;  %v6749_v11 = vld [vmem:[#allocation7 + $0x351] sm:$0xff] }
 0x9b0   :  { %v6748_v53 = vld [vmem:[#allocation7 + $0x349] sm:$0xff]  ;;  %15325 = vst [vmem:[#allocation64_spill] sm:$0xff] %v13052_v43  ;;  %v6751_v51 = vld [vmem:[#allocation7 + $0x371] sm:$0xff]  ;;  %v13056_v49 = vpack.c.bf16 %v6747_v14, %v6746_v30 }
 0x9b1   :  { %15326 = vst [vmem:[#allocation56_spill] sm:$0xff] %v13054_v21  ;;  %v6750_v46 = vld [vmem:[#allocation7 + $0x369] sm:$0xff]  ;;  %v6753_v15 = vld [vmem:[#allocation7 + $0x391] sm:$0xff]  ;;  %v13058_v34 = vpack.c.bf16 %v6749_v11, %v6748_v53 }
 0x9b2   :  { %15327 = vst [vmem:[#allocation65_spill] sm:$0xff] %v13056_v49  ;;  %v6752_v9 = vld [vmem:[#allocation7 + $0x389] sm:$0xff]  ;;  %v13060_v47 = vpack.c.bf16 %v6751_v51, %v6750_v46  ;;  %v6755_v20 = vld [vmem:[#allocation7 + $0x3b1] sm:$0xff] }
 0x9b3   :  { %v6754_v61 = vld [vmem:[#allocation7 + $0x3a9] sm:$0xff]  ;;  %15328 = vst [vmem:[#allocation62_spill] sm:$0xff] %v13058_v34  ;;  %v6757_v23 = vld [vmem:[#allocation7 + $0x3d1] sm:$0xff]  ;;  %v13062_v4 = vpack.c.bf16 %v6753_v15, %v6752_v9 }
 0x9b4   :  { %15329 = vst [vmem:[#allocation71_spill] sm:$0xff] %v13060_v47  ;;  %v6756_v59 = vld [vmem:[#allocation7 + $0x3c9] sm:$0xff]  ;;  %v6759_v5 = vld [vmem:[#allocation7 + $0x3f1] sm:$0xff]  ;;  %v13064_v6 = vpack.c.bf16 %v6755_v20, %v6754_v61 }
 0x9b5   :  { %15330 = vst [vmem:[#allocation68_spill] sm:$0xff] %v13062_v4  ;;  %v6758_v1 = vld [vmem:[#allocation7 + $0x3e9] sm:$0xff]  ;;  %v13066_v43 = vpack.c.bf16 %v6757_v23, %v6756_v59  ;;  %v6761_v14 = vld [vmem:[#allocation7 + $0x411] sm:$0xff] }
 0x9b6   :  { %v6760_v45 = vld [vmem:[#allocation7 + $0x409] sm:$0xff]  ;;  %15331 = vst [vmem:[#allocation72_spill] sm:$0xff] %v13064_v6  ;;  %v6763_v21 = vld [vmem:[#allocation7 + $0x431] sm:$0xff]  ;;  %v13068_v49 = vpack.c.bf16 %v6759_v5, %v6758_v1 }
 0x9b7   :  { %15332 = vst [vmem:[#allocation74_spill] sm:$0xff] %v13066_v43  ;;  %v6762_v30 = vld [vmem:[#allocation7 + $0x429] sm:$0xff]  ;;  %v13070_v53 = vpack.c.bf16 %v6761_v14, %v6760_v45  ;;  %v7019_v61 = vld [vmem:[#allocation7 + $0x211] sm:$0xff] }
 0x9b8   :  { %15333 = vst [vmem:[#allocation45_spill] sm:$0xff] %v13068_v49  ;;  %v13072_v51 = vpack.c.bf16 %v6763_v21, %v6762_v30  ;;  %v6826_v11 = vld [vmem:[#allocation7 + $0x207] sm:$0xff]  ;;  %v6827_v46 = vld [vmem:[#allocation7 + $0x20f] sm:$0xff] }
 0x9b9   :  { %15334 = vst [vmem:[#allocation78_spill] sm:$0xff] %v13070_v53  ;;  %v6858_v9 = vld [vmem:[#allocation7 + $0x447] sm:$0xff]  ;;  %v6859_v15 = vld [vmem:[#allocation7 + $0x44f] sm:$0xff]  ;;  %v13074_v47 = vpack.c.bf16 %v6827_v46, %v6826_v11 }
 0x9ba   :  { %15335 = vst [vmem:[#allocation87_spill] sm:$0xff] %v13072_v51  ;;  %v7018_v4 = vld [vmem:[#allocation7 + $0x209] sm:$0xff]  ;;  %v13076_v20 = vpack.c.bf16 %v6859_v15, %v6858_v9  ;;  %v7051_v59 = vld [vmem:[#allocation7 + $0x451] sm:$0xff] }
 0x9bb   :  { %v7050_v23 = vld [vmem:[#allocation7 + $0x449] sm:$0xff]  ;;  %v13078_v6 = vpack.c.bf16 %v7019_v61, %v7018_v4 }
 0x9bc   :  { %15336 = vst [vmem:[#allocation36_spill] sm:$0xff] %v13076_v20  ;;  %v13080_v1 = vld [vmem:[#allocation7 + $0x47] sm:$0xff]  ;;  %v13082_v5 = vpack.c.bf16 %v7051_v59, %v7050_v23  ;;  %v13084_v21 = vld [vmem:[#allocation7 + $0x4f] sm:$0xff] }
 0x9bd   :  { %15337 = vst [vmem:[#allocation33_spill] sm:$0xff] %v13078_v6  ;;  %15338 = vst [vmem:[#allocation92_spill] sm:$0xff] %v13080_v1  ;;  %v13086_v45 = vld [vmem:[#allocation7 + $0x67] sm:$0xff]  ;;  %v13088_v14 = vld [vmem:[#allocation7 + $0x6f] sm:$0xff] }
 0x9be   :  { %15339 = vst [vmem:[#allocation94_spill] sm:$0xff] %v13082_v5  ;;  %15340 = vst [vmem:[#allocation90_spill] sm:$0xff] %v13084_v21  ;;  %v13090_v30 = vld [vmem:[#allocation7 + $0x87] sm:$0xff]  ;;  %v13092_v11 = vld [vmem:[#allocation7 + $0x8f] sm:$0xff] }
 0x9bf   :  { %15341 = vst [vmem:[#allocation61_spill] sm:$0xff] %v13086_v45  ;;  %15342 = vst [vmem:[#allocation70_spill] sm:$0xff] %v13088_v14  ;;  %v13094_v46 = vld [vmem:[#allocation7 + $0xa7] sm:$0xff]  ;;  %v13100_v15 = vld [vmem:[#allocation7 + $0xaf] sm:$0xff] }
 0x9c0   :  { %15343 = vst [vmem:[#allocation91_spill] sm:$0xff] %v13090_v30  ;;  %15344 = vst [vmem:[#allocation67_spill] sm:$0xff] %v13092_v11  ;;  %v13102_v61 = vld [vmem:[#allocation7 + $0xc7] sm:$0xff]  ;;  %v13104_v23 = vld [vmem:[#allocation7 + $0xcf] sm:$0xff] }
 0x9c1   :  { %15345 = vst [vmem:[#allocation76_spill] sm:$0xff] %v13094_v46  ;;  %15346 = vst [vmem:[#allocation121_spill] sm:$0xff] %v13100_v15  ;;  %v13108_v5 = vld [vmem:[#allocation7 + $0xe7] sm:$0xff]  ;;  %v13110_v43 = vld [vmem:[#allocation7 + $0xef] sm:$0xff] }
 0x9c2   :  { %15347 = vst [vmem:[#allocation73_spill] sm:$0xff] %v13102_v61  ;;  %15348 = vst [vmem:[#allocation122_spill] sm:$0xff] %v13104_v23  ;;  %v13112_v49 = vld [vmem:[#allocation7 + $0x107] sm:$0xff]  ;;  %v13118_v53 = vld [vmem:[#allocation7 + $0x10f] sm:$0xff] }
 0x9c3   :  { %15349 = vst [vmem:[#allocation82_spill] sm:$0xff] %v13108_v5  ;;  %15350 = vst [vmem:[#allocation123_spill] sm:$0xff] %v13110_v43  ;;  %v13120_v51 = vld [vmem:[#allocation7 + $0x127] sm:$0xff]  ;;  %v13122_v34 = vld [vmem:[#allocation7 + $0x12f] sm:$0xff] }
 0x9c4   :  { %15351 = vst [vmem:[#allocation79_spill] sm:$0xff] %v13112_v49  ;;  %15352 = vst [vmem:[#allocation47_spill] sm:$0xff] %v13118_v53  ;;  %v13126_v20 = vld [vmem:[#allocation7 + $0x147] sm:$0xff]  ;;  %v13128_v6 = vld [vmem:[#allocation7 + $0x14f] sm:$0xff] }
 0x9c5   :  { %15353 = vst [vmem:[#allocation124_spill] sm:$0xff] %v13126_v20  ;;  %15354 = vst [vmem:[#allocation51_spill] sm:$0xff] %v13128_v6  ;;  %v13130_v1 = vld [vmem:[#allocation7 + $0x167] sm:$0xff]  ;;  %v13136_v21 = vld [vmem:[#allocation7 + $0x16f] sm:$0xff] }
 0x9c6   :  { %15355 = vst [vmem:[#allocation52_spill] sm:$0xff] %v13130_v1  ;;  %15356 = vst [vmem:[#allocation29_spill] sm:$0xff] %v13136_v21  ;;  %v13138_v45 = vld [vmem:[#allocation7 + $0x187] sm:$0xff]  ;;  %v13140_v14 = vld [vmem:[#allocation7 + $0x18f] sm:$0xff] }
 0x9c7   :  { %15357 = vst [vmem:[#allocation42_spill] sm:$0xff] %v13138_v45  ;;  %15358 = vst [vmem:[#allocation41_spill] sm:$0xff] %v13140_v14  ;;  %v13144_v30 = vld [vmem:[#allocation7 + $0x1a7] sm:$0xff]  ;;  %v13146_v11 = vld [vmem:[#allocation7 + $0x1af] sm:$0xff] }
 0x9c8   :  { %15359 = vst [vmem:[#allocation40_spill] sm:$0xff] %v13144_v30  ;;  %15360 = vst [vmem:[#allocation25_spill] sm:$0xff] %v13146_v11  ;;  %v13148_v46 = vld [vmem:[#allocation7 + $0x1c7] sm:$0xff]  ;;  %v13154_v15 = vld [vmem:[#allocation7 + $0x1cf] sm:$0xff] }
 0x9c9   :  { %15361 = vst [vmem:[#allocation125_spill] sm:$0xff] %v13148_v46  ;;  %15362 = vst [vmem:[#allocation126_spill] sm:$0xff] %v13154_v15  ;;  %v13156_v61 = vld [vmem:[#allocation7 + $0x1e7] sm:$0xff]  ;;  %v13158_v23 = vld [vmem:[#allocation7 + $0x1ef] sm:$0xff] }
 0x9ca   :  { %15363 = vst [vmem:[#allocation127_spill] sm:$0xff] %v13156_v61  ;;  %15364 = vst [vmem:[#allocation128_spill] sm:$0xff] %v13158_v23  ;;  %v13162_v20 = vld [vmem:[#allocation7 + $0x287] sm:$0xff]  ;;  %v13164_v6 = vld [vmem:[#allocation7 + $0x28f] sm:$0xff] }
 0x9cb   :  { %15365 = vst [vmem:[#allocation129_spill] sm:$0xff] %v13162_v20  ;;  %15366 = vst [vmem:[#allocation130_spill] sm:$0xff] %v13164_v6  ;;  %v13166_v5 = vld [vmem:[#allocation7 + $0x2a7] sm:$0xff]  ;;  %v13172_v1 = vld [vmem:[#allocation7 + $0x2af] sm:$0xff] }
 0x9cc   :  { %15367 = vst [vmem:[#allocation131_spill] sm:$0xff] %v13166_v5  ;;  %15368 = vst [vmem:[#allocation132_spill] sm:$0xff] %v13172_v1  ;;  %v13174_v21 = vld [vmem:[#allocation7 + $0x2c7] sm:$0xff]  ;;  %v13176_v45 = vld [vmem:[#allocation7 + $0x2cf] sm:$0xff] }
 0x9cd   :  { %15369 = vst [vmem:[#allocation133_spill] sm:$0xff] %v13174_v21  ;;  %15370 = vst [vmem:[#allocation134_spill] sm:$0xff] %v13176_v45  ;;  %v13180_v14 = vld [vmem:[#allocation7 + $0x2e7] sm:$0xff]  ;;  %v13182_v30 = vld [vmem:[#allocation7 + $0x2ef] sm:$0xff] }
 0x9ce   :  { %15371 = vst [vmem:[#allocation135_spill] sm:$0xff] %v13180_v14  ;;  %15372 = vst [vmem:[#allocation136_spill] sm:$0xff] %v13182_v30  ;;  %v13184_v11 = vld [vmem:[#allocation7 + $0x307] sm:$0xff]  ;;  %v13190_v46 = vld [vmem:[#allocation7 + $0x30f] sm:$0xff] }
 0x9cf   :  { %15373 = vst [vmem:[#allocation137_spill] sm:$0xff] %v13184_v11  ;;  %15374 = vst [vmem:[#allocation138_spill] sm:$0xff] %v13190_v46  ;;  %v13192_v15 = vld [vmem:[#allocation7 + $0x327] sm:$0xff]  ;;  %v13194_v61 = vld [vmem:[#allocation7 + $0x32f] sm:$0xff] }
 0x9d0   :  { %15375 = vst [vmem:[#allocation139_spill] sm:$0xff] %v13192_v15  ;;  %15376 = vst [vmem:[#allocation140_spill] sm:$0xff] %v13194_v61  ;;  %v13198_v20 = vld [vmem:[#allocation7 + $0x347] sm:$0xff]  ;;  %v13200_v6 = vld [vmem:[#allocation7 + $0x34f] sm:$0xff] }
 0x9d1   :  { %15377 = vst [vmem:[#allocation141_spill] sm:$0xff] %v13198_v20  ;;  %15378 = vst [vmem:[#allocation142_spill] sm:$0xff] %v13200_v6  ;;  %v13202_v23 = vld [vmem:[#allocation7 + $0x367] sm:$0xff]  ;;  %v13208_v5 = vld [vmem:[#allocation7 + $0x36f] sm:$0xff] }
 0x9d2   :  { %15379 = vst [vmem:[#allocation143_spill] sm:$0xff] %v13202_v23  ;;  %15380 = vst [vmem:[#allocation144_spill] sm:$0xff] %v13208_v5  ;;  %v13210_v1 = vld [vmem:[#allocation7 + $0x387] sm:$0xff]  ;;  %v13212_v21 = vld [vmem:[#allocation7 + $0x38f] sm:$0xff] }
 0x9d3   :  { %15381 = vst [vmem:[#allocation145_spill] sm:$0xff] %v13210_v1  ;;  %15382 = vst [vmem:[#allocation146_spill] sm:$0xff] %v13212_v21  ;;  %v13216_v45 = vld [vmem:[#allocation7 + $0x3a7] sm:$0xff]  ;;  %v13218_v14 = vld [vmem:[#allocation7 + $0x3af] sm:$0xff] }
 0x9d4   :  { %15383 = vst [vmem:[#allocation147_spill] sm:$0xff] %v13216_v45  ;;  %15384 = vst [vmem:[#allocation148_spill] sm:$0xff] %v13218_v14  ;;  %v13220_v30 = vld [vmem:[#allocation7 + $0x3c7] sm:$0xff]  ;;  %v13226_v11 = vld [vmem:[#allocation7 + $0x3cf] sm:$0xff] }
 0x9d5   :  { %15385 = vst [vmem:[#allocation149_spill] sm:$0xff] %v13220_v30  ;;  %15386 = vst [vmem:[#allocation150_spill] sm:$0xff] %v13226_v11  ;;  %v13228_v46 = vld [vmem:[#allocation7 + $0x3e7] sm:$0xff]  ;;  %v13230_v15 = vld [vmem:[#allocation7 + $0x3ef] sm:$0xff] }
 0x9d6   :  { %15387 = vst [vmem:[#allocation151_spill] sm:$0xff] %v13228_v46  ;;  %15388 = vst [vmem:[#allocation152_spill] sm:$0xff] %v13230_v15  ;;  %v13234_v61 = vld [vmem:[#allocation7 + $0x407] sm:$0xff]  ;;  %v13236_v20 = vld [vmem:[#allocation7 + $0x40f] sm:$0xff] }
 0x9d7   :  { %15389 = vst [vmem:[#allocation153_spill] sm:$0xff] %v13234_v61  ;;  %15390 = vst [vmem:[#allocation154_spill] sm:$0xff] %v13236_v20  ;;  %v13238_v6 = vld [vmem:[#allocation7 + $0x427] sm:$0xff]  ;;  %v13244_v1 = vld [vmem:[#allocation7 + $0x42f] sm:$0xff] }
 0x9d8   :  { %15391 = vst [vmem:[#allocation155_spill] sm:$0xff] %v13238_v6  ;;  %15392 = vst [vmem:[#allocation156_spill] sm:$0xff] %v13244_v1  ;;  %v13248_v23 = vld [vmem:[#allocation7 + $0x48] sm:$0xff]  ;;  %v13250_v59 = vld [vmem:[#allocation7 + $0x50] sm:$0xff] }
 0x9d9   :  { %15393 = vst [vmem:[#allocation157_spill] sm:$0xff] %v13248_v23  ;;  %15394 = vst [vmem:[#allocation158_spill] sm:$0xff] %v13250_v59  ;;  %v13254_v14 = vld [vmem:[#allocation7 + $0x68] sm:$0xff]  ;;  %v13256_v5 = vld [vmem:[#allocation7 + $0x70] sm:$0xff] }
 0x9da   :  { %15395 = vst [vmem:[#allocation159_spill] sm:$0xff] %v13254_v14  ;;  %15396 = vst [vmem:[#allocation160_spill] sm:$0xff] %v13256_v5  ;;  %v13258_v4 = vld [vmem:[#allocation7 + $0x88] sm:$0xff]  ;;  %v13262_v30 = vld [vmem:[#allocation7 + $0x90] sm:$0xff] }
 0x9db   :  { %15397 = vst [vmem:[#allocation161_spill] sm:$0xff] %v13258_v4  ;;  %15398 = vst [vmem:[#allocation162_spill] sm:$0xff] %v13262_v30  ;;  %v13264_v11 = vld [vmem:[#allocation7 + $0xa8] sm:$0xff]  ;;  %v13266_v21 = vld [vmem:[#allocation7 + $0xb0] sm:$0xff] }
 0x9dc   :  { %15399 = vst [vmem:[#allocation163_spill] sm:$0xff] %v13264_v11  ;;  %15400 = vst [vmem:[#allocation164_spill] sm:$0xff] %v13266_v21  ;;  %v13270_v15 = vld [vmem:[#allocation7 + $0xc8] sm:$0xff]  ;;  %v13272_v45 = vld [vmem:[#allocation7 + $0xd0] sm:$0xff] }
 0x9dd   :  { %15401 = vst [vmem:[#allocation165_spill] sm:$0xff] %v13270_v15  ;;  %15402 = vst [vmem:[#allocation166_spill] sm:$0xff] %v13272_v45  ;;  %v13274_v61 = vld [vmem:[#allocation7 + $0xe8] sm:$0xff]  ;;  %v13280_v6 = vld [vmem:[#allocation7 + $0xf0] sm:$0xff] }
 0x9de   :  { %15403 = vst [vmem:[#allocation167_spill] sm:$0xff] %v13274_v61  ;;  %15404 = vst [vmem:[#allocation168_spill] sm:$0xff] %v13280_v6  ;;  %v13282_v1 = vld [vmem:[#allocation7 + $0x108] sm:$0xff]  ;;  %v13284_v23 = vld [vmem:[#allocation7 + $0x110] sm:$0xff] }
 0x9df   :  { %15405 = vst [vmem:[#allocation169_spill] sm:$0xff] %v13282_v1  ;;  %v13288_v59 = vld [vmem:[#allocation7 + $0x128] sm:$0xff]  ;;  %v13290_v14 = vld [vmem:[#allocation7 + $0x130] sm:$0xff] }
 0x9e0   :  { %v13292_v5 = vld [vmem:[#allocation7 + $0x148] sm:$0xff]  ;;  %v13298_v4 = vld [vmem:[#allocation7 + $0x150] sm:$0xff] }
 0x9e1   :  { %15406 = vst [vmem:[#allocation170_spill] sm:$0xff] %v13292_v5  ;;  %15407 = vst [vmem:[#allocation171_spill] sm:$0xff] %v13298_v4  ;;  %v13300_v30 = vld [vmem:[#allocation7 + $0x168] sm:$0xff]  ;;  %v13302_v11 = vld [vmem:[#allocation7 + $0x170] sm:$0xff] }
 0x9e2   :  { %15408 = vst [vmem:[#allocation172_spill] sm:$0xff] %v13300_v30  ;;  %15409 = vst [vmem:[#allocation173_spill] sm:$0xff] %v13302_v11  ;;  %v13306_v21 = vld [vmem:[#allocation7 + $0x188] sm:$0xff]  ;;  %v13308_v15 = vld [vmem:[#allocation7 + $0x190] sm:$0xff] }
 0x9e3   :  { %15410 = vst [vmem:[#allocation174_spill] sm:$0xff] %v13306_v21  ;;  %15411 = vst [vmem:[#allocation175_spill] sm:$0xff] %v13308_v15  ;;  %v13310_v45 = vld [vmem:[#allocation7 + $0x1a8] sm:$0xff]  ;;  %v13316_v43 = vld [vmem:[#allocation7 + $0x1b0] sm:$0xff] }
 0x9e4   :  { %15412 = vst [vmem:[#allocation176_spill] sm:$0xff] %v13310_v45  ;;  %15413 = vst [vmem:[#allocation177_spill] sm:$0xff] %v13316_v43  ;;  %v13318_v61 = vld [vmem:[#allocation7 + $0x1c8] sm:$0xff]  ;;  %v13320_v6 = vld [vmem:[#allocation7 + $0x1d0] sm:$0xff] }
 0x9e5   :  { %15414 = vst [vmem:[#allocation178_spill] sm:$0xff] %v13318_v61  ;;  %15415 = vst [vmem:[#allocation179_spill] sm:$0xff] %v13320_v6  ;;  %v13324_v49 = vld [vmem:[#allocation7 + $0x1e8] sm:$0xff]  ;;  %v13326_v53 = vld [vmem:[#allocation7 + $0x1f0] sm:$0xff] }
 0x9e6   :  { %15416 = vst [vmem:[#allocation180_spill] sm:$0xff] %v13324_v49  ;;  %15417 = vst [vmem:[#allocation181_spill] sm:$0xff] %v13326_v53  ;;  %v13328_v1 = vld [vmem:[#allocation7 + $0x208] sm:$0xff]  ;;  %v13334_v5 = vld [vmem:[#allocation7 + $0x210] sm:$0xff] }
 0x9e7   :  { %15418 = vst [vmem:[#allocation182_spill] sm:$0xff] %v13328_v1  ;;  %15419 = vst [vmem:[#allocation183_spill] sm:$0xff] %v13334_v5  ;;  %v13336_v4 = vld [vmem:[#allocation7 + $0x288] sm:$0xff]  ;;  %v13338_v30 = vld [vmem:[#allocation7 + $0x290] sm:$0xff] }
 0x9e8   :  { %15420 = vst [vmem:[#allocation184_spill] sm:$0xff] %v13336_v4  ;;  %15421 = vst [vmem:[#allocation185_spill] sm:$0xff] %v13338_v30  ;;  %v13342_v11 = vld [vmem:[#allocation7 + $0x2a8] sm:$0xff]  ;;  %v13344_v21 = vld [vmem:[#allocation7 + $0x2b0] sm:$0xff] }
 0x9e9   :  { %15422 = vst [vmem:[#allocation186_spill] sm:$0xff] %v13342_v11  ;;  %15423 = vst [vmem:[#allocation187_spill] sm:$0xff] %v13344_v21  ;;  %v13346_v15 = vld [vmem:[#allocation7 + $0x2c8] sm:$0xff]  ;;  %v13352_v45 = vld [vmem:[#allocation7 + $0x2d0] sm:$0xff] }
 0x9ea   :  { %15424 = vst [vmem:[#allocation188_spill] sm:$0xff] %v13346_v15  ;;  %15425 = vst [vmem:[#allocation189_spill] sm:$0xff] %v13352_v45  ;;  %v13354_v43 = vld [vmem:[#allocation7 + $0x2e8] sm:$0xff]  ;;  %v13356_v61 = vld [vmem:[#allocation7 + $0x2f0] sm:$0xff] }
 0x9eb   :  { %15426 = vst [vmem:[#allocation190_spill] sm:$0xff] %v13354_v43  ;;  %15427 = vst [vmem:[#allocation191_spill] sm:$0xff] %v13356_v61  ;;  %v13360_v6 = vld [vmem:[#allocation7 + $0x308] sm:$0xff]  ;;  %v13362_v49 = vld [vmem:[#allocation7 + $0x310] sm:$0xff] }
 0x9ec   :  { %15428 = vst [vmem:[#allocation192_spill] sm:$0xff] %v13360_v6  ;;  %15429 = vst [vmem:[#allocation193_spill] sm:$0xff] %v13362_v49  ;;  %v13364_v53 = vld [vmem:[#allocation7 + $0x328] sm:$0xff]  ;;  %v13370_v4 = vld [vmem:[#allocation7 + $0x330] sm:$0xff] }
 0x9ed   :  { %15430 = vst [vmem:[#allocation194_spill] sm:$0xff] %v13364_v53  ;;  %15431 = vst [vmem:[#allocation195_spill] sm:$0xff] %v13370_v4  ;;  %v13372_v30 = vld [vmem:[#allocation7 + $0x348] sm:$0xff]  ;;  %v13374_v1 = vld [vmem:[#allocation7 + $0x350] sm:$0xff] }
 0x9ee   :  { %15432 = vst [vmem:[#allocation196_spill] sm:$0xff] %v13372_v30  ;;  %15433 = vst [vmem:[#allocation197_spill] sm:$0xff] %v13374_v1  ;;  %v13378_v11 = vld [vmem:[#allocation7 + $0x368] sm:$0xff]  ;;  %v13380_v21 = vld [vmem:[#allocation7 + $0x370] sm:$0xff] }
 0x9ef   :  { %15434 = vst [vmem:[#allocation198_spill] sm:$0xff] %v13378_v11  ;;  %15435 = vst [vmem:[#allocation199_spill] sm:$0xff] %v13380_v21  ;;  %v13382_v5 = vld [vmem:[#allocation7 + $0x388] sm:$0xff]  ;;  %v13388_v15 = vld [vmem:[#allocation7 + $0x390] sm:$0xff] }
 0x9f0   :  { %15436 = vst [vmem:[#allocation200_spill] sm:$0xff] %v13382_v5  ;;  %15437 = vst [vmem:[#allocation201_spill] sm:$0xff] %v13388_v15  ;;  %v13390_v45 = vld [vmem:[#allocation7 + $0x3a8] sm:$0xff]  ;;  %v13392_v43 = vld [vmem:[#allocation7 + $0x3b0] sm:$0xff] }
 0x9f1   :  { %15438 = vst [vmem:[#allocation202_spill] sm:$0xff] %v13390_v45  ;;  %15439 = vst [vmem:[#allocation203_spill] sm:$0xff] %v13392_v43  ;;  %v13396_v61 = vld [vmem:[#allocation7 + $0x3c8] sm:$0xff]  ;;  %v13398_v6 = vld [vmem:[#allocation7 + $0x3d0] sm:$0xff] }
 0x9f2   :  { %15440 = vst [vmem:[#allocation204_spill] sm:$0xff] %v13396_v61  ;;  %15441 = vst [vmem:[#allocation205_spill] sm:$0xff] %v13398_v6  ;;  %v13400_v49 = vld [vmem:[#allocation7 + $0x3e8] sm:$0xff]  ;;  %v13406_v53 = vld [vmem:[#allocation7 + $0x3f0] sm:$0xff] }
 0x9f3   :  { %15442 = vst [vmem:[#allocation206_spill] sm:$0xff] %v13400_v49  ;;  %15443 = vst [vmem:[#allocation207_spill] sm:$0xff] %v13406_v53  ;;  %v13408_v4 = vld [vmem:[#allocation7 + $0x408] sm:$0xff]  ;;  %v13410_v30 = vld [vmem:[#allocation7 + $0x410] sm:$0xff] }
 0x9f4   :  { %15444 = vst [vmem:[#allocation208_spill] sm:$0xff] %v13408_v4  ;;  %15445 = vst [vmem:[#allocation209_spill] sm:$0xff] %v13410_v30  ;;  %v13414_v1 = vld [vmem:[#allocation7 + $0x428] sm:$0xff]  ;;  %v13416_v11 = vld [vmem:[#allocation7 + $0x430] sm:$0xff] }
 0x9f5   :  { %15446 = vst [vmem:[#allocation210_spill] sm:$0xff] %v13414_v1  ;;  %15447 = vst [vmem:[#allocation211_spill] sm:$0xff] %v13416_v11  ;;  %v13418_v21 = vld [vmem:[#allocation7 + $0x448] sm:$0xff]  ;;  %v13424_v5 = vld [vmem:[#allocation7 + $0x450] sm:$0xff] }
 0x9f6   :  { %15448 = vst [vmem:[#allocation212_spill] sm:$0xff] %v13418_v21  ;;  %15449 = vst [vmem:[#allocation213_spill] sm:$0xff] %v13424_v5  ;;  %v13428_v45 = vld [vmem:[#allocation7 + $0x49] sm:$0xff]  ;;  %v13430_v46 = vld [vmem:[#allocation7 + $0x51] sm:$0xff] }
 0x9f7   :  { %15450 = vst [vmem:[#allocation214_spill] sm:$0xff] %v13428_v45  ;;  %15451 = vst [vmem:[#allocation215_spill] sm:$0xff] %v13430_v46  ;;  %v13434_v61 = vld [vmem:[#allocation7 + $0x69] sm:$0xff]  ;;  %v13436_v6 = vld [vmem:[#allocation7 + $0x71] sm:$0xff] }
 0x9f8   :  { %15452 = vst [vmem:[#allocation216_spill] sm:$0xff] %v13434_v61  ;;  %15453 = vst [vmem:[#allocation217_spill] sm:$0xff] %v13436_v6  ;;  %v13438_v20 = vld [vmem:[#allocation7 + $0x89] sm:$0xff]  ;;  %v13442_v49 = vld [vmem:[#allocation7 + $0x91] sm:$0xff] }
 0x9f9   :  { %15454 = vst [vmem:[#allocation218_spill] sm:$0xff] %v13438_v20  ;;  %15455 = vst [vmem:[#allocation219_spill] sm:$0xff] %v13442_v49  ;;  %v13444_v53 = vld [vmem:[#allocation7 + $0xa9] sm:$0xff]  ;;  %v13446_v15 = vld [vmem:[#allocation7 + $0xb1] sm:$0xff] }
 0x9fa   :  { %15456 = vst [vmem:[#allocation220_spill] sm:$0xff] %v13444_v53  ;;  %15457 = vst [vmem:[#allocation221_spill] sm:$0xff] %v13446_v15  ;;  %v13450_v30 = vld [vmem:[#allocation7 + $0xc9] sm:$0xff]  ;;  %v13452_v43 = vld [vmem:[#allocation7 + $0xd1] sm:$0xff] }
 0x9fb   :  { %15458 = vst [vmem:[#allocation222_spill] sm:$0xff] %v13450_v30  ;;  %15459 = vst [vmem:[#allocation223_spill] sm:$0xff] %v13452_v43  ;;  %v13454_v1 = vld [vmem:[#allocation7 + $0xe9] sm:$0xff]  ;;  %v13460_v21 = vld [vmem:[#allocation7 + $0xf1] sm:$0xff] }
 0x9fc   :  { %15460 = vst [vmem:[#allocation224_spill] sm:$0xff] %v13454_v1  ;;  %15461 = vst [vmem:[#allocation225_spill] sm:$0xff] %v13460_v21  ;;  %v13462_v5 = vld [vmem:[#allocation7 + $0x109] sm:$0xff]  ;;  %v13464_v45 = vld [vmem:[#allocation7 + $0x111] sm:$0xff] }
 0x9fd   :  { %15462 = vst [vmem:[#allocation226_spill] sm:$0xff] %v13462_v5  ;;  %15463 = vst [vmem:[#allocation227_spill] sm:$0xff] %v13464_v45  ;;  %v13468_v46 = vld [vmem:[#allocation7 + $0x129] sm:$0xff]  ;;  %v13470_v61 = vld [vmem:[#allocation7 + $0x131] sm:$0xff] }
 0x9fe   :  { %15464 = vst [vmem:[#allocation228_spill] sm:$0xff] %v13468_v46  ;;  %15465 = vst [vmem:[#allocation229_spill] sm:$0xff] %v13470_v61  ;;  %v13472_v6 = vld [vmem:[#allocation7 + $0x149] sm:$0xff]  ;;  %v13478_v20 = vld [vmem:[#allocation7 + $0x151] sm:$0xff] }
 0x9ff   :  { %15466 = vst [vmem:[#allocation230_spill] sm:$0xff] %v13472_v6  ;;  %15467 = vst [vmem:[#allocation231_spill] sm:$0xff] %v13478_v20  ;;  %v13480_v49 = vld [vmem:[#allocation7 + $0x169] sm:$0xff]  ;;  %v13482_v53 = vld [vmem:[#allocation7 + $0x171] sm:$0xff] }
 0xa00   :  { %15468 = vst [vmem:[#allocation232_spill] sm:$0xff] %v13480_v49  ;;  %15469 = vst [vmem:[#allocation233_spill] sm:$0xff] %v13482_v53  ;;  %v13486_v15 = vld [vmem:[#allocation7 + $0x189] sm:$0xff]  ;;  %v13488_v30 = vld [vmem:[#allocation7 + $0x191] sm:$0xff] }
 0xa01   :  { %15470 = vst [vmem:[#allocation234_spill] sm:$0xff] %v13486_v15  ;;  %15471 = vst [vmem:[#allocation235_spill] sm:$0xff] %v13488_v30  ;;  %v13490_v43 = vld [vmem:[#allocation7 + $0x1a9] sm:$0xff]  ;;  %v13496_v1 = vld [vmem:[#allocation7 + $0x1b1] sm:$0xff] }
 0xa02   :  { %15472 = vst [vmem:[#allocation236_spill] sm:$0xff] %v13490_v43  ;;  %15473 = vst [vmem:[#allocation237_spill] sm:$0xff] %v13496_v1  ;;  %v13498_v21 = vld [vmem:[#allocation7 + $0x1c9] sm:$0xff]  ;;  %v13500_v5 = vld [vmem:[#allocation7 + $0x1d1] sm:$0xff] }
 0xa03   :  { %15474 = vst [vmem:[#allocation238_spill] sm:$0xff] %v13498_v21  ;;  %15475 = vst [vmem:[#allocation239_spill] sm:$0xff] %v13500_v5  ;;  %v13504_v45 = vld [vmem:[#allocation7 + $0x1e9] sm:$0xff]  ;;  %v13506_v46 = vld [vmem:[#allocation7 + $0x1f1] sm:$0xff] }
 0xa04   :  { %15476 = vst [vmem:[#allocation240_spill] sm:$0xff] %v13504_v45  ;;  %15477 = vst [vmem:[#allocation241_spill] sm:$0xff] %v13506_v46  ;;  %v13508_v61 = vld [vmem:[#allocation7 + $0x289] sm:$0xff]  ;;  %v13514_v6 = vld [vmem:[#allocation7 + $0x291] sm:$0xff] }
 0xa05   :  { %15478 = vst [vmem:[#allocation242_spill] sm:$0xff] %v13508_v61  ;;  %15479 = vst [vmem:[#allocation243_spill] sm:$0xff] %v13514_v6  ;;  %v13516_v20 = vld [vmem:[#allocation7 + $0x2a9] sm:$0xff]  ;;  %v13518_v49 = vld [vmem:[#allocation7 + $0x2b1] sm:$0xff] }
 0xa06   :  { %15480 = vst [vmem:[#allocation244_spill] sm:$0xff] %v13516_v20  ;;  %15481 = vst [vmem:[#allocation245_spill] sm:$0xff] %v13518_v49  ;;  %v13522_v53 = vld [vmem:[#allocation7 + $0x2c9] sm:$0xff]  ;;  %v13524_v15 = vld [vmem:[#allocation7 + $0x2d1] sm:$0xff] }
 0xa07   :  { %15482 = vst [vmem:[#allocation246_spill] sm:$0xff] %v13522_v53  ;;  %15483 = vst [vmem:[#allocation247_spill] sm:$0xff] %v13524_v15  ;;  %v13526_v30 = vld [vmem:[#allocation7 + $0x2e9] sm:$0xff]  ;;  %v13532_v43 = vld [vmem:[#allocation7 + $0x2f1] sm:$0xff] }
 0xa08   :  { %15484 = vst [vmem:[#allocation248_spill] sm:$0xff] %v13526_v30  ;;  %15485 = vst [vmem:[#allocation249_spill] sm:$0xff] %v13532_v43  ;;  %v13534_v1 = vld [vmem:[#allocation7 + $0x309] sm:$0xff]  ;;  %v13536_v21 = vld [vmem:[#allocation7 + $0x311] sm:$0xff] }
 0xa09   :  { %15486 = vst [vmem:[#allocation250_spill] sm:$0xff] %v13534_v1  ;;  %15487 = vst [vmem:[#allocation251_spill] sm:$0xff] %v13536_v21  ;;  %v13540_v5 = vld [vmem:[#allocation7 + $0x329] sm:$0xff]  ;;  %v13542_v45 = vld [vmem:[#allocation7 + $0x331] sm:$0xff] }
 0xa0a   :  { %15488 = vst [vmem:[#allocation252_spill] sm:$0xff] %v13540_v5  ;;  %15489 = vst [vmem:[#allocation253_spill] sm:$0xff] %v13542_v45  ;;  %v13544_v46 = vld [vmem:[#allocation7 + $0x349] sm:$0xff]  ;;  %v13550_v61 = vld [vmem:[#allocation7 + $0x351] sm:$0xff] }
 0xa0b   :  { %15490 = vst [vmem:[#allocation254_spill] sm:$0xff] %v13544_v46  ;;  %15491 = vst [vmem:[#allocation255_spill] sm:$0xff] %v13550_v61  ;;  %v13552_v6 = vld [vmem:[#allocation7 + $0x369] sm:$0xff]  ;;  %v13554_v20 = vld [vmem:[#allocation7 + $0x371] sm:$0xff] }
 0xa0c   :  { %15492 = vst [vmem:[#allocation256_spill] sm:$0xff] %v13552_v6  ;;  %v13558_v49 = vld [vmem:[#allocation7 + $0x389] sm:$0xff]  ;;  %v13560_v53 = vld [vmem:[#allocation7 + $0x391] sm:$0xff] }
 0xa0d   :  { %15493 = vst [vmem:[#allocation257_spill] sm:$0xff] %v13558_v49  ;;  %15494 = vst [vmem:[#allocation258_spill] sm:$0xff] %v13560_v53  ;;  %v13562_v15 = vld [vmem:[#allocation7 + $0x3a9] sm:$0xff]  ;;  %v13568_v30 = vld [vmem:[#allocation7 + $0x3b1] sm:$0xff] }
 0xa0e   :  { %15495 = vst [vmem:[#allocation259_spill] sm:$0xff] %v13562_v15  ;;  %15496 = vst [vmem:[#allocation260_spill] sm:$0xff] %v13568_v30  ;;  %v13570_v43 = vld [vmem:[#allocation7 + $0x3c9] sm:$0xff]  ;;  %v13572_v1 = vld [vmem:[#allocation7 + $0x3d1] sm:$0xff] }
 0xa0f   :  { %15497 = vst [vmem:[#allocation261_spill] sm:$0xff] %v13570_v43  ;;  %15498 = vst [vmem:[#allocation262_spill] sm:$0xff] %v13572_v1  ;;  %v13576_v21 = vld [vmem:[#allocation7 + $0x3e9] sm:$0xff]  ;;  %v13578_v5 = vld [vmem:[#allocation7 + $0x3f1] sm:$0xff] }
 0xa10   :  { %15499 = vst [vmem:[#allocation263_spill] sm:$0xff] %v13576_v21  ;;  %15500 = vst [vmem:[#allocation264_spill] sm:$0xff] %v13578_v5  ;;  %v13580_v45 = vld [vmem:[#allocation7 + $0x409] sm:$0xff]  ;;  %v13586_v46 = vld [vmem:[#allocation7 + $0x411] sm:$0xff] }
 0xa11   :  { %v13588_v61 = vld [vmem:[#allocation7 + $0x429] sm:$0xff]  ;;  %v13590_v6 = vld [vmem:[#allocation7 + $0x431] sm:$0xff] }
 0xa12   :  { %9151 = dma.done.wait [#allocation5 + $0x2], 576 }
 0xa13   :  { %9152 = vsyncadd [#allocation5 + $0x2], 4294966720  ;;  %7414 = vmatpush1.bf16.xpose.msra.mxu0 %v12842_v52  ;;  %7455 = vmatpush1.bf16.xpose.msra.mxu1 %v13022_v7  ;;  %v15501_v11 = vmov 0   ;;  %v13605_v9 = vld [vmem:[#allocation4] sm:$0xff]  ;;  %v13607_v4 = vld [vmem:[#allocation4 + $0x8] sm:$0xff] }
 0xa14   :  { %7415 = vmatprep.subr.bf16.mxu0 %v12900_v38  ;;  %7456 = vmatprep.subr.bf16.mxu1 %v12842_v52  ;;  %v13611_v49 = vcombine.high %v13605_v9, %v13605_v9  ;;  %v13615_v53 = vcombine.high %v13607_v4, %v13607_v4  ;;  %v15502_v52 = vld [vmem:[#allocation55_spill] sm:$0xff]  ;;  %v15508_v30 = vld [vmem:[#allocation97_spill] sm:$0xff]  ;;  %v15512_v21 = vld [vmem:[#allocation104_spill] sm:$0xff] }
 0xa15   :  { %9067 = vset.pattern.permute.xlu0 %v15501_v11  ;;  %v15506_v11 = vld [vmem:[#allocation100_spill] sm:$0xff]  ;;  %v15511_v1 = vld [vmem:[#allocation105_spill] sm:$0xff] }
 0xa16   :  { %7445 = vmatprep.mubr.bf16.mxu0 %v13611_v49  ;;  %7486 = vmatprep.mubr.bf16.mxu1 %v13615_v53  ;;  %v15513_v5 = vpack.c.bf16 %v15511_v1, %v15512_v21  ;;  %v15518_v1 = vld [vmem:[#allocation47_spill] sm:$0xff] }
 0xa1b   :  { %7416 = vmatpush1.bf16.xpose.msra.mxu0 %v12840_v0  ;;  %7457 = vmatpush1.bf16.xpose.msra.mxu1 %v13020_v29 }
 0xa1c   :  { %7417 = vmatprep.subr.bf16.mxu0 %v12896_v26  ;;  %7458 = vmatprep.subr.bf16.mxu1 %v12840_v0  ;;  %v15503_v0 = vld [vmem:[#allocation53_spill] sm:$0xff] }
 0xa23   :  { %7418 = vmatpush1.bf16.xpose.msra.mxu0 %v12838_v2  ;;  %7459 = vmatpush1.bf16.xpose.msra.mxu1 %v13018_v24 }
 0xa24   :  { %7419 = vmatprep.subr.bf16.mxu0 %v12892_v31  ;;  %7460 = vmatprep.subr.bf16.mxu1 %v12838_v2  ;;  %v15504_v2 = vld [vmem:[#allocation60_spill] sm:$0xff] }
 0xa2b   :  { %7420 = vmatpush1.bf16.xpose.msra.mxu0 %v12836_v42  ;;  %7461 = vmatpush1.bf16.xpose.msra.mxu1 %v13016_v56 }
 0xa2c   :  { %7421 = vmatprep.subr.bf16.mxu0 %v12886_v50  ;;  %7462 = vmatprep.subr.bf16.mxu1 %v12836_v42  ;;  %v15505_v42 = vld [vmem:[#allocation101_spill] sm:$0xff] }
 0xa2d   :  { %v15507_v15 = vpack.c.bf16 %v15505_v42, %v15506_v11  ;;  %v15539_v11 = vld [vmem:[#allocation162_spill] sm:$0xff] }
 0xa33   :  { %7422 = vmatpush1.bf16.xpose.msra.mxu0 %v15502_v52  ;;  %7463 = vmatpush1.bf16.xpose.msra.mxu1 %v13014_v22 }
 0xa34   :  { %7423 = vmatprep.subr.bf16.mxu0 %v12882_v3  ;;  %7464 = vmatprep.subr.bf16.mxu1 %v15502_v52  ;;  %v15509_v52 = vld [vmem:[#allocation96_spill] sm:$0xff] }
 0xa35   :  { %v15510_v43 = vpack.c.bf16 %v15508_v30, %v15509_v52 }
 0xa3b   :  { %7424 = vmatpush1.bf16.xpose.msra.mxu0 %v15503_v0  ;;  %7465 = vmatpush1.bf16.xpose.msra.mxu1 %v13012_v35 }
 0xa3c   :  { %7425 = vmatprep.subr.bf16.mxu0 %v12874_v44  ;;  %7466 = vmatprep.subr.bf16.mxu1 %v15503_v0 }
 0xa43   :  { %7426 = vmatpush1.bf16.xpose.msra.mxu0 %v15504_v2  ;;  %7467 = vmatpush1.bf16.xpose.msra.mxu1 %v13010_v16 }
 0xa44   :  { %7427 = vmatprep.subr.bf16.mxu0 %v15507_v15  ;;  %7468 = vmatprep.subr.bf16.mxu1 %v15504_v2  ;;  %v15530_v15 = vld [vmem:[#allocation122_spill] sm:$0xff]  ;;  %v15536_v2 = vld [vmem:[#allocation121_spill] sm:$0xff] }
 0xa4b   :  { %7428 = vmatpush1.bf16.xpose.msra.mxu0 %v15510_v43  ;;  %7469 = vmatpush1.bf16.xpose.msra.mxu1 %v15513_v5  ;;  %v15519_v5 = vld [vmem:[#allocation79_spill] sm:$0xff] }
 0xa4c   :  { %7429 = vmatprep.subr.bf16.mxu0 %v12948_v33  ;;  %7470 = vmatprep.subr.bf16.mxu1 %v13074_v47  ;;  %v15520_v21 = vpack.c.bf16 %v15518_v1, %v15519_v5  ;;  %v15548_v1 = vld [vmem:[#allocation70_spill] sm:$0xff] }
 0xa53   :  { %7430 = vmatpush2.bf16.xpose.msra.mxu0 %v12858_v27  ;;  %7471 = vmatpush2.bf16.xpose.msra.mxu1 %v13040_v32 }
 0xa54   :  { %7431 = vmatprep.subr.bf16.mxu0 %v12944_v36  ;;  %7472 = vmatprep.subr.bf16.mxu1 %v12858_v27  ;;  %v15515_v27 = vpack.c.bf16 %v13122_v34, %v13120_v51  ;;  %v15522_v34 = vld [vmem:[#allocation167_spill] sm:$0xff] }
 0xa5b   :  { %7432 = vmatpush2.bf16.xpose.msra.mxu0 %v12856_v62  ;;  %7473 = vmatpush2.bf16.xpose.msra.mxu1 %v13038_v8 }
 0xa5c   :  { %7433 = vmatprep.subr.bf16.mxu0 %v12938_v37  ;;  %7474 = vmatprep.subr.bf16.mxu1 %v12856_v62 }
 0xa63   :  { %7434 = vmatpush2.bf16.xpose.msra.mxu0 %v12854_v19  ;;  %7475 = vmatpush2.bf16.xpose.msra.mxu1 %v13034_v28 }
 0xa64   :  { %7435 = vmatprep.subr.bf16.mxu0 %v12934_v55  ;;  %7476 = vmatprep.subr.bf16.mxu1 %v12854_v19  ;;  %v13695_v19 = vld [vmem:[#allocation4 + $0x10] sm:$0xff] }
 0xa6b   :  { %7436 = vmatpush2.bf16.xpose.msra.mxu0 %v12852_v54  ;;  %7477 = vmatpush2.bf16.xpose.msra.mxu1 %v13032_v25 }
 0xa6c   :  { %7437 = vmatprep.subr.bf16.mxu0 %v12926_v40  ;;  %7478 = vmatprep.subr.bf16.mxu1 %v12852_v54  ;;  %v13693_v54 = vcombine.low %v13607_v4, %v13607_v4  ;;  %v15527_v4 = vld [vmem:[#allocation166_spill] sm:$0xff] }
 0xa73   :  { %7438 = vmatpush2.bf16.xpose.msra.mxu0 %v12850_v12  ;;  %7479 = vmatpush2.bf16.xpose.msra.mxu1 %v13030_v48 }
 0xa74   :  { %7439 = vmatprep.subr.bf16.mxu0 %v12922_v18  ;;  %7480 = vmatprep.subr.bf16.mxu1 %v12850_v12  ;;  %v15514_v12 = vpack.c.bf16 %v13290_v14, %v13288_v59  ;;  %v15525_v14 = vld [vmem:[#allocation82_spill] sm:$0xff]  ;;  %v15533_v59 = vld [vmem:[#allocation164_spill] sm:$0xff] }
 0xa7b   :  { %7440 = vmatpush2.bf16.xpose.msra.mxu0 %v12848_v57  ;;  %7481 = vmatpush2.bf16.xpose.msra.mxu1 %v13028_v58 }
 0xa7c   :  { %7441 = vmatprep.subr.bf16.mxu0 %v12918_v13  ;;  %7482 = vmatprep.subr.bf16.mxu1 %v12848_v57  ;;  %v13689_v57 = vcombine.low %v13605_v9, %v13605_v9 }
 0xa83   :  { %7442 = vmatpush2.bf16.xpose.msra.mxu0 %v12846_v10  ;;  %7483 = vmatpush2.bf16.xpose.msra.mxu1 %v13026_v60 }
 0xa84   :  { %7443 = vmatprep.subr.bf16.mxu0 %v12912_v41  ;;  %7484 = vmatprep.subr.bf16.mxu1 %v12846_v10  ;;  %v13697_v10 = vld [vmem:[#allocation4 + $0x18] sm:$0xff] }
 0xa85   :  { %v13705_v62 = vcombine.high %v13697_v10, %v13697_v10 }
 0xa8b   :  { %7444 = vmatpush2.bf16.xpose.msra.mxu0 %v12844_v63  ;;  %7485 = vmatpush2.bf16.xpose.msra.mxu1 %v13024_v17  ;;  %v13701_v63 = vcombine.high %v13695_v19, %v13695_v19 }
 0xa8c   :  { %7495 = vmatprep.subr.bf16.mxu0 %v13024_v17  ;;  %7536 = vmatprep.subr.bf16.mxu1 %v15514_v12  ;;  %v15516_v17 = vld [vmem:[#allocation169_spill] sm:$0xff]  ;;  %v15542_v12 = vld [vmem:[#allocation67_spill] sm:$0xff] }
 0xa8d   :  { %v15517_v43 = vpack.c.bf16 %v13284_v23, %v15516_v17  ;;  %v15545_v17 = vld [vmem:[#allocation160_spill] sm:$0xff] }
 0xa92   :  { %7446 = vmatmul.mubr.bf16.vlgmr.msra.gmra.mxu0 %v13689_v57  ;;  %7487 = vmatmul.mubr.bf16.vlgmr.msra.gmra.mxu1 %v13693_v54 }
 0xa93   :  { %7496 = vmatpush1.bf16.xpose.msra.mxu0 %v12912_v41  ;;  %7537 = vmatpush1.bf16.xpose.msra.mxu1 %v15515_v27  ;;  %v15521_v41 = vld [vmem:[#allocation168_spill] sm:$0xff] }
 0xa94   :  { %7497 = vmatprep.subr.bf16.mxu0 %v13022_v7  ;;  %7538 = vmatprep.subr.bf16.mxu1 %v15517_v43  ;;  %v15523_v51 = vpack.c.bf16 %v15521_v41, %v15522_v34  ;;  %v15524_v7 = vld [vmem:[#allocation123_spill] sm:$0xff]  ;;  %v15554_v34 = vld [vmem:[#allocation90_spill] sm:$0xff] }
 0xa95   :  { %7527 = vmatprep.mubr.bf16.mxu0 %v13701_v63  ;;  %7568 = vmatprep.mubr.bf16.mxu1 %v13705_v62  ;;  %v15526_v30 = vpack.c.bf16 %v15524_v7, %v15525_v14  ;;  %v15557_v7 = vld [vmem:[#allocation33_spill] sm:$0xff] }
 0xa96   :  { %v15558_v14 = vld [vmem:[#allocation113_spill] sm:$0xff] }
 0xa9b   :  { %7498 = vmatpush1.bf16.xpose.msra.mxu0 %v12908_v39  ;;  %7539 = vmatpush1.bf16.xpose.msra.mxu1 %v15520_v21  ;;  %v15528_v39 = vld [vmem:[#allocation165_spill] sm:$0xff]  ;;  %v15551_v21 = vld [vmem:[#allocation158_spill] sm:$0xff] }
 0xa9c   :  { %7499 = vmatprep.subr.bf16.mxu0 %v13020_v29  ;;  %7540 = vmatprep.subr.bf16.mxu1 %v15523_v51  ;;  %v15529_v9 = vpack.c.bf16 %v15527_v4, %v15528_v39  ;;  %v15531_v29 = vld [vmem:[#allocation73_spill] sm:$0xff]  ;;  %v15561_v4 = vld [vmem:[#allocation86_spill] sm:$0xff] }
 0xa9d   :  { %v15532_v23 = vpack.c.bf16 %v15530_v15, %v15531_v29  ;;  %v15562_v39 = vld [vmem:[#allocation46_spill] sm:$0xff]  ;;  %v15565_v15 = vld [vmem:[#allocation108_spill] sm:$0xff] }
 0xaa3   :  { %7500 = vmatpush1.bf16.xpose.msra.mxu0 %v12900_v38  ;;  %7541 = vmatpush1.bf16.xpose.msra.mxu1 %v15526_v30  ;;  %v15534_v38 = vld [vmem:[#allocation163_spill] sm:$0xff] }
 0xaa4   :  { %7501 = vmatprep.subr.bf16.mxu0 %v13018_v24  ;;  %7542 = vmatprep.subr.bf16.mxu1 %v15529_v9  ;;  %v15535_v0 = vpack.c.bf16 %v15533_v59, %v15534_v38  ;;  %v15537_v24 = vld [vmem:[#allocation76_spill] sm:$0xff]  ;;  %v15563_v9 = vpack.c.bf16 %v15561_v4, %v15562_v39  ;;  %v15570_v38 = vld [vmem:[#allocation181_spill] sm:$0xff]  ;;  %v13841_v39 = vcombine.low %v13695_v19, %v13695_v19 }
 0xaa5   :  { %v15538_v42 = vpack.c.bf16 %v15536_v2, %v15537_v24  ;;  %v15573_v24 = vld [vmem:[#allocation128_spill] sm:$0xff] }
 0xaa6   :  { %v15614_v19 = vld [vmem:[#allocation84_spill] sm:$0xff] }
 0xaab   :  { %7502 = vmatpush1.bf16.xpose.msra.mxu0 %v12896_v26  ;;  %7543 = vmatpush1.bf16.xpose.msra.mxu1 %v15532_v23  ;;  %v15540_v26 = vld [vmem:[#allocation161_spill] sm:$0xff]  ;;  %v15568_v23 = vld [vmem:[#allocation182_spill] sm:$0xff] }
 0xaac   :  { %7503 = vmatprep.subr.bf16.mxu0 %v13016_v56  ;;  %7544 = vmatprep.subr.bf16.mxu1 %v15535_v0  ;;  %v15541_v52 = vpack.c.bf16 %v15539_v11, %v15540_v26  ;;  %v15543_v56 = vld [vmem:[#allocation91_spill] sm:$0xff]  ;;  %v15571_v0 = vld [vmem:[#allocation180_spill] sm:$0xff]  ;;  %v15577_v26 = vld [vmem:[#allocation178_spill] sm:$0xff] }
 0xaad   :  { %v15544_v27 = vpack.c.bf16 %v15542_v12, %v15543_v56  ;;  %v15572_v2 = vpack.c.bf16 %v15570_v38, %v15571_v0  ;;  %v15582_v12 = vld [vmem:[#allocation177_spill] sm:$0xff] }
 0xaae   :  { %v15618_v38 = vld [vmem:[#allocation81_spill] sm:$0xff] }
 0xaaf   :  { %v15619_v0 = vld [vmem:[#allocation241_spill] sm:$0xff] }
 0xab3   :  { %7504 = vmatpush1.bf16.xpose.msra.mxu0 %v12892_v31  ;;  %7545 = vmatpush1.bf16.xpose.msra.mxu1 %v15538_v42  ;;  %v15546_v31 = vld [vmem:[#allocation159_spill] sm:$0xff] }
 0xab4   :  { %7505 = vmatprep.subr.bf16.mxu0 %v13014_v22  ;;  %7546 = vmatprep.subr.bf16.mxu1 %v15541_v52  ;;  %v15547_v43 = vpack.c.bf16 %v15545_v17, %v15546_v31  ;;  %v15549_v22 = vld [vmem:[#allocation61_spill] sm:$0xff]  ;;  %v15574_v42 = vld [vmem:[#allocation127_spill] sm:$0xff] }
 0xab5   :  { %v15550_v5 = vpack.c.bf16 %v15548_v1, %v15549_v22  ;;  %v15575_v11 = vpack.c.bf16 %v15573_v24, %v15574_v42  ;;  %v15588_v31 = vld [vmem:[#allocation175_spill] sm:$0xff]  ;;  %v15591_v1 = vld [vmem:[#allocation41_spill] sm:$0xff] }
 0xab6   :  { %v15622_v42 = vld [vmem:[#allocation83_spill] sm:$0xff] }
 0xabb   :  { %7506 = vmatpush1.bf16.xpose.msra.mxu0 %v12886_v50  ;;  %7547 = vmatpush1.bf16.xpose.msra.mxu1 %v15544_v27  ;;  %v15552_v50 = vld [vmem:[#allocation157_spill] sm:$0xff] }
 0xabc   :  { %7507 = vmatprep.subr.bf16.mxu0 %v13012_v35  ;;  %7548 = vmatprep.subr.bf16.mxu1 %v15547_v43  ;;  %v15553_v41 = vpack.c.bf16 %v15551_v21, %v15552_v50  ;;  %v15555_v35 = vld [vmem:[#allocation92_spill] sm:$0xff]  ;;  %v15585_v27 = vld [vmem:[#allocation25_spill] sm:$0xff] }
 0xabd   :  { %v15556_v51 = vpack.c.bf16 %v15554_v34, %v15555_v35  ;;  %v15597_v50 = vld [vmem:[#allocation29_spill] sm:$0xff]  ;;  %v15600_v34 = vld [vmem:[#allocation171_spill] sm:$0xff] }
 0xac3   :  { %7508 = vmatpush1.bf16.xpose.msra.mxu0 %v12882_v3  ;;  %7549 = vmatpush1.bf16.xpose.msra.mxu1 %v15550_v5  ;;  %v15559_v3 = vld [vmem:[#allocation112_spill] sm:$0xff]  ;;  %v15594_v5 = vld [vmem:[#allocation173_spill] sm:$0xff] }
 0xac4   :  { %7509 = vmatprep.subr.bf16.mxu0 %v13010_v16  ;;  %7550 = vmatprep.subr.bf16.mxu1 %v15553_v41  ;;  %v15560_v30 = vpack.c.bf16 %v15558_v14, %v15559_v3  ;;  %v15564_v16 = vld [vmem:[#allocation109_spill] sm:$0xff] }
 0xac5   :  { %v15566_v29 = vpack.c.bf16 %v15564_v16, %v15565_v15  ;;  %v15606_v3 = vld [vmem:[#allocation117_spill] sm:$0xff]  ;;  %v15611_v16 = vld [vmem:[#allocation228_spill] sm:$0xff] }
 0xacb   :  { %7510 = vmatpush1.bf16.xpose.msra.mxu0 %v12874_v44  ;;  %7551 = vmatpush1.bf16.xpose.msra.mxu1 %v15556_v51  ;;  %v15567_v44 = vld [vmem:[#allocation183_spill] sm:$0xff] }
 0xacc   :  { %7511 = vmatprep.subr.bf16.mxu0 %v15557_v7  ;;  %7552 = vmatprep.subr.bf16.mxu1 %v15560_v30  ;;  %v15569_v59 = vpack.c.bf16 %v15567_v44, %v15568_v23  ;;  %v15603_v51 = vld [vmem:[#allocation51_spill] sm:$0xff]  ;;  %v15607_v30 = vld [vmem:[#allocation116_spill] sm:$0xff]  ;;  %v7823_v44 = vld [vmem:[#allocation8] sm:$0x1] }
 0xacd   :  { %v15608_v4 = vpack.c.bf16 %v15606_v3, %v15607_v30  ;;  %7826 = vperm.xlu0 %9067, %v7823_v44   ;;  %v15616_v23 = vld [vmem:[#allocation226_spill] sm:$0xff]  ;;  %v15656_v3 = vld [vmem:[#allocation216_spill] sm:$0xff]  ;;  %v15662_v44 = vld [vmem:[#allocation103_spill] sm:$0xff] }
 0xad3   :  { %7512 = vmatpush2.bf16.xpose.msra.mxu0 %v15563_v9  ;;  %7553 = vmatpush2.bf16.xpose.msra.mxu1 %v15566_v29  ;;  %v13847_v9 = vld [vmem:[#allocation4 + $0x20] ss:$0 sps:$4 sm:$0xff]   ;;  %v15613_v29 = vld [vmem:[#allocation28_spill] sm:$0xff] }
 0xad4   :  { %7513 = vmatprep.subr.bf16.mxu0 %v13040_v32  ;;  %7554 = vmatprep.subr.bf16.mxu1 %v15569_v59  ;;  %v15576_v32 = vld [vmem:[#allocation179_spill] sm:$0xff] }
 0xad5   :  { %v15578_v52 = vpack.c.bf16 %v15576_v32, %v15577_v26  ;;  %v15626_v26 = vld [vmem:[#allocation77_spill] sm:$0xff] }
 0xadb   :  { %7514 = vmatpush2.bf16.xpose.msra.mxu0 %v12948_v33  ;;  %7555 = vmatpush2.bf16.xpose.msra.mxu1 %v13074_v47  ;;  %v15579_v47 = vld [vmem:[#allocation126_spill] sm:$0xff]  ;;  %v15580_v33 = vld [vmem:[#allocation125_spill] sm:$0xff] }
 0xadc   :  { %7515 = vmatprep.subr.bf16.mxu0 %v13038_v8  ;;  %7556 = vmatprep.subr.bf16.mxu1 %v15572_v2  ;;  %v15581_v8 = vpack.c.bf16 %v15579_v47, %v15580_v33  ;;  %v15620_v2 = vld [vmem:[#allocation240_spill] sm:$0xff]  ;;  %v15630_v33 = vld [vmem:[#allocation37_spill] sm:$0xff] }
 0xadd   :  { %v15621_v24 = vpack.c.bf16 %v15619_v0, %v15620_v2  ;;  %v15666_v0 = vld [vmem:[#allocation214_spill] sm:$0xff] }
 0xae3   :  { %7516 = vmatpush2.bf16.xpose.msra.mxu0 %v12944_v36  ;;  %7557 = vmatpush2.bf16.xpose.msra.mxu1 %v15575_v11  ;;  %v15583_v36 = vld [vmem:[#allocation176_spill] sm:$0xff] }
 0xae4   :  { %7517 = vmatprep.subr.bf16.mxu0 %v13034_v28  ;;  %7558 = vmatprep.subr.bf16.mxu1 %v15578_v52  ;;  %v15584_v56 = vpack.c.bf16 %v15582_v12, %v15583_v36  ;;  %v15586_v28 = vld [vmem:[#allocation40_spill] sm:$0xff]  ;;  %v15628_v52 = vld [vmem:[#allocation238_spill] sm:$0xff] }
 0xae5   :  { %v15587_v17 = vpack.c.bf16 %v15585_v27, %v15586_v28  ;;  %v15624_v11 = vld [vmem:[#allocation224_spill] sm:$0xff]  ;;  %v15632_v12 = vld [vmem:[#allocation222_spill] sm:$0xff]  ;;  %v15635_v27 = vld [vmem:[#allocation237_spill] sm:$0xff] }
 0xae6   :  { %v15636_v28 = vld [vmem:[#allocation236_spill] sm:$0xff] }
 0xaeb   :  { %7518 = vmatpush2.bf16.xpose.msra.mxu0 %v12938_v37  ;;  %7559 = vmatpush2.bf16.xpose.msra.mxu1 %v15581_v8  ;;  %v15589_v37 = vld [vmem:[#allocation174_spill] sm:$0xff]  ;;  %v15631_v8 = vld [vmem:[#allocation223_spill] sm:$0xff] }
 0xaec   :  { %7519 = vmatprep.subr.bf16.mxu0 %v13032_v25  ;;  %7560 = vmatprep.subr.bf16.mxu1 %v15584_v56  ;;  %v15590_v43 = vpack.c.bf16 %v15588_v31, %v15589_v37  ;;  %v15592_v25 = vld [vmem:[#allocation42_spill] sm:$0xff]  ;;  %v15633_v36 = vpack.c.bf16 %v15631_v8, %v15632_v12  ;;  %v15634_v56 = vld [vmem:[#allocation75_spill] sm:$0xff]  ;;  %v15638_v31 = vld [vmem:[#allocation48_spill] sm:$0xff] }
 0xaed   :  { %v15593_v22 = vpack.c.bf16 %v15591_v1, %v15592_v25  ;;  %v15639_v37 = vld [vmem:[#allocation221_spill] sm:$0xff]  ;;  %v15642_v25 = vld [vmem:[#allocation66_spill] sm:$0xff] }
 0xaee   :  { %v15673_v12 = vld [vmem:[#allocation34_spill] sm:$0xff] }
 0xaf3   :  { %7520 = vmatpush2.bf16.xpose.msra.mxu0 %v12934_v55  ;;  %7561 = vmatpush2.bf16.xpose.msra.mxu1 %v15587_v17  ;;  %v15595_v55 = vld [vmem:[#allocation172_spill] sm:$0xff]  ;;  %v15637_v17 = vpack.c.bf16 %v15635_v27, %v15636_v28 }
 0xaf4   :  { %7521 = vmatprep.subr.bf16.mxu0 %v13030_v48  ;;  %7562 = vmatprep.subr.bf16.mxu1 %v15590_v43  ;;  %v15596_v21 = vpack.c.bf16 %v15594_v5, %v15595_v55  ;;  %v15598_v48 = vld [vmem:[#allocation52_spill] sm:$0xff]  ;;  %v15644_v5 = vld [vmem:[#allocation234_spill] sm:$0xff] }
 0xaf5   :  { %v15599_v41 = vpack.c.bf16 %v15597_v50, %v15598_v48  ;;  %v15640_v43 = vld [vmem:[#allocation220_spill] sm:$0xff]  ;;  %v15647_v50 = vld [vmem:[#allocation219_spill] sm:$0xff]  ;;  %v15648_v48 = vld [vmem:[#allocation218_spill] sm:$0xff] }
 0xaf6   :  { %v15641_v1 = vpack.c.bf16 %v15639_v37, %v15640_v43 }
 0xafb   :  { %7522 = vmatpush2.bf16.xpose.msra.mxu0 %v12926_v40  ;;  %7563 = vmatpush2.bf16.xpose.msra.mxu1 %v15593_v22  ;;  %v15601_v40 = vld [vmem:[#allocation170_spill] sm:$0xff]  ;;  %v15643_v22 = vld [vmem:[#allocation235_spill] sm:$0xff] }
 0xafc   :  { %7523 = vmatprep.subr.bf16.mxu0 %v13028_v58  ;;  %7564 = vmatprep.subr.bf16.mxu1 %v15596_v21  ;;  %v15602_v35 = vpack.c.bf16 %v15600_v34, %v15601_v40  ;;  %v15604_v58 = vld [vmem:[#allocation124_spill] sm:$0xff]  ;;  %v15645_v55 = vpack.c.bf16 %v15643_v22, %v15644_v5  ;;  %v15646_v21 = vld [vmem:[#allocation38_spill] sm:$0xff]  ;;  %v15650_v34 = vld [vmem:[#allocation69_spill] sm:$0xff] }
 0xafd   :  { %v15605_v14 = vpack.c.bf16 %v15603_v51, %v15604_v58  ;;  %v15651_v40 = vld [vmem:[#allocation233_spill] sm:$0xff] }
 0xafe   :  { %v15654_v58 = vld [vmem:[#allocation93_spill] sm:$0xff] }
 0xb03   :  { %7524 = vmatpush2.bf16.xpose.msra.mxu0 %v12922_v18  ;;  %7565 = vmatpush2.bf16.xpose.msra.mxu1 %v15599_v41  ;;  %v15609_v18 = vld [vmem:[#allocation89_spill] sm:$0xff]  ;;  %v15649_v41 = vpack.c.bf16 %v15647_v50, %v15648_v48  ;;  %v15677_v50 = vld [vmem:[#allocation56_spill] sm:$0xff] }
 0xb04   :  { %7525 = vmatprep.subr.bf16.mxu0 %v13026_v60  ;;  %7566 = vmatprep.subr.bf16.mxu1 %v15602_v35  ;;  %v13845_v60 = vcombine.low %v13697_v10, %v13697_v10  ;;  %v15615_v10 = vld [vmem:[#allocation227_spill] sm:$0xff]  ;;  %v15652_v35 = vld [vmem:[#allocation232_spill] sm:$0xff] }
 0xb05   :  { %v15617_v59 = vpack.c.bf16 %v15615_v10, %v15616_v23  ;;  %v15653_v51 = vpack.c.bf16 %v15651_v40, %v15652_v35  ;;  %v15663_v10 = vld [vmem:[#allocation102_spill] sm:$0xff]  ;;  %v15678_v48 = vld [vmem:[#allocation32_spill] sm:$0xff]  ;;  %v15683_v35 = vld [vmem:[#allocation63_spill] sm:$0xff] }
 0xb06   :  { %v15664_v23 = vpack.c.bf16 %v15662_v44, %v15663_v10  ;;  %v15680_v40 = vld [vmem:[#allocation64_spill] sm:$0xff]  ;;  %v15694_v44 = vld [vmem:[#allocation107_spill] sm:$0xff] }
 0xb0b   :  { %7526 = vmatpush2.bf16.xpose.msra.mxu0 %v12918_v13  ;;  %7567 = vmatpush2.bf16.xpose.msra.mxu1 %v15605_v14  ;;  %v15610_v13 = vld [vmem:[#allocation229_spill] sm:$0xff] }
 0xb0c   :  { %8577 = vmatprep.subr.bf16.mxu0 %v15608_v4  ;;  %7618 = vmatprep.subr.bf16.mxu1 %v15609_v18  ;;  %v15612_v15 = vpack.c.bf16 %v15610_v13, %v15611_v16  ;;  %v15655_v14 = vld [vmem:[#allocation217_spill] sm:$0xff]  ;;  %v15658_v4 = vld [vmem:[#allocation59_spill] sm:$0xff]  ;;  %v15660_v16 = vld [vmem:[#allocation230_spill] sm:$0xff] }
 0xb0d   :  { %v15657_v30 = vpack.c.bf16 %v15655_v14, %v15656_v3  ;;  %v15659_v13 = vld [vmem:[#allocation231_spill] sm:$0xff]  ;;  %v15685_v14 = vld [vmem:[#allocation88_spill] sm:$0xff] }
 0xb0e   :  { %v15686_v3 = vld [vmem:[#allocation120_spill] sm:$0xff] }
 0xb12   :  { %7528 = vmatmul.mubr.bf16.vlgmr.msra.gmra.mxu0 %v13841_v39  ;;  %7569 = vmatmul.mubr.bf16.vlgmr.msra.gmra.mxu1 %v13845_v60 }
 0xb13   :  { %8578 = vmatpush3.bf16.xpose.msra.mxu0 %v15612_v15  ;;  %7619 = vmatpush1.bf16.xpose.msra.mxu1 %v15613_v29  ;;  %v15661_v15 = vpack.c.bf16 %v15659_v13, %v15660_v16  ;;  %v15689_v13 = vld [vmem:[#allocation54_spill] sm:$0xff]  ;;  %v15691_v16 = vld [vmem:[#allocation31_spill] sm:$0xff] }
 0xb14   :  { %8579 = vmatprep.subr.bf16.mxu0 %v15557_v7  ;;  %7620 = vmatprep.subr.bf16.mxu1 %v15614_v19  ;;  %v15623_v7 = vld [vmem:[#allocation225_spill] sm:$0xff] }
 0xb15   :  { %8593 = vmatprep.mubr.bf16.mxu0 %v13847_v9  ;;  %7650 = vmatprep.mubr.bf16.mxu1 %v13611_v49  ;;  %v15625_v32 = vpack.c.bf16 %v15623_v7, %v15624_v11  ;;  %v15627_v49 = vld [vmem:[#allocation239_spill] sm:$0xff]  ;;  %v15669_v7 = vld [vmem:[#allocation98_spill] sm:$0xff] }
 0xb16   :  { %v15629_v47 = vpack.c.bf16 %v15627_v49, %v15628_v52  ;;  %v15672_v49 = vld [vmem:[#allocation44_spill] sm:$0xff] }
 0xb1b   :  { %8580 = vmatpush3.bf16.xpose.msra.mxu0 %v15617_v59  ;;  %7621 = vmatpush1.bf16.xpose.msra.mxu1 %v15618_v38  ;;  %v15665_v59 = vld [vmem:[#allocation215_spill] sm:$0xff] }
 0xb1c   :  { %8581 = vmatprep.subr.bf16.mxu0 %v15621_v24  ;;  %7622 = vmatprep.subr.bf16.mxu1 %v15622_v42  ;;  %v15667_v2 = vpack.c.bf16 %v15665_v59, %v15666_v0  ;;  %v15668_v24 = vld [vmem:[#allocation99_spill] sm:$0xff]  ;;  %v15698_v59 = vld [vmem:[#allocation62_spill] sm:$0xff]  ;;  %v15701_v0 = vld [vmem:[#allocation45_spill] sm:$0xff] }
 0xb1d   :  { %v15670_v11 = vpack.c.bf16 %v15668_v24, %v15669_v7 }
 0xb23   :  { %8582 = vmatpush3.bf16.xpose.msra.mxu0 %v15625_v32  ;;  %7623 = vmatpush1.bf16.xpose.msra.mxu1 %v15626_v26  ;;  %v15671_v32 = vld [vmem:[#allocation24_spill] sm:$0xff] }
 0xb24   :  { %8583 = vmatprep.subr.bf16.mxu0 %v15629_v47  ;;  %7624 = vmatprep.subr.bf16.mxu1 %v15630_v33 }
 0xb2b   :  { %8584 = vmatpush3.bf16.xpose.msra.mxu0 %v15633_v36  ;;  %7625 = vmatpush1.bf16.xpose.msra.mxu1 %v15634_v56  ;;  %v15674_v36 = vld [vmem:[#allocation65_spill] sm:$0xff] }
 0xb2c   :  { %8585 = vmatprep.subr.bf16.mxu0 %v15637_v17  ;;  %7626 = vmatprep.subr.bf16.mxu1 %v15638_v31  ;;  %v15675_v17 = vld [vmem:[#allocation39_spill] sm:$0xff] }
 0xb33   :  { %8586 = vmatpush3.bf16.xpose.msra.mxu0 %v15641_v1  ;;  %7627 = vmatpush1.bf16.xpose.msra.mxu1 %v15642_v25 }
 0xb34   :  { %8587 = vmatprep.subr.bf16.mxu0 %v15645_v55  ;;  %7628 = vmatprep.subr.bf16.mxu1 %v15646_v21  ;;  %v15676_v55 = vld [vmem:[#allocation57_spill] sm:$0xff] }
 0xb3b   :  { %8588 = vmatpush3.bf16.xpose.msra.mxu0 %v15649_v41  ;;  %7629 = vmatpush1.bf16.xpose.msra.mxu1 %v15650_v34  ;;  %v15679_v41 = vld [vmem:[#allocation85_spill] sm:$0xff] }
 0xb3c   :  { %8589 = vmatprep.subr.bf16.mxu0 %v15653_v51  ;;  %7630 = vmatprep.subr.bf16.mxu1 %v15654_v58  ;;  %v15684_v51 = vld [vmem:[#allocation43_spill] sm:$0xff] }
 0xb43   :  { %8590 = vmatpush3.bf16.xpose.msra.mxu0 %v15657_v30  ;;  %7631 = vmatpush1.bf16.xpose.msra.mxu1 %v15658_v4  ;;  %v15688_v30 = vld [vmem:[#allocation80_spill] sm:$0xff] }
 0xb44   :  { %8591 = vmatprep.subr.bf16.mxu0 %v15661_v15  ;;  %7632 = vmatprep.subr.bf16.mxu1 %v15664_v23  ;;  %v15692_v15 = vld [vmem:[#allocation27_spill] sm:$0xff]  ;;  %v15697_v23 = vld [vmem:[#allocation36_spill] sm:$0xff] }
 0xb4b   :  { %8592 = vmatpush3.bf16.xpose.msra.mxu0 %v15667_v2  ;;  %7633 = vmatpush1.bf16.xpose.msra.mxu1 %v15670_v11  ;;  %v15710_v11 = vld [vmem:[#allocation50_spill] sm:$0xff] }
 0xb4c   :  { %7634 = vmatprep.subr.bf16.mxu1 %v15671_v32  ;;  %7659 = vmatprep.subr.bf16.mxu0 %v15672_v49 }
 0xb52   :  { %v7447_v52 = vpop.f32.mrf.mxu0  ;;  %v7488_v47 = vpop.f32.mrf.mxu1  ;;  %8594 = vmatmul.mubr.bf16.vlgmr.msra.gmra.mxu0 %v13847_v9 }
 0xb53   :  { %v13918_v8 = vadd.f32 %v7488_v47, %v7447_v52  ;;  %7635 = vmatpush2.bf16.xpose.msra.mxu1 %v15673_v12  ;;  %7660 = vmatpush1.bf16.xpose.msra.mxu0 %v15674_v36  ;;  %v15713_v47 = vld [vmem:[#allocation144_spill] sm:$0xff] }
 0xb54   :  { %v7449_v27 = vpop.f32.mrf.mxu0  ;;  %v7490_v28 = vpop.f32.mrf.mxu1  ;;  %7636 = vmatprep.subr.bf16.mxu1 %v15675_v17  ;;  %7661 = vmatprep.subr.bf16.mxu0 %v15613_v29  ;;  %v15681_v29 = vld [vmem:[#allocation30_spill] sm:$0xff] }
 0xb55   :  { %v13924_v37 = vadd.f32 %v7490_v28, %v7449_v27  ;;  %7691 = vmatprep.mubr.bf16.mxu0 %v13615_v53  ;;  %v15682_v53 = vld [vmem:[#allocation35_spill] sm:$0xff]  ;;  %v15716_v28 = vld [vmem:[#allocation197_spill] sm:$0xff] }
 0xb56   :  { %v7451_v43 = vpop.f32.mrf.mxu0  ;;  %v7492_v1 = vpop.f32.mrf.mxu1 }
 0xb57   :  { %v15717_v43 = vld [vmem:[#allocation196_spill] sm:$0xff] }
 0xb58   :  { %v7452_v22 = vpop.f32.mrf.mxu0  ;;  %v7493_v5 = vpop.f32.mrf.mxu1  ;;  %v15718_v1 = vpack.c.bf16 %v15716_v28, %v15717_v43  ;;  %v15762_v43 = vld [vmem:[#allocation118_spill] sm:$0xff] }
 0xb5b   :  { %7637 = vmatpush2.bf16.xpose.msra.mxu1 %v15676_v55  ;;  %7662 = vmatpush1.bf16.xpose.msra.mxu0 %v15677_v50 }
 0xb5c   :  { %7638 = vmatprep.subr.bf16.mxu1 %v15678_v48  ;;  %7663 = vmatprep.subr.bf16.mxu0 %v15618_v38  ;;  %v15687_v38 = vld [vmem:[#allocation95_spill] sm:$0xff] }
 0xb63   :  { %7639 = vmatpush2.bf16.xpose.msra.mxu1 %v15679_v41  ;;  %7664 = vmatpush1.bf16.xpose.msra.mxu0 %v15680_v40 }
 0xb64   :  { %7640 = vmatprep.subr.bf16.mxu1 %v15681_v29  ;;  %7665 = vmatprep.subr.bf16.mxu0 %v15626_v26  ;;  %v15690_v26 = vld [vmem:[#allocation26_spill] sm:$0xff] }
 0xb6b   :  { %7641 = vmatpush2.bf16.xpose.msra.mxu1 %v15682_v53  ;;  %7666 = vmatpush1.bf16.xpose.msra.mxu0 %v15683_v35 }
 0xb6c   :  { %7642 = vmatprep.subr.bf16.mxu1 %v15684_v51  ;;  %7667 = vmatprep.subr.bf16.mxu0 %v15634_v56  ;;  %v15693_v56 = vld [vmem:[#allocation49_spill] sm:$0xff] }
 0xb73   :  { %7643 = vmatpush2.bf16.xpose.msra.mxu1 %v15685_v14  ;;  %7668 = vmatpush1.bf16.xpose.msra.mxu0 %v15686_v3 }
 0xb74   :  { %7644 = vmatprep.subr.bf16.mxu1 %v15687_v38  ;;  %7669 = vmatprep.subr.bf16.mxu0 %v15642_v25  ;;  %v15695_v25 = vld [vmem:[#allocation106_spill] sm:$0xff] }
 0xb75   :  { %v15696_v10 = vpack.c.bf16 %v15694_v44, %v15695_v25  ;;  %v15732_v44 = vld [vmem:[#allocation137_spill] sm:$0xff] }
 0xb7b   :  { %7645 = vmatpush2.bf16.xpose.msra.mxu1 %v15688_v30  ;;  %7670 = vmatpush1.bf16.xpose.msra.mxu0 %v15689_v13 }
 0xb7c   :  { %7646 = vmatprep.subr.bf16.mxu1 %v15690_v26  ;;  %7671 = vmatprep.subr.bf16.mxu0 %v15650_v34  ;;  %v15699_v34 = vld [vmem:[#allocation87_spill] sm:$0xff] }
 0xb83   :  { %7647 = vmatpush2.bf16.xpose.msra.mxu1 %v15691_v16  ;;  %7672 = vmatpush1.bf16.xpose.msra.mxu0 %v15692_v15 }
 0xb84   :  { %7648 = vmatprep.subr.bf16.mxu1 %v15693_v56  ;;  %7673 = vmatprep.subr.bf16.mxu0 %v15658_v4  ;;  %v15700_v4 = vld [vmem:[#allocation78_spill] sm:$0xff] }
 0xb8b   :  { %7649 = vmatpush2.bf16.xpose.msra.mxu1 %v15672_v49  ;;  %7674 = vmatpush1.bf16.xpose.msra.mxu0 %v15696_v10  ;;  %v15711_v49 = vld [vmem:[#allocation58_spill] sm:$0xff]  ;;  %v15734_v10 = vld [vmem:[#allocation191_spill] sm:$0xff] }
 0xb8c   :  { %7675 = vmatprep.subr.bf16.mxu0 %v15697_v23  ;;  %7700 = vmatprep.subr.bf16.mxu1 %v15698_v59  ;;  %v15712_v52 = vpack.c.bf16 %v15710_v11, %v15711_v49  ;;  %v15749_v11 = vld [vmem:[#allocation132_spill] sm:$0xff] }
 0xb92   :  { %7651 = vmatmul.mubr.bf16.vlgmr.msra.gmra.mxu1 %v13689_v57  ;;  %v15702_v57 = vld [vmem:[#allocation74_spill] sm:$0xff] }
 0xb93   :  { %7676 = vmatpush2.bf16.xpose.msra.mxu0 %v15699_v34  ;;  %7701 = vmatpush1.bf16.xpose.msra.mxu1 %v15693_v56  ;;  %v15731_v56 = vld [vmem:[#allocation138_spill] sm:$0xff] }
 0xb94   :  { %7677 = vmatprep.subr.bf16.mxu0 %v15673_v12  ;;  %7702 = vmatprep.subr.bf16.mxu1 %v15674_v36  ;;  %v15714_v12 = vld [vmem:[#allocation143_spill] sm:$0xff]  ;;  %v15733_v25 = vpack.c.bf16 %v15731_v56, %v15732_v44  ;;  %v15777_v44 = vld [vmem:[#allocation210_spill] sm:$0xff] }
 0xb95   :  { %7732 = vmatprep.mubr.bf16.mxu1 %v13701_v63  ;;  %v15703_v63 = vld [vmem:[#allocation72_spill] sm:$0xff]  ;;  %v15715_v36 = vpack.c.bf16 %v15713_v47, %v15714_v12  ;;  %v15755_v12 = vld [vmem:[#allocation130_spill] sm:$0xff]  ;;  %v15776_v56 = vld [vmem:[#allocation211_spill] sm:$0xff] }
 0xb9b   :  { %7678 = vmatpush2.bf16.xpose.msra.mxu0 %v15700_v4  ;;  %7703 = vmatpush1.bf16.xpose.msra.mxu1 %v15609_v18  ;;  %v15704_v18 = vld [vmem:[#allocation68_spill] sm:$0xff] }
 0xb9c   :  { %7679 = vmatprep.subr.bf16.mxu0 %v15676_v55  ;;  %7704 = vmatprep.subr.bf16.mxu1 %v15677_v50 }
 0xba3   :  { %7680 = vmatpush2.bf16.xpose.msra.mxu0 %v15701_v0  ;;  %7705 = vmatpush1.bf16.xpose.msra.mxu1 %v15614_v19  ;;  %v15705_v19 = vld [vmem:[#allocation71_spill] sm:$0xff] }
 0xba4   :  { %7681 = vmatprep.subr.bf16.mxu0 %v15679_v41  ;;  %7706 = vmatprep.subr.bf16.mxu1 %v15680_v40  ;;  %v15719_v40 = vld [vmem:[#allocation142_spill] sm:$0xff] }
 0xbab   :  { %7682 = vmatpush2.bf16.xpose.msra.mxu0 %v15702_v57  ;;  %7707 = vmatpush1.bf16.xpose.msra.mxu1 %v15622_v42  ;;  %v15706_v42 = vld [vmem:[#allocation94_spill] sm:$0xff] }
 0xbac   :  { %7683 = vmatprep.subr.bf16.mxu0 %v15682_v53  ;;  %7708 = vmatprep.subr.bf16.mxu1 %v15683_v35  ;;  %v15720_v53 = vld [vmem:[#allocation141_spill] sm:$0xff] }
 0xbad   :  { %v15721_v35 = vpack.c.bf16 %v15719_v40, %v15720_v53  ;;  %v15768_v53 = vld [vmem:[#allocation256_spill] sm:$0xff] }
 0xbb3   :  { %7684 = vmatpush2.bf16.xpose.msra.mxu0 %v15703_v63  ;;  %7709 = vmatpush1.bf16.xpose.msra.mxu1 %v15630_v33  ;;  %v15707_v33 = vld [vmem:[#allocation199_spill] sm:$0xff] }
 0xbb4   :  { %7685 = vmatprep.subr.bf16.mxu0 %v15685_v14  ;;  %7710 = vmatprep.subr.bf16.mxu1 %v15686_v3  ;;  %v15722_v14 = vld [vmem:[#allocation195_spill] sm:$0xff]  ;;  %v15723_v3 = vld [vmem:[#allocation194_spill] sm:$0xff] }
 0xbbb   :  { %7686 = vmatpush2.bf16.xpose.msra.mxu0 %v15704_v18  ;;  %7711 = vmatpush1.bf16.xpose.msra.mxu1 %v15638_v31  ;;  %v15708_v31 = vld [vmem:[#allocation198_spill] sm:$0xff] }
 0xbbc   :  { %7687 = vmatprep.subr.bf16.mxu0 %v15688_v30  ;;  %7712 = vmatprep.subr.bf16.mxu1 %v15689_v13  ;;  %v15709_v2 = vpack.c.bf16 %v15707_v33, %v15708_v31  ;;  %v15724_v30 = vpack.c.bf16 %v15722_v14, %v15723_v3  ;;  %v15740_v33 = vld [vmem:[#allocation189_spill] sm:$0xff] }
 0xbbd   :  { %v15770_v3 = vld [vmem:[#allocation213_spill] sm:$0xff] }
 0xbc3   :  { %7688 = vmatpush2.bf16.xpose.msra.mxu0 %v15705_v19  ;;  %7713 = vmatpush1.bf16.xpose.msra.mxu1 %v15646_v21 }
 0xbc4   :  { %7689 = vmatprep.subr.bf16.mxu0 %v15691_v16  ;;  %7714 = vmatprep.subr.bf16.mxu1 %v15692_v15  ;;  %v15728_v16 = vld [vmem:[#allocation193_spill] sm:$0xff] }
 0xbcb   :  { %7690 = vmatpush2.bf16.xpose.msra.mxu0 %v15698_v59  ;;  %7715 = vmatpush1.bf16.xpose.msra.mxu1 %v15654_v58 }
 0xbcc   :  { %7716 = vmatprep.subr.bf16.mxu1 %v15706_v42  ;;  %7741 = vmatprep.subr.bf16.mxu0 %v15709_v2  ;;  %v15743_v2 = vld [vmem:[#allocation134_spill] sm:$0xff] }
 0xbd2   :  { %v7529_v24 = vpop.f32.mrf.mxu0  ;;  %v7570_v7 = vpop.f32.mrf.mxu1  ;;  %7692 = vmatmul.mubr.bf16.vlgmr.msra.gmra.mxu0 %v13693_v54 }
 0xbd3   :  { %v7530_v21 = vadd.f32 %v7529_v24, %v13918_v8  ;;  %7717 = vmatpush2.bf16.xpose.msra.mxu1 %v15712_v52  ;;  %7742 = vmatpush1.bf16.xpose.msra.mxu0 %v15715_v36  ;;  %v15752_v52 = vld [vmem:[#allocation185_spill] sm:$0xff] }
 0xbd4   :  { %v7531_v58 = vpop.f32.mrf.mxu0  ;;  %v7572_v27 = vpop.f32.mrf.mxu1  ;;  %7718 = vmatprep.subr.bf16.mxu1 %v15699_v34  ;;  %7743 = vmatprep.subr.bf16.mxu0 %v15718_v1  ;;  %v15737_v34 = vld [vmem:[#allocation136_spill] sm:$0xff] }
 0xbd5   :  { %v7571_v22 = vadd.f32 %v7570_v7, %v7530_v21  ;;  %v7532_v54 = vadd.f32 %v7531_v58, %v13924_v37  ;;  %7773 = vmatprep.mubr.bf16.mxu0 %v13705_v62  ;;  %v15725_v62 = vld [vmem:[#allocation140_spill] sm:$0xff]  ;;  %v15726_v37 = vld [vmem:[#allocation139_spill] sm:$0xff] }
 0xbd6   :  { %v7533_v8 = vpop.f32.mrf.mxu0  ;;  %v7574_v5 = vpop.f32.mrf.mxu1  ;;  %v15727_v13 = vpack.c.bf16 %v15725_v62, %v15726_v37  ;;  %v15746_v7 = vld [vmem:[#allocation187_spill] sm:$0xff] }
 0xbd7   :  { %v7573_v55 = vadd.f32 %v7572_v27, %v7532_v54  ;;  %v15758_v58 = vld [vmem:[#allocation115_spill] sm:$0xff]  ;;  %v15759_v27 = vld [vmem:[#allocation114_spill] sm:$0xff]  ;;  %v7827_v54 = vpop.permute.xlu0 %7826 }
 0xbd8   :  { %v7534_v50 = vpop.f32.mrf.mxu0  ;;  %v7575_v41 = vpop.f32.mrf.mxu1  ;;  %v15760_v28 = vpack.c.bf16 %v15758_v58, %v15759_v27  ;;  %v15808_v27 = vld [vmem:[#allocation205_spill] sm:$0xff] }
 0xbd9   :  { %v15765_v50 = vld [vmem:[#allocation111_spill] sm:$0xff]  ;;  %v15766_v41 = vld [vmem:[#allocation110_spill] sm:$0xff] }
 0xbda   :  { %v15767_v40 = vpack.c.bf16 %v15765_v50, %v15766_v41  ;;  %v15817_v50 = vld [vmem:[#allocation247_spill] sm:$0xff]  ;;  %v15818_v41 = vld [vmem:[#allocation246_spill] sm:$0xff] }
 0xbdb   :  { %7719 = vmatpush2.bf16.xpose.msra.mxu1 %v15671_v32  ;;  %7744 = vmatpush1.bf16.xpose.msra.mxu0 %v15721_v35  ;;  %v15729_v32 = vld [vmem:[#allocation192_spill] sm:$0xff]  ;;  %v15769_v35 = vpack.c.bf16 %v13554_v20, %v15768_v53  ;;  %v15773_v20 = vld [vmem:[#allocation255_spill] sm:$0xff] }
 0xbdc   :  { %7720 = vmatprep.subr.bf16.mxu1 %v15700_v4  ;;  %7745 = vmatprep.subr.bf16.mxu0 %v15724_v30  ;;  %v15730_v15 = vpack.c.bf16 %v15728_v16, %v15729_v32  ;;  %v15738_v4 = vld [vmem:[#allocation135_spill] sm:$0xff]  ;;  %v15771_v30 = vld [vmem:[#allocation212_spill] sm:$0xff]  ;;  %v15774_v32 = vld [vmem:[#allocation254_spill] sm:$0xff] }
 0xbdd   :  { %v15772_v62 = vpack.c.bf16 %v15770_v3, %v15771_v30  ;;  %v15820_v53 = vld [vmem:[#allocation203_spill] sm:$0xff]  ;;  %v15823_v3 = vld [vmem:[#allocation260_spill] sm:$0xff] }
 0xbde   :  { %v15824_v30 = vld [vmem:[#allocation259_spill] sm:$0xff] }
 0xbe3   :  { %7721 = vmatpush2.bf16.xpose.msra.mxu1 %v15675_v17  ;;  %7746 = vmatpush1.bf16.xpose.msra.mxu0 %v15727_v13  ;;  %v15735_v17 = vld [vmem:[#allocation190_spill] sm:$0xff] }
 0xbe4   :  { %7722 = vmatprep.subr.bf16.mxu1 %v15701_v0  ;;  %7747 = vmatprep.subr.bf16.mxu0 %v15730_v15  ;;  %v15736_v59 = vpack.c.bf16 %v15734_v10, %v15735_v17  ;;  %v15739_v0 = vpack.c.bf16 %v15737_v34, %v15738_v4  ;;  %v15775_v15 = vpack.c.bf16 %v15773_v20, %v15774_v32  ;;  %v15781_v10 = vld [vmem:[#allocation155_spill] sm:$0xff]  ;;  %v15784_v34 = vld [vmem:[#allocation252_spill] sm:$0xff]  ;;  %v15832_v32 = vld [vmem:[#allocation201_spill] sm:$0xff] }
 0xbeb   :  { %7723 = vmatpush2.bf16.xpose.msra.mxu1 %v15678_v48  ;;  %7748 = vmatpush1.bf16.xpose.msra.mxu0 %v15733_v25  ;;  %v15741_v48 = vld [vmem:[#allocation188_spill] sm:$0xff] }
 0xbec   :  { %7724 = vmatprep.subr.bf16.mxu1 %v15702_v57  ;;  %7749 = vmatprep.subr.bf16.mxu0 %v15736_v59  ;;  %v15742_v31 = vpack.c.bf16 %v15740_v33, %v15741_v48  ;;  %v15744_v57 = vld [vmem:[#allocation133_spill] sm:$0xff]  ;;  %v15780_v25 = vld [vmem:[#allocation156_spill] sm:$0xff]  ;;  %v15789_v48 = vpack.c.bf16 %v13586_v46, %v13580_v45  ;;  %v15800_v45 = vld [vmem:[#allocation263_spill] sm:$0xff] }
 0xbed   :  { %v15745_v24 = vpack.c.bf16 %v15743_v2, %v15744_v57  ;;  %v15782_v17 = vpack.c.bf16 %v15780_v25, %v15781_v10  ;;  %v15783_v59 = vld [vmem:[#allocation253_spill] sm:$0xff]  ;;  %v15790_v2 = vld [vmem:[#allocation154_spill] sm:$0xff] }
 0xbee   :  { %v15785_v4 = vpack.c.bf16 %v15783_v59, %v15784_v34  ;;  %v15791_v57 = vld [vmem:[#allocation153_spill] sm:$0xff]  ;;  %v15838_v25 = vld [vmem:[#allocation146_spill] sm:$0xff]  ;;  %v15841_v59 = vld [vmem:[#allocation243_spill] sm:$0xff] }
 0xbef   :  { %v15839_v10 = vld [vmem:[#allocation145_spill] sm:$0xff]  ;;  %v15842_v34 = vld [vmem:[#allocation242_spill] sm:$0xff] }
 0xbf3   :  { %7725 = vmatpush2.bf16.xpose.msra.mxu1 %v15681_v29  ;;  %7750 = vmatpush1.bf16.xpose.msra.mxu0 %v15739_v0  ;;  %v15747_v29 = vld [vmem:[#allocation186_spill] sm:$0xff]  ;;  %v15787_v0 = vld [vmem:[#allocation208_spill] sm:$0xff] }
 0xbf4   :  { %7726 = vmatprep.subr.bf16.mxu1 %v15703_v63  ;;  %7751 = vmatprep.subr.bf16.mxu0 %v15742_v31  ;;  %v15748_v21 = vpack.c.bf16 %v15746_v7, %v15747_v29  ;;  %v15750_v63 = vld [vmem:[#allocation131_spill] sm:$0xff]  ;;  %v15794_v29 = vld [vmem:[#allocation250_spill] sm:$0xff] }
 0xbf5   :  { %v15751_v49 = vpack.c.bf16 %v15749_v11, %v15750_v63  ;;  %v15793_v7 = vld [vmem:[#allocation251_spill] sm:$0xff]  ;;  %v15797_v63 = vld [vmem:[#allocation206_spill] sm:$0xff] }
 0xbf6   :  { %v15796_v11 = vld [vmem:[#allocation207_spill] sm:$0xff] }
 0xbfb   :  { %7727 = vmatpush2.bf16.xpose.msra.mxu1 %v15684_v51  ;;  %7752 = vmatpush1.bf16.xpose.msra.mxu0 %v15745_v24  ;;  %v15753_v51 = vld [vmem:[#allocation184_spill] sm:$0xff]  ;;  %v15792_v24 = vpack.c.bf16 %v15790_v2, %v15791_v57 }
 0xbfc   :  { %7728 = vmatprep.subr.bf16.mxu1 %v15704_v18  ;;  %7753 = vmatprep.subr.bf16.mxu0 %v15748_v21  ;;  %v15754_v47 = vpack.c.bf16 %v15752_v52, %v15753_v51  ;;  %v15756_v18 = vld [vmem:[#allocation129_spill] sm:$0xff]  ;;  %v15795_v21 = vpack.c.bf16 %v15793_v7, %v15794_v29  ;;  %v15799_v52 = vld [vmem:[#allocation264_spill] sm:$0xff] }
 0xbfd   :  { %v15757_v36 = vpack.c.bf16 %v15755_v12, %v15756_v18  ;;  %v15801_v46 = vpack.c.bf16 %v15799_v52, %v15800_v45  ;;  %v15802_v51 = vld [vmem:[#allocation152_spill] sm:$0xff]  ;;  %v15805_v18 = vld [vmem:[#allocation249_spill] sm:$0xff] }
 0xc03   :  { %7729 = vmatpush2.bf16.xpose.msra.mxu1 %v15687_v38  ;;  %7754 = vmatpush1.bf16.xpose.msra.mxu0 %v15751_v49  ;;  %v15761_v38 = vld [vmem:[#allocation119_spill] sm:$0xff]  ;;  %v15798_v49 = vpack.c.bf16 %v15796_v11, %v15797_v63 }
 0xc04   :  { %7730 = vmatprep.subr.bf16.mxu1 %v15705_v19  ;;  %7755 = vmatprep.subr.bf16.mxu0 %v15754_v47  ;;  %v15763_v1 = vpack.c.bf16 %v15761_v38, %v15762_v43  ;;  %v15764_v19 = vld [vmem:[#allocation23_spill] sm:$0xff]  ;;  %v15811_v43 = vld [vmem:[#allocation262_spill] sm:$0xff] }
 0xc05   :  { %v14066_v8 = vrot.slane %v7827_v54, %v15764_v19  ;;  %v15803_v47 = vld [vmem:[#allocation151_spill] sm:$0xff]  ;;  %v15814_v19 = vld [vmem:[#allocation150_spill] sm:$0xff] }
 0xc06   :  { %v15804_v12 = vpack.c.bf16 %v15802_v51, %v15803_v47 }
 0xc0b   :  { %7731 = vmatpush2.bf16.xpose.msra.mxu1 %v15690_v26  ;;  %7756 = vmatpush1.bf16.xpose.msra.mxu0 %v15757_v36  ;;  %v15806_v36 = vld [vmem:[#allocation248_spill] sm:$0xff] }
 0xc0c   :  { %7757 = vmatprep.subr.bf16.mxu0 %v15760_v28  ;;  %8595 = vmatprep.subr.bf16.mxu1 %v15763_v1  ;;  %v15807_v58 = vpack.c.bf16 %v15805_v18, %v15806_v36  ;;  %v15809_v28 = vld [vmem:[#allocation204_spill] sm:$0xff]  ;;  %v15812_v1 = vld [vmem:[#allocation261_spill] sm:$0xff] }
 0xc0d   :  { %v15810_v38 = vpack.c.bf16 %v15808_v27, %v15809_v28  ;;  %v15813_v54 = vpack.c.bf16 %v15811_v43, %v15812_v1  ;;  %v9160_v1 = vmov 1966171168  }
 0xc12   :  { %v7611_v5 = vpop.f32.mrf.mxu0  ;;  %7733 = vmatmul.mubr.bf16.vlgmr.msra.gmra.mxu1 %v13841_v39 }
 0xc13   :  { %v7612_v26 = vadd.f32 %v7611_v5, %v7571_v22  ;;  %7758 = vmatpush2.bf16.xpose.msra.mxu0 %v15767_v40  ;;  %8596 = vmatpush3.bf16.xpose.msra.mxu1 %v15769_v35  ;;  %v15815_v5 = vld [vmem:[#allocation149_spill] sm:$0xff]  ;;  %v15819_v40 = vpack.c.bf16 %v15817_v50, %v15818_v41  ;;  %v15821_v35 = vld [vmem:[#allocation202_spill] sm:$0xff] }
 0xc14   :  { %v7613_v14 = vpop.f32.mrf.mxu0  ;;  %7759 = vmatprep.subr.bf16.mxu0 %v15772_v62  ;;  %8597 = vmatprep.subr.bf16.mxu1 %v15706_v42  ;;  %v15778_v42 = vpack.c.bf16 %v15776_v56, %v15777_v44  ;;  %v15825_v62 = vpack.c.bf16 %v15823_v3, %v15824_v30  ;;  %v15835_v44 = vld [vmem:[#allocation258_spill] sm:$0xff]  ;;  %v15845_v3 = vlaneseq }
 0xc15   :  { %v7833_v37 = vadd.f32 %v14066_v8, %v7612_v26  ;;  %v7614_v13 = vadd.f32 %v7613_v14, %v7573_v55  ;;  %8611 = vmatprep.mubr.bf16.mxu1 %v13847_v9  ;;  %v15779_v55 = vpack.c.bf16 %v13590_v6, %v13588_v61  ;;  %v15816_v26 = vpack.c.bf16 %v15814_v19, %v15815_v5 }
 0xc16   :  { %v7615_v39 = vpop.f32.mrf.mxu0  ;;  %v15822_v14 = vpack.c.bf16 %v15820_v53, %v15821_v35  ;;  %vm7872_vm6 = vcmp.lt.s32.totalorder %v15845_v3, 512 }
 0xc17   :  { %v7834_v22 = vadd.f32 %v14066_v8, %v7614_v13  ;;  %9077 = vtanh.f32 %v7833_v37  ;;  %v15826_v37 = vld [vmem:[#allocation148_spill] sm:$0xff]  ;;  %v15827_v13 = vld [vmem:[#allocation147_spill] sm:$0xff] }
 0xc18   :  { %v7616_v16 = vpop.f32.mrf.mxu0  ;;  %v15828_v39 = vpack.c.bf16 %v15826_v37, %v15827_v13 }
 0xc19   :  { %9079 = vtanh.f32 %v7834_v22  ;;  %v15829_v22 = vld [vmem:[#allocation245_spill] sm:$0xff]  ;;  %v15830_v16 = vld [vmem:[#allocation244_spill] sm:$0xff] }
 0xc1a   :  { %v15831_v20 = vpack.c.bf16 %v15829_v22, %v15830_v16 }
 0xc1b   :  { %7760 = vmatpush2.bf16.xpose.msra.mxu0 %v15697_v23  ;;  %8598 = vmatpush3.bf16.xpose.msra.mxu1 %v15775_v15  ;;  %v15786_v23 = vld [vmem:[#allocation209_spill] sm:$0xff]  ;;  %v15833_v15 = vld [vmem:[#allocation200_spill] sm:$0xff] }
 0xc1c   :  { %7761 = vmatprep.subr.bf16.mxu0 %v15778_v42  ;;  %8599 = vmatprep.subr.bf16.mxu1 %v15779_v55  ;;  %v15788_v33 = vpack.c.bf16 %v15786_v23, %v15787_v0  ;;  %v15834_v56 = vpack.c.bf16 %v15832_v32, %v15833_v15  ;;  %v15836_v42 = vld [vmem:[#allocation257_spill] sm:$0xff] }
 0xc1d   :  { %v15837_v55 = vpack.c.bf16 %v15835_v44, %v15836_v42 }
 0xc23   :  { %7762 = vmatpush2.bf16.xpose.msra.mxu0 %v15782_v17  ;;  %8600 = vmatpush3.bf16.xpose.msra.mxu1 %v15785_v4  ;;  %v15840_v17 = vpack.c.bf16 %v15838_v25, %v15839_v10  ;;  %v15843_v4 = vpack.c.bf16 %v15841_v59, %v15842_v34 }
 0xc24   :  { %7763 = vmatprep.subr.bf16.mxu0 %v15788_v33  ;;  %8601 = vmatprep.subr.bf16.mxu1 %v15789_v48  ;;  %v14104_v31 = vpop.eup %9077 }
 0xc26   :  { %v9080_v6 = vpop.eup %9079 }
 0xc27   :  { %v7845_v61 = vcombine.low %v14104_v31, %v9080_v6 }
 0xc2b   :  { %7764 = vmatpush2.bf16.xpose.msra.mxu0 %v15792_v24  ;;  %8602 = vmatpush3.bf16.xpose.msra.mxu1 %v15795_v21 }
 0xc2c   :  { %7765 = vmatprep.subr.bf16.mxu0 %v15798_v49  ;;  %8603 = vmatprep.subr.bf16.mxu1 %v15801_v46 }
 0xc33   :  { %7766 = vmatpush2.bf16.xpose.msra.mxu0 %v15804_v12  ;;  %8604 = vmatpush3.bf16.xpose.msra.mxu1 %v15807_v58 }
 0xc34   :  { %7767 = vmatprep.subr.bf16.mxu0 %v15810_v38  ;;  %8605 = vmatprep.subr.bf16.mxu1 %v15813_v54  ;;  %v7848_v54 = vunpack.c.l.s4 %v9160_v1 }
 0xc36   :  { %v7849_v19 = vunpack.c.0.s8 %v7848_v54 }
 0xc3b   :  { %7768 = vmatpush2.bf16.xpose.msra.mxu0 %v15816_v26  ;;  %8606 = vmatpush3.bf16.xpose.msra.mxu1 %v15819_v40  ;;  %v15844_v26 = vld [vmem:[#allocation22_spill] sm:$0xff] }
 0xc3c   :  { %7769 = vmatprep.subr.bf16.mxu0 %v15822_v14  ;;  %8607 = vmatprep.subr.bf16.mxu1 %v15825_v62  ;;  %v7852_v50 = vsub.s32 %v7849_v19, %v15844_v26 }
 0xc3e   :  { %v7853_v53 = vrot.slane %v7845_v61, %v7852_v50 }
 0xc43   :  { %7770 = vmatpush2.bf16.xpose.msra.mxu0 %v15828_v39  ;;  %8608 = vmatpush3.bf16.xpose.msra.mxu1 %v15831_v20 }
 0xc44   :  { %7771 = vmatprep.subr.bf16.mxu0 %v15834_v56  ;;  %8609 = vmatprep.subr.bf16.mxu1 %v15837_v55 }
 0xc4b   :  { %7772 = vmatpush2.bf16.xpose.msra.mxu0 %v15840_v17  ;;  %8610 = vmatpush3.bf16.xpose.msra.mxu1 %v15843_v4 }
 0xc52   :  { %v7652_v23 = vpop.f32.mrf.mxu1  ;;  %7774 = vmatmul.mubr.bf16.vlgmr.msra.gmra.mxu0 %v13845_v60  ;;  %8612 = vmatmul.mubr.bf16.vlgmr.msra.gmra.mxu1 %v13847_v9 }
 0xc54   :  { %v7654_v0 = vpop.f32.mrf.mxu1 }
 0xc56   :  { %v7656_v33 = vpop.f32.mrf.mxu1 }
 0xc58   :  { %v7657_v48 = vpop.f32.mrf.mxu1 }
 0xc92   :  { %v7693_v31 = vpop.f32.mrf.mxu0 }
 0xc93   :  { %v7694_v6 = vadd.f32 %v7693_v31, %v7652_v23 }
 0xc94   :  { %v7695_v2 = vpop.f32.mrf.mxu0 }
 0xc95   :  { %v7696_v57 = vadd.f32 %v7695_v2, %v7654_v0 }
 0xc96   :  { %v7697_v24 = vpop.f32.mrf.mxu0 }
 0xc98   :  { %v7698_v7 = vpop.f32.mrf.mxu0 }
 0xcd2   :  { %v7734_v29 = vpop.f32.mrf.mxu1 }
 0xcd3   :  { %v7735_v21 = vadd.f32 %v7734_v29, %v7694_v6 }
 0xcd4   :  { %v7736_v11 = vpop.f32.mrf.mxu1 }
 0xcd5   :  { %v7737_v46 = vadd.f32 %v7736_v11, %v7696_v57 }
 0xcd6   :  { %v7738_v63 = vpop.f32.mrf.mxu1 }
 0xcd8   :  { %v7739_v49 = vpop.f32.mrf.mxu1 }
 0xd12   :  { %v7775_v52 = vpop.f32.mrf.mxu0  ;;  %v7816_v45 = vpop.f32.mrf.mxu1 }
 0xd13   :  { %v7776_v60 = vadd.f32 %v7775_v52, %v7735_v21 }
 0xd14   :  { %v7777_v51 = vpop.f32.mrf.mxu0  ;;  %v7818_v9 = vpop.f32.mrf.mxu1 }
 0xd15   :  { %v7817_v47 = vadd.f32 %v7816_v45, %v7776_v60  ;;  %v7778_v12 = vadd.f32 %v7777_v51, %v7737_v46 }
 0xd16   :  { %v7779_v18 = vpop.f32.mrf.mxu0  ;;  %v7820_v36 = vpop.f32.mrf.mxu1 }
 0xd17   :  { %v7835_v58 = vadd.f32 %v14066_v8, %v7817_v47  ;;  %v7819_v27 = vadd.f32 %v7818_v9, %v7778_v12 }
 0xd18   :  { %v7780_v28 = vpop.f32.mrf.mxu0  ;;  %v7821_v38 = vpop.f32.mrf.mxu1 }
 0xd19   :  { %v7836_v43 = vadd.f32 %v14066_v8, %v7819_v27  ;;  %9081 = vtanh.f32 %v7835_v58 }
 0xd1b   :  { %9083 = vtanh.f32 %v7836_v43 }
 0xd26   :  { %v9082_v5 = vpop.eup %9081 }
 0xd28   :  { %v9084_v41 = vpop.eup %9083 }
 0xd29   :  { %v7846_v40 = vcombine.low %v9082_v5, %v9084_v41 }
 0xd2b   :  { %v7860_v35 = vrot.slane %v7846_v40, %v7852_v50 }
 0xd2d   :  { %v7861_v14 = vcombine.low %v7853_v53, %v7860_v35 }
 0xd2f   :  { %v7868_v30 = vrot.slane %v7861_v14, %v7852_v50 }
 0xd31   :  { %7874 = vst.msk [vmem:[%s14185_s15] sm:$0xf] %vm7872_vm6, %v7868_v30 }
 0xd32   :  { %7879 = vsyncpa [#allocation10], 1 }
 0xd33   :  { %7880 = vsyncmov [#allocation5] }
 0xd36   :  { %s7881_s28 = vpop.sfrf %7880 }
 0xd37   :  { %p8156_p1 = scmp.ne.s32.totalorder %s7881_s28, 0 }
 0xd39   :  { %7885 = shalt.err (%p8156_p1)  }
 0xd3a   :  { %7887 = vsyncmov [#allocation5 + $0x1] }
 0xd3d   :  { %s7888_s29 = vpop.sfrf %7887 }
 0xd3e   :  { %p8157_p2 = scmp.ne.s32.totalorder %s7888_s29, 0 }
 0xd40   :  { %7892 = shalt.err (%p8157_p2)  }
 0xd41   :  { %7894 = vsyncmov [#allocation5 + $0x2] }
 0xd44   :  { %s7895_s4 = vpop.sfrf %7894 }
 0xd45   :  { %p8158_p3 = scmp.ne.s32.totalorder %s7895_s4, 0 }
 0xd47   :  { %7899 = shalt.err (%p8158_p3)  }

</bundles_post_ra>
